<compile_context>
chip_gen: v6e
topology: v6e:2x2x1
jax: 0.10.0
libtpu: 0.0.40
codegen_flags: <defaults>
</compile_context>

<pallas_src>
import functools

import jax
import jax.numpy as jnp
from jax.experimental import pallas as pl
from jax.experimental.pallas import tpu as pltpu

EPS = 1e-5  # nn.InstanceNorm2d default


# ----------------------------- Pallas kernel --------------------------------


def _make_block_kernel(H, W, C, cdt):
    """Builds the fused ResnetBlock kernel for a fixed (H, W, C, compute dtype).

    Layout: the reflect-padded image (Hp, Wp, C) is flattened to (Hp*Wp, C)
    rows x C lanes.  A 3x3 conv output on the "extended" grid m = y*Wp + x
    (x in [0, Wp), columns >= W are junk and discarded) is
        z[m] = sum_t  padded[m + off_t] @ w[t],   off_t = dy*Wp + dx,
    i.e. 9 contiguous row-slice matmuls -- no im2col, no strided gathers.
    """
    Wp, Hp = W + 2, H + 2
    M = H * Wp            # extended-output rows (valid where col < W)
    Mp = Hp * Wp          # flattened padded-image rows
    MpP = Mp + 8          # + tail so every tap slice stays in range
    offsets = [dy * Wp + dx for dy in range(3) for dx in range(3)]
    inv_count = 1.0 / float(H * W)

    def kernel(xp_ref, mask_ref, w1_ref, w2_ref, o_ref, yp_ref):
        # xp_ref : (1, MpP, C) f32  reflect-padded input, flattened (+ zero tail)
        # mask_ref: (M, 1)     f32  1.0 where the extended column is valid
        # w1_ref, w2_ref: (9, C, C) in compute dtype, tap order (dy, dx)
        # o_ref  : (1, M, C)   f32  extended-layout output (junk cols sliced off
        #                           in the wrapper)
        # yp_ref : (MpP, C)    cdt  VMEM scratch: reflect-padded y1
        mask = mask_ref[...]                      # (M, 1)
        xs = xp_ref[0]                            # (MpP, C) f32

        def conv3x3(load_tap, w_ref):
            acc = jnp.dot(load_tap(offsets[0]).astype(cdt), w_ref[0],
                          preferred_element_type=jnp.float32)
            for t in range(1, 9):
                acc = acc + jnp.dot(load_tap(offsets[t]).astype(cdt), w_ref[t],
                                    preferred_element_type=jnp.float32)
            return acc                            # (M, C) f32

        def inorm(z):
            # single-pass masked mean / var (junk columns excluded)
            zm = z * mask
            mean = jnp.sum(zm, axis=0, keepdims=True) * inv_count
            ex2 = jnp.sum(zm * zm, axis=0, keepdims=True) * inv_count
            var = jnp.maximum(ex2 - mean * mean, 0.0)
            return (z - mean) * jax.lax.rsqrt(var + EPS)

        # ---- conv1 + InstanceNorm + ReLU (bias dropped: IN cancels it) ------
        z1 = conv3x3(lambda off: xs[off:off + M, :], w1_ref)
        y1 = jnp.maximum(inorm(z1), 0.0).astype(cdt)

        # ---- reflect-pad y1 into the flat VMEM scratch ----------------------
        # interior bulk copy (junk cols land on border positions, fixed below)
        yp_ref[Wp + 1:Wp + 1 + M, :] = y1
        # left / right reflect columns: yp[py,0]=y1[py-1,1], yp[py,W+1]=y1[py-1,W-2]
        for py in range(1, H + 1):
            base = py * Wp
            yp_ref[base:base + 1, :] = yp_ref[base + 2:base + 3, :]
            yp_ref[base + W + 1:base + W + 2, :] = yp_ref[base + W - 1:base + W, :]
        # top / bottom reflect rows (corners correct since columns fixed first)
        yp_ref[0:Wp, :] = yp_ref[2 * Wp:3 * Wp, :]
        yp_ref[(H + 1) * Wp:(H + 2) * Wp, :] = yp_ref[(H - 1) * Wp:H * Wp, :]
        # keep the tail finite (only read by discarded junk outputs)
        yp_ref[Mp:MpP, :] = jnp.zeros((MpP - Mp, C), dtype=cdt)

        # ---- conv2 + InstanceNorm + residual add ----------------------------
        z2 = conv3x3(lambda off: yp_ref[off:off + M, :], w2_ref)
        y2 = inorm(z2)
        skip = xs[Wp + 1:Wp + 1 + M, :]           # original x, exact f32
        o_ref[0] = (skip + y2).astype(o_ref.dtype)

    return kernel, M, Mp, MpP


# ------------------------------- JAX wrapper ---------------------------------


def resnet_block_forward(x_nchw, w1, w2, *, compute_dtype=jnp.float32):
    """out = x + conv_block(x) for the reflect-pad / InstanceNorm ResnetBlock.

    x_nchw : (N, C, H, W) float32
    w1, w2 : (3, 3, C, C) HWIO conv weights (biases are a no-op under
             affine=False InstanceNorm and are omitted)
    compute_dtype: jnp.float32 or jnp.bfloat16 (MXU feed; accumulation and all
             normalization / skip math stay f32)
    """
    N, C, H, W = x_nchw.shape
    Wp = W + 2
    kernel, M, Mp, MpP = _make_block_kernel(H, W, C, compute_dtype)

    x = jnp.transpose(x_nchw, (0, 2, 3, 1))                         # NHWC
    xp = jnp.pad(x, ((0, 0), (1, 1), (1, 1), (0, 0)), mode="reflect")
    xpf = xp.reshape(N, Mp, C).astype(jnp.float32)
    xpf = jnp.pad(xpf, ((0, 0), (0, MpP - Mp), (0, 0)))             # finite tail

    col = jnp.arange(M, dtype=jnp.int32) % Wp
    mask = (col < W).astype(jnp.float32).reshape(M, 1)

    w1r = w1.reshape(9, C, C).astype(compute_dtype)
    w2r = w2.reshape(9, C, C).astype(compute_dtype)

    out_ext = pl.pallas_call(
        kernel,
        out_shape=jax.ShapeDtypeStruct((N, M, C), jnp.float32),
        grid_spec=pltpu.PrefetchScalarGridSpec(
            num_scalar_prefetch=0,
            grid=(N,),
            in_specs=[
                pl.BlockSpec((1, MpP, C), lambda n: (n, 0, 0)),     # padded img
                pl.BlockSpec((M, 1), lambda n: (0, 0)),             # col mask
                pl.BlockSpec((9, C, C), lambda n: (0, 0, 0)),       # w1
                pl.BlockSpec((9, C, C), lambda n: (0, 0, 0)),       # w2
            ],
            out_specs=pl.BlockSpec((1, M, C), lambda n: (n, 0, 0)),
            scratch_shapes=[pltpu.VMEM((MpP, C), compute_dtype)],   # padded y1
        ),
        compiler_params=pltpu.CompilerParams(
            dimension_semantics=("parallel",),   # batch across TCs on v7x
            vmem_limit_bytes=48 * 1024 * 1024,
        ),
    )(xpf, mask, w1r, w2r)

    out = out_ext.reshape(N, H, Wp, C)[:, :, :W, :]                 # drop junk
    return jnp.transpose(out, (0, 3, 1, 2))                         # NCHW


# ----------------------- pure-JAX reference (checking) -----------------------


def _ref_forward(x_nchw, w1, b1, w2, b2):
    """Reference keeps the conv biases to demonstrate they are cancelled by
    affine=False InstanceNorm (the kernel omits them)."""
    x = jnp.transpose(x_nchw, (0, 2, 3, 1))

    def conv(z, w, b):
        zp = jnp.pad(z, ((0, 0), (1, 1), (1, 1), (0, 0)), mode="reflect")
        y = jax.lax.conv_general_dilated(
            zp, w, window_strides=(1, 1), padding="VALID",
            dimension_numbers=("NHWC", "HWIO", "NHWC"))
        return y + b[None, None, None, :]

    def inorm(z):
        m = jnp.mean(z, axis=(1, 2), keepdims=True)
        v = jnp.mean((z - m) ** 2, axis=(1, 2), keepdims=True)
        return (z - m) * jax.lax.rsqrt(v + EPS)

    y = jax.nn.relu(inorm(conv(x, w1, b1)))
    y = inorm(conv(y, w2, b2))
    return jnp.transpose(x + y, (0, 3, 1, 2))


# ---------------------------------- main -------------------------------------


if __name__ == "__main__":
    # Small functional-test shape (do NOT use for perf tuning; use C>=128,
    # H=W=64 when benchmarking).
    N, C, H, W = 2, 4, 16, 16

    key = jax.random.PRNGKey(0)
    kx, kw1, kb1, kw2, kb2 = jax.random.split(key, 5)

    x = jax.random.normal(kx, (N, C, H, W), dtype=jnp.float32)
    w1 = 0.1 * jax.random.normal(kw1, (3, 3, C, C), dtype=jnp.float32)
    b1 = 0.1 * jax.random.normal(kb1, (C,), dtype=jnp.float32)
    w2 = 0.1 * jax.random.normal(kw2, (3, 3, C, C), dtype=jnp.float32)
    b2 = 0.1 * jax.random.normal(kb2, (C,), dtype=jnp.float32)

    ref = _ref_forward(x, w1, b1, w2, b2)

    # f32 MXU path (tight check; also proves the bias is a no-op under IN).
    fwd_f32 = jax.jit(functools.partial(resnet_block_forward,
                                        compute_dtype=jnp.float32))
    out = jax.block_until_ready(fwd_f32(x, w1, w2))
    assert out.shape == (N, C, H, W)
    err = float(jnp.max(jnp.abs(out - ref)))
    assert err < 2e-4, f"f32 mismatch vs pure-JAX reference: {err}"

    # bf16 MXU-feed path (v6e/v7x): bf16 taps/weights, f32 accumulation + norm.
    fwd_bf16 = jax.jit(functools.partial(resnet_block_forward,
                                         compute_dtype=jnp.bfloat16))
    out_bf16 = jax.block_until_ready(fwd_bf16(x, w1, w2))
    err_bf16 = float(jnp.max(jnp.abs(out_bf16 - ref)))
    assert err_bf16 < 1e-1, f"bf16 mismatch vs pure-JAX reference: {err_bf16}"

    print("KERNEL_OK")
</pallas_src>

<mosaic_0001>
module attributes {stable_mosaic.version = 11 : i64} {
  func.func @kernel(%arg0: i32, %arg1: memref<1x332x4xf32, #tpu.memory_space<vmem>>, %arg2: memref<288x1xf32, #tpu.memory_space<vmem>>, %arg3: memref<9x4x4xf32, #tpu.memory_space<vmem>>, %arg4: memref<9x4x4xf32, #tpu.memory_space<vmem>>, %arg5: memref<1x288x4xf32, #tpu.memory_space<vmem>>, %arg6: memref<332x4xf32, #tpu.memory_space<vmem>>) attributes {dimension_semantics = [#tpu.dimension_semantics<parallel>], iteration_bounds = array<i64: 2>, scalar_prefetch = 0 : i64, scratch_operands = 1 : i64, tpu.core_type = #tpu.core_type<tc>, window_params = [{transform_indices = @transform_0, window_bounds = array<i64: 1, 332, 4>}, {pipeline_mode = #tpu.pipeline_mode<synchronous>, transform_indices = @transform_1, window_bounds = array<i64: 288, 1>}, {pipeline_mode = #tpu.pipeline_mode<synchronous>, transform_indices = @transform_2, window_bounds = array<i64: 9, 4, 4>}, {pipeline_mode = #tpu.pipeline_mode<synchronous>, transform_indices = @transform_3, window_bounds = array<i64: 9, 4, 4>}, {transform_indices = @transform_4, window_bounds = array<i64: 1, 288, 4>}]} {
    %c0 = arith.constant 0 : index
    %c0_0 = arith.constant 0 : index
    %0 = vector.load %arg2[%c0, %c0_0] : memref<288x1xf32, #tpu.memory_space<vmem>>, vector<288x1xf32>
    %c0_1 = arith.constant 0 : index
    %c0_2 = arith.constant 0 : index
    %c0_3 = arith.constant 0 : index
    %1 = vector.load %arg1[%c0_1, %c0_2, %c0_3] : memref<1x332x4xf32, #tpu.memory_space<vmem>>, vector<1x332x4xf32>
    %2 = vector.shape_cast %1 : vector<1x332x4xf32> to vector<332x4xf32>
    %3 = vector.extract_strided_slice %2 {offsets = [0, 0], sizes = [288, 4], strides = [1, 1]} : vector<332x4xf32> to vector<288x4xf32>
    %c0_4 = arith.constant 0 : index
    %c0_5 = arith.constant 0 : index
    %c0_6 = arith.constant 0 : index
    %4 = vector.load %arg3[%c0_4, %c0_5, %c0_6] : memref<9x4x4xf32, #tpu.memory_space<vmem>>, vector<1x4x4xf32>
    %5 = vector.shape_cast %4 : vector<1x4x4xf32> to vector<4x4xf32>
    %cst = arith.constant dense<0.000000e+00> : vector<288x4xf32>
    %6 = tpu.matmul %3, %5, %cst {dimension_numbers = #tpu.dot_dimension_numbers<[1], [0], [0], [1], [0, 0, 1, 1], [], []>} : vector<288x4xf32>, vector<4x4xf32>, vector<288x4xf32> -> vector<288x4xf32>
    %7 = vector.extract_strided_slice %2 {offsets = [1, 0], sizes = [288, 4], strides = [1, 1]} : vector<332x4xf32> to vector<288x4xf32>
    %c1 = arith.constant 1 : index
    %c0_7 = arith.constant 0 : index
    %c0_8 = arith.constant 0 : index
    %8 = vector.load %arg3[%c1, %c0_7, %c0_8] : memref<9x4x4xf32, #tpu.memory_space<vmem>>, vector<1x4x4xf32>
    %9 = vector.shape_cast %8 : vector<1x4x4xf32> to vector<4x4xf32>
    %cst_9 = arith.constant dense<0.000000e+00> : vector<288x4xf32>
    %10 = tpu.matmul %7, %9, %cst_9 {dimension_numbers = #tpu.dot_dimension_numbers<[1], [0], [0], [1], [0, 0, 1, 1], [], []>} : vector<288x4xf32>, vector<4x4xf32>, vector<288x4xf32> -> vector<288x4xf32>
    %11 = arith.addf %6, %10 : vector<288x4xf32>
    %12 = vector.extract_strided_slice %2 {offsets = [2, 0], sizes = [288, 4], strides = [1, 1]} : vector<332x4xf32> to vector<288x4xf32>
    %c2 = arith.constant 2 : index
    %c0_10 = arith.constant 0 : index
    %c0_11 = arith.constant 0 : index
    %13 = vector.load %arg3[%c2, %c0_10, %c0_11] : memref<9x4x4xf32, #tpu.memory_space<vmem>>, vector<1x4x4xf32>
    %14 = vector.shape_cast %13 : vector<1x4x4xf32> to vector<4x4xf32>
    %cst_12 = arith.constant dense<0.000000e+00> : vector<288x4xf32>
    %15 = tpu.matmul %12, %14, %cst_12 {dimension_numbers = #tpu.dot_dimension_numbers<[1], [0], [0], [1], [0, 0, 1, 1], [], []>} : vector<288x4xf32>, vector<4x4xf32>, vector<288x4xf32> -> vector<288x4xf32>
    %16 = arith.addf %11, %15 : vector<288x4xf32>
    %17 = vector.extract_strided_slice %2 {offsets = [18, 0], sizes = [288, 4], strides = [1, 1]} : vector<332x4xf32> to vector<288x4xf32>
    %c3 = arith.constant 3 : index
    %c0_13 = arith.constant 0 : index
    %c0_14 = arith.constant 0 : index
    %18 = vector.load %arg3[%c3, %c0_13, %c0_14] : memref<9x4x4xf32, #tpu.memory_space<vmem>>, vector<1x4x4xf32>
    %19 = vector.shape_cast %18 : vector<1x4x4xf32> to vector<4x4xf32>
    %cst_15 = arith.constant dense<0.000000e+00> : vector<288x4xf32>
    %20 = tpu.matmul %17, %19, %cst_15 {dimension_numbers = #tpu.dot_dimension_numbers<[1], [0], [0], [1], [0, 0, 1, 1], [], []>} : vector<288x4xf32>, vector<4x4xf32>, vector<288x4xf32> -> vector<288x4xf32>
    %21 = arith.addf %16, %20 : vector<288x4xf32>
    %22 = vector.extract_strided_slice %2 {offsets = [19, 0], sizes = [288, 4], strides = [1, 1]} : vector<332x4xf32> to vector<288x4xf32>
    %c4 = arith.constant 4 : index
    %c0_16 = arith.constant 0 : index
    %c0_17 = arith.constant 0 : index
    %23 = vector.load %arg3[%c4, %c0_16, %c0_17] : memref<9x4x4xf32, #tpu.memory_space<vmem>>, vector<1x4x4xf32>
    %24 = vector.shape_cast %23 : vector<1x4x4xf32> to vector<4x4xf32>
    %cst_18 = arith.constant dense<0.000000e+00> : vector<288x4xf32>
    %25 = tpu.matmul %22, %24, %cst_18 {dimension_numbers = #tpu.dot_dimension_numbers<[1], [0], [0], [1], [0, 0, 1, 1], [], []>} : vector<288x4xf32>, vector<4x4xf32>, vector<288x4xf32> -> vector<288x4xf32>
    %26 = arith.addf %21, %25 : vector<288x4xf32>
    %27 = vector.extract_strided_slice %2 {offsets = [20, 0], sizes = [288, 4], strides = [1, 1]} : vector<332x4xf32> to vector<288x4xf32>
    %c5 = arith.constant 5 : index
    %c0_19 = arith.constant 0 : index
    %c0_20 = arith.constant 0 : index
    %28 = vector.load %arg3[%c5, %c0_19, %c0_20] : memref<9x4x4xf32, #tpu.memory_space<vmem>>, vector<1x4x4xf32>
    %29 = vector.shape_cast %28 : vector<1x4x4xf32> to vector<4x4xf32>
    %cst_21 = arith.constant dense<0.000000e+00> : vector<288x4xf32>
    %30 = tpu.matmul %27, %29, %cst_21 {dimension_numbers = #tpu.dot_dimension_numbers<[1], [0], [0], [1], [0, 0, 1, 1], [], []>} : vector<288x4xf32>, vector<4x4xf32>, vector<288x4xf32> -> vector<288x4xf32>
    %31 = arith.addf %26, %30 : vector<288x4xf32>
    %32 = vector.extract_strided_slice %2 {offsets = [36, 0], sizes = [288, 4], strides = [1, 1]} : vector<332x4xf32> to vector<288x4xf32>
    %c6 = arith.constant 6 : index
    %c0_22 = arith.constant 0 : index
    %c0_23 = arith.constant 0 : index
    %33 = vector.load %arg3[%c6, %c0_22, %c0_23] : memref<9x4x4xf32, #tpu.memory_space<vmem>>, vector<1x4x4xf32>
    %34 = vector.shape_cast %33 : vector<1x4x4xf32> to vector<4x4xf32>
    %cst_24 = arith.constant dense<0.000000e+00> : vector<288x4xf32>
    %35 = tpu.matmul %32, %34, %cst_24 {dimension_numbers = #tpu.dot_dimension_numbers<[1], [0], [0], [1], [0, 0, 1, 1], [], []>} : vector<288x4xf32>, vector<4x4xf32>, vector<288x4xf32> -> vector<288x4xf32>
    %36 = arith.addf %31, %35 : vector<288x4xf32>
    %37 = vector.extract_strided_slice %2 {offsets = [37, 0], sizes = [288, 4], strides = [1, 1]} : vector<332x4xf32> to vector<288x4xf32>
    %c7 = arith.constant 7 : index
    %c0_25 = arith.constant 0 : index
    %c0_26 = arith.constant 0 : index
    %38 = vector.load %arg3[%c7, %c0_25, %c0_26] : memref<9x4x4xf32, #tpu.memory_space<vmem>>, vector<1x4x4xf32>
    %39 = vector.shape_cast %38 : vector<1x4x4xf32> to vector<4x4xf32>
    %cst_27 = arith.constant dense<0.000000e+00> : vector<288x4xf32>
    %40 = tpu.matmul %37, %39, %cst_27 {dimension_numbers = #tpu.dot_dimension_numbers<[1], [0], [0], [1], [0, 0, 1, 1], [], []>} : vector<288x4xf32>, vector<4x4xf32>, vector<288x4xf32> -> vector<288x4xf32>
    %41 = arith.addf %36, %40 : vector<288x4xf32>
    %42 = vector.extract_strided_slice %2 {offsets = [38, 0], sizes = [288, 4], strides = [1, 1]} : vector<332x4xf32> to vector<288x4xf32>
    %c8 = arith.constant 8 : index
    %c0_28 = arith.constant 0 : index
    %c0_29 = arith.constant 0 : index
    %43 = vector.load %arg3[%c8, %c0_28, %c0_29] : memref<9x4x4xf32, #tpu.memory_space<vmem>>, vector<1x4x4xf32>
    %44 = vector.shape_cast %43 : vector<1x4x4xf32> to vector<4x4xf32>
    %cst_30 = arith.constant dense<0.000000e+00> : vector<288x4xf32>
    %45 = tpu.matmul %42, %44, %cst_30 {dimension_numbers = #tpu.dot_dimension_numbers<[1], [0], [0], [1], [0, 0, 1, 1], [], []>} : vector<288x4xf32>, vector<4x4xf32>, vector<288x4xf32> -> vector<288x4xf32>
    %46 = arith.addf %41, %45 : vector<288x4xf32>
    %47 = vector.broadcast %0 : vector<288x1xf32> to vector<288x4xf32>
    %48 = arith.mulf %46, %47 : vector<288x4xf32>
    %cst_31 = arith.constant dense<0.000000e+00> : vector<4xf32>
    %49 = vector.multi_reduction <add>, %48, %cst_31 [0] : vector<288x4xf32> to vector<4xf32>
    %50 = vector.shape_cast %49 : vector<4xf32> to vector<1x4xf32>
    %cst_32 = arith.constant 3.906250e-03 : f32
    %51 = vector.broadcast %cst_32 : f32 to vector<1x4xf32>
    %52 = arith.mulf %50, %51 : vector<1x4xf32>
    %53 = arith.mulf %48, %48 : vector<288x4xf32>
    %cst_33 = arith.constant dense<0.000000e+00> : vector<4xf32>
    %54 = vector.multi_reduction <add>, %53, %cst_33 [0] : vector<288x4xf32> to vector<4xf32>
    %55 = vector.shape_cast %54 : vector<4xf32> to vector<1x4xf32>
    %cst_34 = arith.constant 3.906250e-03 : f32
    %56 = vector.broadcast %cst_34 : f32 to vector<1x4xf32>
    %57 = arith.mulf %55, %56 : vector<1x4xf32>
    %58 = arith.mulf %52, %52 : vector<1x4xf32>
    %59 = arith.subf %57, %58 : vector<1x4xf32>
    %cst_35 = arith.constant 0.000000e+00 : f32
    %60 = vector.broadcast %cst_35 : f32 to vector<1x4xf32>
    %61 = arith.maximumf %59, %60 : vector<1x4xf32>
    %62 = vector.broadcast %52 : vector<1x4xf32> to vector<288x4xf32>
    %63 = arith.subf %46, %62 : vector<288x4xf32>
    %cst_36 = arith.constant 9.99999974E-6 : f32
    %64 = vector.broadcast %cst_36 : f32 to vector<1x4xf32>
    %65 = arith.addf %61, %64 : vector<1x4xf32>
    %66 = math.rsqrt %65 : vector<1x4xf32>
    %67 = vector.broadcast %66 : vector<1x4xf32> to vector<288x4xf32>
    %68 = arith.mulf %63, %67 : vector<288x4xf32>
    %cst_37 = arith.constant 0.000000e+00 : f32
    %69 = vector.broadcast %cst_37 : f32 to vector<288x4xf32>
    %70 = arith.maximumf %68, %69 : vector<288x4xf32>
    %c19 = arith.constant 19 : index
    %c0_38 = arith.constant 0 : index
    %71 = vector.load %arg6[%c19, %c0_38] : memref<332x4xf32, #tpu.memory_space<vmem>>, vector<288x4xf32>
    tpu.vector_store %arg6[%c19, %c0_38], %70 {strides = array<i32>} : memref<332x4xf32, #tpu.memory_space<vmem>>, vector<288x4xf32>,
    %c20 = arith.constant 20 : index
    %c0_39 = arith.constant 0 : index
    %72 = vector.load %arg6[%c20, %c0_39] : memref<332x4xf32, #tpu.memory_space<vmem>>, vector<1x4xf32>
    %c18 = arith.constant 18 : index
    %c0_40 = arith.constant 0 : index
    %73 = vector.load %arg6[%c18, %c0_40] : memref<332x4xf32, #tpu.memory_space<vmem>>, vector<1x4xf32>
    tpu.vector_store %arg6[%c18, %c0_40], %72 {strides = array<i32>} : memref<332x4xf32, #tpu.memory_space<vmem>>, vector<1x4xf32>,
    %c33 = arith.constant 33 : index
    %c0_41 = arith.constant 0 : index
    %74 = vector.load %arg6[%c33, %c0_41] : memref<332x4xf32, #tpu.memory_space<vmem>>, vector<1x4xf32>
    %c35 = arith.constant 35 : index
    %c0_42 = arith.constant 0 : index
    %75 = vector.load %arg6[%c35, %c0_42] : memref<332x4xf32, #tpu.memory_space<vmem>>, vector<1x4xf32>
    tpu.vector_store %arg6[%c35, %c0_42], %74 {strides = array<i32>} : memref<332x4xf32, #tpu.memory_space<vmem>>, vector<1x4xf32>,
    %c38 = arith.constant 38 : index
    %c0_43 = arith.constant 0 : index
    %76 = vector.load %arg6[%c38, %c0_43] : memref<332x4xf32, #tpu.memory_space<vmem>>, vector<1x4xf32>
    %c36 = arith.constant 36 : index
    %c0_44 = arith.constant 0 : index
    %77 = vector.load %arg6[%c36, %c0_44] : memref<332x4xf32, #tpu.memory_space<vmem>>, vector<1x4xf32>
    tpu.vector_store %arg6[%c36, %c0_44], %76 {strides = array<i32>} : memref<332x4xf32, #tpu.memory_space<vmem>>, vector<1x4xf32>,
    %c51 = arith.constant 51 : index
    %c0_45 = arith.constant 0 : index
    %78 = vector.load %arg6[%c51, %c0_45] : memref<332x4xf32, #tpu.memory_space<vmem>>, vector<1x4xf32>
    %c53 = arith.constant 53 : index
    %c0_46 = arith.constant 0 : index
    %79 = vector.load %arg6[%c53, %c0_46] : memref<332x4xf32, #tpu.memory_space<vmem>>, vector<1x4xf32>
    tpu.vector_store %arg6[%c53, %c0_46], %78 {strides = array<i32>} : memref<332x4xf32, #tpu.memory_space<vmem>>, vector<1x4xf32>,
    %c56 = arith.constant 56 : index
    %c0_47 = arith.constant 0 : index
    %80 = vector.load %arg6[%c56, %c0_47] : memref<332x4xf32, #tpu.memory_space<vmem>>, vector<1x4xf32>
    %c54 = arith.constant 54 : index
    %c0_48 = arith.constant 0 : index
    %81 = vector.load %arg6[%c54, %c0_48] : memref<332x4xf32, #tpu.memory_space<vmem>>, vector<1x4xf32>
    tpu.vector_store %arg6[%c54, %c0_48], %80 {strides = array<i32>} : memref<332x4xf32, #tpu.memory_space<vmem>>, vector<1x4xf32>,
    %c69 = arith.constant 69 : index
    %c0_49 = arith.constant 0 : index
    %82 = vector.load %arg6[%c69, %c0_49] : memref<332x4xf32, #tpu.memory_space<vmem>>, vector<1x4xf32>
    %c71 = arith.constant 71 : index
    %c0_50 = arith.constant 0 : index
    %83 = vector.load %arg6[%c71, %c0_50] : memref<332x4xf32, #tpu.memory_space<vmem>>, vector<1x4xf32>
    tpu.vector_store %arg6[%c71, %c0_50], %82 {strides = array<i32>} : memref<332x4xf32, #tpu.memory_space<vmem>>, vector<1x4xf32>,
    %c74 = arith.constant 74 : index
    %c0_51 = arith.constant 0 : index
    %84 = vector.load %arg6[%c74, %c0_51] : memref<332x4xf32, #tpu.memory_space<vmem>>, vector<1x4xf32>
    %c72 = arith.constant 72 : index
    %c0_52 = arith.constant 0 : index
    %85 = vector.load %arg6[%c72, %c0_52] : memref<332x4xf32, #tpu.memory_space<vmem>>, vector<1x4xf32>
    tpu.vector_store %arg6[%c72, %c0_52], %84 {strides = array<i32>} : memref<332x4xf32, #tpu.memory_space<vmem>>, vector<1x4xf32>,
    %c87 = arith.constant 87 : index
    %c0_53 = arith.constant 0 : index
    %86 = vector.load %arg6[%c87, %c0_53] : memref<332x4xf32, #tpu.memory_space<vmem>>, vector<1x4xf32>
    %c89 = arith.constant 89 : index
    %c0_54 = arith.constant 0 : index
    %87 = vector.load %arg6[%c89, %c0_54] : memref<332x4xf32, #tpu.memory_space<vmem>>, vector<1x4xf32>
    tpu.vector_store %arg6[%c89, %c0_54], %86 {strides = array<i32>} : memref<332x4xf32, #tpu.memory_space<vmem>>, vector<1x4xf32>,
    %c92 = arith.constant 92 : index
    %c0_55 = arith.constant 0 : index
    %88 = vector.load %arg6[%c92, %c0_55] : memref<332x4xf32, #tpu.memory_space<vmem>>, vector<1x4xf32>
    %c90 = arith.constant 90 : index
    %c0_56 = arith.constant 0 : index
    %89 = vector.load %arg6[%c90, %c0_56] : memref<332x4xf32, #tpu.memory_space<vmem>>, vector<1x4xf32>
    tpu.vector_store %arg6[%c90, %c0_56], %88 {strides = array<i32>} : memref<332x4xf32, #tpu.memory_space<vmem>>, vector<1x4xf32>,
    %c105 = arith.constant 105 : index
    %c0_57 = arith.constant 0 : index
    %90 = vector.load %arg6[%c105, %c0_57] : memref<332x4xf32, #tpu.memory_space<vmem>>, vector<1x4xf32>
    %c107 = arith.constant 107 : index
    %c0_58 = arith.constant 0 : index
    %91 = vector.load %arg6[%c107, %c0_58] : memref<332x4xf32, #tpu.memory_space<vmem>>, vector<1x4xf32>
    tpu.vector_store %arg6[%c107, %c0_58], %90 {strides = array<i32>} : memref<332x4xf32, #tpu.memory_space<vmem>>, vector<1x4xf32>,
    %c110 = arith.constant 110 : index
    %c0_59 = arith.constant 0 : index
    %92 = vector.load %arg6[%c110, %c0_59] : memref<332x4xf32, #tpu.memory_space<vmem>>, vector<1x4xf32>
    %c108 = arith.constant 108 : index
    %c0_60 = arith.constant 0 : index
    %93 = vector.load %arg6[%c108, %c0_60] : memref<332x4xf32, #tpu.memory_space<vmem>>, vector<1x4xf32>
    tpu.vector_store %arg6[%c108, %c0_60], %92 {strides = array<i32>} : memref<332x4xf32, #tpu.memory_space<vmem>>, vector<1x4xf32>,
    %c123 = arith.constant 123 : index
    %c0_61 = arith.constant 0 : index
    %94 = vector.load %arg6[%c123, %c0_61] : memref<332x4xf32, #tpu.memory_space<vmem>>, vector<1x4xf32>
    %c125 = arith.constant 125 : index
    %c0_62 = arith.constant 0 : index
    %95 = vector.load %arg6[%c125, %c0_62] : memref<332x4xf32, #tpu.memory_space<vmem>>, vector<1x4xf32>
    tpu.vector_store %arg6[%c125, %c0_62], %94 {strides = array<i32>} : memref<332x4xf32, #tpu.memory_space<vmem>>, vector<1x4xf32>,
    %c128 = arith.constant 128 : index
    %c0_63 = arith.constant 0 : index
    %96 = vector.load %arg6[%c128, %c0_63] : memref<332x4xf32, #tpu.memory_space<vmem>>, vector<1x4xf32>
    %c126 = arith.constant 126 : index
    %c0_64 = arith.constant 0 : index
    %97 = vector.load %arg6[%c126, %c0_64] : memref<332x4xf32, #tpu.memory_space<vmem>>, vector<1x4xf32>
    tpu.vector_store %arg6[%c126, %c0_64], %96 {strides = array<i32>} : memref<332x4xf32, #tpu.memory_space<vmem>>, vector<1x4xf32>,
    %c141 = arith.constant 141 : index
    %c0_65 = arith.constant 0 : index
    %98 = vector.load %arg6[%c141, %c0_65] : memref<332x4xf32, #tpu.memory_space<vmem>>, vector<1x4xf32>
    %c143 = arith.constant 143 : index
    %c0_66 = arith.constant 0 : index
    %99 = vector.load %arg6[%c143, %c0_66] : memref<332x4xf32, #tpu.memory_space<vmem>>, vector<1x4xf32>
    tpu.vector_store %arg6[%c143, %c0_66], %98 {strides = array<i32>} : memref<332x4xf32, #tpu.memory_space<vmem>>, vector<1x4xf32>,
    %c146 = arith.constant 146 : index
    %c0_67 = arith.constant 0 : index
    %100 = vector.load %arg6[%c146, %c0_67] : memref<332x4xf32, #tpu.memory_space<vmem>>, vector<1x4xf32>
    %c144 = arith.constant 144 : index
    %c0_68 = arith.constant 0 : index
    %101 = vector.load %arg6[%c144, %c0_68] : memref<332x4xf32, #tpu.memory_space<vmem>>, vector<1x4xf32>
    tpu.vector_store %arg6[%c144, %c0_68], %100 {strides = array<i32>} : memref<332x4xf32, #tpu.memory_space<vmem>>, vector<1x4xf32>,
    %c159 = arith.constant 159 : index
    %c0_69 = arith.constant 0 : index
    %102 = vector.load %arg6[%c159, %c0_69] : memref<332x4xf32, #tpu.memory_space<vmem>>, vector<1x4xf32>
    %c161 = arith.constant 161 : index
    %c0_70 = arith.constant 0 : index
    %103 = vector.load %arg6[%c161, %c0_70] : memref<332x4xf32, #tpu.memory_space<vmem>>, vector<1x4xf32>
    tpu.vector_store %arg6[%c161, %c0_70], %102 {strides = array<i32>} : memref<332x4xf32, #tpu.memory_space<vmem>>, vector<1x4xf32>,
    %c164 = arith.constant 164 : index
    %c0_71 = arith.constant 0 : index
    %104 = vector.load %arg6[%c164, %c0_71] : memref<332x4xf32, #tpu.memory_space<vmem>>, vector<1x4xf32>
    %c162 = arith.constant 162 : index
    %c0_72 = arith.constant 0 : index
    %105 = vector.load %arg6[%c162, %c0_72] : memref<332x4xf32, #tpu.memory_space<vmem>>, vector<1x4xf32>
    tpu.vector_store %arg6[%c162, %c0_72], %104 {strides = array<i32>} : memref<332x4xf32, #tpu.memory_space<vmem>>, vector<1x4xf32>,
    %c177 = arith.constant 177 : index
    %c0_73 = arith.constant 0 : index
    %106 = vector.load %arg6[%c177, %c0_73] : memref<332x4xf32, #tpu.memory_space<vmem>>, vector<1x4xf32>
    %c179 = arith.constant 179 : index
    %c0_74 = arith.constant 0 : index
    %107 = vector.load %arg6[%c179, %c0_74] : memref<332x4xf32, #tpu.memory_space<vmem>>, vector<1x4xf32>
    tpu.vector_store %arg6[%c179, %c0_74], %106 {strides = array<i32>} : memref<332x4xf32, #tpu.memory_space<vmem>>, vector<1x4xf32>,
    %c182 = arith.constant 182 : index
    %c0_75 = arith.constant 0 : index
    %108 = vector.load %arg6[%c182, %c0_75] : memref<332x4xf32, #tpu.memory_space<vmem>>, vector<1x4xf32>
    %c180 = arith.constant 180 : index
    %c0_76 = arith.constant 0 : index
    %109 = vector.load %arg6[%c180, %c0_76] : memref<332x4xf32, #tpu.memory_space<vmem>>, vector<1x4xf32>
    tpu.vector_store %arg6[%c180, %c0_76], %108 {strides = array<i32>} : memref<332x4xf32, #tpu.memory_space<vmem>>, vector<1x4xf32>,
    %c195 = arith.constant 195 : index
    %c0_77 = arith.constant 0 : index
    %110 = vector.load %arg6[%c195, %c0_77] : memref<332x4xf32, #tpu.memory_space<vmem>>, vector<1x4xf32>
    %c197 = arith.constant 197 : index
    %c0_78 = arith.constant 0 : index
    %111 = vector.load %arg6[%c197, %c0_78] : memref<332x4xf32, #tpu.memory_space<vmem>>, vector<1x4xf32>
    tpu.vector_store %arg6[%c197, %c0_78], %110 {strides = array<i32>} : memref<332x4xf32, #tpu.memory_space<vmem>>, vector<1x4xf32>,
    %c200 = arith.constant 200 : index
    %c0_79 = arith.constant 0 : index
    %112 = vector.load %arg6[%c200, %c0_79] : memref<332x4xf32, #tpu.memory_space<vmem>>, vector<1x4xf32>
    %c198 = arith.constant 198 : index
    %c0_80 = arith.constant 0 : index
    %113 = vector.load %arg6[%c198, %c0_80] : memref<332x4xf32, #tpu.memory_space<vmem>>, vector<1x4xf32>
    tpu.vector_store %arg6[%c198, %c0_80], %112 {strides = array<i32>} : memref<332x4xf32, #tpu.memory_space<vmem>>, vector<1x4xf32>,
    %c213 = arith.constant 213 : index
    %c0_81 = arith.constant 0 : index
    %114 = vector.load %arg6[%c213, %c0_81] : memref<332x4xf32, #tpu.memory_space<vmem>>, vector<1x4xf32>
    %c215 = arith.constant 215 : index
    %c0_82 = arith.constant 0 : index
    %115 = vector.load %arg6[%c215, %c0_82] : memref<332x4xf32, #tpu.memory_space<vmem>>, vector<1x4xf32>
    tpu.vector_store %arg6[%c215, %c0_82], %114 {strides = array<i32>} : memref<332x4xf32, #tpu.memory_space<vmem>>, vector<1x4xf32>,
    %c218 = arith.constant 218 : index
    %c0_83 = arith.constant 0 : index
    %116 = vector.load %arg6[%c218, %c0_83] : memref<332x4xf32, #tpu.memory_space<vmem>>, vector<1x4xf32>
    %c216 = arith.constant 216 : index
    %c0_84 = arith.constant 0 : index
    %117 = vector.load %arg6[%c216, %c0_84] : memref<332x4xf32, #tpu.memory_space<vmem>>, vector<1x4xf32>
    tpu.vector_store %arg6[%c216, %c0_84], %116 {strides = array<i32>} : memref<332x4xf32, #tpu.memory_space<vmem>>, vector<1x4xf32>,
    %c231 = arith.constant 231 : index
    %c0_85 = arith.constant 0 : index
    %118 = vector.load %arg6[%c231, %c0_85] : memref<332x4xf32, #tpu.memory_space<vmem>>, vector<1x4xf32>
    %c233 = arith.constant 233 : index
    %c0_86 = arith.constant 0 : index
    %119 = vector.load %arg6[%c233, %c0_86] : memref<332x4xf32, #tpu.memory_space<vmem>>, vector<1x4xf32>
    tpu.vector_store %arg6[%c233, %c0_86], %118 {strides = array<i32>} : memref<332x4xf32, #tpu.memory_space<vmem>>, vector<1x4xf32>,
    %c236 = arith.constant 236 : index
    %c0_87 = arith.constant 0 : index
    %120 = vector.load %arg6[%c236, %c0_87] : memref<332x4xf32, #tpu.memory_space<vmem>>, vector<1x4xf32>
    %c234 = arith.constant 234 : index
    %c0_88 = arith.constant 0 : index
    %121 = vector.load %arg6[%c234, %c0_88] : memref<332x4xf32, #tpu.memory_space<vmem>>, vector<1x4xf32>
    tpu.vector_store %arg6[%c234, %c0_88], %120 {strides = array<i32>} : memref<332x4xf32, #tpu.memory_space<vmem>>, vector<1x4xf32>,
    %c249 = arith.constant 249 : index
    %c0_89 = arith.constant 0 : index
    %122 = vector.load %arg6[%c249, %c0_89] : memref<332x4xf32, #tpu.memory_space<vmem>>, vector<1x4xf32>
    %c251 = arith.constant 251 : index
    %c0_90 = arith.constant 0 : index
    %123 = vector.load %arg6[%c251, %c0_90] : memref<332x4xf32, #tpu.memory_space<vmem>>, vector<1x4xf32>
    tpu.vector_store %arg6[%c251, %c0_90], %122 {strides = array<i32>} : memref<332x4xf32, #tpu.memory_space<vmem>>, vector<1x4xf32>,
    %c254 = arith.constant 254 : index
    %c0_91 = arith.constant 0 : index
    %124 = vector.load %arg6[%c254, %c0_91] : memref<332x4xf32, #tpu.memory_space<vmem>>, vector<1x4xf32>
    %c252 = arith.constant 252 : index
    %c0_92 = arith.constant 0 : index
    %125 = vector.load %arg6[%c252, %c0_92] : memref<332x4xf32, #tpu.memory_space<vmem>>, vector<1x4xf32>
    tpu.vector_store %arg6[%c252, %c0_92], %124 {strides = array<i32>} : memref<332x4xf32, #tpu.memory_space<vmem>>, vector<1x4xf32>,
    %c267 = arith.constant 267 : index
    %c0_93 = arith.constant 0 : index
    %126 = vector.load %arg6[%c267, %c0_93] : memref<332x4xf32, #tpu.memory_space<vmem>>, vector<1x4xf32>
    %c269 = arith.constant 269 : index
    %c0_94 = arith.constant 0 : index
    %127 = vector.load %arg6[%c269, %c0_94] : memref<332x4xf32, #tpu.memory_space<vmem>>, vector<1x4xf32>
    tpu.vector_store %arg6[%c269, %c0_94], %126 {strides = array<i32>} : memref<332x4xf32, #tpu.memory_space<vmem>>, vector<1x4xf32>,
    %c272 = arith.constant 272 : index
    %c0_95 = arith.constant 0 : index
    %128 = vector.load %arg6[%c272, %c0_95] : memref<332x4xf32, #tpu.memory_space<vmem>>, vector<1x4xf32>
    %c270 = arith.constant 270 : index
    %c0_96 = arith.constant 0 : index
    %129 = vector.load %arg6[%c270, %c0_96] : memref<332x4xf32, #tpu.memory_space<vmem>>, vector<1x4xf32>
    tpu.vector_store %arg6[%c270, %c0_96], %128 {strides = array<i32>} : memref<332x4xf32, #tpu.memory_space<vmem>>, vector<1x4xf32>,
    %c285 = arith.constant 285 : index
    %c0_97 = arith.constant 0 : index
    %130 = vector.load %arg6[%c285, %c0_97] : memref<332x4xf32, #tpu.memory_space<vmem>>, vector<1x4xf32>
    %c287 = arith.constant 287 : index
    %c0_98 = arith.constant 0 : index
    %131 = vector.load %arg6[%c287, %c0_98] : memref<332x4xf32, #tpu.memory_space<vmem>>, vector<1x4xf32>
    tpu.vector_store %arg6[%c287, %c0_98], %130 {strides = array<i32>} : memref<332x4xf32, #tpu.memory_space<vmem>>, vector<1x4xf32>,
    %c290 = arith.constant 290 : index
    %c0_99 = arith.constant 0 : index
    %132 = vector.load %arg6[%c290, %c0_99] : memref<332x4xf32, #tpu.memory_space<vmem>>, vector<1x4xf32>
    %c288 = arith.constant 288 : index
    %c0_100 = arith.constant 0 : index
    %133 = vector.load %arg6[%c288, %c0_100] : memref<332x4xf32, #tpu.memory_space<vmem>>, vector<1x4xf32>
    tpu.vector_store %arg6[%c288, %c0_100], %132 {strides = array<i32>} : memref<332x4xf32, #tpu.memory_space<vmem>>, vector<1x4xf32>,
    %c303 = arith.constant 303 : index
    %c0_101 = arith.constant 0 : index
    %134 = vector.load %arg6[%c303, %c0_101] : memref<332x4xf32, #tpu.memory_space<vmem>>, vector<1x4xf32>
    %c305 = arith.constant 305 : index
    %c0_102 = arith.constant 0 : index
    %135 = vector.load %arg6[%c305, %c0_102] : memref<332x4xf32, #tpu.memory_space<vmem>>, vector<1x4xf32>
    tpu.vector_store %arg6[%c305, %c0_102], %134 {strides = array<i32>} : memref<332x4xf32, #tpu.memory_space<vmem>>, vector<1x4xf32>,
    %c36_103 = arith.constant 36 : index
    %c0_104 = arith.constant 0 : index
    %136 = vector.load %arg6[%c36_103, %c0_104] : memref<332x4xf32, #tpu.memory_space<vmem>>, vector<18x4xf32>
    %c0_105 = arith.constant 0 : index
    %c0_106 = arith.constant 0 : index
    %137 = vector.load %arg6[%c0_105, %c0_106] : memref<332x4xf32, #tpu.memory_space<vmem>>, vector<18x4xf32>
    tpu.vector_store %arg6[%c0_105, %c0_106], %136 {strides = array<i32>} : memref<332x4xf32, #tpu.memory_space<vmem>>, vector<18x4xf32>,
    %c270_107 = arith.constant 270 : index
    %c0_108 = arith.constant 0 : index
    %138 = vector.load %arg6[%c270_107, %c0_108] : memref<332x4xf32, #tpu.memory_space<vmem>>, vector<18x4xf32>
    %c306 = arith.constant 306 : index
    %c0_109 = arith.constant 0 : index
    %139 = vector.load %arg6[%c306, %c0_109] : memref<332x4xf32, #tpu.memory_space<vmem>>, vector<18x4xf32>
    tpu.vector_store %arg6[%c306, %c0_109], %138 {strides = array<i32>} : memref<332x4xf32, #tpu.memory_space<vmem>>, vector<18x4xf32>,
    %cst_110 = arith.constant 0.000000e+00 : f32
    %140 = vector.broadcast %cst_110 : f32 to vector<8x4xf32>
    %c324 = arith.constant 324 : index
    %c0_111 = arith.constant 0 : index
    %141 = vector.load %arg6[%c324, %c0_111] : memref<332x4xf32, #tpu.memory_space<vmem>>, vector<8x4xf32>
    tpu.vector_store %arg6[%c324, %c0_111], %140 {strides = array<i32>} : memref<332x4xf32, #tpu.memory_space<vmem>>, vector<8x4xf32>,
    %c0_112 = arith.constant 0 : index
    %c0_113 = arith.constant 0 : index
    %142 = vector.load %arg6[%c0_112, %c0_113] : memref<332x4xf32, #tpu.memory_space<vmem>>, vector<288x4xf32>
    %c0_114 = arith.constant 0 : index
    %c0_115 = arith.constant 0 : index
    %c0_116 = arith.constant 0 : index
    %143 = vector.load %arg4[%c0_114, %c0_115, %c0_116] : memref<9x4x4xf32, #tpu.memory_space<vmem>>, vector<1x4x4xf32>
    %144 = vector.shape_cast %143 : vector<1x4x4xf32> to vector<4x4xf32>
    %cst_117 = arith.constant dense<0.000000e+00> : vector<288x4xf32>
    %145 = tpu.matmul %142, %144, %cst_117 {dimension_numbers = #tpu.dot_dimension_numbers<[1], [0], [0], [1], [0, 0, 1, 1], [], []>} : vector<288x4xf32>, vector<4x4xf32>, vector<288x4xf32> -> vector<288x4xf32>
    %c1_118 = arith.constant 1 : index
    %c0_119 = arith.constant 0 : index
    %146 = vector.load %arg6[%c1_118, %c0_119] : memref<332x4xf32, #tpu.memory_space<vmem>>, vector<288x4xf32>
    %c1_120 = arith.constant 1 : index
    %c0_121 = arith.constant 0 : index
    %c0_122 = arith.constant 0 : index
    %147 = vector.load %arg4[%c1_120, %c0_121, %c0_122] : memref<9x4x4xf32, #tpu.memory_space<vmem>>, vector<1x4x4xf32>
    %148 = vector.shape_cast %147 : vector<1x4x4xf32> to vector<4x4xf32>
    %cst_123 = arith.constant dense<0.000000e+00> : vector<288x4xf32>
    %149 = tpu.matmul %146, %148, %cst_123 {dimension_numbers = #tpu.dot_dimension_numbers<[1], [0], [0], [1], [0, 0, 1, 1], [], []>} : vector<288x4xf32>, vector<4x4xf32>, vector<288x4xf32> -> vector<288x4xf32>
    %150 = arith.addf %145, %149 : vector<288x4xf32>
    %c2_124 = arith.constant 2 : index
    %c0_125 = arith.constant 0 : index
    %151 = vector.load %arg6[%c2_124, %c0_125] : memref<332x4xf32, #tpu.memory_space<vmem>>, vector<288x4xf32>
    %c2_126 = arith.constant 2 : index
    %c0_127 = arith.constant 0 : index
    %c0_128 = arith.constant 0 : index
    %152 = vector.load %arg4[%c2_126, %c0_127, %c0_128] : memref<9x4x4xf32, #tpu.memory_space<vmem>>, vector<1x4x4xf32>
    %153 = vector.shape_cast %152 : vector<1x4x4xf32> to vector<4x4xf32>
    %cst_129 = arith.constant dense<0.000000e+00> : vector<288x4xf32>
    %154 = tpu.matmul %151, %153, %cst_129 {dimension_numbers = #tpu.dot_dimension_numbers<[1], [0], [0], [1], [0, 0, 1, 1], [], []>} : vector<288x4xf32>, vector<4x4xf32>, vector<288x4xf32> -> vector<288x4xf32>
    %155 = arith.addf %150, %154 : vector<288x4xf32>
    %c18_130 = arith.constant 18 : index
    %c0_131 = arith.constant 0 : index
    %156 = vector.load %arg6[%c18_130, %c0_131] : memref<332x4xf32, #tpu.memory_space<vmem>>, vector<288x4xf32>
    %c3_132 = arith.constant 3 : index
    %c0_133 = arith.constant 0 : index
    %c0_134 = arith.constant 0 : index
    %157 = vector.load %arg4[%c3_132, %c0_133, %c0_134] : memref<9x4x4xf32, #tpu.memory_space<vmem>>, vector<1x4x4xf32>
    %158 = vector.shape_cast %157 : vector<1x4x4xf32> to vector<4x4xf32>
    %cst_135 = arith.constant dense<0.000000e+00> : vector<288x4xf32>
    %159 = tpu.matmul %156, %158, %cst_135 {dimension_numbers = #tpu.dot_dimension_numbers<[1], [0], [0], [1], [0, 0, 1, 1], [], []>} : vector<288x4xf32>, vector<4x4xf32>, vector<288x4xf32> -> vector<288x4xf32>
    %160 = arith.addf %155, %159 : vector<288x4xf32>
    %c19_136 = arith.constant 19 : index
    %c0_137 = arith.constant 0 : index
    %161 = vector.load %arg6[%c19_136, %c0_137] : memref<332x4xf32, #tpu.memory_space<vmem>>, vector<288x4xf32>
    %c4_138 = arith.constant 4 : index
    %c0_139 = arith.constant 0 : index
    %c0_140 = arith.constant 0 : index
    %162 = vector.load %arg4[%c4_138, %c0_139, %c0_140] : memref<9x4x4xf32, #tpu.memory_space<vmem>>, vector<1x4x4xf32>
    %163 = vector.shape_cast %162 : vector<1x4x4xf32> to vector<4x4xf32>
    %cst_141 = arith.constant dense<0.000000e+00> : vector<288x4xf32>
    %164 = tpu.matmul %161, %163, %cst_141 {dimension_numbers = #tpu.dot_dimension_numbers<[1], [0], [0], [1], [0, 0, 1, 1], [], []>} : vector<288x4xf32>, vector<4x4xf32>, vector<288x4xf32> -> vector<288x4xf32>
    %165 = arith.addf %160, %164 : vector<288x4xf32>
    %c20_142 = arith.constant 20 : index
    %c0_143 = arith.constant 0 : index
    %166 = vector.load %arg6[%c20_142, %c0_143] : memref<332x4xf32, #tpu.memory_space<vmem>>, vector<288x4xf32>
    %c5_144 = arith.constant 5 : index
    %c0_145 = arith.constant 0 : index
    %c0_146 = arith.constant 0 : index
    %167 = vector.load %arg4[%c5_144, %c0_145, %c0_146] : memref<9x4x4xf32, #tpu.memory_space<vmem>>, vector<1x4x4xf32>
    %168 = vector.shape_cast %167 : vector<1x4x4xf32> to vector<4x4xf32>
    %cst_147 = arith.constant dense<0.000000e+00> : vector<288x4xf32>
    %169 = tpu.matmul %166, %168, %cst_147 {dimension_numbers = #tpu.dot_dimension_numbers<[1], [0], [0], [1], [0, 0, 1, 1], [], []>} : vector<288x4xf32>, vector<4x4xf32>, vector<288x4xf32> -> vector<288x4xf32>
    %170 = arith.addf %165, %169 : vector<288x4xf32>
    %c36_148 = arith.constant 36 : index
    %c0_149 = arith.constant 0 : index
    %171 = vector.load %arg6[%c36_148, %c0_149] : memref<332x4xf32, #tpu.memory_space<vmem>>, vector<288x4xf32>
    %c6_150 = arith.constant 6 : index
    %c0_151 = arith.constant 0 : index
    %c0_152 = arith.constant 0 : index
    %172 = vector.load %arg4[%c6_150, %c0_151, %c0_152] : memref<9x4x4xf32, #tpu.memory_space<vmem>>, vector<1x4x4xf32>
    %173 = vector.shape_cast %172 : vector<1x4x4xf32> to vector<4x4xf32>
    %cst_153 = arith.constant dense<0.000000e+00> : vector<288x4xf32>
    %174 = tpu.matmul %171, %173, %cst_153 {dimension_numbers = #tpu.dot_dimension_numbers<[1], [0], [0], [1], [0, 0, 1, 1], [], []>} : vector<288x4xf32>, vector<4x4xf32>, vector<288x4xf32> -> vector<288x4xf32>
    %175 = arith.addf %170, %174 : vector<288x4xf32>
    %c37 = arith.constant 37 : index
    %c0_154 = arith.constant 0 : index
    %176 = vector.load %arg6[%c37, %c0_154] : memref<332x4xf32, #tpu.memory_space<vmem>>, vector<288x4xf32>
    %c7_155 = arith.constant 7 : index
    %c0_156 = arith.constant 0 : index
    %c0_157 = arith.constant 0 : index
    %177 = vector.load %arg4[%c7_155, %c0_156, %c0_157] : memref<9x4x4xf32, #tpu.memory_space<vmem>>, vector<1x4x4xf32>
    %178 = vector.shape_cast %177 : vector<1x4x4xf32> to vector<4x4xf32>
    %cst_158 = arith.constant dense<0.000000e+00> : vector<288x4xf32>
    %179 = tpu.matmul %176, %178, %cst_158 {dimension_numbers = #tpu.dot_dimension_numbers<[1], [0], [0], [1], [0, 0, 1, 1], [], []>} : vector<288x4xf32>, vector<4x4xf32>, vector<288x4xf32> -> vector<288x4xf32>
    %180 = arith.addf %175, %179 : vector<288x4xf32>
    %c38_159 = arith.constant 38 : index
    %c0_160 = arith.constant 0 : index
    %181 = vector.load %arg6[%c38_159, %c0_160] : memref<332x4xf32, #tpu.memory_space<vmem>>, vector<288x4xf32>
    %c8_161 = arith.constant 8 : index
    %c0_162 = arith.constant 0 : index
    %c0_163 = arith.constant 0 : index
    %182 = vector.load %arg4[%c8_161, %c0_162, %c0_163] : memref<9x4x4xf32, #tpu.memory_space<vmem>>, vector<1x4x4xf32>
    %183 = vector.shape_cast %182 : vector<1x4x4xf32> to vector<4x4xf32>
    %cst_164 = arith.constant dense<0.000000e+00> : vector<288x4xf32>
    %184 = tpu.matmul %181, %183, %cst_164 {dimension_numbers = #tpu.dot_dimension_numbers<[1], [0], [0], [1], [0, 0, 1, 1], [], []>} : vector<288x4xf32>, vector<4x4xf32>, vector<288x4xf32> -> vector<288x4xf32>
    %185 = arith.addf %180, %184 : vector<288x4xf32>
    %186 = vector.broadcast %0 : vector<288x1xf32> to vector<288x4xf32>
    %187 = arith.mulf %185, %186 : vector<288x4xf32>
    %cst_165 = arith.constant dense<0.000000e+00> : vector<4xf32>
    %188 = vector.multi_reduction <add>, %187, %cst_165 [0] : vector<288x4xf32> to vector<4xf32>
    %189 = vector.shape_cast %188 : vector<4xf32> to vector<1x4xf32>
    %cst_166 = arith.constant 3.906250e-03 : f32
    %190 = vector.broadcast %cst_166 : f32 to vector<1x4xf32>
    %191 = arith.mulf %189, %190 : vector<1x4xf32>
    %192 = arith.mulf %187, %187 : vector<288x4xf32>
    %cst_167 = arith.constant dense<0.000000e+00> : vector<4xf32>
    %193 = vector.multi_reduction <add>, %192, %cst_167 [0] : vector<288x4xf32> to vector<4xf32>
    %194 = vector.shape_cast %193 : vector<4xf32> to vector<1x4xf32>
    %cst_168 = arith.constant 3.906250e-03 : f32
    %195 = vector.broadcast %cst_168 : f32 to vector<1x4xf32>
    %196 = arith.mulf %194, %195 : vector<1x4xf32>
    %197 = arith.mulf %191, %191 : vector<1x4xf32>
    %198 = arith.subf %196, %197 : vector<1x4xf32>
    %cst_169 = arith.constant 0.000000e+00 : f32
    %199 = vector.broadcast %cst_169 : f32 to vector<1x4xf32>
    %200 = arith.maximumf %198, %199 : vector<1x4xf32>
    %201 = vector.broadcast %191 : vector<1x4xf32> to vector<288x4xf32>
    %202 = arith.subf %185, %201 : vector<288x4xf32>
    %cst_170 = arith.constant 9.99999974E-6 : f32
    %203 = vector.broadcast %cst_170 : f32 to vector<1x4xf32>
    %204 = arith.addf %200, %203 : vector<1x4xf32>
    %205 = math.rsqrt %204 : vector<1x4xf32>
    %206 = vector.broadcast %205 : vector<1x4xf32> to vector<288x4xf32>
    %207 = arith.mulf %202, %206 : vector<288x4xf32>
    %208 = vector.extract_strided_slice %2 {offsets = [19, 0], sizes = [288, 4], strides = [1, 1]} : vector<332x4xf32> to vector<288x4xf32>
    %209 = arith.addf %208, %207 : vector<288x4xf32>
    %c0_171 = arith.constant 0 : index
    %c0_172 = arith.constant 0 : index
    %c0_173 = arith.constant 0 : index
    %210 = vector.load %arg5[%c0_171, %c0_172, %c0_173] : memref<1x288x4xf32, #tpu.memory_space<vmem>>, vector<1x288x4xf32>
    %211 = vector.shape_cast %210 : vector<1x288x4xf32> to vector<288x4xf32>
    %212 = vector.shape_cast %209 : vector<288x4xf32> to vector<1x288x4xf32>
    tpu.vector_store %arg5[%c0_171, %c0_172, %c0_173], %212 {strides = array<i32>} : memref<1x288x4xf32, #tpu.memory_space<vmem>>, vector<1x288x4xf32>,
    return
  }
  func.func @transform_0(%arg0: i32) -> (i32, i32, i32) {
    %c0_i32 = arith.constant 0 : i32
    %c0_i32_0 = arith.constant 0 : i32
    %c0_i32_1 = arith.constant 0 : i32
    return %arg0, %c0_i32, %c0_i32_0 : i32, i32, i32
  }
  func.func @transform_1(%arg0: i32) -> (i32, i32) {
    %c0_i32 = arith.constant 0 : i32
    %c0_i32_0 = arith.constant 0 : i32
    %c0_i32_1 = arith.constant 0 : i32
    return %c0_i32, %c0_i32_0 : i32, i32
  }
  func.func @transform_2(%arg0: i32) -> (i32, i32, i32) {
    %c0_i32 = arith.constant 0 : i32
    %c0_i32_0 = arith.constant 0 : i32
    %c0_i32_1 = arith.constant 0 : i32
    %c0_i32_2 = arith.constant 0 : i32
    return %c0_i32, %c0_i32_0, %c0_i32_1 : i32, i32, i32
  }
  func.func @transform_3(%arg0: i32) -> (i32, i32, i32) {
    %c0_i32 = arith.constant 0 : i32
    %c0_i32_0 = arith.constant 0 : i32
    %c0_i32_1 = arith.constant 0 : i32
    %c0_i32_2 = arith.constant 0 : i32
    return %c0_i32, %c0_i32_0, %c0_i32_1 : i32, i32, i32
  }
  func.func @transform_4(%arg0: i32) -> (i32, i32, i32) {
    %c0_i32 = arith.constant 0 : i32
    %c0_i32_0 = arith.constant 0 : i32
    %c0_i32_1 = arith.constant 0 : i32
    return %arg0, %c0_i32, %c0_i32_0 : i32, i32, i32
  }
}

</mosaic_0001>

<bundles_post_ra>
// kernel: resnet_block_forward.1
= control target key start
LH: loop header
LB: loop body
LE: loop exit
PB: predicated region body
PF: predicated region fallthrough
CT: control target
= control target key end

     0   :  { %s11285_s15 = smov 0   ;;  %s15539_s0 = inlined_call_operand.vmem [shape: f32[2,332,4], index: 0, kind: input, shape index: {}]   ;;  %s15540_s1 = inlined_call_operand.vmem [shape: f32[288,1], index: 1, kind: input, shape index: {}]   ;;  %s15541_s2 = inlined_call_operand.vmem [shape: f32[9,4,4], index: 2, kind: input, shape index: {}]   ;;  %s15542_s3 = inlined_call_operand.vmem [shape: f32[9,4,4], index: 3, kind: input, shape index: {}]   ;;  %s15543_s4 = inlined_call_operand.vmem [shape: f32[2,288,4], index: 4, kind: output, shape index: {}]  }
   0x1 LB: > { %s8795_s16 = sadd.s32 4294967295, %s11256_s15   ;;  %p8799_p0 = scmp.ge.s32.totalorder %s11256_s15, 1  ;;  %s11256_s15 = sphi %s11285_s15, %s14_s15  }
   0x2   : > { %p162_p1 = scmp.lt.s32.totalorder %s11256_s15, 3 }
   0x4   : > { %p163_p2 = pnand %p8799_p0, %p162_p1 }
   0x6   : > { %166 = sbr.rel (%p163_p2) target bundleno = 1312 (0x520), region = 36 }
   0xb   : > { %v8802_v0 = vld [vmem:[%s15541_s2 + $0x4] sm:$0xf]  ;;  %vm462_vm0 = vcmask 1043456   ;;  %v275_v1 = vld [vmem:[%s15541_s2] sm:$0xf]  ;;  %p188_p3 = scmp.lt.s32.totalorder %s8795_s16, 1 }
   0xc   : > { %10152 = vmatprep.subr.msk.mxu0 %vm462_vm0, %v8802_v0  ;;  %10208 = vmatprep.subr.msk.mxu1 %vm462_vm0, %v275_v1  ;;  %v8877_v2 = vld [vmem:[%s15541_s2 + $0x8] sm:$0xf]  ;;  %v8915_v3 = vld [vmem:[%s15541_s2 + $0xc] sm:$0xf]  ;;  %vm389_vm1 = vcmask 31744   ;;  %vm315_vm2 = vcmask 1046528  }
   0xd   : > { %10153 = vmatpush3.msk.msra.mxu0 %vm462_vm0, %v8802_v0  ;;  %s15927_s16 = smov (!%p188_p3, %s8795_s16), 1  ;;  %10209 = vmatpush3.msk.msra.mxu1 %vm462_vm0, %v275_v1  ;;  %v11363_v21 = vld [vmem:[%s15541_s2 + $0x10] sm:$0xf]  ;;  %v11420_v40 = vld [vmem:[%s15541_s2 + $0x14] sm:$0xf]  ;;  %vm1033_vm3 = vcmask 1045504  }
   0xe   : > { %10264 = vmatprep.subr.msk.mxu0 %vm462_vm0, %v8877_v2  ;;  %10320 = vmatprep.subr.msk.mxu1 %vm462_vm0, %v8915_v3  ;;  %s11160_s25 = smul.u32 336, %s15927_s16  ;;  %vm1761_vm4 = vcmask 1044480   ;;  %vm2920_vm5 = vcmask 1042432   ;;  %vm3352_vm6 = vcmask 1041408   ;;  %vm4340_vm7 = vcmask 24576  }
   0xf   : > { %vm4409_vm8 = vcmask 25600   ;;  %vm8701_vm9 = vcmask 31747   ;;  %s11161_s11 = smul.u32 288, %s15927_s16  ;;  %vm8738_vm10 = vcmask 26624  }
  0x10   : > { %s11317_s28 = scalar_lea.vmem %s15539_s0, %s11160_s25 }
  0x11   : > { %v11320_v4 = vld [vmem:[%s11317_s28] sm:$0xff]  ;;  %v11323_v5 = vld [vmem:[%s11317_s28 + $0x8] sm:$0xff]  ;;  %v11326_v6 = vld [vmem:[%s11317_s28 + $0x10] sm:$0xff]  ;;  %s15367_s13 = scalar_lea.vmem %s15543_s4, %s11161_s11 }
  0x12   : > { %v316_v7 = vrot.slane %v11320_v4, 1  ;;  %v317_v8 = vrot.slane %v11323_v5, 1  ;;  %10210 = vmatprep.mubr.msk.f32.mxu1 %vm389_vm1, %v11320_v4  ;;  %v319_v9 = vrot.slane %v11326_v6, 1  ;;  %v11334_v10 = vld [vmem:[%s11317_s28 + $0x18] sm:$0xff]  ;;  %v11337_v11 = vld [vmem:[%s11317_s28 + $0x20] sm:$0xff]  ;;  %v11340_v12 = vld [vmem:[%s11317_s28 + $0x28] sm:$0xff] }
  0x13   : > { %10211 = vmatmul.mubr.msk.f32.vlgmr.msra.gmra.mxu1 %vm389_vm1, %v11323_v5  ;;  %v321_v13 = vrot.slane %v11334_v10, 1  ;;  %v323_v14 = vrot.slane %v11337_v11, 1  ;;  %v325_v17 = vrot.slane %v11340_v12, 1  ;;  %v11352_v18 = vld [vmem:[%s11317_s28 + $0x30] sm:$0xff]  ;;  %v11358_v20 = vld [vmem:[%s11317_s28 + $0x38] sm:$0xff]  ;;  %v11375_v26 = vld [vmem:[%s11317_s28 + $0x40] sm:$0xff] }
  0x14   : > { %v318_v15 = vsel %vm315_vm2, %v316_v7, %v317_v8  ;;  %v320_v16 = vsel %vm315_vm2, %v317_v8, %v319_v9  ;;  %10213 = vmatprep.mubr.msk.f32.mxu1 %vm389_vm1, %v11326_v6  ;;  %10321 = vmatpush3.msk.msra.mxu1 %vm462_vm0, %v8915_v3  ;;  %v327_v23 = vrot.slane %v11352_v18, 1  ;;  %v329_v25 = vrot.slane %v11358_v20, 1  ;;  %v11382_v27 = vld [vmem:[%s11317_s28 + $0x48] sm:$0xff]  ;;  %v11393_v32 = vld [vmem:[%s11317_s28 + $0x50] sm:$0xff]  ;;  %v11398_v33 = vld [vmem:[%s11317_s28 + $0x58] sm:$0xff] }
  0x15   : > { %10154 = vmatprep.mubr.msk.f32.mxu0 %vm389_vm1, %v318_v15  ;;  %v322_v19 = vsel %vm315_vm2, %v319_v9, %v321_v13  ;;  %v324_v22 = vsel %vm315_vm2, %v321_v13, %v323_v14  ;;  %v326_v24 = vsel %vm315_vm2, %v323_v14, %v325_v17  ;;  %v331_v29 = vrot.slane %v11375_v26, 1  ;;  %v11409_v38 = vld [vmem:[%s11317_s28 + $0x60] sm:$0xff]  ;;  %v11414_v39 = vld [vmem:[%s11317_s28 + $0x68] sm:$0xff]  ;;  %10432 = vmatprep.subr.msk.mxu1 %vm462_vm0, %v11420_v40  ;;  %v11433_v46 = vld [vmem:[%s11317_s28 + $0x70] sm:$0xff] }
  0x16   : > { %10155 = vmatmul.mubr.msk.f32.vlgmr.msra.gmra.mxu0 %vm389_vm1, %v320_v16  ;;  %v328_v28 = vsel %vm315_vm2, %v325_v17, %v327_v23  ;;  %v330_v30 = vsel %vm315_vm2, %v327_v23, %v329_v25  ;;  %v333_v31 = vrot.slane %v11382_v27, 1  ;;  %v335_v35 = vrot.slane %v11393_v32, 1  ;;  %v11439_v48 = vld [vmem:[%s11317_s28 + $0x78] sm:$0xff]  ;;  %v11455_v54 = vld [vmem:[%s11317_s28 + $0x80] sm:$0xff]  ;;  %v11460_v55 = vld [vmem:[%s11317_s28 + $0x88] sm:$0xff] }
  0x17   : > { %10265 = vmatpush3.msk.msra.mxu0 %vm462_vm0, %v8877_v2  ;;  %10157 = vmatprep.mubr.msk.f32.mxu0 %vm389_vm1, %v322_v19  ;;  %v332_v34 = vsel %vm315_vm2, %v329_v25, %v331_v29  ;;  %v337_v37 = vrot.slane %v11398_v33, 1  ;;  %v339_v42 = vrot.slane %v11409_v38, 1  ;;  %v1034_v43 = vrot.slane %v11320_v4, 2  ;;  %v11471_v60 = vld [vmem:[%s11317_s28 + $0x90] sm:$0xff]  ;;  %v11476_v61 = vld [vmem:[%s11317_s28 + $0x98] sm:$0xff]  ;;  %v11487_v2 = vld [vmem:[%s11317_s28 + $0xa0] sm:$0xff] }
  0x18   : > { %10214 = vmatmul.mubr.msk.f32.gmra.mxu1 %vm389_vm1, %v11334_v10  ;;  %10376 = vmatprep.subr.msk.mxu0 %vm462_vm0, %v11363_v21  ;;  %v334_v36 = vsel %vm315_vm2, %v331_v29, %v333_v31  ;;  %v336_v41 = vsel %vm315_vm2, %v333_v31, %v335_v35  ;;  %v341_v45 = vrot.slane %v11414_v39, 1  ;;  %v1035_v47 = vrot.slane %v11323_v5, 2  ;;  %v11492_v3 = vld [vmem:[%s11317_s28 + $0xa8] sm:$0xff]  ;;  %v11503_v13 = vld [vmem:[%s11317_s28 + $0xb0] sm:$0xff]  ;;  %v11508_v14 = vld [vmem:[%s11317_s28 + $0xb8] sm:$0xff] }
  0x19   : > { %10216 = vmatprep.mubr.msk.f32.mxu1 %vm389_vm1, %v11337_v11  ;;  %v338_v44 = vsel %vm315_vm2, %v335_v35, %v337_v37  ;;  %v340_v50 = vsel %vm315_vm2, %v337_v37, %v339_v42  ;;  %v343_v51 = vrot.slane %v11433_v46, 1  ;;  %v345_v53 = vrot.slane %v11439_v48, 1  ;;  %v11524_v23 = vld [vmem:[%s11317_s28 + $0xc8] sm:$0xff]  ;;  %v11540_v31 = vld [vmem:[%s11317_s28 + $0xd8] sm:$0xff] }
  0x1a   : > { %10158 = vmatmul.mubr.msk.f32.gmra.mxu0 %vm389_vm1, %v324_v22  ;;  %v11445_v49 = vsel %vm1033_vm3, %v1034_v43, %v1035_v47  ;;  %v342_v52 = vsel %vm315_vm2, %v339_v42, %v341_v45  ;;  %v347_v57 = vrot.slane %v11455_v54, 1  ;;  %v349_v59 = vrot.slane %v11460_v55, 1  ;;  %v11519_v22 = vld [vmem:[%s11317_s28 + $0xc0] sm:$0xff]  ;;  %v11556_v42 = vld [vmem:[%s11317_s28 + $0xe8] sm:$0xff] }
  0x1b   : > { %10160 = vmatprep.mubr.msk.f32.mxu0 %vm389_vm1, %v326_v24  ;;  %v344_v56 = vsel %vm315_vm2, %v341_v45, %v343_v51  ;;  %v346_v58 = vsel %vm315_vm2, %v343_v51, %v345_v53  ;;  %v351_v63 = vrot.slane %v11471_v60, 1  ;;  %v353_v1 = vrot.slane %v11476_v61, 1  ;;  %v11567_v51 = vld [vmem:[%s11317_s28 + $0xf0] sm:$0xff] }
  0x1c   : > { %10217 = vmatmul.mubr.msk.f32.gmra.mxu1 %vm389_vm1, %v11340_v12  ;;  %v348_v62 = vsel %vm315_vm2, %v345_v53, %v347_v57  ;;  %v350_v0 = vsel %vm315_vm2, %v347_v57, %v349_v59  ;;  %v355_v7 = vrot.slane %v11487_v2, 1  ;;  %v357_v9 = vrot.slane %v11492_v3, 1 }
  0x1d   : > { %10219 = vmatprep.mubr.msk.f32.mxu1 %vm389_vm1, %v11352_v18  ;;  %v352_v4 = vsel %vm315_vm2, %v349_v59, %v351_v63  ;;  %v354_v8 = vsel %vm315_vm2, %v351_v63, %v353_v1  ;;  %v359_v16 = vrot.slane %v11503_v13, 1  ;;  %v361_v19 = vrot.slane %v11508_v14, 1  ;;  %v11583_v59 = vld [vmem:[%s11317_s28 + $0x100] sm:$0xff] }
  0x1e   : > { %10161 = vmatmul.mubr.msk.f32.gmra.mxu0 %vm389_vm1, %v328_v28  ;;  %v356_v15 = vsel %vm315_vm2, %v353_v1, %v355_v7  ;;  %v358_v17 = vsel %vm315_vm2, %v355_v7, %v357_v9  ;;  %v363_v25 = vrot.slane %v11519_v22, 1  ;;  %v365_v29 = vrot.slane %v11524_v23, 1  ;;  %v11599_v7 = vld [vmem:[%s11317_s28 + $0x110] sm:$0xff] }
  0x1f   : > { %10163 = vmatprep.mubr.msk.f32.mxu0 %vm389_vm1, %v330_v30  ;;  %v360_v24 = vsel %vm315_vm2, %v357_v9, %v359_v16  ;;  %v362_v28 = vsel %vm315_vm2, %v359_v16, %v361_v19  ;;  %v11535_v30 = vld [vmem:[%s11317_s28 + $0xd0] sm:$0xff]  ;;  %v369_v37 = vrot.slane %v11540_v31, 1 }
  0x20   : > { %10220 = vmatmul.mubr.msk.f32.gmra.mxu1 %vm389_vm1, %v11358_v20  ;;  %v367_v35 = vrot.slane %v11535_v30, 1 }
  0x21   : > { %10222 = vmatprep.mubr.msk.f32.mxu1 %vm389_vm1, %v11375_v26 }
  0x22   : > { %10164 = vmatmul.mubr.msk.f32.gmra.mxu0 %vm389_vm1, %v332_v34  ;;  %v364_v34 = vsel %vm315_vm2, %v361_v19, %v363_v25  ;;  %v368_v43 = vsel %vm315_vm2, %v365_v29, %v367_v35  ;;  %v370_v45 = vsel %vm315_vm2, %v367_v35, %v369_v37  ;;  %v11615_v19 = vld [vmem:[%s11317_s28 + $0x120] sm:$0xff]  ;;  %v1041_v35 = vrot.slane %v11337_v11, 2 }
  0x23   : > { %10166 = vmatprep.mubr.msk.f32.mxu0 %vm389_vm1, %v334_v36  ;;  %v366_v36 = vsel %vm315_vm2, %v363_v25, %v365_v29  ;;  %v1039_v25 = vrot.slane %v11334_v10, 2  ;;  %v387_v29 = vrot.slane %v11615_v19, 1 }
  0x24   : > { %10223 = vmatmul.mubr.msk.f32.gmra.mxu1 %vm389_vm1, %v11382_v27 }
  0x25   : > { %10225 = vmatprep.mubr.msk.f32.mxu1 %vm389_vm1, %v11393_v32 }
  0x26   : > { %10167 = vmatmul.mubr.msk.f32.gmra.mxu0 %vm389_vm1, %v336_v41  ;;  %v11551_v41 = vld [vmem:[%s11317_s28 + $0xe0] sm:$0xff] }
  0x27   : > { %10169 = vmatprep.mubr.msk.f32.mxu0 %vm389_vm1, %v338_v44  ;;  %v371_v44 = vrot.slane %v11551_v41, 1 }
  0x28   : > { %10226 = vmatmul.mubr.msk.f32.gmra.mxu1 %vm389_vm1, %v11398_v33 }
  0x29   : > { %10228 = vmatprep.mubr.msk.f32.mxu1 %vm389_vm1, %v11409_v38  ;;  %v372_v53 = vsel %vm315_vm2, %v369_v37, %v371_v44  ;;  %v1043_v37 = vrot.slane %v11340_v12, 2 }
  0x2a   : > { %10170 = vmatmul.mubr.msk.f32.gmra.mxu0 %vm389_vm1, %v340_v50  ;;  %v373_v50 = vrot.slane %v11556_v42, 1 }
  0x2b   : > { %10172 = vmatprep.mubr.msk.f32.mxu0 %vm389_vm1, %v342_v52  ;;  %v11572_v52 = vld [vmem:[%s11317_s28 + $0xf8] sm:$0xff] }
  0x2c   : > { %10229 = vmatmul.mubr.msk.f32.gmra.mxu1 %vm389_vm1, %v11414_v39  ;;  %v374_v57 = vsel %vm315_vm2, %v371_v44, %v373_v50  ;;  %v1042_v44 = vsel %vm1033_vm3, %v1039_v25, %v1041_v35 }
  0x2d   : > { %10231 = vmatprep.mubr.msk.f32.mxu1 %vm389_vm1, %v11433_v46 }
  0x2e   : > { %10173 = vmatmul.mubr.msk.f32.gmra.mxu0 %vm389_vm1, %v344_v56  ;;  %v375_v56 = vrot.slane %v11567_v51, 1 }
  0x2f   : > { %10175 = vmatprep.mubr.msk.f32.mxu0 %vm389_vm1, %v346_v58  ;;  %v377_v58 = vrot.slane %v11572_v52, 1 }
  0x30   : > { %10232 = vmatmul.mubr.msk.f32.gmra.mxu1 %vm389_vm1, %v11439_v48  ;;  %v376_v63 = vsel %vm315_vm2, %v373_v50, %v375_v56  ;;  %v1044_v50 = vsel %vm1033_vm3, %v1041_v35, %v1043_v37 }
  0x31   : > { %10234 = vmatprep.mubr.msk.f32.mxu1 %vm389_vm1, %v11455_v54  ;;  %v378_v1 = vsel %vm315_vm2, %v375_v56, %v377_v58 }
  0x32   : > { %10176 = vmatmul.mubr.msk.f32.gmra.mxu0 %vm389_vm1, %v348_v62  ;;  %v11588_v62 = vld [vmem:[%s11317_s28 + $0x108] sm:$0xff] }
  0x33   : > { %10178 = vmatprep.mubr.msk.f32.mxu0 %vm389_vm1, %v350_v0  ;;  %v379_v0 = vrot.slane %v11583_v59, 1 }
  0x34   : > { %10235 = vmatmul.mubr.msk.f32.gmra.mxu1 %vm389_vm1, %v11460_v55 }
  0x35   : > { %10237 = vmatprep.mubr.msk.f32.mxu1 %vm389_vm1, %v11471_v60  ;;  %v380_v9 = vsel %vm315_vm2, %v377_v58, %v379_v0  ;;  %v1049_v58 = vrot.slane %v11375_v26, 2 }
  0x36   : > { %10179 = vmatmul.mubr.msk.f32.gmra.mxu0 %vm389_vm1, %v352_v4  ;;  %v381_v4 = vrot.slane %v11588_v62, 1 }
  0x37   : > { %10181 = vmatprep.mubr.msk.f32.mxu0 %vm389_vm1, %v354_v8  ;;  %v11604_v8 = vld [vmem:[%s11317_s28 + $0x118] sm:$0xff] }
  0x38   : > { %10238 = vmatmul.mubr.msk.f32.gmra.mxu1 %vm389_vm1, %v11476_v61  ;;  %v382_v16 = vsel %vm315_vm2, %v379_v0, %v381_v4 }
  0x39   : > { %10240 = vmatprep.mubr.msk.f32.mxu1 %vm389_vm1, %v11487_v2 }
  0x3a   : > { %10182 = vmatmul.mubr.msk.f32.gmra.mxu0 %vm389_vm1, %v356_v15  ;;  %v383_v15 = vrot.slane %v11599_v7, 1 }
  0x3b   : > { %10184 = vmatprep.mubr.msk.f32.mxu0 %vm389_vm1, %v358_v17  ;;  %v385_v17 = vrot.slane %v11604_v8, 1 }
  0x3c   : > { %10241 = vmatmul.mubr.msk.f32.gmra.mxu1 %vm389_vm1, %v11492_v3 }
  0x3d   : > { %10243 = vmatprep.mubr.msk.f32.mxu1 %vm389_vm1, %v11503_v13 }
  0x3e   : > { %10185 = vmatmul.mubr.msk.f32.gmra.mxu0 %vm389_vm1, %v360_v24  ;;  %v1037_v24 = vrot.slane %v11326_v6, 2 }
  0x3f   : > { %10187 = vmatprep.mubr.msk.f32.mxu0 %vm389_vm1, %v362_v28  ;;  %v384_v28 = vsel %vm315_vm2, %v381_v4, %v383_v15  ;;  %v1057_v4 = vrot.slane %v11409_v38, 2 }
  0x40   : > { %10244 = vmatmul.mubr.msk.f32.gmra.mxu1 %vm389_vm1, %v11508_v14  ;;  %v1038_v56 = vsel %vm1033_vm3, %v1035_v47, %v1037_v24  ;;  %v1051_v47 = vrot.slane %v11382_v27, 2 }
  0x41   : > { %10246 = vmatprep.mubr.msk.f32.mxu1 %vm389_vm1, %v11519_v22 }
  0x42   : > { %10188 = vmatmul.mubr.msk.f32.gmra.mxu0 %vm389_vm1, %v364_v34  ;;  %v386_v34 = vsel %vm315_vm2, %v383_v15, %v385_v17  ;;  %v1052_v0 = vsel %vm1033_vm3, %v1049_v58, %v1051_v47  ;;  %v1059_v15 = vrot.slane %v11414_v39, 2 }
  0x43   : > { %10190 = vmatprep.mubr.msk.f32.mxu0 %vm389_vm1, %v366_v36  ;;  %v1040_v36 = vsel %vm1033_vm3, %v1037_v24, %v1039_v25  ;;  %v1063_v25 = vrot.slane %v11439_v48, 2 }
  0x44   : > { %10247 = vmatmul.mubr.msk.f32.gmra.mxu1 %vm389_vm1, %v11524_v23  ;;  %v1060_v24 = vsel %vm1033_vm3, %v1057_v4, %v1059_v15 }
  0x45   : > { %10249 = vmatprep.mubr.msk.f32.mxu1 %vm389_vm1, %v11535_v30 }
  0x46   : > { %10191 = vmatmul.mubr.msk.f32.gmra.mxu0 %vm389_vm1, %v368_v43  ;;  %v388_v43 = vsel %vm315_vm2, %v385_v17, %v387_v29  ;;  %v1061_v17 = vrot.slane %v11433_v46, 2 }
  0x47   : > { %10193 = vmatprep.mubr.msk.f32.mxu0 %vm389_vm1, %v370_v45  ;;  %v1045_v45 = vrot.slane %v11352_v18, 2 }
  0x48   : > { %10250 = vmatmul.mubr.msk.f32.gmra.mxu1 %vm389_vm1, %v11540_v31  ;;  %v1062_v29 = vsel %vm1033_vm3, %v1059_v15, %v1061_v17  ;;  %v1064_v35 = vsel %vm1033_vm3, %v1061_v17, %v1063_v25 }
  0x49   : > { %10252 = vmatprep.mubr.msk.f32.mxu1 %vm389_vm1, %v11551_v41 }
  0x4a   : > { %10194 = vmatmul.mubr.msk.f32.gmra.mxu0 %vm389_vm1, %v372_v53  ;;  %v1047_v53 = vrot.slane %v11358_v20, 2 }
  0x4b   : > { %10196 = vmatprep.mubr.msk.f32.mxu0 %vm389_vm1, %v374_v57  ;;  %v1046_v57 = vsel %vm1033_vm3, %v1043_v37, %v1045_v45 }
  0x4c   : > { %10253 = vmatmul.mubr.msk.f32.gmra.mxu1 %vm389_vm1, %v11556_v42  ;;  %v1048_v5 = vsel %vm1033_vm3, %v1045_v45, %v1047_v53  ;;  %v1071_v45 = vrot.slane %v11476_v61, 2 }
  0x4d   : > { %10255 = vmatprep.mubr.msk.f32.mxu1 %vm389_vm1, %v11567_v51 }
  0x4e   : > { %10197 = vmatmul.mubr.msk.f32.gmra.mxu0 %vm389_vm1, %v376_v63  ;;  %v11658_v63 = vld [vmem:[%s15541_s2 + $0x18] sm:$0xf] }
  0x4f   : > { %10199 = vmatprep.mubr.msk.f32.mxu0 %vm389_vm1, %v378_v1  ;;  %v1055_v1 = vrot.slane %v11398_v33, 2 }
  0x50   : > { %10256 = vmatmul.mubr.msk.f32.gmra.mxu1 %vm389_vm1, %v11572_v52 }
  0x51   : > { %10258 = vmatprep.mubr.msk.f32.mxu1 %vm389_vm1, %v11583_v59 }
  0x52   : > { %10200 = vmatmul.mubr.msk.f32.gmra.mxu0 %vm389_vm1, %v380_v9 }
  0x53   : > { %10202 = vmatprep.mubr.msk.f32.mxu0 %vm389_vm1, %v382_v16  ;;  %v1058_v16 = vsel %vm1033_vm3, %v1055_v1, %v1057_v4 }
  0x54   : > { %10259 = vmatmul.mubr.msk.f32.gmra.mxu1 %vm389_vm1, %v11588_v62 }
  0x55   : > { %10261 = vmatprep.mubr.msk.f32.mxu1 %vm389_vm1, %v11599_v7 }
  0x56   : > { %10203 = vmatmul.mubr.msk.f32.gmra.mxu0 %vm389_vm1, %v384_v28  ;;  %v11695_v28 = vld [vmem:[%s15541_s2 + $0x1c] sm:$0xf] }
  0x57   : > { %10205 = vmatprep.mubr.msk.f32.mxu0 %vm389_vm1, %v386_v34  ;;  %v1065_v34 = vrot.slane %v11455_v54, 2 }
  0x58   : > { %10262 = vmatmul.mubr.msk.f32.gmra.mxu1 %vm389_vm1, %v11604_v8 }
  0x59   : > { %10322 = vmatprep.mubr.msk.f32.mxu1 %vm389_vm1, %v1040_v36  ;;  %v1066_v37 = vsel %vm1033_vm3, %v1063_v25, %v1065_v34 }
  0x5a   : > { %10206 = vmatmul.mubr.msk.f32.gmra.mxu0 %vm389_vm1, %v388_v43  ;;  %v1069_v43 = vrot.slane %v11471_v60, 2 }
  0x5b   : > { %10266 = vmatprep.mubr.msk.f32.mxu0 %vm389_vm1, %v11445_v49  ;;  %v1053_v49 = vrot.slane %v11393_v32, 2 }
  0x5c   : > { %10323 = vmatmul.mubr.msk.f32.vlgmr.msra.gmra.mxu1 %vm389_vm1, %v1042_v44 }
  0x5d   : > { %10325 = vmatprep.mubr.msk.f32.mxu1 %vm389_vm1, %v1044_v50  ;;  %10433 = vmatpush3.msk.msra.mxu1 %vm462_vm0, %v11420_v40  ;;  %v1050_v40 = vsel %vm1033_vm3, %v1047_v53, %v1049_v58  ;;  %v1056_v9 = vsel %vm1033_vm3, %v1053_v49, %v1055_v1  ;;  %v1073_v53 = vrot.slane %v11487_v2, 2 }
  0x5e   : > { %10267 = vmatmul.mubr.msk.f32.vlgmr.msra.gmra.mxu0 %vm389_vm1, %v1038_v56  ;;  %10544 = vmatprep.subr.msk.mxu1 %vm462_vm0, %v11695_v28  ;;  %v1072_v56 = vsel %vm1033_vm3, %v1069_v43, %v1071_v45 }
  0x5f   : > { %10377 = vmatpush3.msk.msra.mxu0 %vm462_vm0, %v11363_v21  ;;  %10269 = vmatprep.mubr.msk.f32.mxu0 %vm389_vm1, %v1040_v36  ;;  %v1054_v21 = vsel %vm1033_vm3, %v1051_v47, %v1053_v49  ;;  %v1067_v36 = vrot.slane %v11460_v55, 2  ;;  %v1074_v58 = vsel %vm1033_vm3, %v1071_v45, %v1073_v53 }
  0x60   : > { %10326 = vmatmul.mubr.msk.f32.gmra.mxu1 %vm389_vm1, %v1046_v57  ;;  %10488 = vmatprep.subr.msk.mxu0 %vm462_vm0, %v11658_v63 }
  0x61   : > { %10328 = vmatprep.mubr.msk.f32.mxu1 %vm389_vm1, %v1048_v5 }
  0x62   : > { %10270 = vmatmul.mubr.msk.f32.gmra.mxu0 %vm389_vm1, %v1042_v44  ;;  %v1068_v44 = vsel %vm1033_vm3, %v1065_v34, %v1067_v36 }
  0x63   : > { %10272 = vmatprep.mubr.msk.f32.mxu0 %vm389_vm1, %v1044_v50  ;;  %v1070_v50 = vsel %vm1033_vm3, %v1067_v36, %v1069_v43 }
  0x64   : > { %10329 = vmatmul.mubr.msk.f32.gmra.mxu1 %vm389_vm1, %v1050_v40 }
  0x65   : > { %10331 = vmatprep.mubr.msk.f32.mxu1 %vm389_vm1, %v1052_v0 }
  0x66   : > { %10273 = vmatmul.mubr.msk.f32.gmra.mxu0 %vm389_vm1, %v1046_v57  ;;  %v1075_v57 = vrot.slane %v11492_v3, 2 }
  0x67   : > { %10275 = vmatprep.mubr.msk.f32.mxu0 %vm389_vm1, %v1048_v5  ;;  %v1077_v5 = vrot.slane %v11503_v13, 2 }
  0x68   : > { %10332 = vmatmul.mubr.msk.f32.gmra.mxu1 %vm389_vm1, %v1054_v21  ;;  %v1076_v47 = vsel %vm1033_vm3, %v1073_v53, %v1075_v57 }
  0x69   : > { %10334 = vmatprep.mubr.msk.f32.mxu1 %vm389_vm1, %v1056_v9  ;;  %v1078_v49 = vsel %vm1033_vm3, %v1075_v57, %v1077_v5 }
  0x6a   : > { %10276 = vmatmul.mubr.msk.f32.gmra.mxu0 %vm389_vm1, %v1050_v40  ;;  %v1079_v40 = vrot.slane %v11508_v14, 2 }
  0x6b   : > { %10278 = vmatprep.mubr.msk.f32.mxu0 %vm389_vm1, %v1052_v0  ;;  %v1081_v0 = vrot.slane %v11519_v22, 2 }
  0x6c   : > { %10335 = vmatmul.mubr.msk.f32.gmra.mxu1 %vm389_vm1, %v1058_v16  ;;  %v1080_v1 = vsel %vm1033_vm3, %v1077_v5, %v1079_v40  ;;  %v11780_v5 = vld [vmem:[%s11317_s28 + $0x128] sm:$0xff] }
  0x6d   : > { %10337 = vmatprep.mubr.msk.f32.mxu1 %vm389_vm1, %v1060_v24  ;;  %v1082_v4 = vsel %vm1033_vm3, %v1079_v40, %v1081_v0  ;;  %v1105_v40 = vrot.slane %v11615_v19, 2 }
  0x6e   : > { %10279 = vmatmul.mubr.msk.f32.gmra.mxu0 %vm389_vm1, %v1054_v21  ;;  %v1083_v21 = vrot.slane %v11524_v23, 2 }
  0x6f   : > { %10281 = vmatprep.mubr.msk.f32.mxu0 %vm389_vm1, %v1056_v9  ;;  %v1085_v9 = vrot.slane %v11535_v30, 2 }
  0x70   : > { %10338 = vmatmul.mubr.msk.f32.gmra.mxu1 %vm389_vm1, %v1062_v29  ;;  %v1084_v15 = vsel %vm1033_vm3, %v1081_v0, %v1083_v21  ;;  %v1467_v0 = vrot.slane %v11780_v5, 2 }
  0x71   : > { %10340 = vmatprep.mubr.msk.f32.mxu1 %vm389_vm1, %v1064_v35  ;;  %v1086_v17 = vsel %vm1033_vm3, %v1083_v21, %v1085_v9 }
  0x72   : > { %10282 = vmatmul.mubr.msk.f32.gmra.mxu0 %vm389_vm1, %v1058_v16  ;;  %v1087_v16 = vrot.slane %v11540_v31, 2 }
  0x73   : > { %10284 = vmatprep.mubr.msk.f32.mxu0 %vm389_vm1, %v1060_v24  ;;  %v1089_v24 = vrot.slane %v11551_v41, 2 }
  0x74   : > { %10341 = vmatmul.mubr.msk.f32.gmra.mxu1 %vm389_vm1, %v1066_v37  ;;  %v1088_v25 = vsel %vm1033_vm3, %v1085_v9, %v1087_v16  ;;  %v1468_v9 = vsel %vm1033_vm3, %v1105_v40, %v1467_v0 }
  0x75   : > { %10343 = vmatprep.mubr.msk.f32.mxu1 %vm389_vm1, %v1068_v44  ;;  %v1090_v34 = vsel %vm1033_vm3, %v1087_v16, %v1089_v24  ;;  %v2194_v16 = vrot.slane %v11334_v10, 4 }
  0x76   : > { %10285 = vmatmul.mubr.msk.f32.gmra.mxu0 %vm389_vm1, %v1062_v29  ;;  %v1091_v29 = vrot.slane %v11556_v42, 2 }
  0x77   : > { %10287 = vmatprep.mubr.msk.f32.mxu0 %vm389_vm1, %v1064_v35  ;;  %v1093_v35 = vrot.slane %v11567_v51, 2 }
  0x78   : > { %10344 = vmatmul.mubr.msk.f32.gmra.mxu1 %vm389_vm1, %v1070_v50  ;;  %v1092_v36 = vsel %vm1033_vm3, %v1089_v24, %v1091_v29  ;;  %v1763_v24 = vrot.slane %v11334_v10, 3  ;;  %v1767_v10 = vrot.slane %v11340_v12, 3 }
  0x79   : > { %10346 = vmatprep.mubr.msk.f32.mxu1 %vm389_vm1, %v1072_v56  ;;  %v1094_v43 = vsel %vm1033_vm3, %v1091_v29, %v1093_v35  ;;  %v2196_v29 = vrot.slane %v11337_v11, 4 }
  0x7a   : > { %10288 = vmatmul.mubr.msk.f32.gmra.mxu0 %vm389_vm1, %v1066_v37  ;;  %v1095_v37 = vrot.slane %v11572_v52, 2 }
  0x7b   : > { %10290 = vmatprep.mubr.msk.f32.mxu0 %vm389_vm1, %v1068_v44  ;;  %v1097_v44 = vrot.slane %v11583_v59, 2 }
  0x7c   : > { %10347 = vmatmul.mubr.msk.f32.gmra.mxu1 %vm389_vm1, %v1074_v58  ;;  %v1096_v45 = vsel %vm1033_vm3, %v1093_v35, %v1095_v37  ;;  %v2198_v35 = vrot.slane %v11340_v12, 4 }
  0x7d   : > { %10349 = vmatprep.mubr.msk.f32.mxu1 %vm389_vm1, %v1076_v47  ;;  %v1098_v53 = vsel %vm1033_vm3, %v1095_v37, %v1097_v44  ;;  %v2197_v37 = vsel %vm462_vm0, %v2194_v16, %v2196_v29 }
  0x7e   : > { %10291 = vmatmul.mubr.msk.f32.gmra.mxu0 %vm389_vm1, %v1070_v50  ;;  %v1099_v50 = vrot.slane %v11588_v62, 2 }
  0x7f   : > { %10293 = vmatprep.mubr.msk.f32.mxu0 %vm389_vm1, %v1072_v56  ;;  %v1101_v56 = vrot.slane %v11599_v7, 2 }
  0x80   : > { %10350 = vmatmul.mubr.msk.f32.gmra.mxu1 %vm389_vm1, %v1078_v49  ;;  %v1100_v57 = vsel %vm1033_vm3, %v1097_v44, %v1099_v50  ;;  %v11821_v44 = vsel %vm462_vm0, %v2196_v29, %v2198_v35 }
  0x81   : > { %10352 = vmatprep.mubr.msk.f32.mxu1 %vm389_vm1, %v1080_v1 }
  0x82   : > { %10294 = vmatmul.mubr.msk.f32.gmra.mxu0 %vm389_vm1, %v1074_v58  ;;  %v1103_v58 = vrot.slane %v11604_v8, 2 }
  0x83   : > { %10296 = vmatprep.mubr.msk.f32.mxu0 %vm389_vm1, %v1076_v47  ;;  %v1102_v47 = vsel %vm1033_vm3, %v1099_v50, %v1101_v56  ;;  %v1769_v50 = vrot.slane %v11352_v18, 3 }
  0x84   : > { %10353 = vmatmul.mubr.msk.f32.gmra.mxu1 %vm389_vm1, %v1082_v4  ;;  %v1106_v21 = vsel %vm1033_vm3, %v1103_v58, %v1105_v40 }
  0x85   : > { %10355 = vmatprep.mubr.msk.f32.mxu1 %vm389_vm1, %v1084_v15 }
  0x86   : > { %10297 = vmatmul.mubr.msk.f32.gmra.mxu0 %vm389_vm1, %v1078_v49  ;;  %v1104_v49 = vsel %vm1033_vm3, %v1101_v56, %v1103_v58  ;;  %v2206_v58 = vrot.slane %v11382_v27, 4 }
  0x87   : > { %10299 = vmatprep.mubr.msk.f32.mxu0 %vm389_vm1, %v1080_v1  ;;  %v11790_v1 = vld [vmem:[%s11317_s28 + $0x130] sm:$0xff] }
  0x88   : > { %10356 = vmatmul.mubr.msk.f32.gmra.mxu1 %vm389_vm1, %v1086_v17 }
  0x89   : > { %10358 = vmatprep.mubr.msk.f32.mxu1 %vm389_vm1, %v1088_v25 }
  0x8a   : > { %10300 = vmatmul.mubr.msk.f32.gmra.mxu0 %vm389_vm1, %v1082_v4  ;;  %v1469_v4 = vrot.slane %v11790_v1, 2 }
  0x8b   : > { %10302 = vmatprep.mubr.msk.f32.mxu0 %vm389_vm1, %v1084_v15  ;;  %v2193_v15 = vrot.slane %v11326_v6, 4 }
  0x8c   : > { %10359 = vmatmul.mubr.msk.f32.gmra.mxu1 %vm389_vm1, %v1090_v34 }
  0x8d   : > { %10361 = vmatprep.mubr.msk.f32.mxu1 %vm389_vm1, %v1092_v36 }
  0x8e   : > { %10303 = vmatmul.mubr.msk.f32.gmra.mxu0 %vm389_vm1, %v1086_v17  ;;  %v1762_v17 = vrot.slane %v11326_v6, 3 }
  0x8f   : > { %10305 = vmatprep.mubr.msk.f32.mxu0 %vm389_vm1, %v1088_v25  ;;  %v1470_v25 = vsel %vm1033_vm3, %v1467_v0, %v1469_v4  ;;  %v2208_v0 = vrot.slane %v11393_v32, 4  ;;  %v1777_v4 = vrot.slane %v11393_v32, 3  ;;  %v2214_v32 = vrot.slane %v11414_v39, 4 }
  0x90   : > { %10362 = vmatmul.mubr.msk.f32.gmra.mxu1 %vm389_vm1, %v1094_v43  ;;  %v1764_v6 = vsel %vm1761_vm4, %v1762_v17, %v1763_v24  ;;  %v2212_v17 = vrot.slane %v11409_v38, 4 }
  0x91   : > { %10364 = vmatprep.mubr.msk.f32.mxu1 %vm389_vm1, %v1096_v45 }
  0x92   : > { %10306 = vmatmul.mubr.msk.f32.gmra.mxu0 %vm389_vm1, %v1090_v34  ;;  %v2195_v34 = vsel %vm462_vm0, %v2193_v15, %v2194_v16  ;;  %v1779_v15 = vrot.slane %v11398_v33, 3  ;;  %v11880_v16 = vsel %vm462_vm0, %v2206_v58, %v2208_v0 }
  0x93   : > { %10308 = vmatprep.mubr.msk.f32.mxu0 %vm389_vm1, %v1092_v36  ;;  %v1765_v36 = vrot.slane %v11337_v11, 3 }
  0x94   : > { %10365 = vmatmul.mubr.msk.f32.gmra.mxu1 %vm389_vm1, %v1098_v53  ;;  %v1780_v29 = vsel %vm1761_vm4, %v1777_v4, %v1779_v15 }
  0x95   : > { %10367 = vmatprep.mubr.msk.f32.mxu1 %vm389_vm1, %v1100_v57  ;;  %v1766_v11 = vsel %vm1761_vm4, %v1763_v24, %v1765_v36  ;;  %v1768_v12 = vsel %vm1761_vm4, %v1765_v36, %v1767_v10  ;;  %v2216_v36 = vrot.slane %v11433_v46, 4 }
  0x96   : > { %10309 = vmatmul.mubr.msk.f32.gmra.mxu0 %vm389_vm1, %v1094_v43  ;;  %v2200_v43 = vrot.slane %v11352_v18, 4  ;;  %v11841_v18 = vld [vmem:[%s15541_s2 + $0x20] sm:$0xf] }
  0x97   : > { %10311 = vmatprep.mubr.msk.f32.mxu0 %vm389_vm1, %v1096_v45  ;;  %v2202_v45 = vrot.slane %v11358_v20, 4 }
  0x98   : > { %10368 = vmatmul.mubr.msk.f32.gmra.mxu1 %vm389_vm1, %v1102_v47  ;;  %v11833_v56 = vsel %vm462_vm0, %v2198_v35, %v2200_v43 }
  0x99   : > { %10370 = vmatprep.mubr.msk.f32.mxu1 %vm389_vm1, %v1104_v49 }
  0x9a   : > { %10312 = vmatmul.mubr.msk.f32.gmra.mxu0 %vm389_vm1, %v1098_v53  ;;  %v1771_v53 = vrot.slane %v11358_v20, 3  ;;  %v11845_v20 = vsel %vm462_vm0, %v2200_v43, %v2202_v45  ;;  %v1787_v43 = vrot.slane %v11439_v48, 3 }
  0x9b   : > { %10314 = vmatprep.mubr.msk.f32.mxu0 %vm389_vm1, %v1100_v57  ;;  %v2204_v57 = vrot.slane %v11375_v26, 4 }
  0x9c   : > { %10371 = vmatmul.mubr.msk.f32.gmra.mxu1 %vm389_vm1, %v1106_v21  ;;  %v1772_v40 = vsel %vm1761_vm4, %v1769_v50, %v1771_v53 }
  0x9d   : > { %10373 = vmatprep.mubr.msk.f32.mxu1 %vm389_vm1, %v1468_v9 }
  0x9e   : > { %10315 = vmatmul.mubr.msk.f32.gmra.mxu0 %vm389_vm1, %v1102_v47  ;;  %v1770_v47 = vsel %vm1761_vm4, %v1767_v10, %v1769_v50 }
  0x9f   : > { %10317 = vmatprep.mubr.msk.f32.mxu0 %vm389_vm1, %v1104_v49  ;;  %v1775_v49 = vrot.slane %v11382_v27, 3 }
  0xa0   : > { %10374 = vmatmul.mubr.msk.f32.gmra.mxu1 %vm389_vm1, %v1470_v25 }
  0xa1   : > { %10434 = vmatprep.mubr.msk.f32.mxu1 %vm389_vm1, %v2195_v34  ;;  %v1778_v25 = vsel %vm1761_vm4, %v1775_v49, %v1777_v4  ;;  %v1783_v34 = vrot.slane %v11414_v39, 3  ;;  %v1785_v39 = vrot.slane %v11433_v46, 3  ;;  %v2222_v46 = vrot.slane %v11460_v55, 4  ;;  %v200_v4 = vld [vmem:[%s15540_s1 + $0x10] sm:$0xff] }
  0xa2   : > { %10318 = vmatmul.mubr.msk.f32.gmra.mxu0 %vm389_vm1, %v1106_v21  ;;  %v2210_v21 = vrot.slane %v11398_v33, 4  ;;  %v1781_v33 = vrot.slane %v11409_v38, 3  ;;  %v2218_v38 = vrot.slane %v11439_v48, 4  ;;  %v1789_v48 = vrot.slane %v11455_v54, 3 }
  0xa3   : > { %10378 = vmatprep.mubr.msk.f32.mxu0 %vm389_vm1, %v1764_v6  ;;  %v11903_v6 = vsel %vm462_vm0, %v2212_v17, %v2214_v32 }
  0xa4   : > { %10435 = vmatmul.mubr.msk.f32.vlgmr.msra.gmra.mxu1 %vm389_vm1, %v2197_v37  ;;  %v11885_v24 = vsel %vm462_vm0, %v2208_v0, %v2210_v21  ;;  %v11898_v35 = vsel %vm462_vm0, %v2210_v21, %v2212_v17  ;;  %v1782_v10 = vsel %vm1761_vm4, %v1779_v15, %v1781_v33  ;;  %v1784_v37 = vsel %vm1761_vm4, %v1781_v33, %v1783_v34 }
  0xa5   : > { %10437 = vmatprep.mubr.msk.f32.mxu1 %vm389_vm1, %v11821_v44  ;;  %10545 = vmatpush3.msk.msra.mxu1 %vm462_vm0, %v11695_v28  ;;  %v1773_v28 = vrot.slane %v11375_v26, 3  ;;  %v11867_v26 = vsel %vm462_vm0, %v2204_v57, %v2206_v58  ;;  %v11921_v50 = vsel %vm462_vm0, %v2216_v36, %v2218_v38  ;;  %v11258_v58 = vmov 0  }
  0xa6   : > { %10379 = vmatmul.mubr.msk.f32.vlgmr.msra.gmra.mxu0 %vm389_vm1, %v1766_v11  ;;  %v2220_v11 = vrot.slane %v11455_v54, 4  ;;  %11172 = vset.pattern.permute.xlu0 %v11258_v58  ;;  %v2224_v54 = vrot.slane %v11471_v60, 4  ;;  %v1793_v0 = vrot.slane %v11471_v60, 3  ;;  %v2228_v15 = vrot.slane %v11487_v2, 4 }
  0xa7   : > { %10489 = vmatpush3.msk.msra.mxu0 %vm462_vm0, %v11658_v63  ;;  %10381 = vmatprep.mubr.msk.f32.mxu0 %vm389_vm1, %v1768_v12  ;;  %v11862_v63 = vsel %vm462_vm0, %v2202_v45, %v2204_v57  ;;  %v1774_v27 = vsel %vm1761_vm4, %v1771_v53, %v1773_v28  ;;  %v1776_v9 = vsel %vm1761_vm4, %v1773_v28, %v1775_v49  ;;  %v1791_v57 = vrot.slane %v11460_v55, 3 }
  0xa8   : > { %10438 = vmatmul.mubr.msk.f32.gmra.mxu1 %vm389_vm1, %v11833_v56  ;;  %10600 = vmatprep.subr.msk.mxu0 %vm462_vm0, %v11841_v18  ;;  %v11916_v45 = vsel %vm462_vm0, %v2214_v32, %v2216_v36  ;;  %v1786_v12 = vsel %vm1761_vm4, %v1783_v34, %v1785_v39  ;;  %v1788_v53 = vsel %vm1761_vm4, %v1785_v39, %v1787_v43  ;;  %v2226_v55 = vrot.slane %v11476_v61, 4  ;;  %v201_v34 = vld [vmem:[%s15540_s1 + $0x18] sm:$0xff]  ;;  %v202_v36 = vld [vmem:[%s15540_s1 + $0x20] sm:$0xff] }
  0xa9   : > { %10440 = vmatprep.mubr.msk.f32.mxu1 %vm389_vm1, %v11845_v20  ;;  %v11937_v28 = vsel %vm462_vm0, %v2218_v38, %v2220_v11  ;;  %11173 = vset.pattern.permute.xlu1 %v11258_v58  ;;  %v1790_v49 = vsel %vm1761_vm4, %v1787_v43, %v1789_v48  ;;  %v1792_v21 = vsel %vm1761_vm4, %v1789_v48, %v1791_v57  ;;  %v2230_v17 = vrot.slane %v11492_v3, 4 }
  0xaa   : > { %10382 = vmatmul.mubr.msk.f32.gmra.mxu0 %vm389_vm1, %v1770_v47  ;;  %v198_v47 = vld [vmem:[%s15540_s1] sm:$0xff]  ;;  %v11961_v60 = vsel %vm462_vm0, %v2222_v46, %v2224_v54  ;;  %3794 = vperm.xlu1 %11173, %v200_v4   ;;  %v1794_v32 = vsel %vm1761_vm4, %v1791_v57, %v1793_v0  ;;  %v2232_v38 = vrot.slane %v11503_v13, 4  ;;  %v2236_v48 = vrot.slane %v11519_v22, 4 }
  0xab   : > { %10384 = vmatprep.mubr.msk.f32.mxu0 %vm389_vm1, %v1772_v40  ;;  %3784 = vperm.xlu0 %11172, %v198_v47   ;;  %v11942_v40 = vsel %vm462_vm0, %v2220_v11, %v2222_v46  ;;  %v1803_v11 = vrot.slane %v11508_v14, 3  ;;  %v203_v46 = vld [vmem:[%s15540_s1 + $0x28] sm:$0xff]  ;;  %v1805_v58 = vrot.slane %v11519_v22, 3  ;;  %v1809_v4 = vrot.slane %v11535_v30, 3 }
  0xac   : > { %10441 = vmatmul.mubr.msk.f32.gmra.mxu1 %vm389_vm1, %v11862_v63 }
  0xad   : > { %10443 = vmatprep.mubr.msk.f32.mxu1 %vm389_vm1, %v11867_v26 }
  0xae   : > { %10385 = vmatmul.mubr.msk.f32.gmra.mxu0 %vm389_vm1, %v1774_v27  ;;  %v1795_v27 = vrot.slane %v11476_v61, 3  ;;  %v11966_v61 = vsel %vm462_vm0, %v2224_v54, %v2226_v55  ;;  %3799 = vperm.xlu1 %11173, %v201_v34   ;;  %v1807_v54 = vrot.slane %v11524_v23, 3  ;;  %v1813_v34 = vrot.slane %v11551_v41, 3 }
  0xaf   : > { %10387 = vmatprep.mubr.msk.f32.mxu0 %vm389_vm1, %v1776_v9  ;;  %v199_v9 = vld [vmem:[%s15540_s1 + $0x8] sm:$0xff] }
  0xb0   : > { %10444 = vmatmul.mubr.msk.f32.gmra.mxu1 %vm389_vm1, %v11880_v16  ;;  %3789 = vperm.xlu0 %11172, %v199_v9   ;;  %v1796_v33 = vsel %vm1761_vm4, %v1793_v0, %v1795_v27  ;;  %v2240_v0 = vrot.slane %v11535_v30, 4  ;;  %v1808_v9 = vsel %vm1761_vm4, %v1805_v58, %v1807_v54 }
  0xb1   : > { %10446 = vmatprep.mubr.msk.f32.mxu1 %vm389_vm1, %v11885_v24 }
  0xb2   : > { %10388 = vmatmul.mubr.msk.f32.gmra.mxu0 %vm389_vm1, %v1778_v25  ;;  %v1797_v25 = vrot.slane %v11487_v2, 3  ;;  %v11985_v2 = vsel %vm462_vm0, %v2226_v55, %v2228_v15  ;;  %3809 = vperm.xlu1 %11173, %v203_v46   ;;  %v205_v55 = vld [vmem:[%s15540_s1 + $0x38] sm:$0xff] }
  0xb3   : > { %10390 = vmatprep.mubr.msk.f32.mxu0 %vm389_vm1, %v1780_v29  ;;  %v1799_v29 = vrot.slane %v11492_v3, 3  ;;  %v11990_v3 = vsel %vm462_vm0, %v2228_v15, %v2230_v17  ;;  %v1811_v15 = vrot.slane %v11540_v31, 3 }
  0xb4   : > { %10447 = vmatmul.mubr.msk.f32.gmra.mxu1 %vm389_vm1, %v11898_v35  ;;  %3804 = vperm.xlu0 %11172, %v202_v36   ;;  %v1798_v39 = vsel %vm1761_vm4, %v1795_v27, %v1797_v25  ;;  %v1806_v27 = vsel %vm1761_vm4, %v1803_v11, %v1805_v58  ;;  %v212_v58 = vld [vmem:[%s15540_s1 + $0x70] sm:$0xff] }
  0xb5   : > { %10449 = vmatprep.mubr.msk.f32.mxu1 %vm389_vm1, %v11903_v6  ;;  %v1800_v43 = vsel %vm1761_vm4, %v1797_v25, %v1799_v29  ;;  %v2244_v25 = vrot.slane %v11551_v41, 4  ;;  %v1812_v36 = vsel %vm1761_vm4, %v1809_v4, %v1811_v15  ;;  %v1814_v46 = vsel %vm1761_vm4, %v1811_v15, %v1813_v34 }
  0xb6   : > { %10391 = vmatmul.mubr.msk.f32.gmra.mxu0 %vm389_vm1, %v1782_v10  ;;  %v2234_v10 = vrot.slane %v11508_v14, 4  ;;  %3819 = vperm.xlu1 %11173, %v205_v55  }
  0xb7   : > { %10393 = vmatprep.mubr.msk.f32.mxu0 %vm389_vm1, %v1784_v37  ;;  %v1801_v37 = vrot.slane %v11503_v13, 3  ;;  %v12009_v13 = vsel %vm462_vm0, %v2230_v17, %v2232_v38  ;;  %v207_v17 = vld [vmem:[%s15540_s1 + $0x48] sm:$0xff] }
  0xb8   : > { %10450 = vmatmul.mubr.msk.f32.gmra.mxu1 %vm389_vm1, %v11916_v45  ;;  %v12014_v14 = vsel %vm462_vm0, %v2232_v38, %v2234_v10  ;;  %v12033_v22 = vsel %vm462_vm0, %v2234_v10, %v2236_v48  ;;  %v1815_v38 = vrot.slane %v11556_v42, 3  ;;  %v209_v10 = vld [vmem:[%s15540_s1 + $0x58] sm:$0xff] }
  0xb9   : > { %10452 = vmatprep.mubr.msk.f32.mxu1 %vm389_vm1, %v11921_v50  ;;  %v1802_v57 = vsel %vm1761_vm4, %v1799_v29, %v1801_v37  ;;  %v1804_v47 = vsel %vm1761_vm4, %v1801_v37, %v1803_v11  ;;  %v1810_v29 = vsel %vm1761_vm4, %v1807_v54, %v1809_v4  ;;  %v2248_v37 = vrot.slane %v11567_v51, 4 }
  0xba   : > { %10394 = vmatmul.mubr.msk.f32.gmra.mxu0 %vm389_vm1, %v1786_v12  ;;  %v204_v12 = vld [vmem:[%s15540_s1 + $0x30] sm:$0xff]  ;;  %3829 = vperm.xlu1 %11173, %v207_v17   ;;  %v2252_v54 = vrot.slane %v11583_v59, 4  ;;  %v1823_v17 = vrot.slane %v11588_v62, 3 }
  0xbb   : > { %10396 = vmatprep.mubr.msk.f32.mxu0 %vm389_vm1, %v1788_v53  ;;  %v2238_v53 = vrot.slane %v11524_v23, 4  ;;  %3814 = vperm.xlu0 %11172, %v204_v12   ;;  %v1817_v12 = vrot.slane %v11567_v51, 3 }
  0xbc   : > { %10453 = vmatmul.mubr.msk.f32.gmra.mxu1 %vm389_vm1, %v11937_v28 }
  0xbd   : > { %10455 = vmatprep.mubr.msk.f32.mxu1 %vm389_vm1, %v11942_v40  ;;  %v12038_v23 = vsel %vm462_vm0, %v2236_v48, %v2238_v53  ;;  %v12057_v30 = vsel %vm462_vm0, %v2238_v53, %v2240_v0  ;;  %v1816_v48 = vsel %vm1761_vm4, %v1813_v34, %v1815_v38  ;;  %v1819_v53 = vrot.slane %v11572_v52, 3 }
  0xbe   : > { %10397 = vmatmul.mubr.msk.f32.gmra.mxu0 %vm389_vm1, %v1790_v49  ;;  %v206_v49 = vld [vmem:[%s15540_s1 + $0x40] sm:$0xff]  ;;  %3839 = vperm.xlu1 %11173, %v209_v10  }
  0xbf   : > { %10399 = vmatprep.mubr.msk.f32.mxu0 %vm389_vm1, %v1792_v21  ;;  %v2242_v21 = vrot.slane %v11540_v31, 4  ;;  %3824 = vperm.xlu0 %11172, %v206_v49   ;;  %v2254_v49 = vrot.slane %v11588_v62, 4  ;;  %v1820_v15 = vsel %vm1761_vm4, %v1817_v12, %v1819_v53 }
  0xc0   : > { %10456 = vmatmul.mubr.msk.f32.gmra.mxu1 %vm389_vm1, %v11961_v60 }
  0xc1   : > { %10458 = vmatprep.mubr.msk.f32.mxu1 %vm389_vm1, %v11966_v61  ;;  %v12062_v31 = vsel %vm462_vm0, %v2240_v0, %v2242_v21  ;;  %v12081_v41 = vsel %vm462_vm0, %v2242_v21, %v2244_v25  ;;  %v1818_v21 = vsel %vm1761_vm4, %v1815_v38, %v1817_v12  ;;  %v2258_v38 = vrot.slane %v11604_v8, 4 }
  0xc2   : > { %10400 = vmatmul.mubr.msk.f32.gmra.mxu0 %vm389_vm1, %v1794_v32  ;;  %v208_v32 = vld [vmem:[%s15540_s1 + $0x50] sm:$0xff]  ;;  %v1827_v12 = vrot.slane %v11604_v8, 3 }
  0xc3   : > { %10402 = vmatprep.mubr.msk.f32.mxu0 %vm389_vm1, %v1796_v33  ;;  %v2246_v33 = vrot.slane %v11556_v42, 4  ;;  %3834 = vperm.xlu0 %11172, %v208_v32   ;;  %v213_v32 = vld [vmem:[%s15540_s1 + $0x78] sm:$0xff] }
  0xc4   : > { %10459 = vmatmul.mubr.msk.f32.gmra.mxu1 %vm389_vm1, %v11985_v2 }
  0xc5   : > { %10461 = vmatprep.mubr.msk.f32.mxu1 %vm389_vm1, %v11990_v3  ;;  %v12086_v42 = vsel %vm462_vm0, %v2244_v25, %v2246_v33  ;;  %v12105_v51 = vsel %vm462_vm0, %v2246_v33, %v2248_v37  ;;  %v214_v25 = vld [vmem:[%s15540_s1 + $0x80] sm:$0xff] }
  0xc6   : > { %10403 = vmatmul.mubr.msk.f32.gmra.mxu0 %vm389_vm1, %v1798_v39  ;;  %v210_v39 = vld [vmem:[%s15540_s1 + $0x60] sm:$0xff] }
  0xc7   : > { %10405 = vmatprep.mubr.msk.f32.mxu0 %vm389_vm1, %v1800_v43  ;;  %v2250_v43 = vrot.slane %v11572_v52, 4  ;;  %3844 = vperm.xlu0 %11172, %v210_v39  }
  0xc8   : > { %10462 = vmatmul.mubr.msk.f32.gmra.mxu1 %vm389_vm1, %v12009_v13 }
  0xc9   : > { %10464 = vmatprep.mubr.msk.f32.mxu1 %vm389_vm1, %v12014_v14  ;;  %v12110_v52 = vsel %vm462_vm0, %v2248_v37, %v2250_v43  ;;  %v1825_v37 = vrot.slane %v11599_v7, 3 }
  0xca   : > { %10406 = vmatmul.mubr.msk.f32.gmra.mxu0 %vm389_vm1, %v1802_v57  ;;  %v211_v57 = vld [vmem:[%s15540_s1 + $0x68] sm:$0xff] }
  0xcb   : > { %10408 = vmatprep.mubr.msk.f32.mxu0 %vm389_vm1, %v1804_v47  ;;  %3849 = vperm.xlu1 %11173, %v211_v57   ;;  %v216_v57 = vld [vmem:[%s15540_s1 + $0x90] sm:$0xff] }
  0xcc   : > { %10465 = vmatmul.mubr.msk.f32.gmra.mxu1 %vm389_vm1, %v12033_v22  ;;  %3854 = vperm.xlu0 %11172, %v212_v58   ;;  %v2260_v58 = vrot.slane %v11615_v19, 4 }
  0xcd   : > { %10467 = vmatprep.mubr.msk.f32.mxu1 %vm389_vm1, %v12038_v23 }
  0xce   : > { %10409 = vmatmul.mubr.msk.f32.gmra.mxu0 %vm389_vm1, %v1806_v27  ;;  %v1821_v27 = vrot.slane %v11583_v59, 3  ;;  %v12133_v59 = vsel %vm462_vm0, %v2250_v43, %v2252_v54 }
  0xcf   : > { %10411 = vmatprep.mubr.msk.f32.mxu0 %vm389_vm1, %v1808_v9  ;;  %3859 = vperm.xlu1 %11173, %v213_v32   ;;  %v1831_v32 = vrot.slane %v11780_v5, 3 }
  0xd0   : > { %10468 = vmatmul.mubr.msk.f32.gmra.mxu1 %vm389_vm1, %v12057_v30  ;;  %3864 = vperm.xlu0 %11172, %v214_v25   ;;  %v1822_v39 = vsel %vm1761_vm4, %v1819_v53, %v1821_v27  ;;  %v217_v25 = vld [vmem:[%s15540_s1 + $0x98] sm:$0xff] }
  0xd1   : > { %10470 = vmatprep.mubr.msk.f32.mxu1 %vm389_vm1, %v12062_v31 }
  0xd2   : > { %10412 = vmatmul.mubr.msk.f32.gmra.mxu0 %vm389_vm1, %v1810_v29  ;;  %v2256_v29 = vrot.slane %v11599_v7, 4 }
  0xd3   : > { %10414 = vmatprep.mubr.msk.f32.mxu0 %vm389_vm1, %v1812_v36  ;;  %v10212_v11 = vpop.f32.mrf.mxu1  ;;  %v12138_v36 = vsel %vm462_vm0, %v2252_v54, %v2254_v49 }
  0xd4   : > { %10471 = vmatmul.mubr.msk.f32.gmra.mxu1 %vm389_vm1, %v12081_v41  ;;  %v12161_v7 = vsel %vm462_vm0, %v2254_v49, %v2256_v29  ;;  %v12166_v54 = vsel %vm462_vm0, %v2256_v29, %v2258_v38  ;;  %3874 = vperm.xlu0 %11172, %v216_v57   ;;  %v1826_v49 = vsel %vm1761_vm4, %v1823_v17, %v1825_v37  ;;  %v1833_v57 = vrot.slane %v11790_v1, 3 }
  0xd5   : > { %v852_v47 = vpop.f32.mrf.mxu1  ;;  %10473 = vmatprep.mubr.msk.f32.mxu1 %vm389_vm1, %v12086_v42  ;;  %v12189_v29 = vsel %vm462_vm0, %v2258_v38, %v2260_v58 }
  0xd6   : > { %v10156_v55 = vpop.f32.mrf.mxu0  ;;  %10415 = vmatmul.mubr.msk.f32.gmra.mxu0 %vm389_vm1, %v1814_v46  ;;  %v1824_v46 = vsel %vm1761_vm4, %v1821_v27, %v1823_v17  ;;  %v1829_v27 = vrot.slane %v11615_v19, 3  ;;  %v218_v17 = vld [vmem:[%s15540_s1 + $0xa0] sm:$0xff] }
  0xd7   : > { %v12113_v0 = vadd.f32 %v10212_v11, %v10156_v55  ;;  %10417 = vmatprep.mubr.msk.f32.mxu0 %vm389_vm1, %v1816_v48  ;;  %v215_v48 = vld [vmem:[%s15540_s1 + $0x88] sm:$0xff]  ;;  %v2262_v55 = vrot.slane %v11780_v5, 4 }
  0xd8   : > { %v532_v4 = vpop.f32.mrf.mxu0  ;;  %v10215_v9 = vpop.f32.mrf.mxu1  ;;  %10474 = vmatmul.mubr.msk.f32.gmra.mxu1 %vm389_vm1, %v12105_v51  ;;  %3869 = vperm.xlu1 %11173, %v215_v48   ;;  %v1830_v48 = vsel %vm1761_vm4, %v1827_v12, %v1829_v27 }
  0xd9   : > { %v12128_v33 = vadd.f32 %v852_v47, %v532_v4  ;;  %10476 = vmatprep.mubr.msk.f32.mxu1 %vm389_vm1, %v12110_v52  ;;  %3884 = vperm.xlu0 %11172, %v218_v17  }
  0xda   : > { %v10159_v62 = vpop.f32.mrf.mxu0  ;;  %10418 = vmatmul.mubr.msk.f32.gmra.mxu0 %vm389_vm1, %v1818_v21  ;;  %v862_v34 = vpop.f32.mrf.mxu1 }
  0xdb   : > { %v12141_v10 = vadd.f32 %v10215_v9, %v10159_v62  ;;  %10420 = vmatprep.mubr.msk.f32.mxu0 %vm389_vm1, %v1820_v15  ;;  %v1828_v15 = vsel %vm1761_vm4, %v1825_v37, %v1827_v12  ;;  %v15544_v62 = vrot.slane %v11790_v1, 4  ;;  %v12197_v37 = vld [vmem:[%s11317_s28 + $0x20] sm:$0xff] }
  0xdc   : > { %v542_v43 = vpop.f32.mrf.mxu0  ;;  %v10218_v11 = vpop.f32.mrf.mxu1  ;;  %10477 = vmatmul.mubr.msk.f32.gmra.mxu1 %vm389_vm1, %v12133_v59  ;;  %3879 = vperm.xlu1 %11173, %v217_v25  }
  0xdd   : > { %v12156_v53 = vadd.f32 %v862_v34, %v542_v43  ;;  %10479 = vmatprep.mubr.msk.f32.mxu1 %vm389_vm1, %v12138_v36  ;;  %v2921_v43 = vrot.slane %v12197_v37, 5 }
  0xde   : > { %v10162_v8 = vpop.f32.mrf.mxu0  ;;  %10421 = vmatmul.mubr.msk.f32.gmra.mxu0 %vm389_vm1, %v1822_v39  ;;  %v872_v47 = vpop.f32.mrf.mxu1  ;;  %v12194_v39 = vsel %vm462_vm0, %v2260_v58, %v2262_v55 }
  0xdf   : > { %v12169_v21 = vadd.f32 %v10218_v11, %v10162_v8  ;;  %10423 = vmatprep.mubr.msk.f32.mxu0 %vm389_vm1, %v1824_v46  ;;  %v12201_v11 = vld [vmem:[%s11317_s28 + $0x28] sm:$0xff] }
  0xe0   : > { %v552_v4 = vpop.f32.mrf.mxu0  ;;  %v10221_v9 = vpop.f32.mrf.mxu1  ;;  %10480 = vmatmul.mubr.msk.f32.gmra.mxu1 %vm389_vm1, %v12161_v7  ;;  %v2922_v46 = vrot.slane %v12201_v11, 5 }
  0xe1   : > { %v12184_v19 = vadd.f32 %v872_v47, %v552_v4  ;;  %10482 = vmatprep.mubr.msk.f32.mxu1 %vm389_vm1, %v12166_v54  ;;  %v1832_v47 = vsel %vm1761_vm4, %v1829_v27, %v1831_v32  ;;  %v220_v4 = vld [vmem:[%s15540_s1 + $0xb0] sm:$0xff] }
  0xe2   : > { %v10165_v5 = vpop.f32.mrf.mxu0  ;;  %10424 = vmatmul.mubr.msk.f32.gmra.mxu0 %vm389_vm1, %v1826_v49  ;;  %v882_v34 = vpop.f32.mrf.mxu1  ;;  %v219_v49 = vld [vmem:[%s15540_s1 + $0xa8] sm:$0xff]  ;;  %3894 = vperm.xlu0 %11172, %v220_v4  }
  0xe3   : > { %v12204_v38 = vadd.f32 %v10221_v9, %v10165_v5  ;;  %10426 = vmatprep.mubr.msk.f32.mxu0 %vm389_vm1, %v1828_v15  ;;  %v12225_v9 = vsel %vm462_vm0, %v2262_v55, %v15544_v62  ;;  %v12228_v15 = vld [vmem:[%s11317_s28 + $0x30] sm:$0xff]  ;;  %3889 = vperm.xlu1 %11173, %v219_v49   ;;  %v2923_v5 = vsel %vm2920_vm5, %v2921_v43, %v2922_v46  ;;  %v221_v43 = vld [vmem:[%s15540_s1 + $0xb8] sm:$0xff] }
  0xe4   : > { %v562_v58 = vpop.f32.mrf.mxu0  ;;  %v10224_v8 = vpop.f32.mrf.mxu1  ;;  %10483 = vmatmul.mubr.msk.f32.gmra.mxu1 %vm389_vm1, %v12189_v29  ;;  %15613 = vst [vmem:[#allocation4_spill] sm:$0xff] %v12228_v15  ;;  %v2924_v27 = vrot.slane %v12228_v15, 5  ;;  %v1834_v55 = vsel %vm1761_vm4, %v1831_v32, %v1833_v57  ;;  %v12254_v57 = vld [vmem:[%s11317_s28 + $0x40] sm:$0xff]  ;;  %v12260_v15 = vld [vmem:[%s11317_s28 + $0x48] sm:$0xff] }
  0xe5   : > { %v12218_v12 = vadd.f32 %v882_v34, %v562_v58  ;;  %10485 = vmatprep.mubr.msk.f32.mxu1 %vm389_vm1, %v12194_v39  ;;  %v12234_v34 = vld [vmem:[%s11317_s28 + $0x38] sm:$0xff]  ;;  %15615 = vst [vmem:[#allocation6_spill] sm:$0xff] %v12254_v57  ;;  %15616 = vst [vmem:[#allocation7_spill] sm:$0xff] %v12260_v15 }
  0xe6   : > { %v10168_v25 = vpop.f32.mrf.mxu0  ;;  %10427 = vmatmul.mubr.msk.f32.gmra.mxu0 %vm389_vm1, %v1830_v48  ;;  %v892_v17 = vpop.f32.mrf.mxu1  ;;  %15614 = vst [vmem:[#allocation5_spill] sm:$0xff] %v12234_v34  ;;  %v2926_v58 = vrot.slane %v12234_v34, 5  ;;  %v222_v48 = vld [vmem:[%s15540_s1 + $0xc0] sm:$0xff]  ;;  %v2925_v32 = vsel %vm2920_vm5, %v2922_v46, %v2924_v27 }
  0xe7   : > { %15612 = vst [vmem:[#allocation3_spill] sm:$0xff] %v12218_v12  ;;  %v12237_v12 = vadd.f32 %v10224_v8, %v10168_v25  ;;  %10429 = vmatprep.mubr.msk.f32.mxu0 %vm389_vm1, %v1832_v47  ;;  %v2928_v47 = vrot.slane %v12254_v57, 5  ;;  %3899 = vperm.xlu1 %11173, %v221_v43   ;;  %v12286_v57 = vld [vmem:[%s11317_s28 + $0x58] sm:$0xff] }
  0xe8   : > { %v572_v49 = vpop.f32.mrf.mxu0  ;;  %v10227_v62 = vpop.f32.mrf.mxu1  ;;  %10486 = vmatmul.mubr.msk.f32.gmra.mxu1 %vm389_vm1, %v12225_v9  ;;  %v2927_v34 = vsel %vm2920_vm5, %v2924_v27, %v2926_v58  ;;  %3904 = vperm.xlu0 %11172, %v222_v48   ;;  %v224_v27 = vld [vmem:[%s15540_s1 + $0xd0] sm:$0xff]  ;;  %15617 = vst [vmem:[#allocation8_spill] sm:$0xff] %v12286_v57 }
  0xe9   : > { %v12249_v8 = vadd.f32 %v892_v17, %v572_v49  ;;  %10546 = vmatprep.mubr.msk.f32.mxu1 %vm389_vm1, %v2923_v5  ;;  %v2930_v17 = vrot.slane %v12260_v15, 5 }
  0xea   : > { %v10171_v4 = vpop.f32.mrf.mxu0  ;;  %10430 = vmatmul.mubr.msk.f32.gmra.mxu0 %vm389_vm1, %v1834_v55  ;;  %v902_v25 = vpop.f32.mrf.mxu1  ;;  %v223_v55 = vld [vmem:[%s15540_s1 + $0xc8] sm:$0xff] }
  0xeb   : > { %v12263_v5 = vadd.f32 %v10227_v62, %v10171_v4  ;;  %10490 = vmatprep.mubr.msk.f32.mxu0 %vm389_vm1, %v11821_v44  ;;  %v2929_v62 = vsel %vm2920_vm5, %v2926_v58, %v2928_v47  ;;  %v12279_v44 = vld [vmem:[%s11317_s28 + $0x50] sm:$0xff]  ;;  %3909 = vperm.xlu1 %11173, %v223_v55   ;;  %v2931_v15 = vsel %vm2920_vm5, %v2928_v47, %v2930_v17  ;;  %v225_v47 = vld [vmem:[%s15540_s1 + $0xd8] sm:$0xff] }
  0xec   : > { %v582_v46 = vpop.f32.mrf.mxu0  ;;  %v10230_v49 = vpop.f32.mrf.mxu1  ;;  %10547 = vmatmul.mubr.msk.f32.vlgmr.msra.gmra.mxu1 %vm389_vm1, %v2925_v32  ;;  %v2932_v48 = vrot.slane %v12279_v44, 5  ;;  %3914 = vperm.xlu0 %11172, %v224_v27  }
  0xed   : > { %v12274_v43 = vadd.f32 %v902_v25, %v582_v46  ;;  %10549 = vmatprep.mubr.msk.f32.mxu1 %vm389_vm1, %v2927_v34  ;;  %v2934_v25 = vrot.slane %v12286_v57, 5  ;;  %v226_v46 = vld [vmem:[%s15540_s1 + $0xe0] sm:$0xff]  ;;  %v12314_v57 = vld [vmem:[%s11317_s28 + $0x68] sm:$0xff] }
  0xee   : > { %v10174_v32 = vpop.f32.mrf.mxu0  ;;  %10491 = vmatmul.mubr.msk.f32.vlgmr.msra.gmra.mxu0 %vm389_vm1, %v11833_v56  ;;  %v912_v4 = vpop.f32.mrf.mxu1  ;;  %15619 = vst [vmem:[#allocation10_spill] sm:$0xff] %v12314_v57 }
  0xef   : > { %v12289_v34 = vadd.f32 %v10230_v49, %v10174_v32  ;;  %10601 = vmatpush3.msk.msra.mxu0 %vm462_vm0, %v11841_v18  ;;  %10493 = vmatprep.mubr.msk.f32.mxu0 %vm389_vm1, %v11845_v20  ;;  %v2933_v18 = vsel %vm2920_vm5, %v2930_v17, %v2932_v48  ;;  %v12307_v20 = vld [vmem:[%s11317_s28 + $0x60] sm:$0xff]  ;;  %v2935_v32 = vsel %vm2920_vm5, %v2932_v48, %v2934_v25  ;;  %v228_v48 = vld [vmem:[%s15540_s1 + $0xf0] sm:$0xff] }
  0xf0   : > { %v592_v58 = vpop.f32.mrf.mxu0  ;;  %v10233_v56 = vpop.f32.mrf.mxu1  ;;  %10550 = vmatmul.mubr.msk.f32.gmra.mxu1 %vm389_vm1, %v2929_v62  ;;  %15618 = vst [vmem:[#allocation9_spill] sm:$0xff] %v12307_v20  ;;  %v2936_v55 = vrot.slane %v12307_v20, 5  ;;  %3919 = vperm.xlu1 %11173, %v225_v47   ;;  %v12340_v20 = vld [vmem:[%s11317_s28 + $0x78] sm:$0xff] }
  0xf1   : > { %v12302_v49 = vadd.f32 %v912_v4, %v592_v58  ;;  %10552 = vmatprep.mubr.msk.f32.mxu1 %vm389_vm1, %v2931_v15  ;;  %v2938_v4 = vrot.slane %v12314_v57, 5  ;;  %3924 = vperm.xlu0 %11172, %v226_v46   ;;  %15621 = vst [vmem:[#allocation12_spill] sm:$0xff] %v12340_v20 }
  0xf2   : > { %v10177_v27 = vpop.f32.mrf.mxu0  ;;  %10494 = vmatmul.mubr.msk.f32.gmra.mxu0 %vm389_vm1, %v11862_v63  ;;  %v922_v62 = vpop.f32.mrf.mxu1  ;;  %v227_v63 = vld [vmem:[%s15540_s1 + $0xe8] sm:$0xff] }
  0xf3   : > { %v12317_v15 = vadd.f32 %v10233_v56, %v10177_v27  ;;  %10496 = vmatprep.mubr.msk.f32.mxu0 %vm389_vm1, %v11867_v26  ;;  %v2937_v56 = vsel %vm2920_vm5, %v2934_v25, %v2936_v55  ;;  %v12333_v26 = vld [vmem:[%s11317_s28 + $0x70] sm:$0xff]  ;;  %v2939_v57 = vsel %vm2920_vm5, %v2936_v55, %v2938_v4  ;;  %v230_v55 = vld [vmem:[%s15540_s1 + $0x100] sm:$0xff] }
  0xf4   : > { %v602_v17 = vpop.f32.mrf.mxu0  ;;  %v10236_v58 = vpop.f32.mrf.mxu1  ;;  %10553 = vmatmul.mubr.msk.f32.gmra.mxu1 %vm389_vm1, %v2933_v18  ;;  %15620 = vst [vmem:[#allocation11_spill] sm:$0xff] %v12333_v26  ;;  %v2940_v46 = vrot.slane %v12333_v26, 5  ;;  %3929 = vperm.xlu1 %11173, %v227_v63   ;;  %v12366_v26 = vld [vmem:[%s11317_s28 + $0x88] sm:$0xff] }
  0xf5   : > { %v12328_v47 = vadd.f32 %v922_v62, %v602_v17  ;;  %10555 = vmatprep.mubr.msk.f32.mxu1 %vm389_vm1, %v2935_v32  ;;  %v2942_v62 = vrot.slane %v12340_v20, 5  ;;  %3934 = vperm.xlu0 %11172, %v228_v48   ;;  %15623 = vst [vmem:[#allocation14_spill] sm:$0xff] %v12366_v26 }
  0xf6   : > { %v10180_v18 = vpop.f32.mrf.mxu0  ;;  %10497 = vmatmul.mubr.msk.f32.gmra.mxu0 %vm389_vm1, %v11880_v16  ;;  %v932_v27 = vpop.f32.mrf.mxu1  ;;  %v229_v16 = vld [vmem:[%s15540_s1 + $0xf8] sm:$0xff] }
  0xf7   : > { %v12343_v32 = vadd.f32 %v10236_v58, %v10180_v18  ;;  %10499 = vmatprep.mubr.msk.f32.mxu0 %vm389_vm1, %v11885_v24  ;;  %v2941_v58 = vsel %vm2920_vm5, %v2938_v4, %v2940_v46  ;;  %v12359_v24 = vld [vmem:[%s11317_s28 + $0x80] sm:$0xff]  ;;  %v2943_v20 = vsel %vm2920_vm5, %v2940_v46, %v2942_v62  ;;  %v232_v46 = vld [vmem:[%s15540_s1 + $0x110] sm:$0xff] }
  0xf8   : > { %v612_v25 = vpop.f32.mrf.mxu0  ;;  %v10239_v17 = vpop.f32.mrf.mxu1  ;;  %10556 = vmatmul.mubr.msk.f32.gmra.mxu1 %vm389_vm1, %v2937_v56  ;;  %15622 = vst [vmem:[#allocation13_spill] sm:$0xff] %v12359_v24  ;;  %v2944_v48 = vrot.slane %v12359_v24, 5  ;;  %3939 = vperm.xlu1 %11173, %v229_v16   ;;  %v12392_v24 = vld [vmem:[%s11317_s28 + $0x98] sm:$0xff] }
  0xf9   : > { %v12354_v63 = vadd.f32 %v932_v27, %v612_v25  ;;  %10558 = vmatprep.mubr.msk.f32.mxu1 %vm389_vm1, %v2939_v57  ;;  %v2946_v27 = vrot.slane %v12366_v26, 5  ;;  %3944 = vperm.xlu0 %11172, %v230_v55   ;;  %15624 = vst [vmem:[#allocation15_spill] sm:$0xff] %v12392_v24 }
  0xfa   : > { %v10183_v56 = vpop.f32.mrf.mxu0  ;;  %10500 = vmatmul.mubr.msk.f32.gmra.mxu0 %vm389_vm1, %v11898_v35  ;;  %v942_v18 = vpop.f32.mrf.mxu1  ;;  %v231_v35 = vld [vmem:[%s15540_s1 + $0x108] sm:$0xff] }
  0xfb   : > { %v12369_v57 = vadd.f32 %v10239_v17, %v10183_v56  ;;  %10502 = vmatprep.mubr.msk.f32.mxu0 %vm389_vm1, %v11903_v6  ;;  %v2945_v17 = vsel %vm2920_vm5, %v2942_v62, %v2944_v48  ;;  %v12385_v6 = vld [vmem:[%s11317_s28 + $0x90] sm:$0xff]  ;;  %v2947_v26 = vsel %vm2920_vm5, %v2944_v48, %v2946_v27 }
  0xfc   : > { %v622_v4 = vpop.f32.mrf.mxu0  ;;  %v10242_v25 = vpop.f32.mrf.mxu1  ;;  %10559 = vmatmul.mubr.msk.f32.gmra.mxu1 %vm389_vm1, %v2941_v58  ;;  %v2948_v55 = vrot.slane %v12385_v6, 5  ;;  %3949 = vperm.xlu1 %11173, %v231_v35  }
  0xfd   : > { %v12380_v16 = vadd.f32 %v942_v18, %v622_v4  ;;  %10561 = vmatprep.mubr.msk.f32.mxu1 %vm389_vm1, %v2943_v20  ;;  %v2950_v18 = vrot.slane %v12392_v24, 5  ;;  %3954 = vperm.xlu0 %11172, %v232_v46   ;;  %v12415_v24 = vld [vmem:[%s11317_s28 + $0xa8] sm:$0xff] }
  0xfe   : > { %v10186_v58 = vpop.f32.mrf.mxu0  ;;  %10503 = vmatmul.mubr.msk.f32.gmra.mxu0 %vm389_vm1, %v11916_v45  ;;  %v952_v56 = vpop.f32.mrf.mxu1  ;;  %v233_v45 = vld [vmem:[%s15540_s1 + $0x118] sm:$0xff]  ;;  %v2949_v35 = vsel %vm2920_vm5, %v2946_v27, %v2948_v55  ;;  %15626 = vst [vmem:[#allocation17_spill] sm:$0xff] %v12415_v24 }
  0xff   : > { %v12395_v20 = vadd.f32 %v10242_v25, %v10186_v58  ;;  %10505 = vmatprep.mubr.msk.f32.mxu0 %vm389_vm1, %v11921_v50  ;;  %v12408_v25 = vld [vmem:[%s11317_s28 + $0xa0] sm:$0xff]  ;;  %v2951_v58 = vsel %vm2920_vm5, %v2948_v55, %v2950_v18  ;;  %v12428_v55 = vld [vmem:[%s11317_s28 + $0xb0] sm:$0xff] }
 0x100   : > { %v632_v62 = vpop.f32.mrf.mxu0  ;;  %v10245_v4 = vpop.f32.mrf.mxu1  ;;  %10562 = vmatmul.mubr.msk.f32.gmra.mxu1 %vm389_vm1, %v2945_v17  ;;  %15625 = vst [vmem:[#allocation16_spill] sm:$0xff] %v12408_v25  ;;  %v2952_v46 = vrot.slane %v12408_v25, 5  ;;  %3959 = vperm.xlu1 %11173, %v233_v45   ;;  %15627 = vst [vmem:[#allocation18_spill] sm:$0xff] %v12428_v55  ;;  %v12435_v25 = vld [vmem:[%s11317_s28 + $0xb8] sm:$0xff] }
 0x101   : > { %v12403_v48 = vadd.f32 %v952_v56, %v632_v62  ;;  %10564 = vmatprep.mubr.msk.f32.mxu1 %vm389_vm1, %v2947_v26  ;;  %v2954_v26 = vrot.slane %v12415_v24, 5  ;;  %v2956_v24 = vrot.slane %v12428_v55, 5  ;;  %15628 = vst [vmem:[#allocation19_spill] sm:$0xff] %v12435_v25  ;;  %v12455_v55 = vld [vmem:[%s11317_s28 + $0xc8] sm:$0xff] }
 0x102   : > { %v10189_v50 = vpop.f32.mrf.mxu0  ;;  %10506 = vmatmul.mubr.msk.f32.gmra.mxu0 %vm389_vm1, %v11937_v28  ;;  %v962_v17 = vpop.f32.mrf.mxu1  ;;  %v2953_v28 = vsel %vm2920_vm5, %v2950_v18, %v2952_v46  ;;  %15630 = vst [vmem:[#allocation21_spill] sm:$0xff] %v12455_v55 }
 0x103   : > { %v12418_v56 = vadd.f32 %v10245_v4, %v10189_v50  ;;  %10508 = vmatprep.mubr.msk.f32.mxu0 %vm389_vm1, %v11942_v40  ;;  %v2955_v50 = vsel %vm2920_vm5, %v2952_v46, %v2954_v26  ;;  %v12448_v46 = vld [vmem:[%s11317_s28 + $0xc0] sm:$0xff] }
 0x104   : > { %v642_v27 = vpop.f32.mrf.mxu0  ;;  %v10248_v62 = vpop.f32.mrf.mxu1  ;;  %10565 = vmatmul.mubr.msk.f32.gmra.mxu1 %vm389_vm1, %v2949_v35  ;;  %v2958_v35 = vrot.slane %v12435_v25, 5  ;;  %15629 = vst [vmem:[#allocation20_spill] sm:$0xff] %v12448_v46  ;;  %v2960_v25 = vrot.slane %v12448_v46, 5  ;;  %v12475_v46 = vld [vmem:[%s11317_s28 + $0xd8] sm:$0xff] }
 0x105   : > { %v12423_v45 = vadd.f32 %v962_v17, %v642_v27  ;;  %10567 = vmatprep.mubr.msk.f32.mxu1 %vm389_vm1, %v2951_v58  ;;  %15632 = vst [vmem:[#allocation23_spill] sm:$0xff] %v12475_v46 }
 0x106   : > { %v10192_v4 = vpop.f32.mrf.mxu0  ;;  %10509 = vmatmul.mubr.msk.f32.gmra.mxu0 %vm389_vm1, %v11961_v60  ;;  %v972_v40 = vpop.f32.mrf.mxu1  ;;  %v2957_v60 = vsel %vm2920_vm5, %v2954_v26, %v2956_v24 }
 0x107   : > { %v12438_v17 = vadd.f32 %v10248_v62, %v10192_v4  ;;  %10511 = vmatprep.mubr.msk.f32.mxu0 %vm389_vm1, %v11966_v61  ;;  %v2959_v4 = vsel %vm2920_vm5, %v2956_v24, %v2958_v35  ;;  %v12468_v24 = vld [vmem:[%s11317_s28 + $0xd0] sm:$0xff] }
 0x108   : > { %v652_v18 = vpop.f32.mrf.mxu0  ;;  %v10251_v58 = vpop.f32.mrf.mxu1  ;;  %10568 = vmatmul.mubr.msk.f32.gmra.mxu1 %vm389_vm1, %v2953_v28  ;;  %v2962_v28 = vrot.slane %v12455_v55, 5  ;;  %15631 = vst [vmem:[#allocation22_spill] sm:$0xff] %v12468_v24  ;;  %v2964_v55 = vrot.slane %v12468_v24, 5  ;;  %v12495_v24 = vld [vmem:[%s11317_s28 + $0xe8] sm:$0xff] }
 0x109   : > { %v12443_v27 = vadd.f32 %v972_v40, %v652_v18  ;;  %10570 = vmatprep.mubr.msk.f32.mxu1 %vm389_vm1, %v2955_v50  ;;  %15633 = vst [vmem:[#allocation24_spill] sm:$0xff] %v12495_v24 }
 0x10a   : > { %v10195_v62 = vpop.f32.mrf.mxu0  ;;  %10512 = vmatmul.mubr.msk.f32.gmra.mxu0 %vm389_vm1, %v11985_v2  ;;  %v982_v61 = vpop.f32.mrf.mxu1  ;;  %v2961_v2 = vsel %vm2920_vm5, %v2958_v35, %v2960_v25 }
 0x10b   : > { %v12458_v40 = vadd.f32 %v10251_v58, %v10195_v62  ;;  %10514 = vmatprep.mubr.msk.f32.mxu0 %vm389_vm1, %v11990_v3  ;;  %v2963_v62 = vsel %vm2920_vm5, %v2960_v25, %v2962_v28  ;;  %v12488_v25 = vld [vmem:[%s11317_s28 + $0xe0] sm:$0xff] }
 0x10c   : > { %v662_v26 = vpop.f32.mrf.mxu0  ;;  %v10254_v50 = vpop.f32.mrf.mxu1  ;;  %10571 = vmatmul.mubr.msk.f32.gmra.mxu1 %vm389_vm1, %v2957_v60  ;;  %v2966_v60 = vrot.slane %v12475_v46, 5  ;;  %v2968_v46 = vrot.slane %v12488_v25, 5 }
 0x10d   : > { %v12463_v18 = vadd.f32 %v982_v61, %v662_v26  ;;  %10573 = vmatprep.mubr.msk.f32.mxu1 %vm389_vm1, %v2959_v4 }
 0x10e   : > { %v10198_v58 = vpop.f32.mrf.mxu0  ;;  %10515 = vmatmul.mubr.msk.f32.gmra.mxu0 %vm389_vm1, %v12009_v13  ;;  %v992_v3 = vpop.f32.mrf.mxu1  ;;  %v2965_v13 = vsel %vm2920_vm5, %v2962_v28, %v2964_v55 }
 0x10f   : > { %v12478_v61 = vadd.f32 %v10254_v50, %v10198_v58  ;;  %10517 = vmatprep.mubr.msk.f32.mxu0 %vm389_vm1, %v12014_v14  ;;  %v2967_v58 = vsel %vm2920_vm5, %v2964_v55, %v2966_v60  ;;  %v12508_v55 = vld [vmem:[%s11317_s28 + $0xf0] sm:$0xff] }
 0x110   : > { %v672_v35 = vpop.f32.mrf.mxu0  ;;  %v10257_v4 = vpop.f32.mrf.mxu1  ;;  %10574 = vmatmul.mubr.msk.f32.gmra.mxu1 %vm389_vm1, %v2961_v2  ;;  %v2970_v2 = vrot.slane %v12495_v24, 5  ;;  %v2972_v24 = vrot.slane %v12508_v55, 5 }
 0x111   : > { %v12483_v26 = vadd.f32 %v992_v3, %v672_v35  ;;  %10576 = vmatprep.mubr.msk.f32.mxu1 %vm389_vm1, %v2963_v62 }
 0x112   : > { %v10201_v50 = vpop.f32.mrf.mxu0  ;;  %10518 = vmatmul.mubr.msk.f32.gmra.mxu0 %vm389_vm1, %v12033_v22  ;;  %v1002_v14 = vpop.f32.mrf.mxu1  ;;  %v2969_v22 = vsel %vm2920_vm5, %v2966_v60, %v2968_v46 }
 0x113   : > { %v12498_v3 = vadd.f32 %v10257_v4, %v10201_v50  ;;  %10520 = vmatprep.mubr.msk.f32.mxu0 %vm389_vm1, %v12038_v23  ;;  %v2971_v50 = vsel %vm2920_vm5, %v2968_v46, %v2970_v2  ;;  %v12530_v46 = vld [vmem:[%s11317_s28 + $0x100] sm:$0xff] }
 0x114   : > { %v682_v28 = vpop.f32.mrf.mxu0  ;;  %v10260_v62 = vpop.f32.mrf.mxu1  ;;  %10577 = vmatmul.mubr.msk.f32.gmra.mxu1 %vm389_vm1, %v2965_v13  ;;  %v12517_v13 = vld [vmem:[%s11317_s28 + $0xf8] sm:$0xff] }
 0x115   : > { %v12503_v35 = vadd.f32 %v1002_v14, %v682_v28  ;;  %10579 = vmatprep.mubr.msk.f32.mxu1 %vm389_vm1, %v2967_v58  ;;  %15635 = vst [vmem:[#allocation26_spill] sm:$0xff] %v12517_v13  ;;  %v2974_v14 = vrot.slane %v12517_v13, 5 }
 0x116   : > { %v10204_v4 = vpop.f32.mrf.mxu0  ;;  %10521 = vmatmul.mubr.msk.f32.gmra.mxu0 %vm389_vm1, %v12057_v30  ;;  %v12513_v23 = vpop.f32.mrf.mxu1  ;;  %v2973_v30 = vsel %vm2920_vm5, %v2970_v2, %v2972_v24 }
 0x117   : > { %15634 = vst [vmem:[#allocation25_spill] sm:$0xff] %v12513_v23  ;;  %v12520_v58 = vadd.f32 %v10260_v62, %v10204_v4  ;;  %10523 = vmatprep.mubr.msk.f32.mxu0 %vm389_vm1, %v12062_v31  ;;  %v2976_v23 = vrot.slane %v12530_v46, 5  ;;  %v2975_v31 = vsel %vm2920_vm5, %v2972_v24, %v2974_v14  ;;  %v12539_v4 = vld [vmem:[%s11317_s28 + $0x108] sm:$0xff]  ;;  %v12552_v24 = vld [vmem:[%s11317_s28 + $0x110] sm:$0xff] }
 0x118   : > { %v12524_v60 = vpop.f32.mrf.mxu0  ;;  %v10263_v28 = vpop.f32.mrf.mxu1  ;;  %10580 = vmatmul.mubr.msk.f32.gmra.mxu1 %vm389_vm1, %v2969_v22  ;;  %15638 = vst [vmem:[#allocation29_spill] sm:$0xff] %v12539_v4  ;;  %v2978_v22 = vrot.slane %v12539_v4, 5 }
 0x119   : > { %15636 = vst [vmem:[#allocation27_spill] sm:$0xff] %v12524_v60  ;;  %10582 = vmatprep.mubr.msk.f32.mxu1 %vm389_vm1, %v2971_v50 }
 0x11a   : > { %v10207_v13 = vpop.f32.mrf.mxu0  ;;  %10524 = vmatmul.mubr.msk.f32.gmra.mxu0 %vm389_vm1, %v12081_v41  ;;  %v12535_v62 = vpop.f32.mrf.mxu1  ;;  %v2977_v41 = vsel %vm2920_vm5, %v2974_v14, %v2976_v23 }
 0x11b   : > { %15637 = vst [vmem:[#allocation28_spill] sm:$0xff] %v12535_v62  ;;  %v12542_v50 = vadd.f32 %v10263_v28, %v10207_v13  ;;  %10526 = vmatprep.mubr.msk.f32.mxu0 %vm389_vm1, %v12086_v42  ;;  %v2980_v62 = vrot.slane %v12552_v24, 5  ;;  %v2979_v42 = vsel %vm2920_vm5, %v2976_v23, %v2978_v22  ;;  %v12561_v28 = vld [vmem:[%s11317_s28 + $0x118] sm:$0xff] }
 0x11c   : > { %v12546_v2 = vpop.f32.mrf.mxu0  ;;  %v10324_v60 = vpop.f32.mrf.mxu1  ;;  %10583 = vmatmul.mubr.msk.f32.gmra.mxu1 %vm389_vm1, %v2973_v30  ;;  %15641 = vst [vmem:[#allocation32_spill] sm:$0xff] %v12561_v28  ;;  %v2982_v30 = vrot.slane %v12561_v28, 5  ;;  %v12576_v28 = vld [vmem:[%s11317_s28 + $0x120] sm:$0xff] }
 0x11d   : > { %15639 = vst [vmem:[#allocation30_spill] sm:$0xff] %v12546_v2  ;;  %10585 = vmatprep.mubr.msk.f32.mxu1 %vm389_vm1, %v2975_v31  ;;  %v2981_v23 = vsel %vm2920_vm5, %v2978_v22, %v2980_v62 }
 0x11e   : > { %v10268_v4 = vpop.f32.mrf.mxu0  ;;  %10527 = vmatmul.mubr.msk.f32.gmra.mxu0 %vm389_vm1, %v12105_v51  ;;  %v12557_v13 = vpop.f32.mrf.mxu1 }
 0x11f   : > { %15640 = vst [vmem:[#allocation31_spill] sm:$0xff] %v12557_v13  ;;  %v1428_v14 = vadd.f32 %v10268_v4, %v12113_v0  ;;  %10529 = vmatprep.mubr.msk.f32.mxu0 %vm389_vm1, %v12110_v52  ;;  %v2984_v0 = vrot.slane %v12576_v28, 5 }
 0x120   : > { %v1248_v31 = vpop.f32.mrf.mxu0  ;;  %v10327_v2 = vpop.f32.mrf.mxu1  ;;  %10586 = vmatmul.mubr.msk.f32.gmra.mxu1 %vm389_vm1, %v2977_v41 }
 0x121   : > { %v12569_v51 = vadd.f32 %v1248_v31, %v12128_v33  ;;  %v12571_v13 = vadd.f32 %v10324_v60, %v1428_v14  ;;  %10588 = vmatprep.mubr.msk.f32.mxu1 %vm389_vm1, %v2979_v42  ;;  %v2983_v33 = vsel %vm2920_vm5, %v2980_v62, %v2982_v30  ;;  %v12585_v60 = vld [vmem:[%s11317_s28 + $0x128] sm:$0xff]  ;;  %v2985_v62 = vsel %vm2920_vm5, %v2982_v30, %v2984_v0 }
 0x122   : > { %v10271_v4 = vpop.f32.mrf.mxu0  ;;  %10530 = vmatmul.mubr.msk.f32.gmra.mxu0 %vm389_vm1, %v12133_v59  ;;  %v12581_v52 = vpop.f32.mrf.mxu1  ;;  %v2986_v41 = vrot.slane %v12585_v60, 5 }
 0x123   : > { %15642 = vst [vmem:[#allocation33_spill] sm:$0xff] %v12569_v51  ;;  %15643 = vst [vmem:[#allocation34_spill] sm:$0xff] %v12581_v52  ;;  %v1430_v22 = vadd.f32 %v10271_v4, %v12141_v10  ;;  %10532 = vmatprep.mubr.msk.f32.mxu0 %vm389_vm1, %v12138_v36  ;;  %v12600_v52 = vld [vmem:[%s11317_s28 + $0x130] sm:$0xff]  ;;  %v12604_v4 = vld [vmem:[%s11317_s28 + $0x138] sm:$0xff] }
 0x124   : > { %v1258_v42 = vpop.f32.mrf.mxu0  ;;  %v10330_v14 = vpop.f32.mrf.mxu1  ;;  %10589 = vmatmul.mubr.msk.f32.gmra.mxu1 %vm389_vm1, %v2981_v23  ;;  %v2988_v10 = vrot.slane %v12600_v52, 5 }
 0x125   : > { %v12593_v59 = vadd.f32 %v1258_v42, %v12156_v53  ;;  %v12595_v31 = vadd.f32 %v10327_v2, %v1430_v22  ;;  %10591 = vmatprep.mubr.msk.f32.mxu1 %vm389_vm1, %v2983_v33  ;;  %v2987_v53 = vsel %vm2920_vm5, %v2984_v0, %v2986_v41  ;;  %v2990_v2 = vrot.slane %v12604_v4, 5 }
 0x126   : > { %v10274_v36 = vpop.f32.mrf.mxu0  ;;  %10533 = vmatmul.mubr.msk.f32.gmra.mxu0 %vm389_vm1, %v12161_v7  ;;  %v12608_v23 = vpop.f32.mrf.mxu1  ;;  %v2626_v42 = vrot.slane %v12604_v4, 4 }
 0x127   : > { %15644 = vst [vmem:[#allocation35_spill] sm:$0xff] %v12593_v59  ;;  %15645 = vst [vmem:[#allocation36_spill] sm:$0xff] %v12608_v23  ;;  %v1432_v33 = vadd.f32 %v10274_v36, %v12169_v21  ;;  %10535 = vmatprep.mubr.msk.f32.mxu0 %vm389_vm1, %v12166_v54  ;;  %v12618_v59 = vld [vmem:[%s11317_s28 + $0x140] sm:$0xff]  ;;  %v2989_v21 = vsel %vm2920_vm5, %v2986_v41, %v2988_v10  ;;  %v2991_v36 = vsel %vm2920_vm5, %v2988_v10, %v2990_v2  ;;  %v15648_v10 = vld [vmem:[#allocation3_spill] sm:$0xff] }
 0x128   : > { %v1268_v30 = vpop.f32.mrf.mxu0  ;;  %v10333_v22 = vpop.f32.mrf.mxu1  ;;  %10592 = vmatmul.mubr.msk.f32.gmra.mxu1 %vm389_vm1, %v2985_v62  ;;  %v2992_v0 = vrot.slane %v12618_v59, 5  ;;  %v15647_v41 = vrot.slane %v11790_v1, 4 }
 0x129   : > { %v12621_v7 = vadd.f32 %v1268_v30, %v12184_v19  ;;  %v12623_v23 = vadd.f32 %v10330_v14, %v1432_v33  ;;  %10594 = vmatprep.mubr.msk.f32.mxu1 %vm389_vm1, %v2987_v53  ;;  %v2628_v19 = vrot.slane %v12618_v59, 4  ;;  %v3354_v30 = vrot.slane %v12201_v11, 6 }
 0x12a   : > { %v10277_v54 = vpop.f32.mrf.mxu0  ;;  %10536 = vmatmul.mubr.msk.f32.gmra.mxu0 %vm389_vm1, %v12189_v29  ;;  %v12630_v62 = vpop.f32.mrf.mxu1  ;;  %v2627_v33 = vsel %vm462_vm0, %v15647_v41, %v2626_v42  ;;  %v3353_v29 = vrot.slane %v12197_v37, 6 }
 0x12b   : > { %15646 = vst [vmem:[#allocation37_spill] sm:$0xff] %v12630_v62  ;;  %v1434_v51 = vadd.f32 %v10277_v54, %v12204_v38  ;;  %10538 = vmatprep.mubr.msk.f32.mxu0 %vm389_vm1, %v12194_v39  ;;  %v2993_v39 = vsel %vm2920_vm5, %v2990_v2, %v2992_v0  ;;  %v2629_v11 = vsel %vm462_vm0, %v2626_v42, %v2628_v19  ;;  %v15650_v0 = vld [vmem:[#allocation5_spill] sm:$0xff] }
 0x12c   : > { %v1278_v14 = vpop.f32.mrf.mxu0  ;;  %v10336_v53 = vpop.f32.mrf.mxu1  ;;  %10595 = vmatmul.mubr.msk.f32.gmra.mxu1 %vm389_vm1, %v2989_v21  ;;  %v15649_v21 = vld [vmem:[#allocation4_spill] sm:$0xff]  ;;  %v3355_v2 = vsel %vm3352_vm6, %v3353_v29, %v3354_v30 }
 0x12d   : > { %v12644_v62 = vadd.f32 %v1278_v14, %v15648_v10  ;;  %v12646_v38 = vadd.f32 %v10333_v22, %v1434_v51  ;;  %10597 = vmatprep.mubr.msk.f32.mxu1 %vm389_vm1, %v2991_v36  ;;  %v3356_v51 = vrot.slane %v15649_v21, 6  ;;  %v3358_v36 = vrot.slane %v15650_v0, 6  ;;  %v15651_v10 = vld [vmem:[#allocation6_spill] sm:$0xff]  ;;  %v15652_v21 = vld [vmem:[#allocation7_spill] sm:$0xff] }
 0x12e   : > { %v10280_v54 = vpop.f32.mrf.mxu0  ;;  %10539 = vmatmul.mubr.msk.f32.gmra.mxu0 %vm389_vm1, %v12225_v9  ;;  %v12652_v1 = vpop.f32.mrf.mxu1  ;;  %v3360_v29 = vrot.slane %v15651_v10, 6  ;;  %v15653_v10 = vld [vmem:[#allocation8_spill] sm:$0xff] }
 0x12f   : > { %v1436_v37 = vadd.f32 %v10280_v54, %v12237_v12  ;;  %10541 = vmatprep.mubr.msk.f32.mxu0 %vm389_vm1, %v2627_v33  ;;  %v3357_v19 = vsel %vm3352_vm6, %v3354_v30, %v3356_v51 }
 0x130   : > { %v1288_v22 = vpop.f32.mrf.mxu0  ;;  %v10339_v14 = vpop.f32.mrf.mxu1  ;;  %10598 = vmatmul.mubr.msk.f32.gmra.mxu1 %vm389_vm1, %v2993_v39 }
 0x131   : > { %v12662_v9 = vadd.f32 %v1288_v22, %v12249_v8  ;;  %v12664_v41 = vadd.f32 %v10336_v53, %v1436_v37  ;;  %v3359_v8 = vsel %vm3352_vm6, %v3356_v51, %v3358_v36  ;;  %v3362_v53 = vrot.slane %v15652_v21, 6 }
 0x132   : > { %v10283_v12 = vpop.f32.mrf.mxu0  ;;  %10542 = vmatmul.mubr.msk.f32.gmra.mxu0 %vm389_vm1, %v2629_v11  ;;  %v12667_v33 = vpop.f32.mrf.mxu1  ;;  %v3364_v51 = vrot.slane %v12279_v44, 6 }
 0x133   : > { %v1438_v42 = vadd.f32 %v10283_v12, %v12263_v5  ;;  %10602 = vmatprep.mubr.msk.f32.mxu0 %vm389_vm1, %v3355_v2  ;;  %v3361_v2 = vsel %vm3352_vm6, %v3358_v36, %v3360_v29 }
 0x134   : > { %v1298_v39 = vpop.f32.mrf.mxu0  ;;  %v10342_v54 = vpop.f32.mrf.mxu1  ;;  %v3365_v44 = vsel %vm3352_vm6, %v3362_v53, %v3364_v51 }
 0x135   : > { %v12676_v37 = vadd.f32 %v1298_v39, %v12274_v43  ;;  %v12678_v11 = vadd.f32 %v10339_v14, %v1438_v42  ;;  %v3363_v43 = vsel %vm3352_vm6, %v3360_v29, %v3362_v53  ;;  %v3366_v14 = vrot.slane %v15653_v10, 6 }
 0x136   : > { %v10286_v22 = vpop.f32.mrf.mxu0  ;;  %10603 = vmatmul.mubr.msk.f32.vlgmr.msra.gmra.mxu0 %vm389_vm1, %v3357_v19  ;;  %v12681_v5 = vpop.f32.mrf.mxu1 }
 0x137   : > { %v1440_v30 = vadd.f32 %v10286_v22, %v12289_v34  ;;  %10605 = vmatprep.mubr.msk.f32.mxu0 %vm389_vm1, %v3359_v8  ;;  %v15654_v8 = vld [vmem:[#allocation9_spill] sm:$0xff] }
 0x138   : > { %v1308_v0 = vpop.f32.mrf.mxu0  ;;  %v10345_v12 = vpop.f32.mrf.mxu1  ;;  %v3368_v29 = vrot.slane %v15654_v8, 6 }
 0x139   : > { %v12690_v42 = vadd.f32 %v1308_v0, %v12302_v49  ;;  %v12692_v19 = vadd.f32 %v10342_v54, %v1440_v30  ;;  %v3367_v49 = vsel %vm3352_vm6, %v3364_v51, %v3366_v14  ;;  %v15655_v0 = vld [vmem:[#allocation10_spill] sm:$0xff] }
 0x13a   : > { %v10289_v39 = vpop.f32.mrf.mxu0  ;;  %10606 = vmatmul.mubr.msk.f32.gmra.mxu0 %vm389_vm1, %v3361_v2  ;;  %v12695_v34 = vpop.f32.mrf.mxu1  ;;  %v3370_v54 = vrot.slane %v15655_v0, 6 }
 0x13b   : > { %v1442_v36 = vadd.f32 %v10289_v39, %v12317_v15  ;;  %10608 = vmatprep.mubr.msk.f32.mxu0 %vm389_vm1, %v3363_v43  ;;  %v3369_v43 = vsel %vm3352_vm6, %v3366_v14, %v3368_v29  ;;  %v15657_v39 = vld [vmem:[#allocation11_spill] sm:$0xff] }
 0x13c   : > { %v1318_v21 = vpop.f32.mrf.mxu0  ;;  %v10348_v22 = vpop.f32.mrf.mxu1  ;;  %v3372_v51 = vrot.slane %v15657_v39, 6 }
 0x13d   : > { %v12704_v30 = vadd.f32 %v1318_v21, %v12328_v47  ;;  %v12706_v2 = vadd.f32 %v10345_v12, %v1442_v36  ;;  %v3371_v47 = vsel %vm3352_vm6, %v3368_v29, %v3370_v54  ;;  %v15658_v21 = vld [vmem:[#allocation12_spill] sm:$0xff] }
 0x13e   : > { %v10292_v10 = vpop.f32.mrf.mxu0  ;;  %10609 = vmatmul.mubr.msk.f32.gmra.mxu0 %vm389_vm1, %v3365_v44  ;;  %v12709_v15 = vpop.f32.mrf.mxu1  ;;  %v3374_v12 = vrot.slane %v15658_v21, 6 }
 0x13f   : > { %15656 = vst [vmem:[#allocation3_spill] sm:$0xff] %v12709_v15  ;;  %v1444_v53 = vadd.f32 %v10292_v10, %v12343_v32  ;;  %10611 = vmatprep.mubr.msk.f32.mxu0 %vm389_vm1, %v3367_v49  ;;  %v3373_v49 = vsel %vm3352_vm6, %v3370_v54, %v3372_v51  ;;  %v15660_v10 = vld [vmem:[#allocation13_spill] sm:$0xff] }
 0x140   : > { %v1328_v8 = vpop.f32.mrf.mxu0  ;;  %v10351_v0 = vpop.f32.mrf.mxu1  ;;  %v3376_v29 = vrot.slane %v15660_v10, 6 }
 0x141   : > { %v12718_v36 = vadd.f32 %v1328_v8, %v12354_v63  ;;  %v12720_v44 = vadd.f32 %v10348_v22, %v1444_v53  ;;  %v3375_v63 = vsel %vm3352_vm6, %v3372_v51, %v3374_v12  ;;  %v15661_v8 = vld [vmem:[#allocation14_spill] sm:$0xff]  ;;  %v3380_v51 = vrot.slane %v12385_v6, 6 }
 0x142   : > { %v10295_v15 = vpop.f32.mrf.mxu0  ;;  %10612 = vmatmul.mubr.msk.f32.gmra.mxu0 %vm389_vm1, %v3369_v43  ;;  %v12723_v32 = vpop.f32.mrf.mxu1  ;;  %v3378_v22 = vrot.slane %v15661_v8, 6 }
 0x143   : > { %15659 = vst [vmem:[#allocation4_spill] sm:$0xff] %v12723_v32  ;;  %v1446_v14 = vadd.f32 %v10295_v15, %v12369_v57  ;;  %10614 = vmatprep.mubr.msk.f32.mxu0 %vm389_vm1, %v3371_v47  ;;  %v3377_v15 = vsel %vm3352_vm6, %v3374_v12, %v3376_v29 }
 0x144   : > { %v1338_v39 = vpop.f32.mrf.mxu0  ;;  %v10354_v21 = vpop.f32.mrf.mxu1  ;;  %v3381_v6 = vsel %vm3352_vm6, %v3378_v22, %v3380_v51 }
 0x145   : > { %v12732_v53 = vadd.f32 %v1338_v39, %v12380_v16  ;;  %v12734_v43 = vadd.f32 %v10351_v0, %v1446_v14  ;;  %v3379_v16 = vsel %vm3352_vm6, %v3376_v29, %v3378_v22  ;;  %v15662_v39 = vld [vmem:[#allocation15_spill] sm:$0xff] }
 0x146   : > { %v10298_v32 = vpop.f32.mrf.mxu0  ;;  %10615 = vmatmul.mubr.msk.f32.gmra.mxu0 %vm389_vm1, %v3373_v49  ;;  %v12737_v57 = vpop.f32.mrf.mxu1  ;;  %v3382_v0 = vrot.slane %v15662_v39, 6 }
 0x147   : > { %v1448_v54 = vadd.f32 %v10298_v32, %v12395_v20  ;;  %10617 = vmatprep.mubr.msk.f32.mxu0 %vm389_vm1, %v3375_v63  ;;  %v15664_v32 = vld [vmem:[#allocation16_spill] sm:$0xff] }
 0x148   : > { %v1348_v47 = vpop.f32.mrf.mxu0  ;;  %v10357_v10 = vpop.f32.mrf.mxu1  ;;  %v3384_v29 = vrot.slane %v15664_v32, 6 }
 0x149   : > { %v12746_v14 = vadd.f32 %v1348_v47, %v12403_v48  ;;  %v12748_v49 = vadd.f32 %v10354_v21, %v1448_v54  ;;  %v3383_v48 = vsel %vm3352_vm6, %v3380_v51, %v3382_v0  ;;  %v15665_v47 = vld [vmem:[#allocation17_spill] sm:$0xff] }
 0x14a   : > { %v10301_v8 = vpop.f32.mrf.mxu0  ;;  %10618 = vmatmul.mubr.msk.f32.gmra.mxu0 %vm389_vm1, %v3377_v15  ;;  %v12751_v20 = vpop.f32.mrf.mxu1  ;;  %v3386_v21 = vrot.slane %v15665_v47, 6 }
 0x14b   : > { %15663 = vst [vmem:[#allocation5_spill] sm:$0xff] %v12751_v20  ;;  %v1450_v12 = vadd.f32 %v10301_v8, %v12418_v56  ;;  %10620 = vmatprep.mubr.msk.f32.mxu0 %vm389_vm1, %v3379_v16  ;;  %v3385_v16 = vsel %vm3352_vm6, %v3382_v0, %v3384_v29  ;;  %v15667_v8 = vld [vmem:[#allocation18_spill] sm:$0xff] }
 0x14c   : > { %v1358_v63 = vpop.f32.mrf.mxu0  ;;  %v10360_v39 = vpop.f32.mrf.mxu1  ;;  %v3388_v51 = vrot.slane %v15667_v8, 6 }
 0x14d   : > { %v12760_v54 = vadd.f32 %v1358_v63, %v12423_v45  ;;  %v12762_v15 = vadd.f32 %v10357_v10, %v1450_v12  ;;  %v3387_v45 = vsel %vm3352_vm6, %v3384_v29, %v3386_v21  ;;  %v15668_v63 = vld [vmem:[#allocation19_spill] sm:$0xff] }
 0x14e   : > { %v10304_v20 = vpop.f32.mrf.mxu0  ;;  %10621 = vmatmul.mubr.msk.f32.gmra.mxu0 %vm389_vm1, %v3381_v6  ;;  %v12765_v56 = vpop.f32.mrf.mxu1  ;;  %v3390_v10 = vrot.slane %v15668_v63, 6 }
 0x14f   : > { %15666 = vst [vmem:[#allocation6_spill] sm:$0xff] %v12765_v56  ;;  %v1452_v22 = vadd.f32 %v10304_v20, %v12438_v17  ;;  %10623 = vmatprep.mubr.msk.f32.mxu0 %vm389_vm1, %v3383_v48  ;;  %v3389_v20 = vsel %vm3352_vm6, %v3386_v21, %v3388_v51  ;;  %v15670_v48 = vld [vmem:[#allocation20_spill] sm:$0xff] }
 0x150   : > { %v1368_v32 = vpop.f32.mrf.mxu0  ;;  %v10363_v47 = vpop.f32.mrf.mxu1  ;;  %v3392_v29 = vrot.slane %v15670_v48, 6 }
 0x151   : > { %v12774_v12 = vadd.f32 %v1368_v32, %v12443_v27  ;;  %v12776_v6 = vadd.f32 %v10360_v39, %v1452_v22  ;;  %v3391_v27 = vsel %vm3352_vm6, %v3388_v51, %v3390_v10  ;;  %v15671_v32 = vld [vmem:[#allocation21_spill] sm:$0xff] }
 0x152   : > { %v10307_v56 = vpop.f32.mrf.mxu0  ;;  %10624 = vmatmul.mubr.msk.f32.gmra.mxu0 %vm389_vm1, %v3385_v16  ;;  %v12779_v17 = vpop.f32.mrf.mxu1  ;;  %v3394_v39 = vrot.slane %v15671_v32, 6 }
 0x153   : > { %15669 = vst [vmem:[#allocation7_spill] sm:$0xff] %v12779_v17  ;;  %v1454_v0 = vadd.f32 %v10307_v56, %v12458_v40  ;;  %10626 = vmatprep.mubr.msk.f32.mxu0 %vm389_vm1, %v3387_v45  ;;  %v3393_v56 = vsel %vm3352_vm6, %v3390_v10, %v3392_v29  ;;  %v15673_v45 = vld [vmem:[#allocation22_spill] sm:$0xff] }
 0x154   : > { %v1378_v8 = vpop.f32.mrf.mxu0  ;;  %v10366_v63 = vpop.f32.mrf.mxu1  ;;  %v3396_v51 = vrot.slane %v15673_v45, 6 }
 0x155   : > { %v12788_v22 = vadd.f32 %v1378_v8, %v12463_v18  ;;  %v12790_v16 = vadd.f32 %v10363_v47, %v1454_v0  ;;  %v3395_v18 = vsel %vm3352_vm6, %v3392_v29, %v3394_v39  ;;  %v15674_v8 = vld [vmem:[#allocation23_spill] sm:$0xff]  ;;  %v3400_v29 = vrot.slane %v12488_v25, 6 }
 0x156   : > { %v10310_v17 = vpop.f32.mrf.mxu0  ;;  %10627 = vmatmul.mubr.msk.f32.gmra.mxu0 %vm389_vm1, %v3389_v20  ;;  %v12793_v40 = vpop.f32.mrf.mxu1  ;;  %v3398_v47 = vrot.slane %v15674_v8, 6 }
 0x157   : > { %15672 = vst [vmem:[#allocation8_spill] sm:$0xff] %v12793_v40  ;;  %v1456_v21 = vadd.f32 %v10310_v17, %v12478_v61  ;;  %10629 = vmatprep.mubr.msk.f32.mxu0 %vm389_vm1, %v3391_v27  ;;  %v3397_v17 = vsel %vm3352_vm6, %v3394_v39, %v3396_v51 }
 0x158   : > { %v1388_v48 = vpop.f32.mrf.mxu0  ;;  %v10369_v32 = vpop.f32.mrf.mxu1  ;;  %v3401_v25 = vsel %vm3352_vm6, %v3398_v47, %v3400_v29 }
 0x159   : > { %v12802_v0 = vadd.f32 %v1388_v48, %v12483_v26  ;;  %v12804_v20 = vadd.f32 %v10366_v63, %v1456_v21  ;;  %v3399_v26 = vsel %vm3352_vm6, %v3396_v51, %v3398_v47  ;;  %v15675_v48 = vld [vmem:[#allocation24_spill] sm:$0xff]  ;;  %v3408_v47 = vrot.slane %v12530_v46, 6 }
 0x15a   : > { %v10313_v40 = vpop.f32.mrf.mxu0  ;;  %10630 = vmatmul.mubr.msk.f32.gmra.mxu0 %vm389_vm1, %v3393_v56  ;;  %v12807_v61 = vpop.f32.mrf.mxu1  ;;  %v3402_v63 = vrot.slane %v15675_v48, 6 }
 0x15b   : > { %v1458_v10 = vadd.f32 %v10313_v40, %v12498_v3  ;;  %10632 = vmatprep.mubr.msk.f32.mxu0 %vm389_vm1, %v3395_v18  ;;  %v3404_v40 = vrot.slane %v12508_v55, 6 }
 0x15c   : > { %v1398_v27 = vpop.f32.mrf.mxu0  ;;  %v10372_v45 = vpop.f32.mrf.mxu1 }
 0x15d   : > { %v12816_v21 = vadd.f32 %v1398_v27, %v12503_v35  ;;  %v12818_v56 = vadd.f32 %v10369_v32, %v1458_v10  ;;  %v3403_v35 = vsel %vm3352_vm6, %v3400_v29, %v3402_v63  ;;  %v15676_v32 = vld [vmem:[#allocation26_spill] sm:$0xff]  ;;  %v3405_v55 = vsel %vm3352_vm6, %v3402_v63, %v3404_v40 }
 0x15e   : > { %v10316_v8 = vpop.f32.mrf.mxu0  ;;  %10633 = vmatmul.mubr.msk.f32.gmra.mxu0 %vm389_vm1, %v3397_v17  ;;  %v12821_v3 = vpop.f32.mrf.mxu1  ;;  %v3406_v10 = vrot.slane %v15676_v32, 6  ;;  %v3412_v63 = vrot.slane %v12552_v24, 6 }
 0x15f   : > { %v1460_v39 = vadd.f32 %v10316_v8, %v12520_v58  ;;  %10635 = vmatprep.mubr.msk.f32.mxu0 %vm389_vm1, %v3399_v26 }
 0x160   : > { %v12827_v51 = vpop.f32.mrf.mxu0  ;;  %v10375_v18 = vpop.f32.mrf.mxu1  ;;  %v3407_v8 = vsel %vm3352_vm6, %v3404_v40, %v3406_v10  ;;  %v3409_v46 = vsel %vm3352_vm6, %v3406_v10, %v3408_v47  ;;  %v3416_v10 = vrot.slane %v12576_v28, 6 }
 0x161   : > { %v12831_v27 = vadd.f32 %v10372_v45, %v1460_v39  ;;  %v15678_v45 = vld [vmem:[#allocation29_spill] sm:$0xff] }
 0x162   : > { %v10319_v17 = vpop.f32.mrf.mxu0  ;;  %10636 = vmatmul.mubr.msk.f32.gmra.mxu0 %vm389_vm1, %v3401_v25  ;;  %v12834_v48 = vpop.f32.mrf.mxu1  ;;  %v3410_v39 = vrot.slane %v15678_v45, 6 }
 0x163   : > { %15677 = vst [vmem:[#allocation9_spill] sm:$0xff] %v12834_v48  ;;  %v1462_v58 = vadd.f32 %v10319_v17, %v12542_v50  ;;  %10638 = vmatprep.mubr.msk.f32.mxu0 %vm389_vm1, %v3403_v35 }
 0x164   : > { %v12840_v26 = vpop.f32.mrf.mxu0  ;;  %v10436_v29 = vpop.f32.mrf.mxu1  ;;  %v3411_v17 = vsel %vm3352_vm6, %v3408_v47, %v3410_v39  ;;  %v3413_v24 = vsel %vm3352_vm6, %v3410_v39, %v3412_v63  ;;  %v3420_v39 = vrot.slane %v12600_v52, 6 }
 0x165   : > { %v12844_v32 = vadd.f32 %v10375_v18, %v1462_v58  ;;  %v15680_v18 = vld [vmem:[#allocation32_spill] sm:$0xff] }
 0x166   : > { %v10380_v25 = vpop.f32.mrf.mxu0  ;;  %10639 = vmatmul.mubr.msk.f32.gmra.mxu0 %vm389_vm1, %v3405_v55  ;;  %v12847_v48 = vpop.f32.mrf.mxu1  ;;  %v3414_v58 = vrot.slane %v15680_v18, 6 }
 0x167   : > { %15679 = vst [vmem:[#allocation10_spill] sm:$0xff] %v12847_v48  ;;  %v2156_v50 = vadd.f32 %v10380_v25, %v12571_v13  ;;  %10641 = vmatprep.mubr.msk.f32.mxu0 %vm389_vm1, %v3407_v8 }
 0x168   : > { %v12853_v35 = vpop.f32.mrf.mxu0  ;;  %v10439_v40 = vpop.f32.mrf.mxu1  ;;  %v3415_v25 = vsel %vm3352_vm6, %v3412_v63, %v3414_v58  ;;  %v3417_v28 = vsel %vm3352_vm6, %v3414_v58, %v3416_v10  ;;  %v3424_v58 = vrot.slane %v12618_v59, 6 }
 0x169   : > { %v12857_v45 = vadd.f32 %v10436_v29, %v2156_v50  ;;  %v3418_v29 = vrot.slane %v12585_v60, 6 }
 0x16a   : > { %v10383_v55 = vpop.f32.mrf.mxu0  ;;  %10642 = vmatmul.mubr.msk.f32.gmra.mxu0 %vm389_vm1, %v3409_v46  ;;  %v12860_v48 = vpop.f32.mrf.mxu1 }
 0x16b   : > { %v2158_v13 = vadd.f32 %v10383_v55, %v12595_v31  ;;  %10644 = vmatprep.mubr.msk.f32.mxu0 %vm389_vm1, %v3411_v17  ;;  %v3419_v60 = vsel %vm3352_vm6, %v3416_v10, %v3418_v29  ;;  %v3421_v52 = vsel %vm3352_vm6, %v3418_v29, %v3420_v39 }
 0x16c   : > { %v12866_v8 = vpop.f32.mrf.mxu0  ;;  %v10442_v47 = vpop.f32.mrf.mxu1 }
 0x16d   : > { %v12870_v50 = vadd.f32 %v10439_v40, %v2158_v13  ;;  %v3422_v40 = vrot.slane %v12604_v4, 6 }
 0x16e   : > { %v10386_v46 = vpop.f32.mrf.mxu0  ;;  %10645 = vmatmul.mubr.msk.f32.gmra.mxu0 %vm389_vm1, %v3413_v24  ;;  %v12873_v18 = vpop.f32.mrf.mxu1 }
 0x16f   : > { %15681 = vst [vmem:[#allocation11_spill] sm:$0xff] %v12873_v18  ;;  %v2160_v31 = vadd.f32 %v10386_v46, %v12623_v23  ;;  %10647 = vmatprep.mubr.msk.f32.mxu0 %vm389_vm1, %v3415_v25  ;;  %v3423_v4 = vsel %vm3352_vm6, %v3420_v39, %v3422_v40  ;;  %v3425_v29 = vsel %vm3352_vm6, %v3422_v40, %v3424_v58 }
 0x170   : > { %v12879_v17 = vpop.f32.mrf.mxu0  ;;  %v10445_v63 = vpop.f32.mrf.mxu1 }
 0x171   : > { %v12883_v55 = vadd.f32 %v10442_v47, %v2160_v31 }
 0x172   : > { %v10389_v13 = vpop.f32.mrf.mxu0  ;;  %10648 = vmatmul.mubr.msk.f32.gmra.mxu0 %vm389_vm1, %v3417_v28  ;;  %v12886_v24 = vpop.f32.mrf.mxu1 }
 0x173   : > { %15682 = vst [vmem:[#allocation12_spill] sm:$0xff] %v12886_v24  ;;  %v2162_v23 = vadd.f32 %v10389_v13, %v12646_v38  ;;  %10650 = vmatprep.mubr.msk.f32.mxu0 %vm389_vm1, %v3419_v60 }
 0x174   : > { %v12892_v25 = vpop.f32.mrf.mxu0  ;;  %v10448_v10 = vpop.f32.mrf.mxu1 }
 0x175   : > { %v12895_v47 = vadd.f32 %v10445_v63, %v2162_v23 }
 0x176   : > { %v10392_v46 = vpop.f32.mrf.mxu0  ;;  %10651 = vmatmul.mubr.msk.f32.gmra.mxu0 %vm389_vm1, %v3421_v52  ;;  %v12898_v31 = vpop.f32.mrf.mxu1 }
 0x177   : > { %15683 = vst [vmem:[#allocation13_spill] sm:$0xff] %v12898_v31  ;;  %v2164_v38 = vadd.f32 %v10392_v46, %v12664_v41  ;;  %10653 = vmatprep.mubr.msk.f32.mxu0 %vm389_vm1, %v3423_v4 }
 0x178   : > { %v12903_v28 = vpop.f32.mrf.mxu0  ;;  %v10451_v59 = vpop.f32.mrf.mxu1 }
 0x179   : > { %v12905_v60 = vadd.f32 %v10448_v10, %v2164_v38 }
 0x17a   : > { %v10395_v13 = vpop.f32.mrf.mxu0  ;;  %10654 = vmatmul.mubr.msk.f32.gmra.mxu0 %vm389_vm1, %v3425_v29  ;;  %v12908_v39 = vpop.f32.mrf.mxu1 }
 0x17b   : > { %15684 = vst [vmem:[#allocation14_spill] sm:$0xff] %v12908_v39  ;;  %v2166_v63 = vadd.f32 %v10395_v13, %v12678_v11 }
 0x17c   : > { %v12911_v23 = vpop.f32.mrf.mxu0  ;;  %v10454_v52 = vpop.f32.mrf.mxu1 }
 0x17d   : > { %v12913_v41 = vadd.f32 %v10451_v59, %v2166_v63 }
 0x17e   : > { %v10398_v4 = vpop.f32.mrf.mxu0  ;;  %v12915_v46 = vpop.f32.mrf.mxu1 }
 0x17f   : > { %15685 = vst [vmem:[#allocation15_spill] sm:$0xff] %v12915_v46  ;;  %v2168_v40 = vadd.f32 %v10398_v4, %v12692_v19 }
 0x180   : > { %v12918_v58 = vpop.f32.mrf.mxu0  ;;  %v10457_v10 = vpop.f32.mrf.mxu1 }
 0x181   : > { %v12920_v38 = vadd.f32 %v10454_v52, %v2168_v40 }
 0x182   : > { %v10401_v29 = vpop.f32.mrf.mxu0  ;;  %v12922_v31 = vpop.f32.mrf.mxu1 }
 0x183   : > { %15686 = vst [vmem:[#allocation16_spill] sm:$0xff] %v12922_v31  ;;  %v2170_v11 = vadd.f32 %v10401_v29, %v12706_v2 }
 0x184   : > { %v12925_v13 = vpop.f32.mrf.mxu0  ;;  %v10460_v39 = vpop.f32.mrf.mxu1 }
 0x185   : > { %15687 = vst [vmem:[#allocation17_spill] sm:$0xff] %v12925_v13  ;;  %v12927_v59 = vadd.f32 %v10457_v10, %v2170_v11 }
 0x186   : > { %v10404_v63 = vpop.f32.mrf.mxu0  ;;  %v12929_v24 = vpop.f32.mrf.mxu1 }
 0x187   : > { %15688 = vst [vmem:[#allocation18_spill] sm:$0xff] %v12929_v24  ;;  %v2172_v19 = vadd.f32 %v10404_v63, %v12720_v44 }
 0x188   : > { %v12932_v4 = vpop.f32.mrf.mxu0  ;;  %v10463_v46 = vpop.f32.mrf.mxu1 }
 0x189   : > { %15689 = vst [vmem:[#allocation19_spill] sm:$0xff] %v12932_v4  ;;  %v12934_v52 = vadd.f32 %v10460_v39, %v2172_v19 }
 0x18a   : > { %v10407_v40 = vpop.f32.mrf.mxu0  ;;  %v12936_v18 = vpop.f32.mrf.mxu1 }
 0x18b   : > { %15690 = vst [vmem:[#allocation20_spill] sm:$0xff] %v12936_v18  ;;  %v2174_v2 = vadd.f32 %v10407_v40, %v12734_v43 }
 0x18c   : > { %v12939_v29 = vpop.f32.mrf.mxu0  ;;  %v10466_v31 = vpop.f32.mrf.mxu1 }
 0x18d   : > { %15691 = vst [vmem:[#allocation21_spill] sm:$0xff] %v12939_v29  ;;  %v12941_v10 = vadd.f32 %v10463_v46, %v2174_v2 }
 0x18e   : > { %v10410_v11 = vpop.f32.mrf.mxu0  ;;  %v12943_v13 = vpop.f32.mrf.mxu1 }
 0x18f   : > { %15692 = vst [vmem:[#allocation22_spill] sm:$0xff] %v12943_v13  ;;  %v2176_v44 = vadd.f32 %v10410_v11, %v12748_v49 }
 0x190   : > { %v12946_v63 = vpop.f32.mrf.mxu0  ;;  %v10469_v24 = vpop.f32.mrf.mxu1 }
 0x191   : > { %15693 = vst [vmem:[#allocation23_spill] sm:$0xff] %v12946_v63  ;;  %v12948_v39 = vadd.f32 %v10466_v31, %v2176_v44 }
 0x192   : > { %v10413_v19 = vpop.f32.mrf.mxu0  ;;  %v12950_v4 = vpop.f32.mrf.mxu1 }
 0x193   : > { %15694 = vst [vmem:[#allocation24_spill] sm:$0xff] %v12950_v4  ;;  %v2178_v43 = vadd.f32 %v10413_v19, %v12762_v15 }
 0x194   : > { %v12953_v40 = vpop.f32.mrf.mxu0  ;;  %v10472_v18 = vpop.f32.mrf.mxu1 }
 0x195   : > { %15695 = vst [vmem:[#allocation26_spill] sm:$0xff] %v12953_v40  ;;  %v12955_v46 = vadd.f32 %v10469_v24, %v2178_v43 }
 0x196   : > { %v10416_v2 = vpop.f32.mrf.mxu0  ;;  %v12957_v29 = vpop.f32.mrf.mxu1 }
 0x197   : > { %15696 = vst [vmem:[#allocation29_spill] sm:$0xff] %v12957_v29  ;;  %v2180_v49 = vadd.f32 %v10416_v2, %v12776_v6 }
 0x198   : > { %v12960_v11 = vpop.f32.mrf.mxu0  ;;  %v10475_v13 = vpop.f32.mrf.mxu1 }
 0x199   : > { %15697 = vst [vmem:[#allocation32_spill] sm:$0xff] %v12960_v11  ;;  %v12962_v31 = vadd.f32 %v10472_v18, %v2180_v49 }
 0x19a   : > { %v10419_v44 = vpop.f32.mrf.mxu0  ;;  %v12964_v63 = vpop.f32.mrf.mxu1 }
 0x19b   : > { %15698 = vst [vmem:[#allocation38_spill] sm:$0xff] %v12964_v63  ;;  %v2182_v15 = vadd.f32 %v10419_v44, %v12790_v16 }
 0x19c   : > { %v12967_v19 = vpop.f32.mrf.mxu0  ;;  %v10478_v4 = vpop.f32.mrf.mxu1 }
 0x19d   : > { %15699 = vst [vmem:[#allocation39_spill] sm:$0xff] %v12967_v19  ;;  %v12969_v24 = vadd.f32 %v10475_v13, %v2182_v15 }
 0x19e   : > { %v10422_v43 = vpop.f32.mrf.mxu0  ;;  %v12971_v40 = vpop.f32.mrf.mxu1 }
 0x19f   : > { %15700 = vst [vmem:[#allocation40_spill] sm:$0xff] %v12971_v40  ;;  %v2184_v6 = vadd.f32 %v10422_v43, %v12804_v20 }
 0x1a0   : > { %v12974_v2 = vpop.f32.mrf.mxu0  ;;  %v10481_v29 = vpop.f32.mrf.mxu1 }
 0x1a1   : > { %15701 = vst [vmem:[#allocation41_spill] sm:$0xff] %v12974_v2  ;;  %v12976_v18 = vadd.f32 %v10478_v4, %v2184_v6 }
 0x1a2   : > { %v10425_v49 = vpop.f32.mrf.mxu0  ;;  %v12978_v11 = vpop.f32.mrf.mxu1 }
 0x1a3   : > { %15702 = vst [vmem:[#allocation42_spill] sm:$0xff] %v12978_v11  ;;  %v2186_v16 = vadd.f32 %v10425_v49, %v12818_v56 }
 0x1a4   : > { %v12981_v44 = vpop.f32.mrf.mxu0  ;;  %v10484_v63 = vpop.f32.mrf.mxu1 }
 0x1a5   : > { %v12983_v13 = vadd.f32 %v10481_v29, %v2186_v16 }
 0x1a6   : > { %v10428_v15 = vpop.f32.mrf.mxu0  ;;  %v12985_v19 = vpop.f32.mrf.mxu1 }
 0x1a7   : > { %15703 = vst [vmem:[#allocation43_spill] sm:$0xff] %v12985_v19  ;;  %v2188_v20 = vadd.f32 %v10428_v15, %v12831_v27 }
 0x1a8   : > { %v12988_v43 = vpop.f32.mrf.mxu0  ;;  %v10487_v40 = vpop.f32.mrf.mxu1 }
 0x1a9   : > { %v12990_v4 = vadd.f32 %v10484_v63, %v2188_v20 }
 0x1aa   : > { %v10431_v6 = vpop.f32.mrf.mxu0  ;;  %v12992_v2 = vpop.f32.mrf.mxu1 }
 0x1ab   : > { %15704 = vst [vmem:[#allocation44_spill] sm:$0xff] %v12992_v2  ;;  %v2190_v56 = vadd.f32 %v10431_v6, %v12844_v32 }
 0x1ac   : > { %v12995_v49 = vpop.f32.mrf.mxu0  ;;  %v12997_v11 = vpop.f32.mrf.mxu1 }
 0x1ad   : > { %15705 = vst [vmem:[#allocation45_spill] sm:$0xff] %v12997_v11  ;;  %v12999_v29 = vadd.f32 %v10487_v40, %v2190_v56 }
 0x1ae   : > { %v10492_v16 = vpop.f32.mrf.mxu0  ;;  %v13006_v15 = vpop.f32.mrf.mxu1 }
 0x1af   : > { %v13002_v19 = vadd.f32 %v10492_v16, %v12857_v45  ;;  %15706 = vst [vmem:[#allocation46_spill] sm:$0xff] %v13006_v15 }
 0x1b0   : > { %v13004_v27 = vpop.f32.mrf.mxu0  ;;  %v13013_v32 = vpop.f32.mrf.mxu1 }
 0x1b1   : > { %15708 = vst [vmem:[#allocation48_spill] sm:$0xff] %v13013_v32 }
 0x1b2   : > { %v10495_v63 = vpop.f32.mrf.mxu0  ;;  %v13018_v56 = vpop.f32.mrf.mxu1 }
 0x1b3   : > { %v13009_v20 = vadd.f32 %v10495_v63, %v12870_v50  ;;  %15710 = vst [vmem:[#allocation50_spill] sm:$0xff] %v13018_v56 }
 0x1b4   : > { %v13011_v2 = vpop.f32.mrf.mxu0  ;;  %v13025_v15 = vpop.f32.mrf.mxu1 }
 0x1b5   : > { %15707 = vst [vmem:[#allocation47_spill] sm:$0xff] %v13009_v20  ;;  %15712 = vst [vmem:[#allocation52_spill] sm:$0xff] %v13025_v15 }
 0x1b6   : > { %v10498_v6 = vpop.f32.mrf.mxu0  ;;  %v13032_v32 = vpop.f32.mrf.mxu1 }
 0x1b7   : > { %v13016_v40 = vadd.f32 %v10498_v6, %v12883_v55  ;;  %15714 = vst [vmem:[#allocation54_spill] sm:$0xff] %v13032_v32 }
 0x1b8   : > { %v13020_v45 = vpop.f32.mrf.mxu0  ;;  %v13039_v56 = vpop.f32.mrf.mxu1 }
 0x1b9   : > { %15709 = vst [vmem:[#allocation49_spill] sm:$0xff] %v13016_v40  ;;  %15716 = vst [vmem:[#allocation56_spill] sm:$0xff] %v13039_v56 }
 0x1ba   : > { %v10501_v16 = vpop.f32.mrf.mxu0  ;;  %v13046_v15 = vpop.f32.mrf.mxu1 }
 0x1bb   : > { %v13023_v11 = vadd.f32 %v10501_v16, %v12895_v47  ;;  %15718 = vst [vmem:[#allocation58_spill] sm:$0xff] %v13046_v15 }
 0x1bc   : > { %v13027_v50 = vpop.f32.mrf.mxu0  ;;  %v13053_v32 = vpop.f32.mrf.mxu1 }
 0x1bd   : > { %15711 = vst [vmem:[#allocation51_spill] sm:$0xff] %v13023_v11  ;;  %15720 = vst [vmem:[#allocation60_spill] sm:$0xff] %v13053_v32  ;;  %v15752_v32 = vld [vmem:[#allocation31_spill] sm:$0xff] }
 0x1be   : > { %v10504_v63 = vpop.f32.mrf.mxu0  ;;  %v13060_v56 = vpop.f32.mrf.mxu1 }
 0x1bf   : > { %v13030_v20 = vadd.f32 %v10504_v63, %v12905_v60  ;;  %15723 = vst [vmem:[#allocation63_spill] sm:$0xff] %v13060_v56 }
 0x1c0   : > { %v13034_v55 = vpop.f32.mrf.mxu0  ;;  %v13067_v15 = vpop.f32.mrf.mxu1 }
 0x1c1   : > { %15713 = vst [vmem:[#allocation53_spill] sm:$0xff] %v13030_v20  ;;  %15726 = vst [vmem:[#allocation66_spill] sm:$0xff] %v13067_v15 }
 0x1c2   : > { %v10507_v6 = vpop.f32.mrf.mxu0 }
 0x1c3   : > { %v13037_v40 = vadd.f32 %v10507_v6, %v12913_v41 }
 0x1c4   : > { %v13041_v47 = vpop.f32.mrf.mxu0 }
 0x1c5   : > { %15715 = vst [vmem:[#allocation55_spill] sm:$0xff] %v13037_v40 }
 0x1c6   : > { %v10510_v16 = vpop.f32.mrf.mxu0 }
 0x1c7   : > { %v13044_v11 = vadd.f32 %v10510_v16, %v12920_v38 }
 0x1c8   : > { %v13048_v60 = vpop.f32.mrf.mxu0 }
 0x1c9   : > { %15717 = vst [vmem:[#allocation57_spill] sm:$0xff] %v13044_v11 }
 0x1ca   : > { %v10513_v63 = vpop.f32.mrf.mxu0 }
 0x1cb   : > { %v13051_v20 = vadd.f32 %v10513_v63, %v12927_v59 }
 0x1cc   : > { %v13055_v41 = vpop.f32.mrf.mxu0 }
 0x1cd   : > { %15719 = vst [vmem:[#allocation59_spill] sm:$0xff] %v13051_v20  ;;  %15721 = vst [vmem:[#allocation61_spill] sm:$0xff] %v13055_v41  ;;  %v13071_v20 = vpop.permute.xlu0 %3784  ;;  %v13073_v41 = vpop.permute.xlu1 %3794 }
 0x1ce   : > { %v10516_v6 = vpop.f32.mrf.mxu0  ;;  %15728 = vst [vmem:[#allocation68_spill] sm:$0xff] %v13071_v20  ;;  %15729 = vst [vmem:[#allocation69_spill] sm:$0xff] %v13073_v41  ;;  %v15753_v20 = vld [vmem:[#allocation35_spill] sm:$0xff] }
 0x1cf   : > { %v13058_v40 = vadd.f32 %v10516_v6, %v12934_v52  ;;  %v13078_v6 = vpop.f32.mrf.mxu1 }
 0x1d0   : > { %v13062_v38 = vpop.f32.mrf.mxu0  ;;  %15731 = vst [vmem:[#allocation71_spill] sm:$0xff] %v13078_v6 }
 0x1d1   : > { %15722 = vst [vmem:[#allocation62_spill] sm:$0xff] %v13058_v40  ;;  %15724 = vst [vmem:[#allocation64_spill] sm:$0xff] %v13062_v38  ;;  %v13091_v15 = vpop.permute.xlu1 %3799 }
 0x1d2   : > { %v10519_v16 = vpop.f32.mrf.mxu0  ;;  %15737 = vst [vmem:[#allocation77_spill] sm:$0xff] %v13091_v15  ;;  %v15750_v15 = vld [vmem:[#allocation28_spill] sm:$0xff] }
 0x1d3   : > { %v13065_v11 = vadd.f32 %v10519_v16, %v12941_v10  ;;  %v13085_v16 = vpop.f32.mrf.mxu1 }
 0x1d4   : > { %v13069_v59 = vpop.f32.mrf.mxu0  ;;  %15734 = vst [vmem:[#allocation74_spill] sm:$0xff] %v13085_v16 }
 0x1d5   : > { %15725 = vst [vmem:[#allocation65_spill] sm:$0xff] %v13065_v11  ;;  %15727 = vst [vmem:[#allocation67_spill] sm:$0xff] %v13069_v59  ;;  %v13089_v59 = vpop.permute.xlu0 %3789 }
 0x1d6   : > { %v10522_v63 = vpop.f32.mrf.mxu0  ;;  %15736 = vst [vmem:[#allocation76_spill] sm:$0xff] %v13089_v59 }
 0x1d7   : > { %v13076_v52 = vadd.f32 %v10522_v63, %v12948_v39  ;;  %v13096_v63 = vpop.f32.mrf.mxu1 }
 0x1d8   : > { %v13080_v40 = vpop.f32.mrf.mxu0  ;;  %15739 = vst [vmem:[#allocation79_spill] sm:$0xff] %v13096_v63 }
 0x1d9   : > { %15730 = vst [vmem:[#allocation70_spill] sm:$0xff] %v13076_v52  ;;  %15732 = vst [vmem:[#allocation72_spill] sm:$0xff] %v13080_v40  ;;  %v13100_v6 = vpop.permute.xlu0 %3804 }
 0x1da   : > { %v10525_v38 = vpop.f32.mrf.mxu0  ;;  %15741 = vst [vmem:[#allocation81_spill] sm:$0xff] %v13100_v6  ;;  %v15751_v6 = vld [vmem:[#allocation33_spill] sm:$0xff] }
 0x1db   : > { %v13083_v10 = vadd.f32 %v10525_v38, %v12955_v46  ;;  %v13102_v46 = vpop.permute.xlu1 %3809 }
 0x1dc   : > { %v13087_v11 = vpop.f32.mrf.mxu0  ;;  %15742 = vst [vmem:[#allocation82_spill] sm:$0xff] %v13102_v46  ;;  %v1723_v46 = vadd.f32 %v15752_v32, %v15751_v6  ;;  %v1737_v6 = vadd.f32 %v12695_v34, %v12704_v30 }
 0x1dd   : > { %15733 = vst [vmem:[#allocation73_spill] sm:$0xff] %v13083_v10  ;;  %15735 = vst [vmem:[#allocation75_spill] sm:$0xff] %v13087_v11  ;;  %v13107_v10 = vpop.f32.mrf.mxu1  ;;  %v13134_v32 = vpop.permute.xlu0 %3814 }
 0x1de   : > { %v10528_v41 = vpop.f32.mrf.mxu0  ;;  %15744 = vst [vmem:[#allocation84_spill] sm:$0xff] %v13107_v10 }
 0x1df   : > { %v13094_v39 = vadd.f32 %v10528_v41, %v12962_v31  ;;  %v15747_v41 = vld [vmem:[#allocation27_spill] sm:$0xff] }
 0x1e0   : > { %v13098_v52 = vpop.f32.mrf.mxu0  ;;  %15757 = vst [vmem:[#allocation27_spill] sm:$0xff] %v13134_v32 }
 0x1e1   : > { %15738 = vst [vmem:[#allocation78_spill] sm:$0xff] %v13094_v39  ;;  %15740 = vst [vmem:[#allocation80_spill] sm:$0xff] %v13098_v52  ;;  %v15748_v39 = vld [vmem:[#allocation25_spill] sm:$0xff]  ;;  %v15749_v52 = vld [vmem:[#allocation30_spill] sm:$0xff] }
 0x1e2   : > { %v10531_v40 = vpop.f32.mrf.mxu0  ;;  %v1013_v63 = vadd.f32 %v15748_v39, %v15747_v41  ;;  %v1023_v56 = vadd.f32 %v15750_v15, %v15749_v52  ;;  %v1731_v39 = vadd.f32 %v12652_v1, %v12662_v9  ;;  %v1733_v15 = vadd.f32 %v12667_v33, %v12676_v37  ;;  %v13136_v52 = vpop.permute.xlu1 %3819 }
 0x1e3   : > { %v13105_v38 = vadd.f32 %v10531_v40, %v12969_v24  ;;  %v15754_v24 = vld [vmem:[#allocation34_spill] sm:$0xff]  ;;  %15758 = vst [vmem:[#allocation25_spill] sm:$0xff] %v13136_v52  ;;  %v2155_v37 = vadd.f32 %v12853_v35, %v1723_v46 }
 0x1e4   : > { %v13109_v11 = vpop.f32.mrf.mxu0  ;;  %v1725_v40 = vadd.f32 %v15754_v24, %v15753_v20  ;;  %v1735_v20 = vadd.f32 %v12681_v5, %v12690_v42  ;;  %v1459_v9 = vadd.f32 %v12827_v51, %v1013_v63  ;;  %v1461_v33 = vadd.f32 %v12840_v26, %v1023_v56  ;;  %v15761_v42 = vld [vmem:[#allocation5_spill] sm:$0xff]  ;;  %v15762_v26 = vld [vmem:[#allocation6_spill] sm:$0xff] }
 0x1e5   : > { %15743 = vst [vmem:[#allocation83_spill] sm:$0xff] %v13105_v38  ;;  %15745 = vst [vmem:[#allocation85_spill] sm:$0xff] %v13109_v11  ;;  %v13122_v38 = vpop.f32.mrf.mxu1  ;;  %v15755_v11 = vld [vmem:[#allocation36_spill] sm:$0xff]  ;;  %v1743_v5 = vadd.f32 %v12737_v57, %v12746_v14  ;;  %v1745_v34 = vadd.f32 %v15761_v42, %v12760_v54  ;;  %v1747_v35 = vadd.f32 %v15762_v26, %v12774_v12 }
 0x1e6   : > { %v10534_v16 = vpop.f32.mrf.mxu0  ;;  %v2157_v30 = vadd.f32 %v12866_v8, %v1725_v40  ;;  %v2163_v57 = vadd.f32 %v12903_v28, %v1731_v39  ;;  %v15764_v14 = vld [vmem:[#allocation8_spill] sm:$0xff]  ;;  %v1753_v8 = vadd.f32 %v12807_v61, %v12816_v21  ;;  %v2167_v46 = vadd.f32 %v12918_v58, %v1735_v20  ;;  %v13179_v28 = vpop.permute.xlu1 %3829  ;;  %v15769_v21 = vld [vmem:[#allocation11_spill] sm:$0xff] }
 0x1e7   : > { %v13112_v31 = vadd.f32 %v10534_v16, %v12976_v18  ;;  %v1727_v18 = vadd.f32 %v15755_v11, %v12621_v7  ;;  %v15756_v16 = vld [vmem:[#allocation37_spill] sm:$0xff]  ;;  %v15759_v7 = vld [vmem:[#allocation3_spill] sm:$0xff]  ;;  %v1751_v54 = vadd.f32 %v15764_v14, %v12802_v0  ;;  %v1755_v12 = vadd.f32 %v12821_v3, %v1459_v9  ;;  %15768 = vst [vmem:[#allocation28_spill] sm:$0xff] %v13179_v28  ;;  %v15778_v14 = vld [vmem:[#allocation26_spill] sm:$0xff] }
 0x1e8   : > { %v13124_v10 = vpop.f32.mrf.mxu0  ;;  %v1739_v11 = vadd.f32 %v15759_v7, %v12718_v36  ;;  %v2588_v61 = vadd.f32 %v12860_v48, %v2157_v30  ;;  %v15771_v39 = vld [vmem:[#allocation19_spill] sm:$0xff]  ;;  %v15773_v9 = vld [vmem:[#allocation13_spill] sm:$0xff] }
 0x1e9   : > { %15746 = vst [vmem:[#allocation86_spill] sm:$0xff] %v13112_v31  ;;  %v1729_v31 = vadd.f32 %v15756_v16, %v12644_v62  ;;  %v15760_v62 = vld [vmem:[#allocation4_spill] sm:$0xff]  ;;  %v2159_v36 = vadd.f32 %v12879_v17, %v1727_v18  ;;  %v2165_v17 = vadd.f32 %v12911_v23, %v1733_v15  ;;  %v15765_v18 = vld [vmem:[#allocation9_spill] sm:$0xff]  ;;  %v15777_v30 = vld [vmem:[#allocation15_spill] sm:$0xff] }
 0x1ea   : > { %v1741_v41 = vadd.f32 %v15760_v62, %v12732_v53  ;;  %v10537_v1 = vpop.f32.mrf.mxu0  ;;  %v13158_v53 = vpop.f32.mrf.mxu1  ;;  %v1757_v16 = vadd.f32 %v15765_v18, %v1461_v33  ;;  %v2171_v15 = vadd.f32 %v15771_v39, %v1739_v11  ;;  %v15772_v62 = vld [vmem:[#allocation12_spill] sm:$0xff]  ;;  %v2594_v33 = vadd.f32 %v15773_v9, %v2163_v57 }
 0x1eb   : > { %v13150_v24 = vadd.f32 %v10537_v1, %v12983_v13  ;;  %v15763_v13 = vld [vmem:[#allocation7_spill] sm:$0xff]  ;;  %v2161_v63 = vadd.f32 %v12892_v25, %v1729_v31  ;;  %v13177_v25 = vpop.permute.xlu0 %3824  ;;  %v2590_v23 = vadd.f32 %v15769_v21, %v2159_v36  ;;  %v15770_v31 = vld [vmem:[#allocation17_spill] sm:$0xff]  ;;  %v2598_v36 = vadd.f32 %v15777_v30, %v2167_v46  ;;  %v15793_v30 = vld [vmem:[#allocation38_spill] sm:$0xff] }
 0x1ec   : > { %v13160_v51 = vpop.f32.mrf.mxu0  ;;  %v1749_v56 = vadd.f32 %v15763_v13, %v12788_v22  ;;  %v15766_v22 = vld [vmem:[#allocation10_spill] sm:$0xff]  ;;  %15767 = vst [vmem:[#allocation30_spill] sm:$0xff] %v13177_v25  ;;  %v2169_v58 = vadd.f32 %v15770_v31, %v1737_v6  ;;  %v13188_v3 = vpop.f32.mrf.mxu1  ;;  %v2177_v6 = vadd.f32 %v15778_v14, %v1745_v34  ;;  %v15781_v31 = vld [vmem:[#allocation41_spill] sm:$0xff]  ;;  %v2185_v46 = vadd.f32 %v12981_v44, %v1753_v8 }
 0x1ed   : > { %v2586_v7 = vadd.f32 %v15766_v22, %v2155_v37  ;;  %v2592_v1 = vadd.f32 %v15772_v62, %v2161_v63  ;;  %v15774_v37 = vld [vmem:[#allocation21_spill] sm:$0xff]  ;;  %v15776_v13 = vld [vmem:[#allocation14_spill] sm:$0xff]  ;;  %v15780_v22 = vld [vmem:[#allocation39_spill] sm:$0xff]  ;;  %v2183_v39 = vadd.f32 %v15781_v31, %v1751_v54  ;;  %v2187_v34 = vadd.f32 %v12988_v43, %v1755_v12  ;;  %v13225_v44 = vpop.permute.xlu1 %3839 }
 0x1ee   : > { %v10540_v40 = vpop.f32.mrf.mxu0  ;;  %v2173_v42 = vadd.f32 %v15774_v37, %v1741_v41  ;;  %v2596_v48 = vadd.f32 %v15776_v13, %v2165_v17  ;;  %v2181_v21 = vadd.f32 %v15780_v22, %v1749_v56  ;;  %v15783_v41 = vld [vmem:[#allocation16_spill] sm:$0xff]  ;;  %v15784_v62 = vld [vmem:[#allocation18_spill] sm:$0xff]  ;;  %v13210_v9 = vpop.f32.mrf.mxu1  ;;  %15790 = vst [vmem:[#allocation34_spill] sm:$0xff] %v13225_v44  ;;  %v15792_v12 = vld [vmem:[#allocation29_spill] sm:$0xff] }
 0x1ef   : > { %v13182_v0 = vadd.f32 %v10540_v40, %v12990_v4  ;;  %v15775_v4 = vld [vmem:[#allocation23_spill] sm:$0xff]  ;;  %v15779_v40 = vld [vmem:[#allocation32_spill] sm:$0xff]  ;;  %v2882_v63 = vadd.f32 %v13004_v27, %v2586_v7  ;;  %v2602_v17 = vadd.f32 %v15784_v62, %v2171_v15  ;;  %v15787_v54 = vld [vmem:[#allocation22_spill] sm:$0xff]  ;;  %v13223_v15 = vpop.permute.xlu0 %3834 }
 0x1f0   : > { %v13190_v20 = vpop.f32.mrf.mxu0  ;;  %v2175_v26 = vadd.f32 %v15775_v4, %v1743_v5  ;;  %v2179_v11 = vadd.f32 %v15779_v40, %v1747_v35  ;;  %v2600_v5 = vadd.f32 %v15783_v41, %v2169_v58  ;;  %v15786_v56 = vld [vmem:[#allocation20_spill] sm:$0xff]  ;;  %v15788_v7 = vld [vmem:[#allocation45_spill] sm:$0xff]  ;;  %15789 = vst [vmem:[#allocation35_spill] sm:$0xff] %v13223_v15  ;;  %v15795_v14 = vld [vmem:[#allocation46_spill] sm:$0xff] }
 0x1f1   : > { %v13215_v37 = vadd.f32 %v15786_v56, %v2173_v42  ;;  %v3315_v58 = vadd.f32 %v15788_v7, %v13002_v19  ;;  %v15791_v43 = vld [vmem:[#allocation24_spill] sm:$0xff]  ;;  %v2884_v42 = vadd.f32 %v13011_v2, %v2588_v61  ;;  %v3314_v40 = vadd.f32 %v15795_v14, %v2882_v63  ;;  %v13252_v61 = vpop.f32.mrf.mxu1  ;;  %v15800_v41 = vld [vmem:[#allocation47_spill] sm:$0xff]  ;;  %v15804_v7 = vld [vmem:[#allocation49_spill] sm:$0xff] }
 0x1f2   : > { %v10543_v18 = vpop.f32.mrf.mxu0  ;;  %v13218_v27 = vadd.f32 %v15787_v54, %v2175_v26  ;;  %v13228_v8 = vadd.f32 %v15791_v43, %v2177_v6  ;;  %v13231_v4 = vadd.f32 %v15792_v12, %v2179_v11  ;;  %v2886_v26 = vadd.f32 %v13020_v45, %v2590_v23  ;;  %v15797_v6 = vld [vmem:[#allocation42_spill] sm:$0xff]  ;;  %v15798_v11 = vld [vmem:[#allocation43_spill] sm:$0xff]  ;;  %v15801_v63 = vld [vmem:[#allocation48_spill] sm:$0xff] }
 0x1f3   : > { %v13204_v57 = vadd.f32 %v10543_v18, %v12999_v29  ;;  %v2189_v29 = vadd.f32 %v12995_v49, %v1757_v16  ;;  %v13236_v49 = vadd.f32 %v15793_v30, %v2181_v21  ;;  %v15794_v16 = vld [vmem:[#allocation40_spill] sm:$0xff]  ;;  %v13245_v22 = vadd.f32 %v15797_v6, %v2185_v46  ;;  %v15803_v54 = vld [vmem:[#allocation50_spill] sm:$0xff]  ;;  %v15814_v6 = vld [vmem:[#allocation53_spill] sm:$0xff] }
 0x1f4   : > { %v13212_v35 = vpop.f32.mrf.mxu0  ;;  %v13239_v19 = vadd.f32 %v15794_v16, %v2183_v39  ;;  %v13248_v31 = vadd.f32 %v15798_v11, %v2187_v34  ;;  %v2888_v2 = vadd.f32 %v13027_v50, %v2592_v1  ;;  %v2890_v45 = vadd.f32 %v13034_v55, %v2594_v33  ;;  %v15799_v21 = vld [vmem:[#allocation44_spill] sm:$0xff]  ;;  %v15806_v1 = vld [vmem:[#allocation54_spill] sm:$0xff]  ;;  %v13271_v16 = vpop.permute.xlu0 %3844 }
 0x1f5   : > { %15782 = vst [vmem:[#allocation33_spill] sm:$0xff] %v13204_v57  ;;  %15785 = vst [vmem:[#allocation31_spill] sm:$0xff] %v13212_v35  ;;  %v13255_v39 = vadd.f32 %v15799_v21, %v2189_v29  ;;  %v3317_v62 = vadd.f32 %v15801_v63, %v15800_v41  ;;  %v2892_v56 = vadd.f32 %v13041_v47, %v2596_v48  ;;  %v15807_v29 = vld [vmem:[#allocation51_spill] sm:$0xff]  ;;  %v15808_v12 = vld [vmem:[#allocation56_spill] sm:$0xff]  ;;  %v13273_v47 = vpop.permute.xlu1 %3849 }
 0x1f6   : > { %v10604_v13 = vpop.f32.mrf.mxu0  ;;  %v3316_v34 = vadd.f32 %v15803_v54, %v2884_v42  ;;  %v3318_v55 = vadd.f32 %v15806_v1, %v2886_v26  ;;  %v2894_v30 = vadd.f32 %v13048_v60, %v2598_v36  ;;  %15809 = vst [vmem:[#allocation3_spill] sm:$0xff] %v13271_v16  ;;  %15810 = vst [vmem:[#allocation4_spill] sm:$0xff] %v13273_v47  ;;  %v15811_v48 = vld [vmem:[#allocation68_spill] sm:$0xff]  ;;  %v15816_v21 = vld [vmem:[#allocation63_spill] sm:$0xff]  ;;  %v13286_v60 = vpop.f32.mrf.mxu1 }
 0x1f7   : > { %v13242_v18 = vadd.f32 %v10604_v13, %v3315_v58  ;;  %v15805_v58 = vld [vmem:[#allocation52_spill] sm:$0xff]  ;;  %v3321_v13 = vadd.f32 %v15808_v12, %v15807_v29  ;;  %v13283_v41 = vadd.f32 %v15816_v21, %v2890_v45  ;;  %v15817_v63 = vld [vmem:[#allocation61_spill] sm:$0xff]  ;;  %v15820_v29 = vld [vmem:[#allocation71_spill] sm:$0xff] }
 0x1f8   : > { %v3567_v23 = vpop.f32.mrf.mxu0  ;;  %v3319_v50 = vadd.f32 %v15805_v58, %v15804_v7  ;;  %v15815_v11 = vld [vmem:[#allocation60_spill] sm:$0xff]  ;;  %v2896_v54 = vadd.f32 %v15817_v63, %v2600_v5  ;;  %v15818_v7 = vld [vmem:[#allocation55_spill] sm:$0xff]  ;;  %v15819_v58 = vld [vmem:[#allocation66_spill] sm:$0xff] }
 0x1f9   : > { %15796 = vst [vmem:[#allocation36_spill] sm:$0xff] %v13242_v18  ;;  %v13260_v46 = vadd.f32 %v3567_v23, %v3314_v40  ;;  %v3963_v33 = vmul.f32 %v13089_v59, %v13242_v18  ;;  %v15813_v40 = vld [vmem:[#allocation58_spill] sm:$0xff]  ;;  %v3323_v23 = vadd.f32 %v15815_v11, %v15814_v6  ;;  %v13290_v1 = vadd.f32 %v15819_v58, %v15818_v7  ;;  %v15826_v58 = vld [vmem:[#allocation59_spill] sm:$0xff]  ;;  %v15828_v59 = vld [vmem:[#allocation64_spill] sm:$0xff] }
 0x1fa   : > { %v10607_v43 = vpop.f32.mrf.mxu0  ;;  %v3320_v26 = vadd.f32 %v15813_v40, %v2888_v2  ;;  %v15821_v2 = vld [vmem:[#allocation77_spill] sm:$0xff]  ;;  %v15823_v6 = vld [vmem:[#allocation74_spill] sm:$0xff]  ;;  %v2898_v18 = vadd.f32 %v15828_v59, %v2602_v17  ;;  %v13329_v17 = vpop.permute.xlu1 %3859 }
 0x1fb   : > { %15802 = vst [vmem:[#allocation37_spill] sm:$0xff] %v13260_v46  ;;  %v3962_v42 = vmul.f32 %v15811_v48, %v13260_v46  ;;  %v13277_v14 = vadd.f32 %v10607_v43, %v3317_v62  ;;  %v13293_v62 = vadd.f32 %v15820_v29, %v2892_v56  ;;  %v15822_v40 = vld [vmem:[#allocation57_spill] sm:$0xff]  ;;  %v4077_v11 = vmul.f32 %v3963_v33, %v3963_v33  ;;  %v15825_v48 = vld [vmem:[#allocation79_spill] sm:$0xff]  ;;  %v15827_v56 = vld [vmem:[#allocation84_spill] sm:$0xff] }
 0x1fc   : > { %v3577_v36 = vpop.f32.mrf.mxu0  ;;  %v13299_v45 = vadd.f32 %v15823_v6, %v15822_v40  ;;  %v13305_v7 = vadd.f32 %v15825_v48, %v2894_v30  ;;  %v13309_v29 = vadd.f32 %v15827_v56, %v15826_v58  ;;  %v13315_v40 = vadd.f32 %v13122_v38, %v2896_v54  ;;  %v13317_v6 = vpop.f32.mrf.mxu1  ;;  %v15829_v30 = vld [vmem:[#allocation69_spill] sm:$0xff]  ;;  %v15831_v58 = vld [vmem:[#allocation62_spill] sm:$0xff]  ;;  %15832 = vst [vmem:[#allocation8_spill] sm:$0xff] %v13329_v17 }
 0x1fd   : > { %15812 = vst [vmem:[#allocation5_spill] sm:$0xff] %v13277_v14  ;;  %v4076_v43 = vmul.f32 %v3962_v42, %v3962_v42  ;;  %v3965_v12 = vmul.f32 %v15821_v2, %v13277_v14  ;;  %v3998_v5 = vsel %vm389_vm1, %v3962_v42, 0.0  ;;  %v13302_v21 = vadd.f32 %v3577_v36, %v3316_v34  ;;  %v13323_v14 = vpop.permute.xlu0 %3854  ;;  %v15833_v56 = vld [vmem:[#allocation82_spill] sm:$0xff]  ;;  %v15834_v57 = vld [vmem:[#allocation81_spill] sm:$0xff] }
 0x1fe   : > { %v10610_v63 = vpop.f32.mrf.mxu0  ;;  %v3999_v34 = vsel %vm389_vm1, %v3963_v33, 0.0  ;;  %15830 = vst [vmem:[#allocation7_spill] sm:$0xff] %v13323_v14  ;;  %v13327_v59 = vadd.f32 %v13158_v53, %v15831_v58  ;;  %v4113_v33 = vsel %vm389_vm1, %v4077_v11, 0.0  ;;  %v13338_v46 = vadd.f32 %v13188_v3, %v2898_v18 }
 0x1ff   : > { %15824 = vst [vmem:[#allocation6_spill] sm:$0xff] %v13302_v21  ;;  %v13312_v2 = vadd.f32 %v10610_v63, %v3319_v50  ;;  %v4112_v42 = vsel %vm389_vm1, %v4076_v43, 0.0  ;;  %v3964_v48 = vmul.f32 %v15829_v30, %v13302_v21  ;;  %v4000_v38 = vadd.f32 %v3999_v34, %v3998_v5 }
 0x200   : > { %v3587_v36 = vpop.f32.mrf.mxu0  ;;  %v4079_v50 = vmul.f32 %v3965_v12, %v3965_v12  ;;  %v4114_v53 = vadd.f32 %v4113_v33, %v4112_v42  ;;  %v4003_v11 = vsel %vm389_vm1, %v3965_v12, 0.0 }
 0x201   : > { %v13331_v54 = vadd.f32 %v3587_v36, %v3318_v55  ;;  %v4001_v43 = vsel %vm389_vm1, %v3964_v48, 0.0  ;;  %v4078_v63 = vmul.f32 %v3964_v48, %v3964_v48  ;;  %v3967_v30 = vmul.f32 %v15833_v56, %v13312_v2  ;;  %v15835_v55 = vld [vmem:[#allocation67_spill] sm:$0xff]  ;;  %v13344_v36 = vpop.f32.mrf.mxu1  ;;  %v13356_v12 = vpop.permute.xlu0 %3864 }
 0x202   : > { %v10613_v21 = vpop.f32.mrf.mxu0  ;;  %v4002_v58 = vadd.f32 %v4001_v43, %v4000_v38  ;;  %v2900_v34 = vadd.f32 %v15835_v55, %v13215_v37  ;;  %v4117_v3 = vsel %vm389_vm1, %v4079_v50, 0.0  ;;  %15836 = vst [vmem:[#allocation9_spill] sm:$0xff] %v13356_v12 }
 0x203   : > { %v3966_v5 = vmul.f32 %v15834_v57, %v13331_v54  ;;  %v4115_v48 = vsel %vm389_vm1, %v4078_v63, 0.0  ;;  %v13348_v35 = vadd.f32 %v10613_v21, %v3321_v13  ;;  %v4081_v33 = vmul.f32 %v3967_v30, %v3967_v30  ;;  %v15837_v63 = vld [vmem:[#allocation65_spill] sm:$0xff]  ;;  %v13362_v21 = vpop.permute.xlu1 %3869 }
 0x204   : > { %v3597_v56 = vpop.f32.mrf.mxu0  ;;  %v4116_v18 = vadd.f32 %v4115_v48, %v4114_v53  ;;  %v4004_v42 = vadd.f32 %v4003_v11, %v4002_v58  ;;  %v13360_v13 = vadd.f32 %v13210_v9, %v15837_v63  ;;  %15838 = vst [vmem:[#allocation10_spill] sm:$0xff] %v13362_v21  ;;  %v13375_v11 = vpop.f32.mrf.mxu1  ;;  %v4007_v9 = vsel %vm389_vm1, %v3967_v30, 0.0 }
 0x205   : > { %v4005_v38 = vsel %vm389_vm1, %v3966_v5, 0.0  ;;  %v4080_v43 = vmul.f32 %v3966_v5, %v3966_v5  ;;  %v3969_v37 = vmul.f32 %v13136_v52, %v13348_v35  ;;  %v13354_v55 = vadd.f32 %v3597_v56, %v3320_v26  ;;  %v9143_v5 = vld [vmem:[%s15542_s3 + $0x4] sm:$0xf]  ;;  %v4454_v26 = vld [vmem:[%s15542_s3] sm:$0xf]  ;;  %v13405_v52 = vpop.permute.xlu0 %3874 }
 0x206   : > { %v10616_v57 = vpop.f32.mrf.mxu0  ;;  %v4006_v50 = vadd.f32 %v4005_v38, %v4004_v42  ;;  %v4118_v53 = vadd.f32 %v4117_v3, %v4116_v18  ;;  %v13373_v56 = vadd.f32 %v13252_v61, %v2900_v34  ;;  %10656 = vmatprep.subr.msk.mxu1 %vm462_vm0, %v9143_v5  ;;  %10712 = vmatprep.subr.msk.mxu0 %vm462_vm0, %v4454_v26  ;;  %v4121_v30 = vsel %vm389_vm1, %v4081_v33, 0.0 }
 0x207   : > { %v13364_v58 = vadd.f32 %v10616_v57, %v3323_v23  ;;  %v4119_v48 = vsel %vm389_vm1, %v4080_v43, 0.0  ;;  %v3968_v57 = vmul.f32 %v13134_v32, %v13354_v55  ;;  %v4083_v18 = vmul.f32 %v3969_v37, %v3969_v37  ;;  %10657 = vmatpush3.msk.msra.mxu1 %vm462_vm0, %v9143_v5  ;;  %10713 = vmatpush3.msk.msra.mxu0 %vm462_vm0, %v4454_v26 }
 0x208   : > { %v3607_v23 = vpop.f32.mrf.mxu0  ;;  %v4120_v3 = vadd.f32 %v4119_v48, %v4118_v53  ;;  %v4008_v42 = vadd.f32 %v4007_v9, %v4006_v50  ;;  %v15839_v53 = vld [vmem:[#allocation72_spill] sm:$0xff]  ;;  %v15840_v50 = vld [vmem:[#allocation70_spill] sm:$0xff]  ;;  %v4011_v33 = vsel %vm389_vm1, %v3969_v37, 0.0 }
 0x209   : > { %v13384_v61 = vadd.f32 %v3607_v23, %v13283_v41  ;;  %v4009_v34 = vsel %vm389_vm1, %v3968_v57, 0.0  ;;  %v4082_v38 = vmul.f32 %v3968_v57, %v3968_v57  ;;  %v3971_v43 = vmul.f32 %v13179_v28, %v13364_v58  ;;  %v10584_v23 = vpop.f32.mrf.mxu1 }
 0x20a   : > { %v10619_v63 = vpop.f32.mrf.mxu0  ;;  %v2902_v48 = vadd.f32 %v15839_v53, %v13218_v27  ;;  %v13396_v41 = vadd.f32 %v13286_v60, %v15840_v50  ;;  %v4010_v9 = vadd.f32 %v4009_v34, %v4008_v42  ;;  %v4122_v5 = vadd.f32 %v4121_v30, %v4120_v3  ;;  %v13407_v27 = vpop.permute.xlu1 %3879 }
 0x20b   : > { %v4123_v57 = vsel %vm389_vm1, %v4082_v38, 0.0  ;;  %v3970_v28 = vmul.f32 %v13177_v25, %v13384_v61  ;;  %v13403_v32 = vadd.f32 %v10619_v63, %v13290_v1  ;;  %15841 = vst [vmem:[#allocation11_spill] sm:$0xff] %v13407_v27  ;;  %v4125_v60 = vsel %vm389_vm1, %v4083_v18, 0.0 }
 0x20c   : > { %v3617_v26 = vpop.f32.mrf.mxu0  ;;  %v4124_v42 = vadd.f32 %v4123_v57, %v4122_v5  ;;  %v4012_v3 = vadd.f32 %v4011_v33, %v4010_v9  ;;  %v4085_v37 = vmul.f32 %v3971_v43, %v3971_v43  ;;  %v13422_v9 = vadd.f32 %v13317_v6, %v2902_v48  ;;  %v3255_v33 = vpop.f32.mrf.mxu1 }
 0x20d   : > { %v13411_v30 = vadd.f32 %v3617_v26, %v13293_v62  ;;  %v4013_v34 = vsel %vm389_vm1, %v3970_v28, 0.0  ;;  %v4084_v38 = vmul.f32 %v3970_v28, %v3970_v28  ;;  %v3973_v1 = vmul.f32 %v13225_v44, %v13403_v32  ;;  %v15842_v62 = vld [vmem:[#allocation75_spill] sm:$0xff] }
 0x20e   : > { %v10622_v63 = vpop.f32.mrf.mxu0  ;;  %v4014_v53 = vadd.f32 %v4013_v34, %v4012_v3  ;;  %v4126_v50 = vadd.f32 %v4125_v60, %v4124_v42  ;;  %v2904_v5 = vadd.f32 %v15842_v62, %v13228_v8  ;;  %v4015_v28 = vsel %vm389_vm1, %v3971_v43, 0.0  ;;  %v13431_v60 = vld [vmem:[%s15542_s3 + $0x8] sm:$0xf] }
 0x20f   : > { %v3972_v25 = vmul.f32 %v13223_v15, %v13411_v30  ;;  %v13419_v18 = vadd.f32 %v10622_v63, %v13299_v45  ;;  %v4127_v57 = vsel %vm389_vm1, %v4084_v38, 0.0  ;;  %15843 = vst [vmem:[#allocation17_spill] sm:$0xff] %v13431_v60  ;;  %10768 = vmatprep.subr.msk.mxu1 %vm462_vm0, %v13431_v60  ;;  %v4129_v8 = vsel %vm389_vm1, %v4085_v37, 0.0  ;;  %v13442_v63 = vpop.permute.xlu0 %3884  ;;  %v15844_v37 = vld [vmem:[#allocation73_spill] sm:$0xff] }
 0x210   : > { %v3627_v26 = vpop.f32.mrf.mxu0  ;;  %v4128_v42 = vadd.f32 %v4127_v57, %v4126_v50  ;;  %v4016_v45 = vadd.f32 %v4015_v28, %v4014_v53  ;;  %v4087_v48 = vmul.f32 %v3973_v1, %v3973_v1  ;;  %v13444_v50 = vpop.permute.xlu1 %3889  ;;  %v13452_v57 = vadd.f32 %v13344_v36, %v15844_v37 }
 0x211   : > { %v4017_v3 = vsel %vm389_vm1, %v3972_v25, 0.0  ;;  %v4086_v6 = vmul.f32 %v3972_v25, %v3972_v25  ;;  %v3975_v43 = vmul.f32 %v13273_v47, %v13419_v18  ;;  %v13440_v34 = vadd.f32 %v3627_v26, %v13305_v7  ;;  %v10587_v7 = vpop.f32.mrf.mxu1 }
 0x212   : > { %v10625_v38 = vpop.f32.mrf.mxu0  ;;  %v4018_v53 = vadd.f32 %v4017_v3, %v4016_v45  ;;  %v4130_v62 = vadd.f32 %v4129_v8, %v4128_v42  ;;  %v13455_v47 = vadd.f32 %v13375_v11, %v2904_v5  ;;  %v4019_v26 = vsel %vm389_vm1, %v3973_v1, 0.0  ;;  %v15845_v1 = vld [vmem:[#allocation80_spill] sm:$0xff] }
 0x213   : > { %v4131_v25 = vsel %vm389_vm1, %v4086_v6, 0.0  ;;  %v13448_v28 = vadd.f32 %v10625_v38, %v13309_v29  ;;  %v3974_v15 = vmul.f32 %v13271_v16, %v13440_v34  ;;  %v4089_v3 = vmul.f32 %v3975_v43, %v3975_v43  ;;  %v15846_v16 = vld [vmem:[#allocation78_spill] sm:$0xff] }
 0x214   : > { %v3637_v45 = vpop.f32.mrf.mxu0  ;;  %v4132_v42 = vadd.f32 %v4131_v25, %v4130_v62  ;;  %v4020_v6 = vadd.f32 %v4019_v26, %v4018_v53  ;;  %v4133_v8 = vsel %vm389_vm1, %v4087_v48, 0.0  ;;  %v2906_v37 = vadd.f32 %v15845_v1, %v13231_v4  ;;  %v3265_v25 = vpop.f32.mrf.mxu1 }
 0x215   : > { %v13461_v29 = vadd.f32 %v3637_v45, %v13315_v40  ;;  %v4021_v36 = vsel %vm389_vm1, %v3974_v15, 0.0  ;;  %v4088_v38 = vmul.f32 %v3974_v15, %v3974_v15  ;;  %v3977_v11 = vmul.f32 %v13329_v17, %v13448_v28  ;;  %v13479_v17 = vpop.permute.xlu0 %3894  ;;  %v13481_v4 = vpop.permute.xlu1 %3899 }
 0x216   : > { %v10628_v5 = vpop.f32.mrf.mxu0  ;;  %v13470_v44 = vadd.f32 %v10584_v23, %v15846_v16  ;;  %v4022_v62 = vadd.f32 %v4021_v36, %v4020_v6  ;;  %v4134_v53 = vadd.f32 %v4133_v8, %v4132_v42  ;;  %v4023_v40 = vsel %vm389_vm1, %v3975_v43, 0.0  ;;  %15847 = vst [vmem:[#allocation19_spill] sm:$0xff] %v13479_v17  ;;  %15848 = vst [vmem:[#allocation12_spill] sm:$0xff] %v13481_v4 }
 0x217   : > { %v4135_v48 = vsel %vm389_vm1, %v4088_v38, 0.0  ;;  %v3976_v15 = vmul.f32 %v13323_v14, %v13461_v29  ;;  %v13477_v26 = vadd.f32 %v10628_v5, %v13327_v59  ;;  %v4137_v16 = vsel %vm389_vm1, %v4089_v3, 0.0 }
 0x218   : > { %v3647_v45 = vpop.f32.mrf.mxu0  ;;  %v4136_v23 = vadd.f32 %v4135_v48, %v4134_v53  ;;  %v4024_v42 = vadd.f32 %v4023_v40, %v4022_v62  ;;  %v4091_v43 = vmul.f32 %v3977_v11, %v3977_v11  ;;  %v13495_v62 = vadd.f32 %v3255_v33, %v2906_v37  ;;  %v10590_v40 = vpop.f32.mrf.mxu1 }
 0x219   : > { %v13485_v6 = vadd.f32 %v3647_v45, %v13338_v46  ;;  %v4025_v8 = vsel %vm389_vm1, %v3976_v15, 0.0  ;;  %v4090_v36 = vmul.f32 %v3976_v15, %v3976_v15  ;;  %v3979_v59 = vmul.f32 %v13362_v21, %v13477_v26  ;;  %v15849_v46 = vld [vmem:[#allocation85_spill] sm:$0xff] }
 0x21a   : > { %v10631_v38 = vpop.f32.mrf.mxu0  ;;  %v4026_v5 = vadd.f32 %v4025_v8, %v4024_v42  ;;  %v4138_v1 = vadd.f32 %v4137_v16, %v4136_v23  ;;  %v2908_v53 = vadd.f32 %v15849_v46, %v13236_v49  ;;  %v4027_v48 = vsel %vm389_vm1, %v3977_v11, 0.0  ;;  %v13510_v11 = vpop.permute.xlu1 %3909 }
 0x21b   : > { %v3978_v14 = vmul.f32 %v13356_v12, %v13485_v6  ;;  %v13493_v3 = vadd.f32 %v10631_v38, %v13360_v13  ;;  %v4139_v15 = vsel %vm389_vm1, %v4090_v36, 0.0  ;;  %v4141_v8 = vsel %vm389_vm1, %v4091_v43, 0.0  ;;  %v13508_v38 = vpop.permute.xlu0 %3904  ;;  %15851 = vst [vmem:[#allocation21_spill] sm:$0xff] %v13510_v11  ;;  %v15852_v43 = vld [vmem:[#allocation83_spill] sm:$0xff] }
 0x21c   : > { %v3657_v45 = vpop.f32.mrf.mxu0  ;;  %v4140_v21 = vadd.f32 %v4139_v15, %v4138_v1  ;;  %v4028_v42 = vadd.f32 %v4027_v48, %v4026_v5  ;;  %v4093_v13 = vmul.f32 %v3979_v59, %v3979_v59  ;;  %15850 = vst [vmem:[#allocation13_spill] sm:$0xff] %v13508_v38  ;;  %v3341_v46 = vadd.f32 %v10587_v7, %v15852_v43  ;;  %v3275_v15 = vpop.f32.mrf.mxu1 }
 0x21d   : > { %v4029_v16 = vsel %vm389_vm1, %v3978_v14, 0.0  ;;  %v4092_v23 = vmul.f32 %v3978_v14, %v3978_v14  ;;  %v3981_v33 = vmul.f32 %v13407_v27, %v13493_v3  ;;  %v13506_v37 = vadd.f32 %v3657_v45, %v13373_v56 }
 0x21e   : > { %v10634_v49 = vpop.f32.mrf.mxu0  ;;  %v4030_v36 = vadd.f32 %v4029_v16, %v4028_v42  ;;  %v4142_v1 = vadd.f32 %v4141_v8, %v4140_v21  ;;  %v13517_v48 = vadd.f32 %v3265_v25, %v2908_v53  ;;  %v4031_v56 = vsel %vm389_vm1, %v3979_v59, 0.0 }
 0x21f   : > { %v4143_v5 = vsel %vm389_vm1, %v4092_v23, 0.0  ;;  %v13514_v14 = vadd.f32 %v10634_v49, %v13396_v41  ;;  %v3980_v45 = vmul.f32 %v13405_v52, %v13506_v37  ;;  %v4095_v60 = vmul.f32 %v3981_v33, %v3981_v33  ;;  %v15853_v23 = vld [vmem:[#allocation86_spill] sm:$0xff] }
 0x220   : > { %v3667_v27 = vpop.f32.mrf.mxu0  ;;  %v4144_v12 = vadd.f32 %v4143_v5, %v4142_v1  ;;  %v4032_v42 = vadd.f32 %v4031_v56, %v4030_v36  ;;  %v4145_v41 = vsel %vm389_vm1, %v4093_v13, 0.0  ;;  %v2910_v59 = vadd.f32 %v13124_v10, %v13239_v19  ;;  %v10593_v1 = vpop.f32.mrf.mxu1 }
 0x221   : > { %v13523_v21 = vadd.f32 %v3667_v27, %v13422_v9  ;;  %v4033_v16 = vsel %vm389_vm1, %v3980_v45, 0.0  ;;  %v4094_v7 = vmul.f32 %v3980_v45, %v3980_v45  ;;  %v3983_v25 = vmul.f32 %v13444_v50, %v13514_v14  ;;  %v13541_v56 = vpop.permute.xlu0 %3914  ;;  %v13543_v10 = vpop.permute.xlu1 %3919 }
 0x222   : > { %v10637_v53 = vpop.f32.mrf.mxu0  ;;  %v13532_v8 = vadd.f32 %v10590_v40, %v15853_v23  ;;  %v4034_v49 = vadd.f32 %v4033_v16, %v4032_v42  ;;  %v4146_v36 = vadd.f32 %v4145_v41, %v4144_v12  ;;  %v4035_v27 = vsel %vm389_vm1, %v3981_v33, 0.0  ;;  %15854 = vst [vmem:[#allocation23_spill] sm:$0xff] %v13541_v56  ;;  %15855 = vst [vmem:[#allocation14_spill] sm:$0xff] %v13543_v10 }
 0x223   : > { %v4147_v9 = vsel %vm389_vm1, %v4094_v7, 0.0  ;;  %v3982_v13 = vmul.f32 %v13442_v63, %v13523_v21  ;;  %v13539_v5 = vadd.f32 %v10637_v53, %v13452_v57  ;;  %v4149_v19 = vsel %vm389_vm1, %v4095_v60, 0.0 }
 0x224   : > { %v3677_v43 = vpop.f32.mrf.mxu0  ;;  %v4148_v40 = vadd.f32 %v4147_v9, %v4146_v36  ;;  %v4036_v12 = vadd.f32 %v4035_v27, %v4034_v49  ;;  %v4097_v33 = vmul.f32 %v3983_v25, %v3983_v25  ;;  %v3342_v49 = vadd.f32 %v3275_v15, %v2910_v59  ;;  %v3285_v36 = vpop.f32.mrf.mxu1 }
 0x225   : > { %v13547_v45 = vadd.f32 %v3677_v43, %v13455_v47  ;;  %v4037_v42 = vsel %vm389_vm1, %v3982_v13, 0.0  ;;  %v4096_v41 = vmul.f32 %v3982_v13, %v3982_v13  ;;  %v3985_v57 = vmul.f32 %v13481_v4, %v13539_v5 }
 0x226   : > { %v10640_v16 = vpop.f32.mrf.mxu0  ;;  %v4038_v7 = vadd.f32 %v4037_v42, %v4036_v12  ;;  %v4150_v53 = vadd.f32 %v4149_v19, %v4148_v40  ;;  %v2912_v47 = vadd.f32 %v13160_v51, %v13245_v22  ;;  %v4039_v27 = vsel %vm389_vm1, %v3983_v25, 0.0  ;;  %v13568_v22 = vpop.permute.xlu0 %3924 }
 0x227   : > { %v3984_v23 = vmul.f32 %v13479_v17, %v13547_v45  ;;  %v13555_v60 = vadd.f32 %v10640_v16, %v13470_v44  ;;  %v4151_v9 = vsel %vm389_vm1, %v4096_v41, 0.0  ;;  %v4153_v12 = vsel %vm389_vm1, %v4097_v33, 0.0  ;;  %15856 = vst [vmem:[#allocation15_spill] sm:$0xff] %v13568_v22  ;;  %v13570_v25 = vpop.permute.xlu1 %3929 }
 0x228   : > { %v3687_v13 = vpop.f32.mrf.mxu0  ;;  %v4152_v43 = vadd.f32 %v4151_v9, %v4150_v53  ;;  %v4040_v4 = vadd.f32 %v4039_v27, %v4038_v7  ;;  %v4099_v42 = vmul.f32 %v3985_v57, %v3985_v57  ;;  %15857 = vst [vmem:[#allocation26_spill] sm:$0xff] %v13570_v25  ;;  %v3345_v33 = vadd.f32 %v10593_v1, %v13150_v24 }
 0x229   : > { %v4041_v19 = vsel %vm389_vm1, %v3984_v23, 0.0  ;;  %v4098_v40 = vmul.f32 %v3984_v23, %v3984_v23  ;;  %v3987_v44 = vmul.f32 %v13510_v11, %v13555_v60  ;;  %v13566_v15 = vadd.f32 %v3687_v13, %v13495_v62  ;;  %v10596_v23 = vpop.f32.mrf.mxu1 }
 0x22a   : > { %v10643_v51 = vpop.f32.mrf.mxu0  ;;  %v4042_v59 = vadd.f32 %v4041_v19, %v4040_v4  ;;  %v4154_v41 = vadd.f32 %v4153_v12, %v4152_v43  ;;  %v3344_v53 = vadd.f32 %v3285_v36, %v2912_v47  ;;  %v4043_v27 = vsel %vm389_vm1, %v3985_v57, 0.0 }
 0x22b   : > { %v4155_v16 = vsel %vm389_vm1, %v4098_v40, 0.0  ;;  %v13573_v7 = vadd.f32 %v10643_v51, %v3341_v46  ;;  %v3986_v62 = vmul.f32 %v13508_v38, %v13566_v15  ;;  %v4101_v11 = vmul.f32 %v3987_v44, %v3987_v44  ;;  %v3295_v12 = vpop.f32.mrf.mxu1 }
 0x22c   : > { %v3697_v9 = vpop.f32.mrf.mxu0  ;;  %v4156_v13 = vadd.f32 %v4155_v16, %v4154_v41  ;;  %v4044_v17 = vadd.f32 %v4043_v27, %v4042_v59  ;;  %v4157_v43 = vsel %vm389_vm1, %v4099_v42, 0.0  ;;  %v2914_v57 = vadd.f32 %v13190_v20, %v13248_v31  ;;  %v13596_v16 = vpop.permute.xlu0 %3934 }
 0x22d   : > { %v13580_v4 = vadd.f32 %v3697_v9, %v13517_v48  ;;  %v4045_v46 = vsel %vm389_vm1, %v3986_v62, 0.0  ;;  %v4100_v19 = vmul.f32 %v3986_v62, %v3986_v62  ;;  %v3989_v24 = vmul.f32 %v13543_v10, %v13573_v7  ;;  %15858 = vst [vmem:[#allocation32_spill] sm:$0xff] %v13596_v16  ;;  %v13598_v27 = vpop.permute.xlu1 %3939 }
 0x22e   : > { %v10646_v1 = vpop.f32.mrf.mxu0  ;;  %v3347_v47 = vadd.f32 %v10596_v23, %v13182_v0  ;;  %v4046_v36 = vadd.f32 %v4045_v46, %v4044_v17  ;;  %v4158_v40 = vadd.f32 %v4157_v43, %v4156_v13  ;;  %v4047_v48 = vsel %vm389_vm1, %v3987_v44, 0.0  ;;  %15859 = vst [vmem:[#allocation39_spill] sm:$0xff] %v13598_v27 }
 0x22f   : > { %v4159_v51 = vsel %vm389_vm1, %v4100_v19, 0.0  ;;  %v3988_v42 = vmul.f32 %v13541_v56, %v13580_v4  ;;  %v13594_v59 = vadd.f32 %v10646_v1, %v13532_v8  ;;  %v4161_v0 = vsel %vm389_vm1, %v4101_v11, 0.0  ;;  %v15860_v1 = vld [vmem:[#allocation31_spill] sm:$0xff] }
 0x230   : > { %v3707_v41 = vpop.f32.mrf.mxu0  ;;  %v4160_v20 = vadd.f32 %v4159_v51, %v4158_v40  ;;  %v4048_v31 = vadd.f32 %v4047_v48, %v4046_v36  ;;  %v4103_v44 = vmul.f32 %v3989_v24, %v3989_v24  ;;  %v3346_v11 = vadd.f32 %v3295_v12, %v2914_v57  ;;  %v10599_v36 = vpop.f32.mrf.mxu1 }
 0x231   : > { %v13601_v17 = vadd.f32 %v3707_v41, %v3342_v49  ;;  %v4049_v23 = vsel %vm389_vm1, %v3988_v42, 0.0  ;;  %v4102_v62 = vmul.f32 %v3988_v42, %v3988_v42  ;;  %v3991_v9 = vmul.f32 %v13570_v25, %v13594_v59  ;;  %v13620_v12 = vpop.permute.xlu0 %3944 }
 0x232   : > { %v10649_v8 = vpop.f32.mrf.mxu0  ;;  %v4050_v13 = vadd.f32 %v4049_v23, %v4048_v31  ;;  %v4162_v43 = vadd.f32 %v4161_v0, %v4160_v20  ;;  %v2916_v49 = vadd.f32 %v15860_v1, %v13255_v39  ;;  %v4051_v40 = vsel %vm389_vm1, %v3989_v24, 0.0  ;;  %15861 = vst [vmem:[#allocation41_spill] sm:$0xff] %v13620_v12  ;;  %v13622_v24 = vpop.permute.xlu1 %3949 }
 0x233   : > { %v3990_v46 = vmul.f32 %v13568_v22, %v13601_v17  ;;  %v13608_v19 = vadd.f32 %v10649_v8, %v3345_v33  ;;  %v4163_v48 = vsel %vm389_vm1, %v4102_v62, 0.0  ;;  %v4165_v20 = vsel %vm389_vm1, %v4103_v44, 0.0  ;;  %15862 = vst [vmem:[#allocation16_spill] sm:$0xff] %v13622_v24  ;;  %v3305_v44 = vpop.f32.mrf.mxu1 }
 0x234   : > { %v3717_v51 = vpop.f32.mrf.mxu0  ;;  %v4164_v42 = vadd.f32 %v4163_v48, %v4162_v43  ;;  %v4052_v41 = vadd.f32 %v4051_v40, %v4050_v13  ;;  %v4105_v23 = vmul.f32 %v3991_v9, %v3991_v9  ;;  %v4055_v40 = vsel %vm389_vm1, %v3991_v9, 0.0 }
 0x235   : > { %v4053_v31 = vsel %vm389_vm1, %v3990_v46, 0.0  ;;  %v4104_v0 = vmul.f32 %v3990_v46, %v3990_v46  ;;  %v3993_v33 = vmul.f32 %v13598_v27, %v13608_v19  ;;  %v13618_v57 = vadd.f32 %v3717_v51, %v3344_v53  ;;  %v15863_v46 = vld [vmem:[#allocation33_spill] sm:$0xff] }
 0x236   : > { %v10652_v39 = vpop.f32.mrf.mxu0  ;;  %v4054_v62 = vadd.f32 %v4053_v31, %v4052_v41  ;;  %v4166_v8 = vadd.f32 %v4165_v20, %v4164_v42  ;;  %v3349_v1 = vadd.f32 %v10599_v36, %v15863_v46  ;;  %v4169_v42 = vsel %vm389_vm1, %v4105_v23, 0.0 }
 0x237   : > { %v4167_v13 = vsel %vm389_vm1, %v4104_v0, 0.0  ;;  %v13625_v43 = vadd.f32 %v10652_v39, %v3347_v47  ;;  %v3992_v53 = vmul.f32 %v13596_v16, %v13618_v57  ;;  %v4107_v27 = vmul.f32 %v3993_v33, %v3993_v33 }
 0x238   : > { %v3727_v48 = vpop.f32.mrf.mxu0  ;;  %v4168_v51 = vadd.f32 %v4167_v13, %v4166_v8  ;;  %v4056_v22 = vadd.f32 %v4055_v40, %v4054_v62  ;;  %v3348_v0 = vadd.f32 %v3305_v44, %v2916_v49  ;;  %v4059_v39 = vsel %vm389_vm1, %v3993_v33, 0.0  ;;  %v13643_v13 = vpop.permute.xlu1 %3959 }
 0x239   : > { %v13631_v25 = vadd.f32 %v3727_v48, %v3346_v11  ;;  %v4057_v41 = vsel %vm389_vm1, %v3992_v53, 0.0  ;;  %v4106_v47 = vmul.f32 %v3992_v53, %v3992_v53  ;;  %v3995_v36 = vmul.f32 %v13622_v24, %v13625_v43  ;;  %15864 = vst [vmem:[#allocation18_spill] sm:$0xff] %v13643_v13 }
 0x23a   : > { %v10655_v31 = vpop.f32.mrf.mxu0  ;;  %v4058_v9 = vadd.f32 %v4057_v41, %v4056_v22  ;;  %v4170_v20 = vadd.f32 %v4169_v42, %v4168_v51  ;;  %v4173_v46 = vsel %vm389_vm1, %v4107_v27, 0.0  ;;  %v13648_v22 = vpop.permute.xlu0 %3954 }
 0x23b   : > { %v4171_v8 = vsel %vm389_vm1, %v4106_v47, 0.0  ;;  %v3994_v11 = vmul.f32 %v13620_v12, %v13631_v25  ;;  %v13641_v62 = vadd.f32 %v10655_v31, %v3349_v1  ;;  %15865 = vst [vmem:[#allocation20_spill] sm:$0xff] %v13648_v22  ;;  %v4109_v49 = vmul.f32 %v3995_v36, %v3995_v36 }
 0x23c   : > { %v3737_v23 = vpop.f32.mrf.mxu0  ;;  %v4172_v40 = vadd.f32 %v4171_v8, %v4170_v20  ;;  %v4060_v53 = vadd.f32 %v4059_v39, %v4058_v9  ;;  %v4063_v27 = vsel %vm389_vm1, %v3995_v36, 0.0 }
 0x23d   : > { %v13646_v48 = vadd.f32 %v3737_v23, %v3348_v0  ;;  %v4061_v33 = vsel %vm389_vm1, %v3994_v11, 0.0  ;;  %v4108_v44 = vmul.f32 %v3994_v11, %v3994_v11  ;;  %v3997_v51 = vmul.f32 %v13643_v13, %v13641_v62 }
 0x23e   : > { %v4062_v1 = vadd.f32 %v4061_v33, %v4060_v53  ;;  %v4174_v42 = vadd.f32 %v4173_v46, %v4172_v40  ;;  %v4177_v39 = vsel %vm389_vm1, %v4109_v49, 0.0 }
 0x23f   : > { %v3996_v41 = vmul.f32 %v13648_v22, %v13646_v48  ;;  %v4175_v47 = vsel %vm389_vm1, %v4108_v44, 0.0  ;;  %v4111_v8 = vmul.f32 %v3997_v51, %v3997_v51  ;;  %v4067_v46 = vsel %vm389_vm1, %v3997_v51, 0.0 }
 0x240   : > { %v4176_v31 = vadd.f32 %v4175_v47, %v4174_v42  ;;  %v4064_v0 = vadd.f32 %v4063_v27, %v4062_v1 }
 0x241   : > { %v4065_v9 = vsel %vm389_vm1, %v3996_v41, 0.0  ;;  %v4110_v20 = vmul.f32 %v3996_v41, %v3996_v41  ;;  %v4181_v36 = vsel %vm389_vm1, %v4111_v8, 0.0 }
 0x242   : > { %v4066_v11 = vadd.f32 %v4065_v9, %v4064_v0  ;;  %v4178_v23 = vadd.f32 %v4177_v39, %v4176_v31 }
 0x243   : > { %v4179_v53 = vsel %vm389_vm1, %v4110_v20, 0.0 }
 0x244   : > { %v4068_v40 = vadd.f32 %v4067_v46, %v4066_v11  ;;  %v4180_v33 = vadd.f32 %v4179_v53, %v4178_v23 }
 0x246   : > { %v4069_v22 = vrot.slane %v4068_v40, 4  ;;  %v4182_v44 = vadd.f32 %v4181_v36, %v4180_v33 }
 0x248   : > { %v4070_v42 = vadd.f32 %v4069_v22, %v4068_v40  ;;  %v4183_v1 = vrot.slane %v4182_v44, 4  ;;  %v13671_v22 = vld [vmem:[%s15542_s3 + $0xc] sm:$0xf] }
 0x249   : > { %10824 = vmatprep.subr.msk.mxu0 %vm462_vm0, %v13671_v22 }
 0x24a   : > { %v4071_v27 = vrot.slane %v4070_v42, 2  ;;  %v4184_v47 = vadd.f32 %v4183_v1, %v4182_v44  ;;  %v11259_v44 = vmov 0.0  }
 0x24b   : > { %4417 = vst.msk [vmem:[#allocation2 + $0x144] sm:$0xff] %vm389_vm1, %v11259_v44 }
 0x24c   : > { %v4072_v41 = vadd.f32 %v4071_v27, %v4070_v42  ;;  %v4185_v13 = vrot.slane %v4184_v47, 2 }
 0x24e   : > { %v4073_v49 = vrot.slane %v4072_v41, 1  ;;  %v4186_v12 = vadd.f32 %v4185_v13, %v4184_v47 }
 0x250   : > { %v4074_v0 = vadd.f32 %v4073_v49, %v4072_v41  ;;  %v4187_v31 = vrot.slane %v4186_v12, 1 }
 0x252   : > { %v13662_v9 = vmul.f32 0.00390625, %v4074_v0  ;;  %v4188_v20 = vadd.f32 %v4187_v31, %v4186_v12 }
 0x254   : > { %v4189_v51 = vmul.f32 0.00390625, %v4188_v20  ;;  %v4190_v39 = vmul.f32 %v13662_v9, %v13662_v9  ;;  %v4227_v8 = vsub.f32 %v13646_v48, %v13662_v9  ;;  %v4209_v12 = vsub.f32 %v13485_v6, %v13662_v9 }
 0x255   : > { %v4210_v23 = vsub.f32 %v13477_v26, %v13662_v9  ;;  %v4211_v53 = vsub.f32 %v13506_v37, %v13662_v9  ;;  %v4212_v46 = vsub.f32 %v13493_v3, %v13662_v9  ;;  %v4213_v40 = vsub.f32 %v13523_v21, %v13662_v9 }
 0x256   : > { %v4191_v11 = vsub.f32 %v4189_v51, %v4190_v39  ;;  %v4214_v33 = vsub.f32 %v13514_v14, %v13662_v9  ;;  %v4215_v36 = vsub.f32 %v13547_v45, %v13662_v9  ;;  %v4216_v6 = vsub.f32 %v13539_v5, %v13662_v9 }
 0x257   : > { %v4217_v26 = vsub.f32 %v13566_v15, %v13662_v9  ;;  %v4218_v37 = vsub.f32 %v13555_v60, %v13662_v9  ;;  %v4219_v3 = vsub.f32 %v13580_v4, %v13662_v9  ;;  %v4220_v21 = vsub.f32 %v13573_v7, %v13662_v9 }
 0x258   : > { %v4192_v13 = vmax.f32 %v4191_v11, 0.0  ;;  %v4221_v14 = vsub.f32 %v13601_v17, %v13662_v9  ;;  %v4222_v45 = vsub.f32 %v13594_v59, %v13662_v9  ;;  %v4223_v5 = vsub.f32 %v13618_v57, %v13662_v9  ;;  %v15866_v59 = vld [vmem:[#allocation37_spill] sm:$0xff]  ;;  %v15867_v57 = vld [vmem:[#allocation36_spill] sm:$0xff] }
 0x259   : > { %v4224_v15 = vsub.f32 %v13608_v19, %v13662_v9  ;;  %v4225_v60 = vsub.f32 %v13631_v25, %v13662_v9  ;;  %v4226_v4 = vsub.f32 %v13625_v43, %v13662_v9  ;;  %v4228_v7 = vsub.f32 %v13641_v62, %v13662_v9  ;;  %v15868_v19 = vld [vmem:[#allocation6_spill] sm:$0xff]  ;;  %v15869_v25 = vld [vmem:[#allocation5_spill] sm:$0xff] }
 0x25a   : > { %v4229_v48 = vadd.f32 1e-05, %v4192_v13  ;;  %v4193_v17 = vsub.f32 %v15866_v59, %v13662_v9  ;;  %v4194_v42 = vsub.f32 %v15867_v57, %v13662_v9  ;;  %v4195_v1 = vsub.f32 %v15868_v19, %v13662_v9 }
 0x25b   : > { %v4196_v27 = vsub.f32 %v15869_v25, %v13662_v9  ;;  %v4197_v43 = vsub.f32 %v13331_v54, %v13662_v9  ;;  %v4198_v62 = vsub.f32 %v13312_v2, %v13662_v9  ;;  %v4199_v47 = vsub.f32 %v13354_v55, %v13662_v9 }
 0x25c   : > { %11174 = vrsqrt.f32 %v4229_v48  ;;  %v4200_v41 = vsub.f32 %v13348_v35, %v13662_v9  ;;  %v4201_v49 = vsub.f32 %v13384_v61, %v13662_v9  ;;  %v4202_v0 = vsub.f32 %v13364_v58, %v13662_v9 }
 0x25d   : > { %v4203_v31 = vsub.f32 %v13411_v30, %v13662_v9  ;;  %v4204_v54 = vsub.f32 %v13403_v32, %v13662_v9  ;;  %v4205_v2 = vsub.f32 %v13440_v34, %v13662_v9  ;;  %v4206_v55 = vsub.f32 %v13419_v18, %v13662_v9 }
 0x25e   : > { %v4207_v35 = vsub.f32 %v13461_v29, %v13662_v9  ;;  %v4208_v61 = vsub.f32 %v13448_v28, %v13662_v9 }
 0x269   : > { %v11175_v20 = vpop.eup %11174 }
 0x26a   : > { %v4265_v58 = vmul.f32 %v11175_v20, %v4227_v8  ;;  %v4231_v51 = vmul.f32 %v11175_v20, %v4193_v17  ;;  %v4232_v39 = vmul.f32 %v11175_v20, %v4194_v42  ;;  %v4233_v30 = vmul.f32 %v11175_v20, %v4195_v1 }
 0x26b   : > { %v4234_v11 = vmul.f32 %v11175_v20, %v4196_v27  ;;  %v4235_v13 = vmul.f32 %v11175_v20, %v4197_v43  ;;  %v4236_v32 = vmul.f32 %v11175_v20, %v4198_v62  ;;  %v4237_v48 = vmul.f32 %v11175_v20, %v4199_v47 }
 0x26c   : > { %v4301_v44 = vmax.f32 %v4265_v58, 0.0  ;;  %v4238_v59 = vmul.f32 %v11175_v20, %v4200_v41  ;;  %v4239_v34 = vmul.f32 %v11175_v20, %v4201_v49  ;;  %v4240_v57 = vmul.f32 %v11175_v20, %v4202_v0 }
 0x26d   : > { %v4241_v19 = vmul.f32 %v11175_v20, %v4203_v31  ;;  %v4242_v18 = vmul.f32 %v11175_v20, %v4204_v54  ;;  %v4243_v25 = vmul.f32 %v11175_v20, %v4205_v2  ;;  %v4244_v24 = vmul.f32 %v11175_v20, %v4206_v55 }
 0x26e   : > { %4337 = vst.msk [vmem:[#allocation2 + $0x123] sm:$0xff] %vm389_vm1, %v4301_v44  ;;  %v4245_v29 = vmul.f32 %v11175_v20, %v4207_v35  ;;  %v13747_v28 = vmul.f32 %v11175_v20, %v4208_v61  ;;  %v13749_v9 = vmul.f32 %v11175_v20, %v4209_v12  ;;  %v13751_v8 = vmul.f32 %v11175_v20, %v4210_v23 }
 0x26f   : > { %v13753_v17 = vmul.f32 %v11175_v20, %v4211_v53  ;;  %v13755_v42 = vmul.f32 %v11175_v20, %v4212_v46  ;;  %v13757_v1 = vmul.f32 %v11175_v20, %v4213_v40  ;;  %v13759_v27 = vmul.f32 %v11175_v20, %v4214_v33 }
 0x270   : > { %v13761_v43 = vmul.f32 %v11175_v20, %v4215_v36  ;;  %v13763_v62 = vmul.f32 %v11175_v20, %v4216_v6  ;;  %v13765_v47 = vmul.f32 %v11175_v20, %v4217_v26  ;;  %v13767_v41 = vmul.f32 %v11175_v20, %v4218_v37 }
 0x271   : > { %v13769_v12 = vmul.f32 %v11175_v20, %v4219_v3  ;;  %v13771_v23 = vmul.f32 %v11175_v20, %v4220_v21  ;;  %v13773_v53 = vmul.f32 %v11175_v20, %v4221_v14  ;;  %v13775_v46 = vmul.f32 %v11175_v20, %v4222_v45 }
 0x272   : > { %v13777_v40 = vmul.f32 %v11175_v20, %v4223_v5  ;;  %v13779_v33 = vmul.f32 %v11175_v20, %v4224_v15  ;;  %v13781_v36 = vmul.f32 %v11175_v20, %v4225_v60  ;;  %v13783_v6 = vmul.f32 %v11175_v20, %v4226_v4 }
 0x273   : > { %v13785_v26 = vmul.f32 %v11175_v20, %v4228_v7  ;;  %v4267_v37 = vmax.f32 %v4231_v51, 0.0  ;;  %v4268_v3 = vmax.f32 %v4232_v39, 0.0  ;;  %v4269_v49 = vmax.f32 %v4233_v30, 0.0 }
 0x274   : > { %v4270_v21 = vmax.f32 %v4234_v11, 0.0  ;;  %v4271_v0 = vmax.f32 %v4235_v13, 0.0  ;;  %v4272_v14 = vmax.f32 %v4236_v32, 0.0  ;;  %v4273_v31 = vmax.f32 %v4237_v48, 0.0 }
 0x275   : > { %v4274_v45 = vmax.f32 %v4238_v59, 0.0  ;;  %v4275_v54 = vmax.f32 %v4239_v34, 0.0  ;;  %v4276_v2 = vmax.f32 %v4240_v57, 0.0  ;;  %v4277_v5 = vmax.f32 %v4241_v19, 0.0  ;;  %4303 = vst.msk [vmem:[#allocation2 + $0x13] sm:$0xff] %vm389_vm1, %v4267_v37  ;;  %4304 = vst.msk [vmem:[#allocation2 + $0x1b] sm:$0xff] %vm389_vm1, %v4268_v3 }
 0x276   : > { %4305 = vst.msk [vmem:[#allocation2 + $0x23] sm:$0xff] %vm389_vm1, %v4269_v49  ;;  %v4278_v15 = vmax.f32 %v4242_v18, 0.0  ;;  %v4279_v60 = vmax.f32 %v4243_v25, 0.0  ;;  %v4280_v4 = vmax.f32 %v4244_v24, 0.0  ;;  %v4281_v7 = vmax.f32 %v4245_v29, 0.0  ;;  %4306 = vst.msk [vmem:[#allocation2 + $0x2b] sm:$0xff] %vm389_vm1, %v4270_v21 }
 0x277   : > { %4307 = vst.msk [vmem:[#allocation2 + $0x33] sm:$0xff] %vm389_vm1, %v4271_v0  ;;  %4308 = vst.msk [vmem:[#allocation2 + $0x3b] sm:$0xff] %vm389_vm1, %v4272_v14  ;;  %v4282_v20 = vmax.f32 %v13747_v28, 0.0  ;;  %v4283_v55 = vmax.f32 %v13749_v9, 0.0  ;;  %v4284_v35 = vmax.f32 %v13751_v8, 0.0  ;;  %v4285_v61 = vmax.f32 %v13753_v17, 0.0 }
 0x278   : > { %4309 = vst.msk [vmem:[#allocation2 + $0x43] sm:$0xff] %vm389_vm1, %v4273_v31  ;;  %4310 = vst.msk [vmem:[#allocation2 + $0x4b] sm:$0xff] %vm389_vm1, %v4274_v45  ;;  %v4286_v24 = vmax.f32 %v13755_v42, 0.0  ;;  %v4287_v58 = vmax.f32 %v13757_v1, 0.0  ;;  %v4288_v51 = vmax.f32 %v13759_v27, 0.0  ;;  %v4289_v39 = vmax.f32 %v13761_v43, 0.0 }
 0x279   : > { %4311 = vst.msk [vmem:[#allocation2 + $0x53] sm:$0xff] %vm389_vm1, %v4275_v54  ;;  %4312 = vst.msk [vmem:[#allocation2 + $0x5b] sm:$0xff] %vm389_vm1, %v4276_v2  ;;  %v4290_v30 = vmax.f32 %v13763_v62, 0.0  ;;  %v4291_v11 = vmax.f32 %v13765_v47, 0.0  ;;  %v4292_v13 = vmax.f32 %v13767_v41, 0.0  ;;  %v4293_v32 = vmax.f32 %v13769_v12, 0.0 }
 0x27a   : > { %4313 = vst.msk [vmem:[#allocation2 + $0x63] sm:$0xff] %vm389_vm1, %v4277_v5  ;;  %4314 = vst.msk [vmem:[#allocation2 + $0x6b] sm:$0xff] %vm389_vm1, %v4278_v15  ;;  %v4294_v48 = vmax.f32 %v13771_v23, 0.0  ;;  %v4295_v44 = vmax.f32 %v13773_v53, 0.0  ;;  %v4296_v59 = vmax.f32 %v13775_v46, 0.0  ;;  %v4297_v34 = vmax.f32 %v13777_v40, 0.0 }
 0x27b   : > { %4315 = vst.msk [vmem:[#allocation2 + $0x73] sm:$0xff] %vm389_vm1, %v4279_v60  ;;  %4316 = vst.msk [vmem:[#allocation2 + $0x7b] sm:$0xff] %vm389_vm1, %v4280_v4  ;;  %v4298_v57 = vmax.f32 %v13779_v33, 0.0  ;;  %v4299_v19 = vmax.f32 %v13781_v36, 0.0  ;;  %v4300_v18 = vmax.f32 %v13783_v6, 0.0  ;;  %v4302_v25 = vmax.f32 %v13785_v26, 0.0 }
 0x27c   : > { %4317 = vst.msk [vmem:[#allocation2 + $0x83] sm:$0xff] %vm389_vm1, %v4281_v7  ;;  %4318 = vst.msk [vmem:[#allocation2 + $0x8b] sm:$0xff] %vm389_vm1, %v4282_v20  ;;  %v4339_v28 = vld [vmem:[#allocation2 + $0x14] sm:$0x1]  ;;  %v4342_v42 = vld [vmem:[#allocation2 + $0x21] sm:$0x1] }
 0x27d   : > { %4319 = vst.msk [vmem:[#allocation2 + $0x93] sm:$0xff] %vm389_vm1, %v4283_v55  ;;  %4320 = vst.msk [vmem:[#allocation2 + $0x9b] sm:$0xff] %vm389_vm1, %v4284_v35  ;;  %v4344_v29 = vld [vmem:[#allocation2 + $0x26] sm:$0x1]  ;;  %v13880_v2 = vld [vmem:[%s15542_s3 + $0x10] sm:$0xf] }
 0x27e   : > { %4321 = vst.msk [vmem:[#allocation2 + $0xa3] sm:$0xff] %vm389_vm1, %v4285_v61  ;;  %4322 = vst.msk [vmem:[#allocation2 + $0xab] sm:$0xff] %vm389_vm1, %v4286_v24  ;;  %v4346_v9 = vld [vmem:[#allocation2 + $0x33] sm:$0x1]  ;;  %v4348_v41 = vld [vmem:[#allocation2 + $0x38] sm:$0x1] }
 0x27f   : > { %4323 = vst.msk [vmem:[#allocation2 + $0xb3] sm:$0xff] %vm389_vm1, %v4287_v58  ;;  %4324 = vst.msk [vmem:[#allocation2 + $0xbb] sm:$0xff] %vm389_vm1, %v4288_v51  ;;  %v13843_v8 = vld [vmem:[#allocation2 + $0x2c] sm:$0xff]  ;;  %v4350_v12 = vld [vmem:[#allocation2 + $0x45] sm:$0x1] }
 0x280   : > { %4325 = vst.msk [vmem:[#allocation2 + $0xc3] sm:$0xff] %vm389_vm1, %v4289_v39  ;;  %4326 = vst.msk [vmem:[#allocation2 + $0xcb] sm:$0xff] %vm389_vm1, %v4290_v30  ;;  %v4356_v17 = vld [vmem:[#allocation2 + $0x5c] sm:$0x1]  ;;  %v4352_v23 = vld [vmem:[#allocation2 + $0x4a] sm:$0x1] }
 0x281   : > { %4327 = vst.msk [vmem:[#allocation2 + $0xd3] sm:$0xff] %vm389_vm1, %v4291_v11  ;;  %4328 = vst.msk [vmem:[#allocation2 + $0xdb] sm:$0xff] %vm389_vm1, %v4292_v13  ;;  %v4360_v1 = vld [vmem:[#allocation2 + $0x6e] sm:$0x1]  ;;  %v4354_v49 = vld [vmem:[#allocation2 + $0x57] sm:$0x1] }
 0x282   : > { %4329 = vst.msk [vmem:[#allocation2 + $0xe3] sm:$0xff] %vm389_vm1, %v4293_v32  ;;  %4330 = vst.msk [vmem:[#allocation2 + $0xeb] sm:$0xff] %vm389_vm1, %v4294_v48  ;;  %v4362_v27 = vld [vmem:[#allocation2 + $0x7b] sm:$0x1]  ;;  %v4364_v43 = vld [vmem:[#allocation2 + $0x80] sm:$0x1] }
 0x283   : > { %4331 = vst.msk [vmem:[#allocation2 + $0xf3] sm:$0xff] %vm389_vm1, %v4295_v44  ;;  %4332 = vst.msk [vmem:[#allocation2 + $0xfb] sm:$0xff] %vm389_vm1, %v4296_v59  ;;  %v4366_v62 = vld [vmem:[#allocation2 + $0x8d] sm:$0x1]  ;;  %v4368_v47 = vld [vmem:[#allocation2 + $0x92] sm:$0x1] }
 0x284   : > { %4333 = vst.msk [vmem:[#allocation2 + $0x103] sm:$0xff] %vm389_vm1, %v4297_v34  ;;  %4334 = vst.msk [vmem:[#allocation2 + $0x10b] sm:$0xff] %vm389_vm1, %v4298_v57  ;;  %v4358_v21 = vld [vmem:[#allocation2 + $0x69] sm:$0x1]  ;;  %v15870_v5 = vld [vmem:[#allocation17_spill] sm:$0xff] }
 0x285   : > { %4335 = vst.msk [vmem:[#allocation2 + $0x113] sm:$0xff] %vm389_vm1, %v4299_v19  ;;  %4336 = vst.msk [vmem:[#allocation2 + $0x11b] sm:$0xff] %vm389_vm1, %v4300_v18  ;;  %v4370_v60 = vld [vmem:[#allocation2 + $0x9f] sm:$0x1]  ;;  %v4372_v20 = vld [vmem:[#allocation2 + $0xa4] sm:$0x1] }
 0x286   : > { %4338 = vst.msk [vmem:[#allocation2 + $0x12b] sm:$0xff] %vm389_vm1, %v4302_v25  ;;  %4408 = vst.msk [vmem:[#allocation2 + $0x8] sm:$0xff] %vm389_vm1, %v13843_v8  ;;  %v4458_v4 = vld [vmem:[#allocation2 + $0x19] sm:$0xff]  ;;  %v4374_v35 = vld [vmem:[#allocation2 + $0xb1] sm:$0x1] }
 0x287   : > { %4345 = vst.msk [vmem:[#allocation2 + $0x24] sm:$0x1] %vm4340_vm7, %v4344_v29  ;;  %4341 = vst.msk [vmem:[#allocation2 + $0x12] sm:$0x1] %vm4340_vm7, %v4339_v28  ;;  %v4421_v7 = vld [vmem:[#allocation2 + $0x18] sm:$0xff]  ;;  %v4460_v30 = vld [vmem:[#allocation2 + $0x29] sm:$0xff] }
 0x288   : > { %4347 = vst.msk [vmem:[#allocation2 + $0x35] sm:$0x1] %vm4340_vm7, %v4346_v9  ;;  %4357 = vst.msk [vmem:[#allocation2 + $0x5a] sm:$0x1] %vm4340_vm7, %v4356_v17  ;;  %v4376_v61 = vld [vmem:[#allocation2 + $0xb6] sm:$0x1] }
 0x289   : > { %4343 = vst.msk [vmem:[#allocation2 + $0x23] sm:$0x1] %vm4340_vm7, %v4342_v42  ;;  %4361 = vst.msk [vmem:[#allocation2 + $0x6c] sm:$0x1] %vm4340_vm7, %v4360_v1  ;;  %v4388_v53 = vld [vmem:[#allocation2 + $0xec] sm:$0x1] }
 0x28a   : > { %4363 = vst.msk [vmem:[#allocation2 + $0x7d] sm:$0x1] %vm4340_vm7, %v4362_v27  ;;  %4365 = vst.msk [vmem:[#allocation2 + $0x7e] sm:$0x1] %vm4340_vm7, %v4364_v43  ;;  %v4392_v46 = vld [vmem:[#allocation2 + $0xfe] sm:$0x1] }
 0x28b   : > { %4367 = vst.msk [vmem:[#allocation2 + $0x8f] sm:$0x1] %vm4340_vm7, %v4366_v62  ;;  %4369 = vst.msk [vmem:[#allocation2 + $0x90] sm:$0x1] %vm4340_vm7, %v4368_v47  ;;  %v4394_v40 = vld [vmem:[#allocation2 + $0x10b] sm:$0x1] }
 0x28c   : > { %4349 = vst.msk [vmem:[#allocation2 + $0x36] sm:$0x1] %vm4340_vm7, %v4348_v41  ;;  %4351 = vst.msk [vmem:[#allocation2 + $0x47] sm:$0x1] %vm4340_vm7, %v4350_v12  ;;  %v4396_v33 = vld [vmem:[#allocation2 + $0x110] sm:$0x1] }
 0x28d   : > { %4353 = vst.msk [vmem:[#allocation2 + $0x48] sm:$0x1] %vm4340_vm7, %v4352_v23  ;;  %v4398_v36 = vld [vmem:[#allocation2 + $0x11d] sm:$0x1]  ;;  %4389 = vst.msk [vmem:[#allocation2 + $0xea] sm:$0x1] %vm4340_vm7, %v4388_v53 }
 0x28e   : > { %4393 = vst.msk [vmem:[#allocation2 + $0xfc] sm:$0x1] %vm4340_vm7, %v4392_v46  ;;  %v4400_v6 = vld [vmem:[#allocation2 + $0x122] sm:$0x1]  ;;  %v4402_v26 = vld [vmem:[#allocation2 + $0x12f] sm:$0x1] }
 0x28f   : > { %v4406_v37 = vld [vmem:[#allocation2 + $0x34] sm:$0x3]  ;;  %4395 = vst.msk [vmem:[#allocation2 + $0x10d] sm:$0x1] %vm4340_vm7, %v4394_v40  ;;  %4397 = vst.msk [vmem:[#allocation2 + $0x10e] sm:$0x1] %vm4340_vm7, %v4396_v33 }
 0x290   : > { %4399 = vst.msk [vmem:[#allocation2 + $0x11f] sm:$0x1] %vm4340_vm7, %v4398_v36  ;;  %4401 = vst.msk [vmem:[#allocation2 + $0x120] sm:$0x1] %vm4340_vm7, %v4400_v6  ;;  %v13867_v3 = vld [vmem:[#allocation2 + $0x24] sm:$0xff]  ;;  %v4462_v59 = vld [vmem:[#allocation2 + $0x39] sm:$0xff] }
 0x291   : > { %4410 = vst.msk [vmem:[#allocation2 + $0x10] sm:$0x3] %vm4409_vm8, %v4406_v37  ;;  %v4419_v45 = vld [vmem:[#allocation2 + $0x8] sm:$0xff]  ;;  %v4422_v24 = vld [vmem:[#allocation2 + $0x20] sm:$0xff]  ;;  %v4384_v39 = vld [vmem:[#allocation2 + $0xda] sm:$0x1] }
 0x292   : > { %4403 = vst.msk [vmem:[#allocation2 + $0x131] sm:$0x1] %vm4340_vm7, %v4402_v26  ;;  %4355 = vst.msk [vmem:[#allocation2 + $0x59] sm:$0x1] %vm4340_vm7, %v4354_v49  ;;  %v4459_v55 = vld [vmem:[#allocation2 + $0x21] sm:$0xff]  ;;  %v4425_v34 = vld [vmem:[#allocation2 + $0x38] sm:$0xff] }
 0x293   : > { %4407 = vst.msk [vmem:[#allocation2] sm:$0xff] %vm389_vm1, %v13867_v3  ;;  %v4378_v58 = vld [vmem:[#allocation2 + $0xc3] sm:$0x1]  ;;  %v4380_v51 = vld [vmem:[#allocation2 + $0xc8] sm:$0x1]  ;;  %v4461_v32 = vld [vmem:[#allocation2 + $0x31] sm:$0xff] }
 0x294   : > { %4359 = vst.msk [vmem:[#allocation2 + $0x6b] sm:$0x1] %vm4340_vm7, %v4358_v21  ;;  %4371 = vst.msk [vmem:[#allocation2 + $0xa1] sm:$0x1] %vm4340_vm7, %v4370_v60  ;;  %v4423_v11 = vld [vmem:[#allocation2 + $0x28] sm:$0xff]  ;;  %v4424_v48 = vld [vmem:[#allocation2 + $0x30] sm:$0xff] }
 0x295   : > { %4373 = vst.msk [vmem:[#allocation2 + $0xa2] sm:$0x1] %vm4340_vm7, %v4372_v20  ;;  %4375 = vst.msk [vmem:[#allocation2 + $0xb3] sm:$0x1] %vm4340_vm7, %v4374_v35  ;;  %v4386_v13 = vld [vmem:[#allocation2 + $0xe7] sm:$0x1] }
 0x296   : > { %4377 = vst.msk [vmem:[#allocation2 + $0xb4] sm:$0x1] %vm4340_vm7, %v4376_v61  ;;  %4379 = vst.msk [vmem:[#allocation2 + $0xc5] sm:$0x1] %vm4340_vm7, %v4378_v58  ;;  %v4390_v44 = vld [vmem:[#allocation2 + $0xf9] sm:$0x1] }
 0x297   : > { %4381 = vst.msk [vmem:[#allocation2 + $0xc6] sm:$0x1] %vm4340_vm7, %v4380_v51  ;;  %4385 = vst.msk [vmem:[#allocation2 + $0xd8] sm:$0x1] %vm4340_vm7, %v4384_v39  ;;  %v4463_v57 = vld [vmem:[#allocation2 + $0x41] sm:$0xff]  ;;  %v4464_v18 = vld [vmem:[#allocation2 + $0x49] sm:$0xff] }
 0x298   : > { %v4456_v0 = vld [vmem:[#allocation2 + $0x9] sm:$0xff]  ;;  %v4457_v54 = vld [vmem:[#allocation2 + $0x11] sm:$0xff]  ;;  %4387 = vst.msk [vmem:[#allocation2 + $0xe9] sm:$0x1] %vm4340_vm7, %v4386_v13  ;;  %4391 = vst.msk [vmem:[#allocation2 + $0xfb] sm:$0x1] %vm4340_vm7, %v4390_v44 }
 0x299   : > { %v4420_v15 = vld [vmem:[#allocation2 + $0x10] sm:$0xff]  ;;  %v4426_v19 = vld [vmem:[#allocation2 + $0x40] sm:$0xff]  ;;  %v4427_v25 = vld [vmem:[#allocation2 + $0x48] sm:$0xff] }
 0x29a   : > { %v4455_v14 = vld [vmem:[#allocation2 + $0x1] sm:$0xff]  ;;  %v4465_v29 = vld [vmem:[#allocation2 + $0x51] sm:$0xff]  ;;  %v4466_v9 = vld [vmem:[#allocation2 + $0x59] sm:$0xff] }
 0x29b   : > { %v4418_v31 = vld [vmem:[#allocation2] sm:$0xff]  ;;  %10658 = vmatprep.mubr.msk.f32.mxu1 %vm389_vm1, %v4455_v14  ;;  %v4428_v28 = vld [vmem:[#allocation2 + $0x50] sm:$0xff]  ;;  %v4429_v17 = vld [vmem:[#allocation2 + $0x58] sm:$0xff] }
 0x29c   : > { %10714 = vmatprep.mubr.msk.f32.mxu0 %vm389_vm1, %v4418_v31  ;;  %10659 = vmatmul.mubr.msk.f32.vlgmr.msra.gmra.mxu1 %vm389_vm1, %v4456_v0  ;;  %v4467_v42 = vld [vmem:[#allocation2 + $0x61] sm:$0xff]  ;;  %v4468_v27 = vld [vmem:[#allocation2 + $0x69] sm:$0xff]  ;;  %v4469_v62 = vld [vmem:[#allocation2 + $0x71] sm:$0xff] }
 0x29d   : > { %10715 = vmatmul.mubr.msk.f32.vlgmr.msra.gmra.mxu0 %vm389_vm1, %v4419_v45  ;;  %10769 = vmatpush3.msk.msra.mxu1 %vm462_vm0, %v15870_v5  ;;  %v4430_v1 = vld [vmem:[#allocation2 + $0x60] sm:$0xff]  ;;  %v4431_v43 = vld [vmem:[#allocation2 + $0x68] sm:$0xff]  ;;  %v4432_v47 = vld [vmem:[#allocation2 + $0x70] sm:$0xff] }
 0x29e   : > { %10661 = vmatprep.mubr.msk.f32.mxu1 %vm389_vm1, %v4457_v54  ;;  %10717 = vmatprep.mubr.msk.f32.mxu0 %vm389_vm1, %v4420_v15  ;;  %v4470_v41 = vld [vmem:[#allocation2 + $0x79] sm:$0xff]  ;;  %v4471_v23 = vld [vmem:[#allocation2 + $0x81] sm:$0xff]  ;;  %v13929_v46 = vld [vmem:[%s15542_s3 + $0x14] sm:$0xf] }
 0x29f   : > { %10825 = vmatpush3.msk.msra.mxu0 %vm462_vm0, %v13671_v22  ;;  %10880 = vmatprep.subr.msk.mxu1 %vm462_vm0, %v13880_v2  ;;  %v4382_v22 = vld [vmem:[#allocation2 + $0xd5] sm:$0x1]  ;;  %v4433_v12 = vld [vmem:[#allocation2 + $0x78] sm:$0xff]  ;;  %v4434_v53 = vld [vmem:[#allocation2 + $0x80] sm:$0xff] }
 0x2a0   : > { %10662 = vmatmul.mubr.msk.f32.gmra.mxu1 %vm389_vm1, %v4458_v4  ;;  %4383 = vst.msk [vmem:[#allocation2 + $0xd7] sm:$0x1] %vm4340_vm7, %v4382_v22  ;;  %10936 = vmatprep.subr.msk.mxu0 %vm462_vm0, %v13929_v46  ;;  %v4472_v40 = vld [vmem:[#allocation2 + $0x89] sm:$0xff]  ;;  %v4473_v36 = vld [vmem:[#allocation2 + $0x91] sm:$0xff]  ;;  %v4474_v26 = vld [vmem:[#allocation2 + $0x99] sm:$0xff] }
 0x2a1   : > { %10718 = vmatmul.mubr.msk.f32.gmra.mxu0 %vm389_vm1, %v4421_v7  ;;  %10664 = vmatprep.mubr.msk.f32.mxu1 %vm389_vm1, %v4459_v55  ;;  %v4435_v33 = vld [vmem:[#allocation2 + $0x88] sm:$0xff]  ;;  %v4436_v6 = vld [vmem:[#allocation2 + $0x90] sm:$0xff]  ;;  %v4437_v37 = vld [vmem:[#allocation2 + $0x98] sm:$0xff] }
 0x2a2   : > { %10720 = vmatprep.mubr.msk.f32.mxu0 %vm389_vm1, %v4422_v24  ;;  %v4475_v49 = vld [vmem:[#allocation2 + $0xa1] sm:$0xff]  ;;  %v4476_v0 = vld [vmem:[#allocation2 + $0xa9] sm:$0xff]  ;;  %v4477_v31 = vld [vmem:[#allocation2 + $0xb1] sm:$0xff] }
 0x2a3   : > { %v4438_v21 = vld [vmem:[#allocation2 + $0xa0] sm:$0xff]  ;;  %v4439_v14 = vld [vmem:[#allocation2 + $0xa8] sm:$0xff]  ;;  %v4440_v45 = vld [vmem:[#allocation2 + $0xb0] sm:$0xff] }
 0x2a4   : > { %10665 = vmatmul.mubr.msk.f32.gmra.mxu1 %vm389_vm1, %v4460_v30  ;;  %v4478_v54 = vld [vmem:[#allocation2 + $0xb9] sm:$0xff]  ;;  %v4479_v15 = vld [vmem:[#allocation2 + $0xc1] sm:$0xff]  ;;  %v4480_v4 = vld [vmem:[#allocation2 + $0xc9] sm:$0xff] }
 0x2a5   : > { %10721 = vmatmul.mubr.msk.f32.gmra.mxu0 %vm389_vm1, %v4423_v11  ;;  %10667 = vmatprep.mubr.msk.f32.mxu1 %vm389_vm1, %v4461_v32  ;;  %v4441_v5 = vld [vmem:[#allocation2 + $0xb8] sm:$0xff]  ;;  %v4442_v60 = vld [vmem:[#allocation2 + $0xc0] sm:$0xff]  ;;  %v4443_v7 = vld [vmem:[#allocation2 + $0xc8] sm:$0xff] }
 0x2a6   : > { %10723 = vmatprep.mubr.msk.f32.mxu0 %vm389_vm1, %v4424_v48  ;;  %v4482_v35 = vld [vmem:[#allocation2 + $0xd9] sm:$0xff]  ;;  %v13955_v24 = vld [vmem:[#allocation2 + $0x10e] sm:$0xff]  ;;  %v4483_v58 = vld [vmem:[#allocation2 + $0xe1] sm:$0xff] }
 0x2a7   : > { %v4481_v20 = vld [vmem:[#allocation2 + $0xd1] sm:$0xff]  ;;  %v4446_v51 = vld [vmem:[#allocation2 + $0xe0] sm:$0xff]  ;;  %4414 = vst.msk [vmem:[#allocation2 + $0x132] sm:$0xff] %vm389_vm1, %v13955_v24  ;;  %v4484_v22 = vld [vmem:[#allocation2 + $0xe9] sm:$0xff] }
 0x2a8   : > { %10668 = vmatmul.mubr.msk.f32.gmra.mxu1 %vm389_vm1, %v4462_v59  ;;  %v4444_v55 = vld [vmem:[#allocation2 + $0xd0] sm:$0xff]  ;;  %v4445_v61 = vld [vmem:[#allocation2 + $0xd8] sm:$0xff]  ;;  %v4447_v39 = vld [vmem:[#allocation2 + $0xe8] sm:$0xff] }
 0x2a9   : > { %10724 = vmatmul.mubr.msk.f32.gmra.mxu0 %vm389_vm1, %v4425_v34  ;;  %10670 = vmatprep.mubr.msk.f32.mxu1 %vm389_vm1, %v4463_v57  ;;  %v4485_v30 = vld [vmem:[#allocation2 + $0xf1] sm:$0xff]  ;;  %v4486_v13 = vld [vmem:[#allocation2 + $0xf9] sm:$0xff]  ;;  %v4487_v48 = vld [vmem:[#allocation2 + $0x101] sm:$0xff] }
 0x2aa   : > { %10726 = vmatprep.mubr.msk.f32.mxu0 %vm389_vm1, %v4426_v19  ;;  %v4448_v11 = vld [vmem:[#allocation2 + $0xf0] sm:$0xff]  ;;  %v4449_v32 = vld [vmem:[#allocation2 + $0xf8] sm:$0xff]  ;;  %v4450_v44 = vld [vmem:[#allocation2 + $0x100] sm:$0xff] }
 0x2ab   : > { %v4488_v59 = vld [vmem:[#allocation2 + $0x109] sm:$0xff]  ;;  %v4489_v57 = vld [vmem:[#allocation2 + $0x111] sm:$0xff] }
 0x2ac   : > { %10671 = vmatmul.mubr.msk.f32.gmra.mxu1 %vm389_vm1, %v4464_v18  ;;  %v4451_v34 = vld [vmem:[#allocation2 + $0x108] sm:$0xff]  ;;  %v4452_v19 = vld [vmem:[#allocation2 + $0x110] sm:$0xff] }
 0x2ad   : > { %10727 = vmatmul.mubr.msk.f32.gmra.mxu0 %vm389_vm1, %v4427_v25  ;;  %10673 = vmatprep.mubr.msk.f32.mxu1 %vm389_vm1, %v4465_v29  ;;  %v13973_v18 = vld [vmem:[#allocation2 + $0x116] sm:$0xff]  ;;  %v4413_v25 = vld [vmem:[#allocation2 + $0x11e] sm:$0x3] }
 0x2ae   : > { %10729 = vmatprep.mubr.msk.f32.mxu0 %vm389_vm1, %v4428_v28  ;;  %4415 = vst.msk [vmem:[#allocation2 + $0x13a] sm:$0xff] %vm389_vm1, %v13973_v18  ;;  %v4490_v29 = vld [vmem:[#allocation2 + $0x119] sm:$0xff] }
 0x2af   : > { %4416 = vst.msk [vmem:[#allocation2 + $0x142] sm:$0x3] %vm4409_vm8, %v4413_v25  ;;  %v4453_v28 = vld [vmem:[#allocation2 + $0x118] sm:$0xff]  ;;  %v6071_v25 = vld [vmem:[#allocation2 + $0x43] sm:$0xff] }
 0x2b0   : > { %10674 = vmatmul.mubr.msk.f32.gmra.mxu1 %vm389_vm1, %v4466_v9  ;;  %v5205_v9 = vld [vmem:[#allocation2 + $0x2] sm:$0xff] }
 0x2b1   : > { %10730 = vmatmul.mubr.msk.f32.gmra.mxu0 %vm389_vm1, %v4429_v17  ;;  %10676 = vmatprep.mubr.msk.f32.mxu1 %vm389_vm1, %v4467_v42  ;;  %v5635_v17 = vld [vmem:[#allocation2 + $0x12] sm:$0xff]  ;;  %v5206_v42 = vld [vmem:[#allocation2 + $0xa] sm:$0xff] }
 0x2b2   : > { %10732 = vmatprep.mubr.msk.f32.mxu0 %vm389_vm1, %v4430_v1  ;;  %v5636_v1 = vld [vmem:[#allocation2 + $0x1a] sm:$0xff] }
 0x2b4   : > { %10677 = vmatmul.mubr.msk.f32.gmra.mxu1 %vm389_vm1, %v4468_v27  ;;  %v13989_v27 = vld [vmem:[%s15542_s3 + $0x18] sm:$0xf] }
 0x2b5   : > { %10733 = vmatmul.mubr.msk.f32.gmra.mxu0 %vm389_vm1, %v4431_v43  ;;  %10679 = vmatprep.mubr.msk.f32.mxu1 %vm389_vm1, %v4469_v62  ;;  %v5637_v43 = vld [vmem:[#allocation2 + $0x22] sm:$0xff]  ;;  %v5638_v62 = vld [vmem:[#allocation2 + $0x2a] sm:$0xff] }
 0x2b6   : > { %10735 = vmatprep.mubr.msk.f32.mxu0 %vm389_vm1, %v4432_v47  ;;  %v5639_v47 = vld [vmem:[#allocation2 + $0x32] sm:$0xff] }
 0x2b8   : > { %10680 = vmatmul.mubr.msk.f32.gmra.mxu1 %vm389_vm1, %v4470_v41  ;;  %v5641_v41 = vld [vmem:[#allocation2 + $0x42] sm:$0xff] }
 0x2b9   : > { %10736 = vmatmul.mubr.msk.f32.gmra.mxu0 %vm389_vm1, %v4433_v12  ;;  %10682 = vmatprep.mubr.msk.f32.mxu1 %vm389_vm1, %v4471_v23  ;;  %v5642_v12 = vld [vmem:[#allocation2 + $0x4a] sm:$0xff]  ;;  %v5643_v23 = vld [vmem:[#allocation2 + $0x52] sm:$0xff] }
 0x2ba   : > { %10738 = vmatprep.mubr.msk.f32.mxu0 %vm389_vm1, %v4434_v53  ;;  %v14014_v53 = vld [vmem:[%s15542_s3 + $0x1c] sm:$0xf] }
 0x2bc   : > { %10683 = vmatmul.mubr.msk.f32.gmra.mxu1 %vm389_vm1, %v4472_v40  ;;  %v5645_v40 = vld [vmem:[#allocation2 + $0x62] sm:$0xff] }
 0x2bd   : > { %10739 = vmatmul.mubr.msk.f32.gmra.mxu0 %vm389_vm1, %v4435_v33  ;;  %10685 = vmatprep.mubr.msk.f32.mxu1 %vm389_vm1, %v4473_v36  ;;  %v5646_v33 = vld [vmem:[#allocation2 + $0x6a] sm:$0xff]  ;;  %v5647_v36 = vld [vmem:[#allocation2 + $0x72] sm:$0xff] }
 0x2be   : > { %10741 = vmatprep.mubr.msk.f32.mxu0 %vm389_vm1, %v4436_v6  ;;  %v5648_v6 = vld [vmem:[#allocation2 + $0x7a] sm:$0xff] }
 0x2c0   : > { %10686 = vmatmul.mubr.msk.f32.gmra.mxu1 %vm389_vm1, %v4474_v26  ;;  %v5649_v26 = vld [vmem:[#allocation2 + $0x82] sm:$0xff] }
 0x2c1   : > { %10742 = vmatmul.mubr.msk.f32.gmra.mxu0 %vm389_vm1, %v4437_v37  ;;  %10688 = vmatprep.mubr.msk.f32.mxu1 %vm389_vm1, %v4475_v49  ;;  %v5650_v37 = vld [vmem:[#allocation2 + $0x8a] sm:$0xff]  ;;  %v5651_v49 = vld [vmem:[#allocation2 + $0x92] sm:$0xff] }
 0x2c2   : > { %10744 = vmatprep.mubr.msk.f32.mxu0 %vm389_vm1, %v4438_v21  ;;  %v5652_v21 = vld [vmem:[#allocation2 + $0x9a] sm:$0xff] }
 0x2c4   : > { %10689 = vmatmul.mubr.msk.f32.gmra.mxu1 %vm389_vm1, %v4476_v0  ;;  %v5653_v0 = vld [vmem:[#allocation2 + $0xa2] sm:$0xff] }
 0x2c5   : > { %10745 = vmatmul.mubr.msk.f32.gmra.mxu0 %vm389_vm1, %v4439_v14  ;;  %10691 = vmatprep.mubr.msk.f32.mxu1 %vm389_vm1, %v4477_v31  ;;  %v5654_v14 = vld [vmem:[#allocation2 + $0xaa] sm:$0xff]  ;;  %v5655_v31 = vld [vmem:[#allocation2 + $0xb2] sm:$0xff] }
 0x2c6   : > { %10747 = vmatprep.mubr.msk.f32.mxu0 %vm389_vm1, %v4440_v45  ;;  %v5656_v45 = vld [vmem:[#allocation2 + $0xba] sm:$0xff] }
 0x2c8   : > { %10692 = vmatmul.mubr.msk.f32.gmra.mxu1 %vm389_vm1, %v4478_v54  ;;  %v5657_v54 = vld [vmem:[#allocation2 + $0xc2] sm:$0xff] }
 0x2c9   : > { %10748 = vmatmul.mubr.msk.f32.gmra.mxu0 %vm389_vm1, %v4441_v5  ;;  %10694 = vmatprep.mubr.msk.f32.mxu1 %vm389_vm1, %v4479_v15  ;;  %v5658_v5 = vld [vmem:[#allocation2 + $0xca] sm:$0xff]  ;;  %v5659_v15 = vld [vmem:[#allocation2 + $0xd2] sm:$0xff] }
 0x2ca   : > { %10750 = vmatprep.mubr.msk.f32.mxu0 %vm389_vm1, %v4442_v60  ;;  %v5660_v60 = vld [vmem:[#allocation2 + $0xda] sm:$0xff] }
 0x2cc   : > { %10695 = vmatmul.mubr.msk.f32.gmra.mxu1 %vm389_vm1, %v4480_v4  ;;  %v5661_v4 = vld [vmem:[#allocation2 + $0xe2] sm:$0xff] }
 0x2cd   : > { %10751 = vmatmul.mubr.msk.f32.gmra.mxu0 %vm389_vm1, %v4443_v7  ;;  %10697 = vmatprep.mubr.msk.f32.mxu1 %vm389_vm1, %v4481_v20  ;;  %v5662_v7 = vld [vmem:[#allocation2 + $0xea] sm:$0xff]  ;;  %v5663_v20 = vld [vmem:[#allocation2 + $0xf2] sm:$0xff] }
 0x2ce   : > { %10753 = vmatprep.mubr.msk.f32.mxu0 %vm389_vm1, %v4444_v55  ;;  %v5664_v55 = vld [vmem:[#allocation2 + $0xfa] sm:$0xff] }
 0x2d0   : > { %10698 = vmatmul.mubr.msk.f32.gmra.mxu1 %vm389_vm1, %v4482_v35  ;;  %v5665_v35 = vld [vmem:[#allocation2 + $0x102] sm:$0xff] }
 0x2d1   : > { %10754 = vmatmul.mubr.msk.f32.gmra.mxu0 %vm389_vm1, %v4445_v61  ;;  %10700 = vmatprep.mubr.msk.f32.mxu1 %vm389_vm1, %v4483_v58  ;;  %v5666_v61 = vld [vmem:[#allocation2 + $0x10a] sm:$0xff]  ;;  %v5667_v58 = vld [vmem:[#allocation2 + $0x112] sm:$0xff] }
 0x2d2   : > { %10756 = vmatprep.mubr.msk.f32.mxu0 %vm389_vm1, %v4446_v51  ;;  %v5668_v51 = vld [vmem:[#allocation2 + $0x11a] sm:$0xff] }
 0x2d4   : > { %10701 = vmatmul.mubr.msk.f32.gmra.mxu1 %vm389_vm1, %v4484_v22  ;;  %v5669_v22 = vld [vmem:[#allocation2 + $0x122] sm:$0xff] }
 0x2d5   : > { %10757 = vmatmul.mubr.msk.f32.gmra.mxu0 %vm389_vm1, %v4447_v39  ;;  %10703 = vmatprep.mubr.msk.f32.mxu1 %vm389_vm1, %v4485_v30  ;;  %v5670_v39 = vld [vmem:[#allocation2 + $0x12a] sm:$0xff]  ;;  %v6065_v30 = vld [vmem:[#allocation2 + $0x13] sm:$0xff] }
 0x2d6   : > { %10759 = vmatprep.mubr.msk.f32.mxu0 %vm389_vm1, %v4448_v11  ;;  %v6495_v11 = vld [vmem:[#allocation2 + $0x14] sm:$0xff] }
 0x2d8   : > { %10704 = vmatmul.mubr.msk.f32.gmra.mxu1 %vm389_vm1, %v4486_v13  ;;  %v6066_v13 = vld [vmem:[#allocation2 + $0x1b] sm:$0xff] }
 0x2d9   : > { %10760 = vmatmul.mubr.msk.f32.gmra.mxu0 %vm389_vm1, %v4449_v32  ;;  %10706 = vmatprep.mubr.msk.f32.mxu1 %vm389_vm1, %v4487_v48  ;;  %v6496_v32 = vld [vmem:[#allocation2 + $0x1c] sm:$0xff] }
 0x2da   : > { %10762 = vmatprep.mubr.msk.f32.mxu0 %vm389_vm1, %v4450_v44  ;;  %v6067_v48 = vld [vmem:[#allocation2 + $0x23] sm:$0xff] }
 0x2db   : > { %v14079_v44 = vld [vmem:[%s15542_s3 + $0x20] sm:$0xf] }
 0x2dc   : > { %10707 = vmatmul.mubr.msk.f32.gmra.mxu1 %vm389_vm1, %v4488_v59  ;;  %v6068_v59 = vld [vmem:[#allocation2 + $0x2b] sm:$0xff] }
 0x2dd   : > { %10763 = vmatmul.mubr.msk.f32.gmra.mxu0 %vm389_vm1, %v4451_v34  ;;  %10709 = vmatprep.mubr.msk.f32.mxu1 %vm389_vm1, %v4489_v57  ;;  %v6069_v34 = vld [vmem:[#allocation2 + $0x33] sm:$0xff] }
 0x2de   : > { %10765 = vmatprep.mubr.msk.f32.mxu0 %vm389_vm1, %v4452_v19  ;;  %v14093_v57 = vld [vmem:[#allocation2 + $0x34] sm:$0xff]  ;;  %v14098_v19 = vld [vmem:[#allocation2 + $0x3c] sm:$0xff] }
 0x2e0   : > { %10710 = vmatmul.mubr.msk.f32.gmra.mxu1 %vm389_vm1, %v4490_v29  ;;  %v14103_v29 = vld [vmem:[#allocation2 + $0x44] sm:$0xff] }
 0x2e1   : > { %10766 = vmatmul.mubr.msk.f32.gmra.mxu0 %vm389_vm1, %v4453_v28  ;;  %10770 = vmatprep.mubr.msk.f32.mxu1 %vm389_vm1, %v5205_v9  ;;  %v14108_v28 = vld [vmem:[#allocation2 + $0x4c] sm:$0xff] }
 0x2e2   : > { %10826 = vmatprep.mubr.msk.f32.mxu0 %vm389_vm1, %v5635_v17  ;;  %v6073_v9 = vld [vmem:[#allocation2 + $0x53] sm:$0xff] }
 0x2e4   : > { %10771 = vmatmul.mubr.msk.f32.vlgmr.msra.gmra.mxu1 %vm389_vm1, %v5206_v42  ;;  %v6074_v42 = vld [vmem:[#allocation2 + $0x5b] sm:$0xff] }
 0x2e5   : > { %10827 = vmatmul.mubr.msk.f32.vlgmr.msra.gmra.mxu0 %vm389_vm1, %v5636_v1  ;;  %10881 = vmatpush3.msk.msra.mxu1 %vm462_vm0, %v13880_v2  ;;  %v5640_v2 = vld [vmem:[#allocation2 + $0x3a] sm:$0xff] }
 0x2e6   : > { %10773 = vmatprep.mubr.msk.f32.mxu1 %vm389_vm1, %v5635_v17  ;;  %10829 = vmatprep.mubr.msk.f32.mxu0 %vm389_vm1, %v5637_v43  ;;  %v14113_v17 = vld [vmem:[#allocation2 + $0x54] sm:$0xff] }
 0x2e7   : > { %10937 = vmatpush3.msk.msra.mxu0 %vm462_vm0, %v13929_v46  ;;  %10992 = vmatprep.subr.msk.mxu1 %vm462_vm0, %v13989_v27  ;;  %v5644_v46 = vld [vmem:[#allocation2 + $0x5a] sm:$0xff] }
 0x2e8   : > { %10774 = vmatmul.mubr.msk.f32.gmra.mxu1 %vm389_vm1, %v5636_v1  ;;  %11048 = vmatprep.subr.msk.mxu0 %vm462_vm0, %v14014_v53  ;;  %v14118_v1 = vld [vmem:[#allocation2 + $0x5c] sm:$0xff] }
 0x2e9   : > { %10830 = vmatmul.mubr.msk.f32.gmra.mxu0 %vm389_vm1, %v5638_v62  ;;  %10776 = vmatprep.mubr.msk.f32.mxu1 %vm389_vm1, %v5637_v43  ;;  %v14123_v43 = vld [vmem:[#allocation2 + $0x64] sm:$0xff] }
 0x2ea   : > { %10832 = vmatprep.mubr.msk.f32.mxu0 %vm389_vm1, %v5639_v47 }
 0x2ec   : > { %10777 = vmatmul.mubr.msk.f32.gmra.mxu1 %vm389_vm1, %v5638_v62  ;;  %v6076_v62 = vld [vmem:[#allocation2 + $0x6b] sm:$0xff] }
 0x2ed   : > { %10833 = vmatmul.mubr.msk.f32.gmra.mxu0 %vm389_vm1, %v5640_v2  ;;  %10779 = vmatprep.mubr.msk.f32.mxu1 %vm389_vm1, %v5639_v47  ;;  %v14128_v47 = vld [vmem:[#allocation2 + $0x6c] sm:$0xff] }
 0x2ee   : > { %10835 = vmatprep.mubr.msk.f32.mxu0 %vm389_vm1, %v5641_v41 }
 0x2f0   : > { %10780 = vmatmul.mubr.msk.f32.gmra.mxu1 %vm389_vm1, %v5640_v2  ;;  %v6077_v2 = vld [vmem:[#allocation2 + $0x73] sm:$0xff] }
 0x2f1   : > { %10836 = vmatmul.mubr.msk.f32.gmra.mxu0 %vm389_vm1, %v5642_v12  ;;  %10782 = vmatprep.mubr.msk.f32.mxu1 %vm389_vm1, %v5641_v41  ;;  %v14133_v41 = vld [vmem:[#allocation2 + $0x74] sm:$0xff] }
 0x2f2   : > { %10838 = vmatprep.mubr.msk.f32.mxu0 %vm389_vm1, %v5643_v23 }
 0x2f4   : > { %10783 = vmatmul.mubr.msk.f32.gmra.mxu1 %vm389_vm1, %v5642_v12  ;;  %v6078_v12 = vld [vmem:[#allocation2 + $0x7b] sm:$0xff] }
 0x2f5   : > { %10839 = vmatmul.mubr.msk.f32.gmra.mxu0 %vm389_vm1, %v5644_v46  ;;  %10785 = vmatprep.mubr.msk.f32.mxu1 %vm389_vm1, %v5643_v23  ;;  %v14138_v23 = vld [vmem:[#allocation2 + $0x7c] sm:$0xff] }
 0x2f6   : > { %10841 = vmatprep.mubr.msk.f32.mxu0 %vm389_vm1, %v5645_v40 }
 0x2f8   : > { %10786 = vmatmul.mubr.msk.f32.gmra.mxu1 %vm389_vm1, %v5644_v46  ;;  %v14143_v46 = vld [vmem:[#allocation2 + $0x84] sm:$0xff] }
 0x2f9   : > { %10842 = vmatmul.mubr.msk.f32.gmra.mxu0 %vm389_vm1, %v5646_v33  ;;  %10788 = vmatprep.mubr.msk.f32.mxu1 %vm389_vm1, %v5645_v40  ;;  %v6080_v40 = vld [vmem:[#allocation2 + $0x8b] sm:$0xff] }
 0x2fa   : > { %10844 = vmatprep.mubr.msk.f32.mxu0 %vm389_vm1, %v5647_v36 }
 0x2fc   : > { %10789 = vmatmul.mubr.msk.f32.gmra.mxu1 %vm389_vm1, %v5646_v33  ;;  %v14148_v33 = vld [vmem:[#allocation2 + $0x8c] sm:$0xff] }
 0x2fd   : > { %10845 = vmatmul.mubr.msk.f32.gmra.mxu0 %vm389_vm1, %v5648_v6  ;;  %10791 = vmatprep.mubr.msk.f32.mxu1 %vm389_vm1, %v5647_v36  ;;  %v6081_v36 = vld [vmem:[#allocation2 + $0x93] sm:$0xff] }
 0x2fe   : > { %10847 = vmatprep.mubr.msk.f32.mxu0 %vm389_vm1, %v5649_v26 }
 0x300   : > { %10792 = vmatmul.mubr.msk.f32.gmra.mxu1 %vm389_vm1, %v5648_v6  ;;  %v14153_v6 = vld [vmem:[#allocation2 + $0x94] sm:$0xff] }
 0x301   : > { %10848 = vmatmul.mubr.msk.f32.gmra.mxu0 %vm389_vm1, %v5650_v37  ;;  %10794 = vmatprep.mubr.msk.f32.mxu1 %vm389_vm1, %v5649_v26  ;;  %v6082_v26 = vld [vmem:[#allocation2 + $0x9b] sm:$0xff] }
 0x302   : > { %10850 = vmatprep.mubr.msk.f32.mxu0 %vm389_vm1, %v5651_v49 }
 0x304   : > { %10795 = vmatmul.mubr.msk.f32.gmra.mxu1 %vm389_vm1, %v5650_v37  ;;  %v14158_v37 = vld [vmem:[#allocation2 + $0x9c] sm:$0xff] }
 0x305   : > { %10851 = vmatmul.mubr.msk.f32.gmra.mxu0 %vm389_vm1, %v5652_v21  ;;  %10797 = vmatprep.mubr.msk.f32.mxu1 %vm389_vm1, %v5651_v49  ;;  %v6083_v49 = vld [vmem:[#allocation2 + $0xa3] sm:$0xff] }
 0x306   : > { %10853 = vmatprep.mubr.msk.f32.mxu0 %vm389_vm1, %v5653_v0 }
 0x308   : > { %10798 = vmatmul.mubr.msk.f32.gmra.mxu1 %vm389_vm1, %v5652_v21  ;;  %v14163_v21 = vld [vmem:[#allocation2 + $0xa4] sm:$0xff] }
 0x309   : > { %10854 = vmatmul.mubr.msk.f32.gmra.mxu0 %vm389_vm1, %v5654_v14  ;;  %10800 = vmatprep.mubr.msk.f32.mxu1 %vm389_vm1, %v5653_v0  ;;  %v6084_v0 = vld [vmem:[#allocation2 + $0xab] sm:$0xff] }
 0x30a   : > { %10856 = vmatprep.mubr.msk.f32.mxu0 %vm389_vm1, %v5655_v31 }
 0x30c   : > { %10801 = vmatmul.mubr.msk.f32.gmra.mxu1 %vm389_vm1, %v5654_v14  ;;  %v14168_v14 = vld [vmem:[#allocation2 + $0xac] sm:$0xff] }
 0x30d   : > { %10857 = vmatmul.mubr.msk.f32.gmra.mxu0 %vm389_vm1, %v5656_v45  ;;  %10803 = vmatprep.mubr.msk.f32.mxu1 %vm389_vm1, %v5655_v31  ;;  %v6085_v31 = vld [vmem:[#allocation2 + $0xb3] sm:$0xff] }
 0x30e   : > { %10859 = vmatprep.mubr.msk.f32.mxu0 %vm389_vm1, %v5657_v54 }
 0x310   : > { %10804 = vmatmul.mubr.msk.f32.gmra.mxu1 %vm389_vm1, %v5656_v45  ;;  %v14173_v45 = vld [vmem:[#allocation2 + $0xb4] sm:$0xff] }
 0x311   : > { %10860 = vmatmul.mubr.msk.f32.gmra.mxu0 %vm389_vm1, %v5658_v5  ;;  %10806 = vmatprep.mubr.msk.f32.mxu1 %vm389_vm1, %v5657_v54  ;;  %v6086_v54 = vld [vmem:[#allocation2 + $0xbb] sm:$0xff] }
 0x312   : > { %10862 = vmatprep.mubr.msk.f32.mxu0 %vm389_vm1, %v5659_v15 }
 0x314   : > { %10807 = vmatmul.mubr.msk.f32.gmra.mxu1 %vm389_vm1, %v5658_v5  ;;  %v14178_v5 = vld [vmem:[#allocation2 + $0xbc] sm:$0xff] }
 0x315   : > { %10863 = vmatmul.mubr.msk.f32.gmra.mxu0 %vm389_vm1, %v5660_v60  ;;  %10809 = vmatprep.mubr.msk.f32.mxu1 %vm389_vm1, %v5659_v15  ;;  %v6087_v15 = vld [vmem:[#allocation2 + $0xc3] sm:$0xff] }
 0x316   : > { %10865 = vmatprep.mubr.msk.f32.mxu0 %vm389_vm1, %v5661_v4 }
 0x318   : > { %10810 = vmatmul.mubr.msk.f32.gmra.mxu1 %vm389_vm1, %v5660_v60  ;;  %v14183_v60 = vld [vmem:[#allocation2 + $0xc4] sm:$0xff] }
 0x319   : > { %10866 = vmatmul.mubr.msk.f32.gmra.mxu0 %vm389_vm1, %v5662_v7  ;;  %10812 = vmatprep.mubr.msk.f32.mxu1 %vm389_vm1, %v5661_v4  ;;  %v6088_v4 = vld [vmem:[#allocation2 + $0xcb] sm:$0xff] }
 0x31a   : > { %10868 = vmatprep.mubr.msk.f32.mxu0 %vm389_vm1, %v5663_v20 }
 0x31c   : > { %10813 = vmatmul.mubr.msk.f32.gmra.mxu1 %vm389_vm1, %v5662_v7  ;;  %v14188_v7 = vld [vmem:[#allocation2 + $0xcc] sm:$0xff] }
 0x31d   : > { %10869 = vmatmul.mubr.msk.f32.gmra.mxu0 %vm389_vm1, %v5664_v55  ;;  %10815 = vmatprep.mubr.msk.f32.mxu1 %vm389_vm1, %v5663_v20  ;;  %v6089_v20 = vld [vmem:[#allocation2 + $0xd3] sm:$0xff] }
 0x31e   : > { %10871 = vmatprep.mubr.msk.f32.mxu0 %vm389_vm1, %v5665_v35 }
 0x320   : > { %10816 = vmatmul.mubr.msk.f32.gmra.mxu1 %vm389_vm1, %v5664_v55  ;;  %v14193_v55 = vld [vmem:[#allocation2 + $0xd4] sm:$0xff] }
 0x321   : > { %10872 = vmatmul.mubr.msk.f32.gmra.mxu0 %vm389_vm1, %v5666_v61  ;;  %10818 = vmatprep.mubr.msk.f32.mxu1 %vm389_vm1, %v5665_v35  ;;  %v6090_v35 = vld [vmem:[#allocation2 + $0xdb] sm:$0xff] }
 0x322   : > { %10874 = vmatprep.mubr.msk.f32.mxu0 %vm389_vm1, %v5667_v58 }
 0x324   : > { %10819 = vmatmul.mubr.msk.f32.gmra.mxu1 %vm389_vm1, %v5666_v61  ;;  %v14198_v61 = vld [vmem:[#allocation2 + $0xdc] sm:$0xff] }
 0x325   : > { %10875 = vmatmul.mubr.msk.f32.gmra.mxu0 %vm389_vm1, %v5668_v51  ;;  %10821 = vmatprep.mubr.msk.f32.mxu1 %vm389_vm1, %v5667_v58 }
 0x326   : > { %10877 = vmatprep.mubr.msk.f32.mxu0 %vm389_vm1, %v5669_v22  ;;  %v6091_v22 = vld [vmem:[#allocation2 + $0xe3] sm:$0xff] }
 0x328   : > { %10822 = vmatmul.mubr.msk.f32.gmra.mxu1 %vm389_vm1, %v5668_v51 }
 0x329   : > { %10878 = vmatmul.mubr.msk.f32.gmra.mxu0 %vm389_vm1, %v5670_v39  ;;  %10882 = vmatprep.mubr.msk.f32.mxu1 %vm389_vm1, %v6065_v30  ;;  %v14203_v39 = vld [vmem:[#allocation2 + $0xe4] sm:$0xff] }
 0x32a   : > { %10938 = vmatprep.mubr.msk.f32.mxu0 %vm389_vm1, %v6495_v11 }
 0x32c   : > { %10883 = vmatmul.mubr.msk.f32.vlgmr.msra.gmra.mxu1 %vm389_vm1, %v6066_v13 }
 0x32d   : > { %10939 = vmatmul.mubr.msk.f32.vlgmr.msra.gmra.mxu0 %vm389_vm1, %v6496_v32  ;;  %10993 = vmatpush3.msk.msra.mxu1 %vm462_vm0, %v13989_v27  ;;  %v6075_v27 = vld [vmem:[#allocation2 + $0x63] sm:$0xff] }
 0x32e   : > { %10885 = vmatprep.mubr.msk.f32.mxu1 %vm389_vm1, %v6067_v48  ;;  %10941 = vmatprep.mubr.msk.f32.mxu0 %vm389_vm1, %v13867_v3  ;;  %v6070_v3 = vld [vmem:[#allocation2 + $0x3b] sm:$0xff]  ;;  %v6092_v48 = vld [vmem:[#allocation2 + $0xeb] sm:$0xff] }
 0x32f   : > { %11049 = vmatpush3.msk.msra.mxu0 %vm462_vm0, %v14014_v53  ;;  %11104 = vmatprep.subr.msk.mxu1 %vm462_vm0, %v14079_v44  ;;  %v6079_v53 = vld [vmem:[#allocation2 + $0x83] sm:$0xff] }
 0x330   : > { %10886 = vmatmul.mubr.msk.f32.gmra.mxu1 %vm389_vm1, %v6068_v59  ;;  %v14212_v59 = vld [vmem:[#allocation2 + $0xec] sm:$0xff] }
 0x331   : > { %10942 = vmatmul.mubr.msk.f32.gmra.mxu0 %vm389_vm1, %v13843_v8  ;;  %10888 = vmatprep.mubr.msk.f32.mxu1 %vm389_vm1, %v6069_v34  ;;  %v6072_v8 = vld [vmem:[#allocation2 + $0x4b] sm:$0xff] }
 0x332   : > { %10944 = vmatprep.mubr.msk.f32.mxu0 %vm389_vm1, %v14093_v57 }
 0x334   : > { %10889 = vmatmul.mubr.msk.f32.gmra.mxu1 %vm389_vm1, %v6070_v3 }
 0x335   : > { %10945 = vmatmul.mubr.msk.f32.gmra.mxu0 %vm389_vm1, %v14098_v19  ;;  %10891 = vmatprep.mubr.msk.f32.mxu1 %vm389_vm1, %v6071_v25  ;;  %v6093_v25 = vld [vmem:[#allocation2 + $0xf3] sm:$0xff] }
 0x336   : > { %10947 = vmatprep.mubr.msk.f32.mxu0 %vm389_vm1, %v14103_v29 }
 0x338   : > { %10892 = vmatmul.mubr.msk.f32.gmra.mxu1 %vm389_vm1, %v6072_v8  ;;  %v14217_v8 = vld [vmem:[#allocation2 + $0xf4] sm:$0xff] }
 0x339   : > { %10948 = vmatmul.mubr.msk.f32.gmra.mxu0 %vm389_vm1, %v14108_v28  ;;  %10894 = vmatprep.mubr.msk.f32.mxu1 %vm389_vm1, %v6073_v9 }
 0x33a   : > { %10950 = vmatprep.mubr.msk.f32.mxu0 %vm389_vm1, %v14113_v17 }
 0x33c   : > { %10895 = vmatmul.mubr.msk.f32.gmra.mxu1 %vm389_vm1, %v6074_v42 }
 0x33d   : > { %10951 = vmatmul.mubr.msk.f32.gmra.mxu0 %vm389_vm1, %v14118_v1  ;;  %10897 = vmatprep.mubr.msk.f32.mxu1 %vm389_vm1, %v6075_v27 }
 0x33e   : > { %10953 = vmatprep.mubr.msk.f32.mxu0 %vm389_vm1, %v14123_v43 }
 0x340   : > { %10898 = vmatmul.mubr.msk.f32.gmra.mxu1 %vm389_vm1, %v6076_v62 }
 0x341   : > { %10954 = vmatmul.mubr.msk.f32.gmra.mxu0 %vm389_vm1, %v14128_v47  ;;  %10900 = vmatprep.mubr.msk.f32.mxu1 %vm389_vm1, %v6077_v2  ;;  %v6094_v2 = vld [vmem:[#allocation2 + $0xfb] sm:$0xff] }
 0x342   : > { %10956 = vmatprep.mubr.msk.f32.mxu0 %vm389_vm1, %v14133_v41 }
 0x344   : > { %10901 = vmatmul.mubr.msk.f32.gmra.mxu1 %vm389_vm1, %v6078_v12  ;;  %v14226_v12 = vld [vmem:[#allocation2 + $0xfc] sm:$0xff] }
 0x345   : > { %10957 = vmatmul.mubr.msk.f32.gmra.mxu0 %vm389_vm1, %v14138_v23  ;;  %10903 = vmatprep.mubr.msk.f32.mxu1 %vm389_vm1, %v6079_v53 }
 0x346   : > { %10959 = vmatprep.mubr.msk.f32.mxu0 %vm389_vm1, %v14143_v46 }
 0x348   : > { %10904 = vmatmul.mubr.msk.f32.gmra.mxu1 %vm389_vm1, %v6080_v40 }
 0x349   : > { %10960 = vmatmul.mubr.msk.f32.gmra.mxu0 %vm389_vm1, %v14148_v33  ;;  %10906 = vmatprep.mubr.msk.f32.mxu1 %vm389_vm1, %v6081_v36  ;;  %v6095_v36 = vld [vmem:[#allocation2 + $0x103] sm:$0xff] }
 0x34a   : > { %10962 = vmatprep.mubr.msk.f32.mxu0 %vm389_vm1, %v14153_v6 }
 0x34c   : > { %10907 = vmatmul.mubr.msk.f32.gmra.mxu1 %vm389_vm1, %v6082_v26  ;;  %v14231_v26 = vld [vmem:[#allocation2 + $0x104] sm:$0xff] }
 0x34d   : > { %10963 = vmatmul.mubr.msk.f32.gmra.mxu0 %vm389_vm1, %v14158_v37  ;;  %10909 = vmatprep.mubr.msk.f32.mxu1 %vm389_vm1, %v6083_v49 }
 0x34e   : > { %10965 = vmatprep.mubr.msk.f32.mxu0 %vm389_vm1, %v14163_v21 }
 0x350   : > { %10910 = vmatmul.mubr.msk.f32.gmra.mxu1 %vm389_vm1, %v6084_v0 }
 0x351   : > { %10966 = vmatmul.mubr.msk.f32.gmra.mxu0 %vm389_vm1, %v14168_v14  ;;  %10912 = vmatprep.mubr.msk.f32.mxu1 %vm389_vm1, %v6085_v31 }
 0x352   : > { %10968 = vmatprep.mubr.msk.f32.mxu0 %vm389_vm1, %v14173_v45 }
 0x354   : > { %10913 = vmatmul.mubr.msk.f32.gmra.mxu1 %vm389_vm1, %v6086_v54 }
 0x355   : > { %10969 = vmatmul.mubr.msk.f32.gmra.mxu0 %vm389_vm1, %v14178_v5  ;;  %10915 = vmatprep.mubr.msk.f32.mxu1 %vm389_vm1, %v6087_v15  ;;  %v6096_v15 = vld [vmem:[#allocation2 + $0x10b] sm:$0xff] }
 0x356   : > { %10971 = vmatprep.mubr.msk.f32.mxu0 %vm389_vm1, %v14183_v60 }
 0x358   : > { %10916 = vmatmul.mubr.msk.f32.gmra.mxu1 %vm389_vm1, %v6088_v4  ;;  %v14240_v4 = vld [vmem:[#allocation2 + $0x10c] sm:$0xff] }
 0x359   : > { %10972 = vmatmul.mubr.msk.f32.gmra.mxu0 %vm389_vm1, %v14188_v7  ;;  %10918 = vmatprep.mubr.msk.f32.mxu1 %vm389_vm1, %v6089_v20 }
 0x35a   : > { %10974 = vmatprep.mubr.msk.f32.mxu0 %vm389_vm1, %v14193_v55 }
 0x35c   : > { %v10660_v58 = vpop.f32.mrf.mxu1  ;;  %10919 = vmatmul.mubr.msk.f32.gmra.mxu1 %vm389_vm1, %v6090_v35 }
 0x35d   : > { %v10716_v51 = vpop.f32.mrf.mxu0  ;;  %10975 = vmatmul.mubr.msk.f32.gmra.mxu0 %vm389_vm1, %v14198_v61  ;;  %10921 = vmatprep.mubr.msk.f32.mxu1 %vm389_vm1, %v6091_v22 }
 0x35e   : > { %v14205_v30 = vadd.f32 %v10716_v51, %v10660_v58  ;;  %10977 = vmatprep.mubr.msk.f32.mxu0 %vm389_vm1, %v14203_v39  ;;  %v4670_v11 = vpop.f32.mrf.mxu1  ;;  %v6097_v58 = vld [vmem:[#allocation2 + $0x113] sm:$0xff] }
 0x35f   : > { %v5026_v13 = vpop.f32.mrf.mxu0  ;;  %v14245_v51 = vld [vmem:[#allocation2 + $0x114] sm:$0xff] }
 0x360   : > { %v14210_v32 = vadd.f32 %v5026_v13, %v4670_v11  ;;  %v10663_v34 = vpop.f32.mrf.mxu1  ;;  %10922 = vmatmul.mubr.msk.f32.gmra.mxu1 %vm389_vm1, %v6092_v48 }
 0x361   : > { %v10719_v3 = vpop.f32.mrf.mxu0  ;;  %10978 = vmatmul.mubr.msk.f32.gmra.mxu0 %vm389_vm1, %v14212_v59  ;;  %10924 = vmatprep.mubr.msk.f32.mxu1 %vm389_vm1, %v6093_v25 }
 0x362   : > { %v14219_v9 = vadd.f32 %v10719_v3, %v10663_v34  ;;  %10980 = vmatprep.mubr.msk.f32.mxu0 %vm389_vm1, %v14217_v8  ;;  %v4680_v42 = vpop.f32.mrf.mxu1  ;;  %v6098_v34 = vld [vmem:[#allocation2 + $0x11b] sm:$0xff] }
 0x363   : > { %v5036_v27 = vpop.f32.mrf.mxu0  ;;  %v14254_v3 = vld [vmem:[#allocation2 + $0x11c] sm:$0xff] }
 0x364   : > { %v14224_v62 = vadd.f32 %v5036_v27, %v4680_v42  ;;  %v10666_v53 = vpop.f32.mrf.mxu1  ;;  %10925 = vmatmul.mubr.msk.f32.gmra.mxu1 %vm389_vm1, %v6094_v2  ;;  %v6099_v27 = vld [vmem:[#allocation2 + $0x123] sm:$0xff] }
 0x365   : > { %v10722_v40 = vpop.f32.mrf.mxu0  ;;  %10981 = vmatmul.mubr.msk.f32.gmra.mxu0 %vm389_vm1, %v14226_v12  ;;  %10927 = vmatprep.mubr.msk.f32.mxu1 %vm389_vm1, %v6095_v36  ;;  %v14259_v2 = vld [vmem:[#allocation2 + $0x124] sm:$0xff] }
 0x366   : > { %v14233_v49 = vadd.f32 %v10722_v40, %v10666_v53  ;;  %10983 = vmatprep.mubr.msk.f32.mxu0 %vm389_vm1, %v14231_v26  ;;  %v4690_v0 = vpop.f32.mrf.mxu1 }
 0x367   : > { %v5046_v31 = vpop.f32.mrf.mxu0 }
 0x368   : > { %v14238_v54 = vadd.f32 %v5046_v31, %v4690_v0  ;;  %v10669_v20 = vpop.f32.mrf.mxu1  ;;  %10928 = vmatmul.mubr.msk.f32.gmra.mxu1 %vm389_vm1, %v6096_v15  ;;  %v6100_v31 = vld [vmem:[#allocation2 + $0x12b] sm:$0xff] }
 0x369   : > { %v10725_v35 = vpop.f32.mrf.mxu0  ;;  %10984 = vmatmul.mubr.msk.f32.gmra.mxu0 %vm389_vm1, %v14240_v4  ;;  %10930 = vmatprep.mubr.msk.f32.mxu1 %vm389_vm1, %v6097_v58  ;;  %v14268_v15 = vld [vmem:[#allocation2 + $0x12c] sm:$0xff]  ;;  %v6925_v58 = vld [vmem:[#allocation2 + $0x24] sm:$0xff] }
 0x36a   : > { %v14247_v22 = vadd.f32 %v10725_v35, %v10669_v20  ;;  %10986 = vmatprep.mubr.msk.f32.mxu0 %vm389_vm1, %v14245_v51  ;;  %v4700_v11 = vpop.f32.mrf.mxu1 }
 0x36b   : > { %v5056_v13 = vpop.f32.mrf.mxu0 }
 0x36c   : > { %v14252_v48 = vadd.f32 %v5056_v13, %v4700_v11  ;;  %v10672_v25 = vpop.f32.mrf.mxu1  ;;  %10931 = vmatmul.mubr.msk.f32.gmra.mxu1 %vm389_vm1, %v6098_v34  ;;  %v7355_v11 = vld [vmem:[#allocation2 + $0x25] sm:$0xff] }
 0x36d   : > { %v10728_v42 = vpop.f32.mrf.mxu0  ;;  %10987 = vmatmul.mubr.msk.f32.gmra.mxu0 %vm389_vm1, %v14254_v3  ;;  %10933 = vmatprep.mubr.msk.f32.mxu1 %vm389_vm1, %v6099_v27  ;;  %v6926_v27 = vld [vmem:[#allocation2 + $0x2c] sm:$0xff] }
 0x36e   : > { %v14261_v53 = vadd.f32 %v10728_v42, %v10672_v25  ;;  %10989 = vmatprep.mubr.msk.f32.mxu0 %vm389_vm1, %v14259_v2  ;;  %v4710_v40 = vpop.f32.mrf.mxu1 }
 0x36f   : > { %v5066_v36 = vpop.f32.mrf.mxu0 }
 0x370   : > { %v14266_v0 = vadd.f32 %v5066_v36, %v4710_v40  ;;  %v10675_v20 = vpop.f32.mrf.mxu1  ;;  %10934 = vmatmul.mubr.msk.f32.gmra.mxu1 %vm389_vm1, %v6100_v31  ;;  %v7356_v40 = vld [vmem:[#allocation2 + $0x2d] sm:$0xff] }
 0x371   : > { %v10731_v35 = vpop.f32.mrf.mxu0  ;;  %10990 = vmatmul.mubr.msk.f32.gmra.mxu0 %vm389_vm1, %v14268_v15  ;;  %10994 = vmatprep.mubr.msk.f32.mxu1 %vm389_vm1, %v6925_v58 }
 0x372   : > { %v14273_v13 = vadd.f32 %v10731_v35, %v10675_v20  ;;  %11050 = vmatprep.mubr.msk.f32.mxu0 %vm389_vm1, %v7355_v11  ;;  %v4720_v34 = vpop.f32.mrf.mxu1  ;;  %v7357_v20 = vld [vmem:[#allocation2 + $0x35] sm:$0xff] }
 0x373   : > { %v5076_v25 = vpop.f32.mrf.mxu0 }
 0x374   : > { %v14277_v42 = vadd.f32 %v5076_v25, %v4720_v34  ;;  %v10678_v36 = vpop.f32.mrf.mxu1  ;;  %10995 = vmatmul.mubr.msk.f32.vlgmr.msra.gmra.mxu1 %vm389_vm1, %v6926_v27  ;;  %v7358_v34 = vld [vmem:[#allocation2 + $0x3d] sm:$0xff] }
 0x375   : > { %v10734_v16 = vpop.f32.mrf.mxu0  ;;  %11051 = vmatmul.mubr.msk.f32.vlgmr.msra.gmra.mxu0 %vm389_vm1, %v7356_v40  ;;  %11105 = vmatpush3.msk.msra.mxu1 %vm462_vm0, %v14079_v44 }
 0x376   : > { %v14281_v31 = vadd.f32 %v10734_v16, %v10678_v36  ;;  %10997 = vmatprep.mubr.msk.f32.mxu1 %vm389_vm1, %v14093_v57  ;;  %11053 = vmatprep.mubr.msk.f32.mxu0 %vm389_vm1, %v7357_v20  ;;  %v4730_v35 = vpop.f32.mrf.mxu1  ;;  %v7359_v16 = vld [vmem:[#allocation2 + $0x45] sm:$0xff]  ;;  %v7360_v20 = vld [vmem:[#allocation2 + $0x4d] sm:$0xff] }
 0x377   : > { %v5086_v58 = vpop.f32.mrf.mxu0 }
 0x378   : > { %v14288_v11 = vadd.f32 %v5086_v58, %v4730_v35  ;;  %v10681_v25 = vpop.f32.mrf.mxu1  ;;  %10998 = vmatmul.mubr.msk.f32.gmra.mxu1 %vm389_vm1, %v14098_v19  ;;  %v7361_v19 = vld [vmem:[#allocation2 + $0x55] sm:$0xff] }
 0x379   : > { %v10737_v27 = vpop.f32.mrf.mxu0  ;;  %11054 = vmatmul.mubr.msk.f32.gmra.mxu0 %vm389_vm1, %v7358_v34  ;;  %11000 = vmatprep.mubr.msk.f32.mxu1 %vm389_vm1, %v14103_v29 }
 0x37a   : > { %v14293_v44 = vadd.f32 %v10737_v27, %v10681_v25  ;;  %11056 = vmatprep.mubr.msk.f32.mxu0 %vm389_vm1, %v7359_v16  ;;  %v4740_v57 = vpop.f32.mrf.mxu1  ;;  %v7362_v16 = vld [vmem:[#allocation2 + $0x5d] sm:$0xff] }
 0x37b   : > { %v5096_v40 = vpop.f32.mrf.mxu0 }
 0x37c   : > { %v14298_v36 = vadd.f32 %v5096_v40, %v4740_v57  ;;  %v10684_v35 = vpop.f32.mrf.mxu1  ;;  %11001 = vmatmul.mubr.msk.f32.gmra.mxu1 %vm389_vm1, %v14108_v28  ;;  %v7363_v28 = vld [vmem:[#allocation2 + $0x65] sm:$0xff] }
 0x37d   : > { %v10740_v58 = vpop.f32.mrf.mxu0  ;;  %11057 = vmatmul.mubr.msk.f32.gmra.mxu0 %vm389_vm1, %v7360_v20  ;;  %11003 = vmatprep.mubr.msk.f32.mxu1 %vm389_vm1, %v14113_v17 }
 0x37e   : > { %v14303_v34 = vadd.f32 %v10740_v58, %v10684_v35  ;;  %11059 = vmatprep.mubr.msk.f32.mxu0 %vm389_vm1, %v7361_v19  ;;  %v4750_v29 = vpop.f32.mrf.mxu1  ;;  %v7364_v19 = vld [vmem:[#allocation2 + $0x6d] sm:$0xff] }
 0x37f   : > { %v5106_v25 = vpop.f32.mrf.mxu0 }
 0x380   : > { %v14308_v27 = vadd.f32 %v5106_v25, %v4750_v29  ;;  %v10687_v57 = vpop.f32.mrf.mxu1  ;;  %11004 = vmatmul.mubr.msk.f32.gmra.mxu1 %vm389_vm1, %v14118_v1  ;;  %v7365_v1 = vld [vmem:[#allocation2 + $0x75] sm:$0xff] }
 0x381   : > { %v10743_v40 = vpop.f32.mrf.mxu0  ;;  %11060 = vmatmul.mubr.msk.f32.gmra.mxu0 %vm389_vm1, %v7362_v16  ;;  %11006 = vmatprep.mubr.msk.f32.mxu1 %vm389_vm1, %v14123_v43 }
 0x382   : > { %v14313_v20 = vadd.f32 %v10743_v40, %v10687_v57  ;;  %11062 = vmatprep.mubr.msk.f32.mxu0 %vm389_vm1, %v7363_v28  ;;  %v4760_v17 = vpop.f32.mrf.mxu1  ;;  %v7366_v28 = vld [vmem:[#allocation2 + $0x7d] sm:$0xff] }
 0x383   : > { %v5116_v35 = vpop.f32.mrf.mxu0 }
 0x384   : > { %v14318_v58 = vadd.f32 %v5116_v35, %v4760_v17  ;;  %v10690_v29 = vpop.f32.mrf.mxu1  ;;  %11007 = vmatmul.mubr.msk.f32.gmra.mxu1 %vm389_vm1, %v14128_v47  ;;  %v7367_v47 = vld [vmem:[#allocation2 + $0x85] sm:$0xff] }
 0x385   : > { %v10746_v25 = vpop.f32.mrf.mxu0  ;;  %11063 = vmatmul.mubr.msk.f32.gmra.mxu0 %vm389_vm1, %v7364_v19  ;;  %11009 = vmatprep.mubr.msk.f32.mxu1 %vm389_vm1, %v14133_v41 }
 0x386   : > { %v14323_v16 = vadd.f32 %v10746_v25, %v10690_v29  ;;  %11065 = vmatprep.mubr.msk.f32.mxu0 %vm389_vm1, %v7365_v1  ;;  %v4770_v43 = vpop.f32.mrf.mxu1  ;;  %v7368_v1 = vld [vmem:[#allocation2 + $0x8d] sm:$0xff] }
 0x387   : > { %v5126_v57 = vpop.f32.mrf.mxu0 }
 0x388   : > { %v14328_v40 = vadd.f32 %v5126_v57, %v4770_v43  ;;  %v10693_v17 = vpop.f32.mrf.mxu1  ;;  %11010 = vmatmul.mubr.msk.f32.gmra.mxu1 %vm389_vm1, %v14138_v23  ;;  %v7369_v23 = vld [vmem:[#allocation2 + $0x95] sm:$0xff] }
 0x389   : > { %v10749_v35 = vpop.f32.mrf.mxu0  ;;  %11066 = vmatmul.mubr.msk.f32.gmra.mxu0 %vm389_vm1, %v7366_v28  ;;  %11012 = vmatprep.mubr.msk.f32.mxu1 %vm389_vm1, %v14143_v46 }
 0x38a   : > { %v14333_v19 = vadd.f32 %v10749_v35, %v10693_v17  ;;  %11068 = vmatprep.mubr.msk.f32.mxu0 %vm389_vm1, %v7367_v47  ;;  %v4780_v41 = vpop.f32.mrf.mxu1  ;;  %v7370_v47 = vld [vmem:[#allocation2 + $0x9d] sm:$0xff] }
 0x38b   : > { %v5136_v29 = vpop.f32.mrf.mxu0 }
 0x38c   : > { %v14338_v25 = vadd.f32 %v5136_v29, %v4780_v41  ;;  %v10696_v43 = vpop.f32.mrf.mxu1  ;;  %11013 = vmatmul.mubr.msk.f32.gmra.mxu1 %vm389_vm1, %v14148_v33  ;;  %v7371_v33 = vld [vmem:[#allocation2 + $0xa5] sm:$0xff] }
 0x38d   : > { %v10752_v57 = vpop.f32.mrf.mxu0  ;;  %11069 = vmatmul.mubr.msk.f32.gmra.mxu0 %vm389_vm1, %v7368_v1  ;;  %11015 = vmatprep.mubr.msk.f32.mxu1 %vm389_vm1, %v14153_v6 }
 0x38e   : > { %v14343_v28 = vadd.f32 %v10752_v57, %v10696_v43  ;;  %11071 = vmatprep.mubr.msk.f32.mxu0 %vm389_vm1, %v7369_v23  ;;  %v4790_v46 = vpop.f32.mrf.mxu1  ;;  %v7372_v23 = vld [vmem:[#allocation2 + $0xad] sm:$0xff] }
 0x38f   : > { %v5146_v17 = vpop.f32.mrf.mxu0 }
 0x390   : > { %v14348_v35 = vadd.f32 %v5146_v17, %v4790_v46  ;;  %v10699_v41 = vpop.f32.mrf.mxu1  ;;  %11016 = vmatmul.mubr.msk.f32.gmra.mxu1 %vm389_vm1, %v14158_v37  ;;  %v7373_v37 = vld [vmem:[#allocation2 + $0xb5] sm:$0xff] }
 0x391   : > { %v10755_v29 = vpop.f32.mrf.mxu0  ;;  %11072 = vmatmul.mubr.msk.f32.gmra.mxu0 %vm389_vm1, %v7370_v47  ;;  %11018 = vmatprep.mubr.msk.f32.mxu1 %vm389_vm1, %v14163_v21 }
 0x392   : > { %v14353_v1 = vadd.f32 %v10755_v29, %v10699_v41  ;;  %11074 = vmatprep.mubr.msk.f32.mxu0 %vm389_vm1, %v7371_v33  ;;  %v4800_v6 = vpop.f32.mrf.mxu1  ;;  %v7374_v33 = vld [vmem:[#allocation2 + $0xbd] sm:$0xff] }
 0x393   : > { %v5156_v43 = vpop.f32.mrf.mxu0 }
 0x394   : > { %v14358_v57 = vadd.f32 %v5156_v43, %v4800_v6  ;;  %v10702_v46 = vpop.f32.mrf.mxu1  ;;  %11019 = vmatmul.mubr.msk.f32.gmra.mxu1 %vm389_vm1, %v14168_v14  ;;  %v7375_v14 = vld [vmem:[#allocation2 + $0xc5] sm:$0xff] }
 0x395   : > { %v10758_v17 = vpop.f32.mrf.mxu0  ;;  %11075 = vmatmul.mubr.msk.f32.gmra.mxu0 %vm389_vm1, %v7372_v23  ;;  %11021 = vmatprep.mubr.msk.f32.mxu1 %vm389_vm1, %v14173_v45 }
 0x396   : > { %v14363_v47 = vadd.f32 %v10758_v17, %v10702_v46  ;;  %11077 = vmatprep.mubr.msk.f32.mxu0 %vm389_vm1, %v7373_v37  ;;  %v4810_v21 = vpop.f32.mrf.mxu1  ;;  %v7376_v37 = vld [vmem:[#allocation2 + $0xcd] sm:$0xff] }
 0x397   : > { %v5166_v41 = vpop.f32.mrf.mxu0 }
 0x398   : > { %v14368_v29 = vadd.f32 %v5166_v41, %v4810_v21  ;;  %v10705_v6 = vpop.f32.mrf.mxu1  ;;  %11022 = vmatmul.mubr.msk.f32.gmra.mxu1 %vm389_vm1, %v14178_v5  ;;  %v7377_v5 = vld [vmem:[#allocation2 + $0xd5] sm:$0xff] }
 0x399   : > { %v10761_v43 = vpop.f32.mrf.mxu0  ;;  %11078 = vmatmul.mubr.msk.f32.gmra.mxu0 %vm389_vm1, %v7374_v33  ;;  %11024 = vmatprep.mubr.msk.f32.mxu1 %vm389_vm1, %v14183_v60 }
 0x39a   : > { %v14373_v23 = vadd.f32 %v10761_v43, %v10705_v6  ;;  %11080 = vmatprep.mubr.msk.f32.mxu0 %vm389_vm1, %v7375_v14  ;;  %v4820_v45 = vpop.f32.mrf.mxu1  ;;  %v7378_v14 = vld [vmem:[#allocation2 + $0xdd] sm:$0xff] }
 0x39b   : > { %v5176_v46 = vpop.f32.mrf.mxu0 }
 0x39c   : > { %v14378_v17 = vadd.f32 %v5176_v46, %v4820_v45  ;;  %v10708_v21 = vpop.f32.mrf.mxu1  ;;  %11025 = vmatmul.mubr.msk.f32.gmra.mxu1 %vm389_vm1, %v14188_v7  ;;  %v7379_v7 = vld [vmem:[#allocation2 + $0xe5] sm:$0xff] }
 0x39d   : > { %v10764_v41 = vpop.f32.mrf.mxu0  ;;  %11081 = vmatmul.mubr.msk.f32.gmra.mxu0 %vm389_vm1, %v7376_v37  ;;  %11027 = vmatprep.mubr.msk.f32.mxu1 %vm389_vm1, %v14193_v55 }
 0x39e   : > { %v14383_v33 = vadd.f32 %v10764_v41, %v10708_v21  ;;  %11083 = vmatprep.mubr.msk.f32.mxu0 %vm389_vm1, %v7377_v5  ;;  %v4830_v60 = vpop.f32.mrf.mxu1  ;;  %v7380_v5 = vld [vmem:[#allocation2 + $0xed] sm:$0xff] }
 0x39f   : > { %v5186_v6 = vpop.f32.mrf.mxu0 }
 0x3a0   : > { %v14388_v43 = vadd.f32 %v5186_v6, %v4830_v60  ;;  %v10711_v45 = vpop.f32.mrf.mxu1  ;;  %11028 = vmatmul.mubr.msk.f32.gmra.mxu1 %vm389_vm1, %v14198_v61  ;;  %v7381_v61 = vld [vmem:[#allocation2 + $0xf5] sm:$0xff] }
 0x3a1   : > { %v10767_v46 = vpop.f32.mrf.mxu0  ;;  %11084 = vmatmul.mubr.msk.f32.gmra.mxu0 %vm389_vm1, %v7378_v14  ;;  %11030 = vmatprep.mubr.msk.f32.mxu1 %vm389_vm1, %v14203_v39 }
 0x3a2   : > { %v14393_v37 = vadd.f32 %v10767_v46, %v10711_v45  ;;  %11086 = vmatprep.mubr.msk.f32.mxu0 %vm389_vm1, %v7379_v7  ;;  %v4840_v55 = vpop.f32.mrf.mxu1 }
 0x3a3   : > { %v5196_v21 = vpop.f32.mrf.mxu0 }
 0x3a4   : > { %v14398_v41 = vadd.f32 %v5196_v21, %v4840_v55  ;;  %v10772_v60 = vpop.f32.mrf.mxu1  ;;  %11031 = vmatmul.mubr.msk.f32.gmra.mxu1 %vm389_vm1, %v14212_v59  ;;  %v7382_v55 = vld [vmem:[#allocation2 + $0xfd] sm:$0xff] }
 0x3a5   : > { %v10828_v6 = vpop.f32.mrf.mxu0  ;;  %11087 = vmatmul.mubr.msk.f32.gmra.mxu0 %vm389_vm1, %v7380_v5  ;;  %v5600_v14 = vadd.f32 %v10772_v60, %v14205_v30  ;;  %11033 = vmatprep.mubr.msk.f32.mxu1 %vm389_vm1, %v14217_v8  ;;  %v7383_v30 = vld [vmem:[#allocation2 + $0x105] sm:$0xff] }
 0x3a6   : > { %11089 = vmatprep.mubr.msk.f32.mxu0 %vm389_vm1, %v7381_v61  ;;  %v5420_v39 = vpop.f32.mrf.mxu1  ;;  %v7384_v61 = vld [vmem:[#allocation2 + $0x10d] sm:$0xff] }
 0x3a7   : > { %v5850_v45 = vpop.f32.mrf.mxu0  ;;  %v14407_v46 = vadd.f32 %v10828_v6, %v5600_v14  ;;  %v5599_v7 = vadd.f32 %v5420_v39, %v14210_v32 }
 0x3a8   : > { %v10775_v21 = vpop.f32.mrf.mxu1  ;;  %11034 = vmatmul.mubr.msk.f32.gmra.mxu1 %vm389_vm1, %v14226_v12 }
 0x3a9   : > { %v10831_v56 = vpop.f32.mrf.mxu0  ;;  %11090 = vmatmul.mubr.msk.f32.gmra.mxu0 %vm389_vm1, %v7382_v55  ;;  %v14413_v59 = vadd.f32 %v5850_v45, %v5599_v7  ;;  %v5602_v8 = vadd.f32 %v10775_v21, %v14219_v9  ;;  %11036 = vmatprep.mubr.msk.f32.mxu1 %vm389_vm1, %v14231_v26  ;;  %v7385_v9 = vld [vmem:[#allocation2 + $0x115] sm:$0xff]  ;;  %v7386_v55 = vld [vmem:[#allocation2 + $0x11d] sm:$0xff] }
 0x3aa   : > { %11092 = vmatprep.mubr.msk.f32.mxu0 %vm389_vm1, %v7383_v30  ;;  %v5430_v5 = vpop.f32.mrf.mxu1 }
 0x3ab   : > { %v5860_v32 = vpop.f32.mrf.mxu0  ;;  %v14419_v60 = vadd.f32 %v10831_v56, %v5602_v8  ;;  %v5601_v6 = vadd.f32 %v5430_v5, %v14224_v62 }
 0x3ac   : > { %v10778_v12 = vpop.f32.mrf.mxu1  ;;  %11037 = vmatmul.mubr.msk.f32.gmra.mxu1 %vm389_vm1, %v14240_v4 }
 0x3ad   : > { %v10834_v14 = vpop.f32.mrf.mxu0  ;;  %11093 = vmatmul.mubr.msk.f32.gmra.mxu0 %vm389_vm1, %v7384_v61  ;;  %v14425_v39 = vadd.f32 %v5860_v32, %v5601_v6  ;;  %v5604_v26 = vadd.f32 %v10778_v12, %v14233_v49  ;;  %11039 = vmatprep.mubr.msk.f32.mxu1 %vm389_vm1, %v14245_v51  ;;  %v7387_v49 = vld [vmem:[#allocation2 + $0x125] sm:$0xff]  ;;  %v7388_v6 = vld [vmem:[#allocation2 + $0x12d] sm:$0xff]  ;;  %v7389_v12 = vld [vmem:[#allocation2 + $0x135] sm:$0xff] }
 0x3ae   : > { %11095 = vmatprep.mubr.msk.f32.mxu0 %vm389_vm1, %v7385_v9  ;;  %v5440_v56 = vpop.f32.mrf.mxu1 }
 0x3af   : > { %v5870_v62 = vpop.f32.mrf.mxu0  ;;  %v14431_v45 = vadd.f32 %v10834_v14, %v5604_v26  ;;  %v5603_v7 = vadd.f32 %v5440_v56, %v14238_v54 }
 0x3b0   : > { %v10781_v4 = vpop.f32.mrf.mxu1  ;;  %11040 = vmatmul.mubr.msk.f32.gmra.mxu1 %vm389_vm1, %v14254_v3 }
 0x3b1   : > { %v10837_v21 = vpop.f32.mrf.mxu0  ;;  %11096 = vmatmul.mubr.msk.f32.gmra.mxu0 %vm389_vm1, %v7386_v55  ;;  %v14437_v30 = vadd.f32 %v5870_v62, %v5603_v7  ;;  %v5606_v51 = vadd.f32 %v10781_v4, %v14247_v22  ;;  %11042 = vmatprep.mubr.msk.f32.mxu1 %vm389_vm1, %v14259_v2  ;;  %v6959_v22 = vld [vmem:[#allocation2 + $0x134] sm:$0xff]  ;;  %v6960_v62 = vld [vmem:[#allocation2 + $0x13c] sm:$0xff]  ;;  %v7785_v4 = vld [vmem:[#allocation2 + $0x26] sm:$0xff] }
 0x3b2   : > { %11098 = vmatprep.mubr.msk.f32.mxu0 %vm389_vm1, %v7387_v49  ;;  %v5450_v8 = vpop.f32.mrf.mxu1 }
 0x3b3   : > { %v5880_v54 = vpop.f32.mrf.mxu0  ;;  %v14443_v5 = vadd.f32 %v10837_v21, %v5606_v51  ;;  %v5605_v32 = vadd.f32 %v5450_v8, %v14252_v48 }
 0x3b4   : > { %v10784_v3 = vpop.f32.mrf.mxu1  ;;  %11043 = vmatmul.mubr.msk.f32.gmra.mxu1 %vm389_vm1, %v14268_v15  ;;  %v7390_v15 = vld [vmem:[#allocation2 + $0x13d] sm:$0xff] }
 0x3b5   : > { %v10840_v61 = vpop.f32.mrf.mxu0  ;;  %11099 = vmatmul.mubr.msk.f32.gmra.mxu0 %vm389_vm1, %v7388_v6  ;;  %v14449_v14 = vadd.f32 %v5880_v54, %v5605_v32  ;;  %v5608_v2 = vadd.f32 %v10784_v3, %v14261_v53  ;;  %11045 = vmatprep.mubr.msk.f32.mxu1 %vm389_vm1, %v6959_v22  ;;  %v7786_v54 = vld [vmem:[#allocation2 + $0x2e] sm:$0xff]  ;;  %v7787_v3 = vld [vmem:[#allocation2 + $0x36] sm:$0xff] }
 0x3b6   : > { %11101 = vmatprep.mubr.msk.f32.mxu0 %vm389_vm1, %v7389_v12  ;;  %v5460_v9 = vpop.f32.mrf.mxu1 }
 0x3b7   : > { %v5890_v48 = vpop.f32.mrf.mxu0  ;;  %v14454_v26 = vadd.f32 %v10840_v61, %v5608_v2  ;;  %v5607_v56 = vadd.f32 %v5460_v9, %v14266_v0 }
 0x3b8   : > { %v10787_v7 = vpop.f32.mrf.mxu1  ;;  %11046 = vmatmul.mubr.msk.f32.gmra.mxu1 %vm389_vm1, %v6960_v62  ;;  %v7789_v62 = vld [vmem:[#allocation2 + $0x46] sm:$0xff] }
 0x3b9   : > { %v10843_v55 = vpop.f32.mrf.mxu0  ;;  %11102 = vmatmul.mubr.msk.f32.gmra.mxu0 %vm389_vm1, %v7390_v15  ;;  %v14459_v53 = vadd.f32 %v5890_v48, %v5607_v56  ;;  %v5610_v21 = vadd.f32 %v10787_v7, %v14273_v13  ;;  %11106 = vmatprep.mubr.msk.f32.mxu1 %vm389_vm1, %v7785_v4  ;;  %v7788_v48 = vld [vmem:[#allocation2 + $0x3e] sm:$0xff] }
 0x3ba   : > { %v5470_v49 = vpop.f32.mrf.mxu1 }
 0x3bb   : > { %v5900_v51 = vpop.f32.mrf.mxu0  ;;  %v14463_v8 = vadd.f32 %v10843_v55, %v5610_v21  ;;  %v5609_v0 = vadd.f32 %v5470_v49, %v14277_v42  ;;  %v7790_v49 = vld [vmem:[#allocation2 + $0x4e] sm:$0xff] }
 0x3bc   : > { %v10790_v32 = vpop.f32.mrf.mxu1  ;;  %11107 = vmatmul.mubr.msk.f32.vlgmr.msra.gmra.mxu1 %vm389_vm1, %v7786_v54 }
 0x3bd   : > { %v10846_v6 = vpop.f32.mrf.mxu0  ;;  %v14467_v61 = vadd.f32 %v5900_v51, %v5609_v0  ;;  %v5612_v22 = vadd.f32 %v10790_v32, %v14281_v31  ;;  %11109 = vmatprep.mubr.msk.f32.mxu1 %vm389_vm1, %v7787_v3  ;;  %v7791_v0 = vld [vmem:[#allocation2 + $0x56] sm:$0xff] }
 0x3be   : > { %v5480_v13 = vpop.f32.mrf.mxu1 }
 0x3bf   : > { %v5910_v12 = vpop.f32.mrf.mxu0  ;;  %v14471_v2 = vadd.f32 %v10846_v6, %v5612_v22  ;;  %v5611_v9 = vadd.f32 %v5480_v13, %v14288_v11  ;;  %v7792_v13 = vld [vmem:[#allocation2 + $0x5e] sm:$0xff] }
 0x3c0   : > { %v10793_v42 = vpop.f32.mrf.mxu1  ;;  %11110 = vmatmul.mubr.msk.f32.gmra.mxu1 %vm389_vm1, %v7788_v48 }
 0x3c1   : > { %v10849_v56 = vpop.f32.mrf.mxu0  ;;  %v14475_v15 = vadd.f32 %v5910_v12, %v5611_v9  ;;  %v5614_v7 = vadd.f32 %v10793_v42, %v14293_v44  ;;  %11112 = vmatprep.mubr.msk.f32.mxu1 %vm389_vm1, %v7789_v62  ;;  %v7793_v9 = vld [vmem:[#allocation2 + $0x66] sm:$0xff] }
 0x3c2   : > { %v5490_v31 = vpop.f32.mrf.mxu1 }
 0x3c3   : > { %v5920_v55 = vpop.f32.mrf.mxu0  ;;  %v14479_v4 = vadd.f32 %v10849_v56, %v5614_v7  ;;  %v5613_v21 = vadd.f32 %v5490_v31, %v14298_v36  ;;  %v7794_v31 = vld [vmem:[#allocation2 + $0x6e] sm:$0xff] }
 0x3c4   : > { %v10796_v11 = vpop.f32.mrf.mxu1  ;;  %11113 = vmatmul.mubr.msk.f32.gmra.mxu1 %vm389_vm1, %v7790_v49 }
 0x3c5   : > { %v10852_v51 = vpop.f32.mrf.mxu0  ;;  %v14483_v54 = vadd.f32 %v5920_v55, %v5613_v21  ;;  %v5616_v32 = vadd.f32 %v10796_v11, %v14303_v34  ;;  %11115 = vmatprep.mubr.msk.f32.mxu1 %vm389_vm1, %v7791_v0  ;;  %v7795_v21 = vld [vmem:[#allocation2 + $0x76] sm:$0xff] }
 0x3c6   : > { %v5500_v44 = vpop.f32.mrf.mxu1 }
 0x3c7   : > { %v5930_v6 = vpop.f32.mrf.mxu0  ;;  %v14487_v3 = vadd.f32 %v10852_v51, %v5616_v32  ;;  %v5615_v22 = vadd.f32 %v5500_v44, %v14308_v27  ;;  %v7796_v44 = vld [vmem:[#allocation2 + $0x7e] sm:$0xff] }
 0x3c8   : > { %v10799_v36 = vpop.f32.mrf.mxu1  ;;  %11116 = vmatmul.mubr.msk.f32.gmra.mxu1 %vm389_vm1, %v7792_v13 }
 0x3c9   : > { %v10855_v12 = vpop.f32.mrf.mxu0  ;;  %v14491_v48 = vadd.f32 %v5930_v6, %v5615_v22  ;;  %v5618_v42 = vadd.f32 %v10799_v36, %v14313_v20  ;;  %11118 = vmatprep.mubr.msk.f32.mxu1 %vm389_vm1, %v7793_v9  ;;  %v7797_v22 = vld [vmem:[#allocation2 + $0x86] sm:$0xff] }
 0x3ca   : > { %v5510_v34 = vpop.f32.mrf.mxu1 }
 0x3cb   : > { %v5940_v56 = vpop.f32.mrf.mxu0  ;;  %v14495_v62 = vadd.f32 %v10855_v12, %v5618_v42  ;;  %v5617_v7 = vadd.f32 %v5510_v34, %v14318_v58  ;;  %v7798_v34 = vld [vmem:[#allocation2 + $0x8e] sm:$0xff] }
 0x3cc   : > { %v10802_v27 = vpop.f32.mrf.mxu1  ;;  %11119 = vmatmul.mubr.msk.f32.gmra.mxu1 %vm389_vm1, %v7794_v31 }
 0x3cd   : > { %v10858_v55 = vpop.f32.mrf.mxu0  ;;  %v14499_v49 = vadd.f32 %v5940_v56, %v5617_v7  ;;  %v5620_v11 = vadd.f32 %v10802_v27, %v14323_v16  ;;  %11121 = vmatprep.mubr.msk.f32.mxu1 %vm389_vm1, %v7795_v21  ;;  %v7799_v7 = vld [vmem:[#allocation2 + $0x96] sm:$0xff] }
 0x3ce   : > { %v5520_v20 = vpop.f32.mrf.mxu1 }
 0x3cf   : > { %v5950_v51 = vpop.f32.mrf.mxu0  ;;  %v14503_v0 = vadd.f32 %v10858_v55, %v5620_v11  ;;  %v5619_v32 = vadd.f32 %v5520_v20, %v14328_v40  ;;  %v7800_v20 = vld [vmem:[#allocation2 + $0x9e] sm:$0xff] }
 0x3d0   : > { %v10805_v58 = vpop.f32.mrf.mxu1  ;;  %11122 = vmatmul.mubr.msk.f32.gmra.mxu1 %vm389_vm1, %v7796_v44 }
 0x3d1   : > { %v10861_v6 = vpop.f32.mrf.mxu0  ;;  %v14507_v13 = vadd.f32 %v5950_v51, %v5619_v32  ;;  %v5622_v36 = vadd.f32 %v10805_v58, %v14333_v19  ;;  %11124 = vmatprep.mubr.msk.f32.mxu1 %vm389_vm1, %v7797_v22  ;;  %v7801_v32 = vld [vmem:[#allocation2 + $0xa6] sm:$0xff] }
 0x3d2   : > { %v5530_v16 = vpop.f32.mrf.mxu1 }
 0x3d3   : > { %v5960_v12 = vpop.f32.mrf.mxu0  ;;  %v14511_v9 = vadd.f32 %v10861_v6, %v5622_v36  ;;  %v5621_v42 = vadd.f32 %v5530_v16, %v14338_v25  ;;  %v7802_v16 = vld [vmem:[#allocation2 + $0xae] sm:$0xff] }
 0x3d4   : > { %v10808_v40 = vpop.f32.mrf.mxu1  ;;  %11125 = vmatmul.mubr.msk.f32.gmra.mxu1 %vm389_vm1, %v7798_v34 }
 0x3d5   : > { %v10864_v56 = vpop.f32.mrf.mxu0  ;;  %v14515_v31 = vadd.f32 %v5960_v12, %v5621_v42  ;;  %v5624_v27 = vadd.f32 %v10808_v40, %v14343_v28  ;;  %11127 = vmatprep.mubr.msk.f32.mxu1 %vm389_vm1, %v7799_v7  ;;  %v7803_v42 = vld [vmem:[#allocation2 + $0xb6] sm:$0xff] }
 0x3d6   : > { %v5540_v19 = vpop.f32.mrf.mxu1 }
 0x3d7   : > { %v5970_v55 = vpop.f32.mrf.mxu0  ;;  %v14519_v21 = vadd.f32 %v10864_v56, %v5624_v27  ;;  %v5623_v11 = vadd.f32 %v5540_v19, %v14348_v35  ;;  %v7804_v19 = vld [vmem:[#allocation2 + $0xbe] sm:$0xff] }
 0x3d8   : > { %v10811_v25 = vpop.f32.mrf.mxu1  ;;  %11128 = vmatmul.mubr.msk.f32.gmra.mxu1 %vm389_vm1, %v7800_v20 }
 0x3d9   : > { %v10867_v51 = vpop.f32.mrf.mxu0  ;;  %v14523_v44 = vadd.f32 %v5970_v55, %v5623_v11  ;;  %v5626_v58 = vadd.f32 %v10811_v25, %v14353_v1  ;;  %11130 = vmatprep.mubr.msk.f32.mxu1 %vm389_vm1, %v7801_v32  ;;  %v7805_v11 = vld [vmem:[#allocation2 + $0xc6] sm:$0xff] }
 0x3da   : > { %v5550_v28 = vpop.f32.mrf.mxu1 }
 0x3db   : > { %v5980_v6 = vpop.f32.mrf.mxu0  ;;  %v14527_v22 = vadd.f32 %v10867_v51, %v5626_v58  ;;  %v5625_v36 = vadd.f32 %v5550_v28, %v14358_v57  ;;  %v7806_v28 = vld [vmem:[#allocation2 + $0xce] sm:$0xff] }
 0x3dc   : > { %v10814_v35 = vpop.f32.mrf.mxu1  ;;  %11131 = vmatmul.mubr.msk.f32.gmra.mxu1 %vm389_vm1, %v7802_v16 }
 0x3dd   : > { %v10870_v12 = vpop.f32.mrf.mxu0  ;;  %v14531_v34 = vadd.f32 %v5980_v6, %v5625_v36  ;;  %v5628_v40 = vadd.f32 %v10814_v35, %v14363_v47  ;;  %11133 = vmatprep.mubr.msk.f32.mxu1 %vm389_vm1, %v7803_v42  ;;  %v7807_v36 = vld [vmem:[#allocation2 + $0xd6] sm:$0xff] }
 0x3de   : > { %v5560_v1 = vpop.f32.mrf.mxu1 }
 0x3df   : > { %v5990_v56 = vpop.f32.mrf.mxu0  ;;  %v14535_v7 = vadd.f32 %v10870_v12, %v5628_v40  ;;  %v5627_v27 = vadd.f32 %v5560_v1, %v14368_v29  ;;  %v7808_v1 = vld [vmem:[#allocation2 + $0xde] sm:$0xff] }
 0x3e0   : > { %v10817_v57 = vpop.f32.mrf.mxu1  ;;  %11134 = vmatmul.mubr.msk.f32.gmra.mxu1 %vm389_vm1, %v7804_v19 }
 0x3e1   : > { %v10873_v55 = vpop.f32.mrf.mxu0  ;;  %v14539_v20 = vadd.f32 %v5990_v56, %v5627_v27  ;;  %v5630_v25 = vadd.f32 %v10817_v57, %v14373_v23  ;;  %11136 = vmatprep.mubr.msk.f32.mxu1 %vm389_vm1, %v7805_v11  ;;  %v7809_v27 = vld [vmem:[#allocation2 + $0xe6] sm:$0xff] }
 0x3e2   : > { %v5570_v47 = vpop.f32.mrf.mxu1 }
 0x3e3   : > { %v6000_v51 = vpop.f32.mrf.mxu0  ;;  %v14543_v32 = vadd.f32 %v10873_v55, %v5630_v25  ;;  %v5629_v58 = vadd.f32 %v5570_v47, %v14378_v17  ;;  %v7810_v47 = vld [vmem:[#allocation2 + $0xee] sm:$0xff] }
 0x3e4   : > { %v10820_v29 = vpop.f32.mrf.mxu1  ;;  %11137 = vmatmul.mubr.msk.f32.gmra.mxu1 %vm389_vm1, %v7806_v28 }
 0x3e5   : > { %v10876_v6 = vpop.f32.mrf.mxu0  ;;  %v14547_v16 = vadd.f32 %v6000_v51, %v5629_v58  ;;  %v5632_v35 = vadd.f32 %v10820_v29, %v14383_v33  ;;  %11139 = vmatprep.mubr.msk.f32.mxu1 %vm389_vm1, %v7807_v36  ;;  %v7811_v58 = vld [vmem:[#allocation2 + $0xf6] sm:$0xff] }
 0x3e6   : > { %v5580_v23 = vpop.f32.mrf.mxu1 }
 0x3e7   : > { %v6010_v12 = vpop.f32.mrf.mxu0  ;;  %v14551_v42 = vadd.f32 %v10876_v6, %v5632_v35  ;;  %v5631_v40 = vadd.f32 %v5580_v23, %v14388_v43  ;;  %v7812_v23 = vld [vmem:[#allocation2 + $0xfe] sm:$0xff] }
 0x3e8   : > { %v10823_v17 = vpop.f32.mrf.mxu1  ;;  %11140 = vmatmul.mubr.msk.f32.gmra.mxu1 %vm389_vm1, %v7808_v1 }
 0x3e9   : > { %v10879_v56 = vpop.f32.mrf.mxu0  ;;  %v14555_v19 = vadd.f32 %v6010_v12, %v5631_v40  ;;  %v5634_v57 = vadd.f32 %v10823_v17, %v14393_v37  ;;  %11142 = vmatprep.mubr.msk.f32.mxu1 %vm389_vm1, %v7809_v27  ;;  %v7813_v40 = vld [vmem:[#allocation2 + $0x106] sm:$0xff] }
 0x3ea   : > { %v5590_v33 = vpop.f32.mrf.mxu1 }
 0x3eb   : > { %v6020_v55 = vpop.f32.mrf.mxu0  ;;  %v14559_v11 = vadd.f32 %v10879_v56, %v5634_v57  ;;  %v5633_v25 = vadd.f32 %v5590_v33, %v14398_v41 }
 0x3ec   : > { %v10884_v43 = vpop.f32.mrf.mxu1  ;;  %11143 = vmatmul.mubr.msk.f32.gmra.mxu1 %vm389_vm1, %v7810_v47 }
 0x3ed   : > { %v10940_v51 = vpop.f32.mrf.mxu0  ;;  %v14563_v28 = vadd.f32 %v6020_v55, %v5633_v25  ;;  %v6460_v29 = vadd.f32 %v10884_v43, %v14407_v46  ;;  %11145 = vmatprep.mubr.msk.f32.mxu1 %vm389_vm1, %v7811_v58  ;;  %v7816_v58 = vld [vmem:[#allocation2 + $0x11e] sm:$0xff] }
 0x3ee   : > { %v6280_v37 = vpop.f32.mrf.mxu1 }
 0x3ef   : > { %v6710_v6 = vpop.f32.mrf.mxu0  ;;  %v14567_v36 = vadd.f32 %v10940_v51, %v6460_v29  ;;  %v6459_v35 = vadd.f32 %v6280_v37, %v14413_v59  ;;  %v7817_v37 = vld [vmem:[#allocation2 + $0x126] sm:$0xff] }
 0x3f0   : > { %v10887_v41 = vpop.f32.mrf.mxu1  ;;  %11146 = vmatmul.mubr.msk.f32.gmra.mxu1 %vm389_vm1, %v7812_v23 }
 0x3f1   : > { %v10943_v12 = vpop.f32.mrf.mxu0  ;;  %v14571_v1 = vadd.f32 %v6710_v6, %v6459_v35  ;;  %v6462_v17 = vadd.f32 %v10887_v41, %v14419_v60  ;;  %11148 = vmatprep.mubr.msk.f32.mxu1 %vm389_vm1, %v7813_v40  ;;  %v7818_v41 = vld [vmem:[#allocation2 + $0x12e] sm:$0xff]  ;;  %v7819_v40 = vld [vmem:[#allocation2 + $0x136] sm:$0xff] }
 0x3f2   : > { %v6290_v46 = vpop.f32.mrf.mxu1 }
 0x3f3   : > { %v6720_v56 = vpop.f32.mrf.mxu0  ;;  %v14575_v27 = vadd.f32 %v10943_v12, %v6462_v17  ;;  %v6461_v57 = vadd.f32 %v6290_v46, %v14425_v39 }
 0x3f4   : > { %v10890_v33 = vpop.f32.mrf.mxu1  ;;  %11149 = vmatmul.mubr.msk.f32.gmra.mxu1 %vm389_vm1, %v13955_v24 }
 0x3f5   : > { %v10946_v59 = vpop.f32.mrf.mxu0  ;;  %v14580_v55 = vadd.f32 %v6720_v56, %v6461_v57  ;;  %v6464_v25 = vadd.f32 %v10890_v33, %v14431_v45  ;;  %11151 = vmatprep.mubr.msk.f32.mxu1 %vm389_vm1, %v13973_v18 }
 0x3f6   : > { %v6300_v60 = vpop.f32.mrf.mxu1 }
 0x3f7   : > { %v6730_v47 = vpop.f32.mrf.mxu0  ;;  %v14585_v43 = vadd.f32 %v10946_v59, %v6464_v25  ;;  %v6463_v51 = vadd.f32 %v6300_v60, %v14437_v30  ;;  %v7820_v59 = vld [vmem:[#allocation2 + $0x13e] sm:$0xff] }
 0x3f8   : > { %v10893_v39 = vpop.f32.mrf.mxu1  ;;  %11152 = vmatmul.mubr.msk.f32.gmra.mxu1 %vm389_vm1, %v7816_v58 }
 0x3f9   : > { %v10949_v29 = vpop.f32.mrf.mxu0  ;;  %v14589_v24 = vadd.f32 %v6730_v47, %v6463_v51  ;;  %v6466_v6 = vadd.f32 %v10893_v39, %v14443_v5  ;;  %11154 = vmatprep.mubr.msk.f32.mxu1 %vm389_vm1, %v7817_v37 }
 0x3fa   : > { %v6310_v45 = vpop.f32.mrf.mxu1 }
 0x3fb   : > { %v6740_v18 = vpop.f32.mrf.mxu0  ;;  %v14593_v35 = vadd.f32 %v10949_v29, %v6466_v6  ;;  %v6465_v23 = vadd.f32 %v6310_v45, %v14449_v14 }
 0x3fc   : > { %v10896_v30 = vpop.f32.mrf.mxu1  ;;  %11155 = vmatmul.mubr.msk.f32.gmra.mxu1 %vm389_vm1, %v7818_v41 }
 0x3fd   : > { %v10952_v12 = vpop.f32.mrf.mxu0  ;;  %v14597_v17 = vadd.f32 %v6740_v18, %v6465_v23  ;;  %v6468_v46 = vadd.f32 %v10896_v30, %v14454_v26  ;;  %11157 = vmatprep.mubr.msk.f32.mxu1 %vm389_vm1, %v7819_v40 }
 0x3fe   : > { %v6320_v5 = vpop.f32.mrf.mxu1 }
 0x3ff   : > { %v6750_v56 = vpop.f32.mrf.mxu0  ;;  %v14601_v57 = vadd.f32 %v10952_v12, %v6468_v46  ;;  %v6467_v33 = vadd.f32 %v6320_v5, %v14459_v53 }
 0x400   : > { %v10899_v14 = vpop.f32.mrf.mxu1  ;;  %11158 = vmatmul.mubr.msk.f32.gmra.mxu1 %vm389_vm1, %v7820_v59 }
 0x401   : > { %v10955_v25 = vpop.f32.mrf.mxu0  ;;  %v14605_v60 = vadd.f32 %v6750_v56, %v6467_v33  ;;  %v6470_v47 = vadd.f32 %v10899_v14, %v14463_v8 }
 0x402   : > { %v6330_v51 = vpop.f32.mrf.mxu1 }
 0x403   : > { %v6760_v58 = vpop.f32.mrf.mxu0  ;;  %v14608_v26 = vadd.f32 %v10955_v25, %v6470_v47  ;;  %v6469_v39 = vadd.f32 %v6330_v51, %v14467_v61 }
 0x404   : > { %v10902_v29 = vpop.f32.mrf.mxu1 }
 0x405   : > { %v10958_v37 = vpop.f32.mrf.mxu0  ;;  %v14611_v6 = vadd.f32 %v6760_v58, %v6469_v39  ;;  %v6472_v53 = vadd.f32 %v10902_v29, %v14471_v2 }
 0x406   : > { %v6340_v45 = vpop.f32.mrf.mxu1 }
 0x407   : > { %v6770_v18 = vpop.f32.mrf.mxu0  ;;  %v14614_v23 = vadd.f32 %v10958_v37, %v6472_v53  ;;  %v6471_v41 = vadd.f32 %v6340_v45, %v14475_v15 }
 0x408   : > { %v10905_v30 = vpop.f32.mrf.mxu1 }
 0x409   : > { %v10961_v8 = vpop.f32.mrf.mxu0  ;;  %v14617_v12 = vadd.f32 %v6770_v18, %v6471_v41  ;;  %v6474_v40 = vadd.f32 %v10905_v30, %v14479_v4 }
 0x40a   : > { %v6350_v46 = vpop.f32.mrf.mxu1 }
 0x40b   : > { %v6780_v61 = vpop.f32.mrf.mxu0  ;;  %v14620_v5 = vadd.f32 %v10961_v8, %v6474_v40  ;;  %v6473_v56 = vadd.f32 %v6350_v46, %v14483_v54 }
 0x40c   : > { %v10908_v33 = vpop.f32.mrf.mxu1 }
 0x40d   : > { %v10964_v2 = vpop.f32.mrf.mxu0  ;;  %v14623_v59 = vadd.f32 %v6780_v61, %v6473_v56  ;;  %v6476_v14 = vadd.f32 %v10908_v33, %v14487_v3 }
 0x40e   : > { %v6360_v25 = vpop.f32.mrf.mxu1 }
 0x40f   : > { %v6790_v15 = vpop.f32.mrf.mxu0  ;;  %v14626_v47 = vadd.f32 %v10964_v2, %v6476_v14  ;;  %v6475_v51 = vadd.f32 %v6360_v25, %v14491_v48 }
 0x410   : > { %v10911_v58 = vpop.f32.mrf.mxu1 }
 0x411   : > { %v10967_v4 = vpop.f32.mrf.mxu0  ;;  %v14629_v39 = vadd.f32 %v6790_v15, %v6475_v51  ;;  %v6478_v29 = vadd.f32 %v10911_v58, %v14495_v62 }
 0x412   : > { %v6370_v37 = vpop.f32.mrf.mxu1 }
 0x413   : > { %v6800_v54 = vpop.f32.mrf.mxu0  ;;  %v14632_v53 = vadd.f32 %v10967_v4, %v6478_v29  ;;  %v6477_v45 = vadd.f32 %v6370_v37, %v14499_v49 }
 0x414   : > { %v10914_v18 = vpop.f32.mrf.mxu1 }
 0x415   : > { %v10970_v3 = vpop.f32.mrf.mxu0  ;;  %v14635_v41 = vadd.f32 %v6800_v54, %v6477_v45  ;;  %v6480_v30 = vadd.f32 %v10914_v18, %v14503_v0 }
 0x416   : > { %v6380_v8 = vpop.f32.mrf.mxu1 }
 0x417   : > { %v6810_v48 = vpop.f32.mrf.mxu0  ;;  %v14638_v40 = vadd.f32 %v10970_v3, %v6480_v30  ;;  %v6479_v46 = vadd.f32 %v6380_v8, %v14507_v13 }
 0x418   : > { %v10917_v61 = vpop.f32.mrf.mxu1 }
 0x419   : > { %v10973_v62 = vpop.f32.mrf.mxu0  ;;  %v14641_v56 = vadd.f32 %v6810_v48, %v6479_v46  ;;  %v6482_v33 = vadd.f32 %v10917_v61, %v14511_v9 }
 0x41a   : > { %v6390_v2 = vpop.f32.mrf.mxu1 }
 0x41b   : > { %v6820_v49 = vpop.f32.mrf.mxu0  ;;  %v14644_v14 = vadd.f32 %v10973_v62, %v6482_v33  ;;  %v6481_v25 = vadd.f32 %v6390_v2, %v14515_v31 }
 0x41c   : > { %v10920_v15 = vpop.f32.mrf.mxu1 }
 0x41d   : > { %v10976_v0 = vpop.f32.mrf.mxu0  ;;  %v14647_v51 = vadd.f32 %v6820_v49, %v6481_v25  ;;  %v6484_v58 = vadd.f32 %v10920_v15, %v14519_v21 }
 0x41e   : > { %v6400_v4 = vpop.f32.mrf.mxu1 }
 0x41f   : > { %v6830_v13 = vpop.f32.mrf.mxu0  ;;  %v14650_v29 = vadd.f32 %v10976_v0, %v6484_v58  ;;  %v6483_v37 = vadd.f32 %v6400_v4, %v14523_v44 }
 0x420   : > { %v10923_v54 = vpop.f32.mrf.mxu1 }
 0x421   : > { %v10979_v9 = vpop.f32.mrf.mxu0  ;;  %v14653_v45 = vadd.f32 %v6830_v13, %v6483_v37  ;;  %v6486_v18 = vadd.f32 %v10923_v54, %v14527_v22 }
 0x422   : > { %v6410_v3 = vpop.f32.mrf.mxu1 }
 0x423   : > { %v6840_v31 = vpop.f32.mrf.mxu0  ;;  %v14656_v30 = vadd.f32 %v10979_v9, %v6486_v18  ;;  %v6485_v8 = vadd.f32 %v6410_v3, %v14531_v34 }
 0x424   : > { %v10926_v48 = vpop.f32.mrf.mxu1 }
 0x425   : > { %v10982_v21 = vpop.f32.mrf.mxu0  ;;  %v14659_v46 = vadd.f32 %v6840_v31, %v6485_v8  ;;  %v6488_v61 = vadd.f32 %v10926_v48, %v14535_v7 }
 0x426   : > { %v6420_v62 = vpop.f32.mrf.mxu1 }
 0x427   : > { %v6850_v44 = vpop.f32.mrf.mxu0  ;;  %v14662_v33 = vadd.f32 %v10982_v21, %v6488_v61  ;;  %v6487_v2 = vadd.f32 %v6420_v62, %v14539_v20 }
 0x428   : > { %v10929_v49 = vpop.f32.mrf.mxu1 }
 0x429   : > { %v10985_v22 = vpop.f32.mrf.mxu0  ;;  %v14665_v25 = vadd.f32 %v6850_v44, %v6487_v2  ;;  %v6490_v15 = vadd.f32 %v10929_v49, %v14543_v32 }
 0x42a   : > { %v6430_v0 = vpop.f32.mrf.mxu1 }
 0x42b   : > { %v6860_v34 = vpop.f32.mrf.mxu0  ;;  %v14668_v58 = vadd.f32 %v10985_v22, %v6490_v15  ;;  %v6489_v4 = vadd.f32 %v6430_v0, %v14547_v16 }
 0x42c   : > { %v10932_v13 = vpop.f32.mrf.mxu1 }
 0x42d   : > { %v10988_v7 = vpop.f32.mrf.mxu0  ;;  %v14671_v37 = vadd.f32 %v6860_v34, %v6489_v4  ;;  %v6492_v54 = vadd.f32 %v10932_v13, %v14551_v42 }
 0x42e   : > { %v6440_v9 = vpop.f32.mrf.mxu1 }
 0x42f   : > { %v6870_v20 = vpop.f32.mrf.mxu0  ;;  %v14674_v18 = vadd.f32 %v10988_v7, %v6492_v54  ;;  %v6491_v3 = vadd.f32 %v6440_v9, %v14555_v19 }
 0x430   : > { %v10935_v31 = vpop.f32.mrf.mxu1 }
 0x431   : > { %v10991_v32 = vpop.f32.mrf.mxu0  ;;  %v14677_v8 = vadd.f32 %v6870_v20, %v6491_v3  ;;  %v6494_v48 = vadd.f32 %v10935_v31, %v14559_v11 }
 0x432   : > { %v6450_v21 = vpop.f32.mrf.mxu1 }
 0x433   : > { %v6880_v16 = vpop.f32.mrf.mxu0  ;;  %v14680_v61 = vadd.f32 %v10991_v32, %v6494_v48  ;;  %v6493_v62 = vadd.f32 %v6450_v21, %v14563_v28 }
 0x434   : > { %v10996_v44 = vpop.f32.mrf.mxu1 }
 0x435   : > { %v14683_v42 = vpop.f32.mrf.mxu0  ;;  %v14685_v2 = vadd.f32 %v6880_v16, %v6493_v62  ;;  %v14688_v49 = vadd.f32 %v10996_v44, %v14567_v36 }
 0x436   : > { %v7140_v19 = vpop.f32.mrf.mxu1 }
 0x437   : > { %v14691_v22 = vadd.f32 %v7140_v19, %v14571_v1  ;;  %v14693_v15 = vpop.f32.mrf.mxu0 }
 0x438   : > { %v10999_v11 = vpop.f32.mrf.mxu1 }
 0x439   : > { %v14696_v0 = vadd.f32 %v10999_v11, %v14575_v27  ;;  %v14701_v4 = vpop.f32.mrf.mxu0 }
 0x43a   : > { %v7150_v34 = vpop.f32.mrf.mxu1 }
 0x43b   : > { %v14699_v28 = vadd.f32 %v7150_v34, %v14580_v55  ;;  %v14709_v54 = vpop.f32.mrf.mxu0 }
 0x43c   : > { %v11002_v13 = vpop.f32.mrf.mxu1 }
 0x43d   : > { %v14704_v36 = vadd.f32 %v11002_v13, %v14585_v43  ;;  %v14717_v3 = vpop.f32.mrf.mxu0 }
 0x43e   : > { %v7160_v7 = vpop.f32.mrf.mxu1 }
 0x43f   : > { %v14707_v1 = vadd.f32 %v7160_v7, %v14589_v24  ;;  %v14725_v48 = vpop.f32.mrf.mxu0 }
 0x440   : > { %v11005_v9 = vpop.f32.mrf.mxu1 }
 0x441   : > { %v14712_v27 = vadd.f32 %v11005_v9, %v14593_v35  ;;  %v14733_v62 = vpop.f32.mrf.mxu0 }
 0x442   : > { %v7170_v20 = vpop.f32.mrf.mxu1 }
 0x443   : > { %v14715_v55 = vadd.f32 %v7170_v20, %v14597_v17  ;;  %v14741_v11 = vpop.f32.mrf.mxu0 }
 0x444   : > { %v11008_v31 = vpop.f32.mrf.mxu1 }
 0x445   : > { %v14720_v43 = vadd.f32 %v11008_v31, %v14601_v57  ;;  %v14749_v7 = vpop.f32.mrf.mxu0 }
 0x446   : > { %v7180_v32 = vpop.f32.mrf.mxu1 }
 0x447   : > { %v14723_v24 = vadd.f32 %v7180_v32, %v14605_v60  ;;  %v14757_v31 = vpop.f32.mrf.mxu0 }
 0x448   : > { %v11011_v21 = vpop.f32.mrf.mxu1 }
 0x449   : > { %v14728_v35 = vadd.f32 %v11011_v21, %v14608_v26 }
 0x44a   : > { %v7190_v16 = vpop.f32.mrf.mxu1 }
 0x44b   : > { %v14731_v17 = vadd.f32 %v7190_v16, %v14611_v6  ;;  %v14765_v16 = vpop.f32.mrf.mxu0 }
 0x44c   : > { %v11014_v44 = vpop.f32.mrf.mxu1 }
 0x44d   : > { %v14736_v57 = vadd.f32 %v11014_v44, %v14614_v23 }
 0x44e   : > { %v7200_v19 = vpop.f32.mrf.mxu1 }
 0x44f   : > { %v14739_v60 = vadd.f32 %v7200_v19, %v14617_v12 }
 0x450   : > { %v11017_v34 = vpop.f32.mrf.mxu1 }
 0x451   : > { %v14744_v26 = vadd.f32 %v11017_v34, %v14620_v5  ;;  %v14773_v34 = vpop.f32.mrf.mxu0 }
 0x452   : > { %v7210_v13 = vpop.f32.mrf.mxu1 }
 0x453   : > { %v14747_v6 = vadd.f32 %v7210_v13, %v14623_v59 }
 0x454   : > { %v11020_v9 = vpop.f32.mrf.mxu1 }
 0x455   : > { %v14752_v23 = vadd.f32 %v11020_v9, %v14626_v47 }
 0x456   : > { %v7220_v20 = vpop.f32.mrf.mxu1 }
 0x457   : > { %v14755_v12 = vadd.f32 %v7220_v20, %v14629_v39  ;;  %v14781_v20 = vpop.f32.mrf.mxu0 }
 0x458   : > { %v11023_v32 = vpop.f32.mrf.mxu1 }
 0x459   : > { %v14760_v5 = vadd.f32 %v11023_v32, %v14632_v53 }
 0x45a   : > { %v7230_v21 = vpop.f32.mrf.mxu1 }
 0x45b   : > { %v14763_v59 = vadd.f32 %v7230_v21, %v14635_v41 }
 0x45c   : > { %v11026_v44 = vpop.f32.mrf.mxu1 }
 0x45d   : > { %v14768_v47 = vadd.f32 %v11026_v44, %v14638_v40  ;;  %v14789_v44 = vpop.f32.mrf.mxu0 }
 0x45e   : > { %v7240_v19 = vpop.f32.mrf.mxu1 }
 0x45f   : > { %v14771_v39 = vadd.f32 %v7240_v19, %v14641_v56 }
 0x460   : > { %v11029_v13 = vpop.f32.mrf.mxu1 }
 0x461   : > { %v14776_v53 = vadd.f32 %v11029_v13, %v14644_v14 }
 0x462   : > { %v7250_v9 = vpop.f32.mrf.mxu1 }
 0x463   : > { %v14779_v41 = vadd.f32 %v7250_v9, %v14647_v51  ;;  %v14797_v9 = vpop.f32.mrf.mxu0 }
 0x464   : > { %v11032_v32 = vpop.f32.mrf.mxu1 }
 0x465   : > { %v14784_v40 = vadd.f32 %v11032_v32, %v14650_v29 }
 0x466   : > { %v7260_v21 = vpop.f32.mrf.mxu1 }
 0x467   : > { %v14787_v56 = vadd.f32 %v7260_v21, %v14653_v45  ;;  %v14805_v21 = vpop.f32.mrf.mxu0 }
 0x468   : > { %v11035_v19 = vpop.f32.mrf.mxu1 }
 0x469   : > { %v14792_v14 = vadd.f32 %v11035_v19, %v14656_v30 }
 0x46a   : > { %v7270_v13 = vpop.f32.mrf.mxu1 }
 0x46b   : > { %v14795_v51 = vadd.f32 %v7270_v13, %v14659_v46  ;;  %v14813_v13 = vpop.f32.mrf.mxu0 }
 0x46c   : > { %v11038_v10 = vpop.f32.mrf.mxu1 }
 0x46d   : > { %15871 = vst [vmem:[#allocation22_spill] sm:$0xff] %v14795_v51  ;;  %v14800_v29 = vadd.f32 %v11038_v10, %v14662_v33 }
 0x46e   : > { %v7280_v32 = vpop.f32.mrf.mxu1 }
 0x46f   : > { %v14803_v45 = vadd.f32 %v7280_v32, %v14665_v25  ;;  %v14821_v32 = vpop.f32.mrf.mxu0 }
 0x470   : > { %v11041_v38 = vpop.f32.mrf.mxu1 }
 0x471   : > { %15872 = vst [vmem:[#allocation45_spill] sm:$0xff] %v14803_v45  ;;  %v14808_v30 = vadd.f32 %v11041_v38, %v14668_v58 }
 0x472   : > { %v7290_v19 = vpop.f32.mrf.mxu1 }
 0x473   : > { %v14811_v46 = vadd.f32 %v7290_v19, %v14671_v37  ;;  %v7750_v37 = vadd.f32 %v14683_v42, %v14688_v49  ;;  %v15879_v42 = vld [vmem:[#allocation76_spill] sm:$0xff] }
 0x474   : > { %v11044_v51 = vpop.f32.mrf.mxu1 }
 0x475   : > { %15873 = vst [vmem:[#allocation24_spill] sm:$0xff] %v14811_v46  ;;  %v14816_v10 = vadd.f32 %v11044_v51, %v14674_v18  ;;  %v14831_v46 = vpop.f32.mrf.mxu0 }
 0x476   : > { %v7300_v33 = vpop.f32.mrf.mxu1 }
 0x477   : > { %v14819_v25 = vadd.f32 %v7300_v33, %v14677_v8  ;;  %v7749_v8 = vadd.f32 %v14693_v15, %v14691_v22  ;;  %v7751_v22 = vadd.f32 %v14709_v54, %v14699_v28 }
 0x478   : > { %v11047_v45 = vpop.f32.mrf.mxu1 }
 0x479   : > { %15874 = vst [vmem:[#allocation29_spill] sm:$0xff] %v14819_v25  ;;  %v14824_v38 = vadd.f32 %v11047_v45, %v14680_v61  ;;  %v7752_v61 = vadd.f32 %v14701_v4, %v14696_v0  ;;  %v7754_v0 = vadd.f32 %v14717_v3, %v14704_v36  ;;  %v7756_v36 = vadd.f32 %v14733_v62, %v14712_v27 }
 0x47a   : > { %v7310_v58 = vpop.f32.mrf.mxu1 }
 0x47b   : > { %15875 = vst [vmem:[#allocation38_spill] sm:$0xff] %v14824_v38  ;;  %v14829_v19 = vadd.f32 %v7310_v58, %v14685_v2  ;;  %v14841_v38 = vpop.f32.mrf.mxu0  ;;  %v15880_v58 = vld [vmem:[#allocation68_spill] sm:$0xff] }
 0x47c   : > { %v11108_v18 = vpop.f32.mrf.mxu1 }
 0x47d   : > { %15876 = vst [vmem:[#allocation40_spill] sm:$0xff] %v14829_v19  ;;  %v14835_v51 = vadd.f32 %v11108_v18, %v7750_v37  ;;  %v15882_v37 = vld [vmem:[#allocation77_spill] sm:$0xff] }
 0x47e   : > { %v8000_v33 = vpop.f32.mrf.mxu1 }
 0x47f   : > { %15877 = vst [vmem:[#allocation46_spill] sm:$0xff] %v14835_v51  ;;  %v14839_v45 = vadd.f32 %v8000_v33, %v7749_v8  ;;  %v8216_v2 = vmul.f32 %v14835_v51, %v15879_v42  ;;  %v14855_v8 = vpop.f32.mrf.mxu0 }
 0x480   : > { %v11111_v49 = vpop.f32.mrf.mxu1 }
 0x481   : > { %15878 = vst [vmem:[#allocation42_spill] sm:$0xff] %v14839_v45  ;;  %v8215_v19 = vmul.f32 %v14839_v45, %v15880_v58  ;;  %v14847_v25 = vadd.f32 %v11111_v49, %v7752_v61  ;;  %v8330_v33 = vmul.f32 %v8216_v2, %v8216_v2  ;;  %v7753_v49 = vadd.f32 %v14725_v48, %v14707_v1  ;;  %v15885_v58 = vld [vmem:[#allocation69_spill] sm:$0xff]  ;;  %v14874_v1 = vpop.f32.mrf.mxu0 }
 0x482   : > { %v8010_v15 = vpop.f32.mrf.mxu1  ;;  %v8252_v54 = vsel %vm389_vm1, %v8216_v2, 0.0  ;;  %v15886_v2 = vld [vmem:[#allocation82_spill] sm:$0xff] }
 0x483   : > { %15881 = vst [vmem:[#allocation43_spill] sm:$0xff] %v14847_v25  ;;  %v8329_v4 = vmul.f32 %v8215_v19, %v8215_v19  ;;  %v8218_v18 = vmul.f32 %v14847_v25, %v15882_v37  ;;  %v8251_v42 = vsel %vm389_vm1, %v8215_v19, 0.0  ;;  %v14858_v51 = vadd.f32 %v8010_v15, %v7751_v22 }
 0x484   : > { %v11114_v61 = vpop.f32.mrf.mxu1  ;;  %v7755_v19 = vadd.f32 %v14741_v11, %v14715_v55  ;;  %v8253_v22 = vadd.f32 %v8252_v54, %v8251_v42  ;;  %v8366_v48 = vsel %vm389_vm1, %v8330_v33, 0.0  ;;  %v15887_v11 = vld [vmem:[#allocation81_spill] sm:$0xff]  ;;  %v7757_v42 = vadd.f32 %v14757_v31, %v14723_v24 }
 0x485   : > { %15883 = vst [vmem:[#allocation44_spill] sm:$0xff] %v14858_v51  ;;  %v14862_v28 = vadd.f32 %v11114_v61, %v7754_v0  ;;  %v8365_v3 = vsel %vm389_vm1, %v8329_v4, 0.0  ;;  %v8217_v37 = vmul.f32 %v14858_v51, %v15885_v58  ;;  %v8332_v15 = vmul.f32 %v8218_v18, %v8218_v18 }
 0x486   : > { %v8020_v25 = vpop.f32.mrf.mxu1  ;;  %v7758_v61 = vadd.f32 %v14749_v7, %v14720_v43  ;;  %v8367_v58 = vadd.f32 %v8366_v48, %v8365_v3  ;;  %v8256_v33 = vsel %vm389_vm1, %v8218_v18, 0.0  ;;  %v14892_v7 = vpop.f32.mrf.mxu0  ;;  %v15888_v48 = vld [vmem:[#allocation25_spill] sm:$0xff] }
 0x487   : > { %15884 = vst [vmem:[#allocation47_spill] sm:$0xff] %v14862_v28  ;;  %v14872_v45 = vadd.f32 %v8020_v25, %v7753_v49  ;;  %v8254_v27 = vsel %vm389_vm1, %v8217_v37, 0.0  ;;  %v8331_v62 = vmul.f32 %v8217_v37, %v8217_v37  ;;  %v8220_v0 = vmul.f32 %v14862_v28, %v15886_v2 }
 0x488   : > { %v11117_v4 = vpop.f32.mrf.mxu1  ;;  %v8255_v55 = vadd.f32 %v8254_v27, %v8253_v22  ;;  %v8370_v2 = vsel %vm389_vm1, %v8332_v15, 0.0 }
 0x489   : > { %v8219_v25 = vmul.f32 %v14872_v45, %v15887_v11  ;;  %v8368_v49 = vsel %vm389_vm1, %v8331_v62, 0.0  ;;  %v14888_v54 = vadd.f32 %v11117_v4, %v7756_v36  ;;  %v8334_v3 = vmul.f32 %v8220_v0, %v8220_v0  ;;  %v15889_v11 = vld [vmem:[#allocation27_spill] sm:$0xff] }
 0x48a   : > { %v8030_v37 = vpop.f32.mrf.mxu1  ;;  %v8369_v28 = vadd.f32 %v8368_v49, %v8367_v58  ;;  %v8257_v51 = vadd.f32 %v8256_v33, %v8255_v55  ;;  %v7760_v36 = vadd.f32 %v14765_v16, %v14728_v35  ;;  %v7759_v4 = vadd.f32 %v14773_v34, %v14731_v17  ;;  %v14910_v35 = vpop.f32.mrf.mxu0  ;;  %v15890_v34 = vld [vmem:[#allocation28_spill] sm:$0xff] }
 0x48b   : > { %v8258_v43 = vsel %vm389_vm1, %v8219_v25, 0.0  ;;  %v8333_v22 = vmul.f32 %v8219_v25, %v8219_v25  ;;  %v8222_v24 = vmul.f32 %v14888_v54, %v15888_v48  ;;  %v14896_v31 = vadd.f32 %v8030_v37, %v7755_v19 }
 0x48c   : > { %v11120_v18 = vpop.f32.mrf.mxu1  ;;  %v8259_v27 = vadd.f32 %v8258_v43, %v8257_v51  ;;  %v8371_v62 = vadd.f32 %v8370_v2, %v8369_v28  ;;  %v8260_v58 = vsel %vm389_vm1, %v8220_v0, 0.0  ;;  %v8374_v16 = vsel %vm389_vm1, %v8334_v3, 0.0  ;;  %v15891_v3 = vld [vmem:[#allocation30_spill] sm:$0xff] }
 0x48d   : > { %v14900_v15 = vadd.f32 %v11120_v18, %v7758_v61  ;;  %v8372_v55 = vsel %vm389_vm1, %v8333_v22, 0.0  ;;  %v8221_v25 = vmul.f32 %v14896_v31, %v15889_v11  ;;  %v8336_v49 = vmul.f32 %v8222_v24, %v8222_v24 }
 0x48e   : > { %v8040_v19 = vpop.f32.mrf.mxu1  ;;  %v8373_v33 = vadd.f32 %v8372_v55, %v8371_v62  ;;  %v8261_v37 = vadd.f32 %v8260_v58, %v8259_v27  ;;  %v7762_v61 = vadd.f32 %v14781_v20, %v14736_v57  ;;  %v7761_v2 = vadd.f32 %v14789_v44, %v14739_v60  ;;  %v14929_v20 = vpop.f32.mrf.mxu0 }
 0x48f   : > { %v14908_v48 = vadd.f32 %v8040_v19, %v7757_v42  ;;  %v8262_v51 = vsel %vm389_vm1, %v8221_v25, 0.0  ;;  %v8335_v17 = vmul.f32 %v8221_v25, %v8221_v25  ;;  %v8224_v28 = vmul.f32 %v14900_v15, %v15890_v34  ;;  %v15892_v19 = vld [vmem:[#allocation34_spill] sm:$0xff] }
 0x490   : > { %v11123_v0 = vpop.f32.mrf.mxu1  ;;  %v8263_v43 = vadd.f32 %v8262_v51, %v8261_v37  ;;  %v8375_v42 = vadd.f32 %v8374_v16, %v8373_v33  ;;  %v8264_v22 = vsel %vm389_vm1, %v8222_v24, 0.0  ;;  %v8378_v55 = vsel %vm389_vm1, %v8336_v49, 0.0  ;;  %v15893_v51 = vld [vmem:[#allocation35_spill] sm:$0xff] }
 0x491   : > { %v8376_v18 = vsel %vm389_vm1, %v8335_v17, 0.0  ;;  %v8223_v27 = vmul.f32 %v14908_v48, %v15891_v3  ;;  %v14924_v62 = vadd.f32 %v11123_v0, %v7760_v36  ;;  %v8338_v60 = vmul.f32 %v8224_v28, %v8224_v28 }
 0x492   : > { %v8050_v58 = vpop.f32.mrf.mxu1  ;;  %v8377_v11 = vadd.f32 %v8376_v18, %v8375_v42  ;;  %v8265_v25 = vadd.f32 %v8264_v22, %v8263_v43  ;;  %v7763_v34 = vadd.f32 %v14805_v21, %v14747_v6  ;;  %v8268_v0 = vsel %vm389_vm1, %v8224_v28, 0.0 }
 0x493   : > { %v14927_v57 = vadd.f32 %v8050_v58, %v7759_v4  ;;  %v8266_v44 = vsel %vm389_vm1, %v8223_v27, 0.0  ;;  %v8337_v24 = vmul.f32 %v8223_v27, %v8223_v27  ;;  %v8226_v33 = vmul.f32 %v14924_v62, %v15892_v19  ;;  %v14945_v58 = vpop.f32.mrf.mxu0 }
 0x494   : > { %v11126_v37 = vpop.f32.mrf.mxu1  ;;  %v8267_v16 = vadd.f32 %v8266_v44, %v8265_v25  ;;  %v8379_v36 = vadd.f32 %v8378_v55, %v8377_v11  ;;  %v7764_v4 = vadd.f32 %v14797_v9, %v14744_v26  ;;  %v15894_v11 = vld [vmem:[#allocation4_spill] sm:$0xff]  ;;  %v7765_v19 = vadd.f32 %v14821_v32, %v14755_v12 }
 0x495   : > { %v8225_v17 = vmul.f32 %v14927_v57, %v15893_v51  ;;  %v14936_v49 = vadd.f32 %v11126_v37, %v7762_v61  ;;  %v8380_v43 = vsel %vm389_vm1, %v8337_v24, 0.0  ;;  %v8382_v61 = vsel %vm389_vm1, %v8338_v60, 0.0  ;;  %v15895_v37 = vld [vmem:[#allocation3_spill] sm:$0xff] }
 0x496   : > { %v8060_v42 = vpop.f32.mrf.mxu1  ;;  %v8381_v22 = vadd.f32 %v8380_v43, %v8379_v36  ;;  %v8269_v18 = vadd.f32 %v8268_v0, %v8267_v16  ;;  %v8340_v55 = vmul.f32 %v8226_v33, %v8226_v33  ;;  %v7766_v24 = vadd.f32 %v14813_v13, %v14752_v23  ;;  %v14964_v43 = vpop.f32.mrf.mxu0 }
 0x497   : > { %v8270_v3 = vsel %vm389_vm1, %v8225_v17, 0.0  ;;  %v8339_v27 = vmul.f32 %v8225_v17, %v8225_v17  ;;  %v8228_v26 = vmul.f32 %v14936_v49, %v15894_v11  ;;  %v14950_v9 = vadd.f32 %v8060_v42, %v7761_v2  ;;  %v15896_v42 = vld [vmem:[#allocation8_spill] sm:$0xff] }
 0x498   : > { %v11129_v6 = vpop.f32.mrf.mxu1  ;;  %v8271_v21 = vadd.f32 %v8270_v3, %v8269_v18  ;;  %v8383_v28 = vadd.f32 %v8382_v61, %v8381_v22  ;;  %v8272_v60 = vsel %vm389_vm1, %v8226_v33, 0.0  ;;  %v7768_v33 = vadd.f32 %v14831_v46, %v14760_v5  ;;  %v15897_v61 = vld [vmem:[#allocation7_spill] sm:$0xff]  ;;  %v14983_v46 = vpop.f32.mrf.mxu0 }
 0x499   : > { %v8384_v25 = vsel %vm389_vm1, %v8339_v27, 0.0  ;;  %v14953_v44 = vadd.f32 %v11129_v6, %v7764_v4  ;;  %v8227_v16 = vmul.f32 %v14950_v9, %v15895_v37  ;;  %v8342_v51 = vmul.f32 %v8228_v26, %v8228_v26 }
 0x49a   : > { %v8070_v2 = vpop.f32.mrf.mxu1  ;;  %v8385_v36 = vadd.f32 %v8384_v25, %v8383_v28  ;;  %v8273_v17 = vadd.f32 %v8272_v60, %v8271_v21  ;;  %v8386_v4 = vsel %vm389_vm1, %v8340_v55, 0.0  ;;  %v7767_v22 = vadd.f32 %v14841_v38, %v14763_v59  ;;  %v15898_v60 = vld [vmem:[#allocation10_spill] sm:$0xff] }
 0x49b   : > { %v14962_v0 = vadd.f32 %v8070_v2, %v7763_v34  ;;  %v8274_v23 = vsel %vm389_vm1, %v8227_v16, 0.0  ;;  %v8341_v13 = vmul.f32 %v8227_v16, %v8227_v16  ;;  %v8230_v12 = vmul.f32 %v14953_v44, %v15896_v42 }
 0x49c   : > { %v11132_v32 = vpop.f32.mrf.mxu1  ;;  %v8275_v18 = vadd.f32 %v8274_v23, %v8273_v17  ;;  %v8387_v34 = vadd.f32 %v8386_v4, %v8385_v36  ;;  %v8276_v3 = vsel %vm389_vm1, %v8228_v26, 0.0  ;;  %v8390_v21 = vsel %vm389_vm1, %v8342_v51, 0.0  ;;  %v15899_v36 = vld [vmem:[#allocation9_spill] sm:$0xff] }
 0x49d   : > { %v8388_v27 = vsel %vm389_vm1, %v8341_v13, 0.0  ;;  %v8229_v55 = vmul.f32 %v14962_v0, %v15897_v61  ;;  %v14978_v11 = vadd.f32 %v11132_v32, %v7766_v24  ;;  %v8344_v59 = vmul.f32 %v8230_v12, %v8230_v12 }
 0x49e   : > { %v8080_v6 = vpop.f32.mrf.mxu1  ;;  %v8389_v28 = vadd.f32 %v8388_v27, %v8387_v34  ;;  %v8277_v25 = vadd.f32 %v8276_v3, %v8275_v18  ;;  %v7769_v4 = vadd.f32 %v14874_v1, %v14771_v39  ;;  %v8280_v23 = vsel %vm389_vm1, %v8230_v12, 0.0  ;;  %v14999_v27 = vpop.f32.mrf.mxu0 }
 0x49f   : > { %v14981_v5 = vadd.f32 %v8080_v6, %v7765_v19  ;;  %v8278_v38 = vsel %vm389_vm1, %v8229_v55, 0.0  ;;  %v8343_v26 = vmul.f32 %v8229_v55, %v8229_v55  ;;  %v8232_v37 = vmul.f32 %v14978_v11, %v15898_v60  ;;  %v15900_v55 = vld [vmem:[#allocation11_spill] sm:$0xff] }
 0x4a0   : > { %v11135_v16 = vpop.f32.mrf.mxu1  ;;  %v8279_v2 = vadd.f32 %v8278_v38, %v8277_v25  ;;  %v8391_v24 = vadd.f32 %v8390_v21, %v8389_v28  ;;  %v7770_v19 = vadd.f32 %v14855_v8, %v14768_v47  ;;  %v7772_v28 = vadd.f32 %v14892_v7, %v14776_v53 }
 0x4a1   : > { %v8231_v17 = vmul.f32 %v14981_v5, %v15899_v36  ;;  %v14990_v51 = vadd.f32 %v11135_v16, %v7768_v33  ;;  %v8392_v13 = vsel %vm389_vm1, %v8343_v26, 0.0  ;;  %v8394_v33 = vsel %vm389_vm1, %v8344_v59, 0.0 }
 0x4a2   : > { %v8090_v42 = vpop.f32.mrf.mxu1  ;;  %v8393_v32 = vadd.f32 %v8392_v13, %v8391_v24  ;;  %v8281_v18 = vadd.f32 %v8280_v23, %v8279_v2  ;;  %v8346_v61 = vmul.f32 %v8232_v37, %v8232_v37  ;;  %v7771_v25 = vadd.f32 %v14910_v35, %v14779_v41  ;;  %v7710_v24 = vpop.f32.mrf.mxu0 }
 0x4a3   : > { %v8282_v34 = vsel %vm389_vm1, %v8231_v17, 0.0  ;;  %v8345_v3 = vmul.f32 %v8231_v17, %v8231_v17  ;;  %v8234_v47 = vmul.f32 %v14990_v51, %v15900_v55  ;;  %v15004_v8 = vadd.f32 %v8090_v42, %v7767_v22 }
 0x4a4   : > { %v11138_v39 = vpop.f32.mrf.mxu1  ;;  %v8283_v1 = vadd.f32 %v8282_v34, %v8281_v18  ;;  %v8395_v12 = vadd.f32 %v8394_v33, %v8393_v32  ;;  %v8284_v59 = vsel %vm389_vm1, %v8232_v37, 0.0  ;;  %v8398_v36 = vsel %vm389_vm1, %v8346_v61, 0.0  ;;  %v15901_v33 = vld [vmem:[#allocation12_spill] sm:$0xff] }
 0x4a5   : > { %v8396_v6 = vsel %vm389_vm1, %v8345_v3, 0.0  ;;  %v15007_v21 = vadd.f32 %v11138_v39, %v7770_v19  ;;  %v8233_v38 = vmul.f32 %v15004_v8, %v13405_v52  ;;  %v8348_v60 = vmul.f32 %v8234_v47, %v8234_v47  ;;  %v15902_v39 = vld [vmem:[#allocation19_spill] sm:$0xff] }
 0x4a6   : > { %v8100_v22 = vpop.f32.mrf.mxu1  ;;  %v8397_v26 = vadd.f32 %v8396_v6, %v8395_v12  ;;  %v8285_v16 = vadd.f32 %v8284_v59, %v8283_v1  ;;  %v7774_v35 = vadd.f32 %v14929_v20, %v14784_v40  ;;  %v7773_v52 = vadd.f32 %v14945_v58, %v14787_v56  ;;  %v11097_v20 = vpop.f32.mrf.mxu0 }
 0x4a7   : > { %v15016_v2 = vadd.f32 %v8100_v22, %v7769_v4  ;;  %v8286_v17 = vsel %vm389_vm1, %v8233_v38, 0.0  ;;  %v8347_v53 = vmul.f32 %v8233_v38, %v8233_v38  ;;  %v8236_v41 = vmul.f32 %v15007_v21, %v13444_v50 }
 0x4a8   : > { %v11141_v7 = vpop.f32.mrf.mxu1  ;;  %v8287_v37 = vadd.f32 %v8286_v17, %v8285_v16  ;;  %v8399_v19 = vadd.f32 %v8398_v36, %v8397_v26  ;;  %v8288_v4 = vsel %vm389_vm1, %v8234_v47, 0.0  ;;  %v8402_v50 = vsel %vm389_vm1, %v8348_v60, 0.0  ;;  %v7720_v17 = vpop.f32.mrf.mxu0 }
 0x4a9   : > { %v8400_v23 = vsel %vm389_vm1, %v8347_v53, 0.0  ;;  %v8235_v13 = vmul.f32 %v15016_v2, %v13442_v63  ;;  %v15030_v42 = vadd.f32 %v11141_v7, %v7772_v28  ;;  %v8350_v56 = vmul.f32 %v8236_v41, %v8236_v41  ;;  %v15903_v28 = vld [vmem:[#allocation22_spill] sm:$0xff] }
 0x4aa   : > { %v8110_v32 = vpop.f32.mrf.mxu1  ;;  %v8401_v18 = vadd.f32 %v8400_v23, %v8399_v19  ;;  %v8289_v34 = vadd.f32 %v8288_v4, %v8287_v37  ;;  %v7776_v6 = vadd.f32 %v14964_v43, %v14792_v14  ;;  %v8292_v59 = vsel %vm389_vm1, %v8236_v41, 0.0 }
 0x4ab   : > { %v15033_v40 = vadd.f32 %v8110_v32, %v7771_v25  ;;  %v8290_v58 = vsel %vm389_vm1, %v8235_v13, 0.0  ;;  %v8349_v3 = vmul.f32 %v8235_v13, %v8235_v13  ;;  %v8238_v61 = vmul.f32 %v15030_v42, %v15901_v33  ;;  %v15905_v13 = vld [vmem:[#allocation45_spill] sm:$0xff] }
 0x4ac   : > { %v11144_v55 = vpop.f32.mrf.mxu1  ;;  %v8291_v47 = vadd.f32 %v8290_v58, %v8289_v34  ;;  %v8403_v63 = vadd.f32 %v8402_v50, %v8401_v18  ;;  %v7775_v25 = vadd.f32 %v14983_v46, %v15903_v28  ;;  %v8406_v53 = vsel %vm389_vm1, %v8350_v56, 0.0  ;;  %v15906_v18 = vld [vmem:[#allocation13_spill] sm:$0xff] }
 0x4ad   : > { %v8237_v1 = vmul.f32 %v15033_v40, %v15902_v39  ;;  %v15040_v12 = vadd.f32 %v11144_v55, %v7774_v35  ;;  %v8404_v38 = vsel %vm389_vm1, %v8349_v3, 0.0  ;;  %v8352_v7 = vmul.f32 %v8238_v61, %v8238_v61  ;;  %v15904_v35 = vld [vmem:[#allocation21_spill] sm:$0xff]  ;;  %v11100_v55 = vpop.f32.mrf.mxu0 }
 0x4ae   : > { %v8120_v22 = vpop.f32.mrf.mxu1  ;;  %v8405_v26 = vadd.f32 %v8404_v38, %v8403_v63  ;;  %v8293_v60 = vadd.f32 %v8292_v59, %v8291_v47  ;;  %v7778_v23 = vadd.f32 %v14999_v27, %v14800_v29  ;;  %v7777_v32 = vadd.f32 %v7710_v24, %v15905_v13  ;;  %v15907_v29 = vld [vmem:[#allocation14_spill] sm:$0xff] }
 0x4af   : > { %v8294_v16 = vsel %vm389_vm1, %v8237_v1, 0.0  ;;  %v8351_v36 = vmul.f32 %v8237_v1, %v8237_v1  ;;  %v8240_v14 = vmul.f32 %v15040_v12, %v15904_v35  ;;  %v15052_v43 = vadd.f32 %v8120_v22, %v7773_v52  ;;  %v15908_v1 = vld [vmem:[#allocation24_spill] sm:$0xff]  ;;  %v15909_v22 = vld [vmem:[#allocation23_spill] sm:$0xff] }
 0x4b0   : > { %v11147_v46 = vpop.f32.mrf.mxu1  ;;  %v8295_v37 = vadd.f32 %v8294_v16, %v8293_v60  ;;  %v8407_v41 = vadd.f32 %v8406_v53, %v8405_v26  ;;  %v8296_v50 = vsel %vm389_vm1, %v8238_v61, 0.0  ;;  %v8410_v47 = vsel %vm389_vm1, %v8352_v7, 0.0 }
 0x4b1   : > { %v8408_v19 = vsel %vm389_vm1, %v8351_v36, 0.0  ;;  %v15055_v4 = vadd.f32 %v11147_v46, %v7776_v6  ;;  %v8239_v34 = vmul.f32 %v15052_v43, %v15906_v18  ;;  %v8354_v58 = vmul.f32 %v8240_v14, %v8240_v14 }
 0x4b2   : > { %v8130_v56 = vpop.f32.mrf.mxu1  ;;  %v8409_v52 = vadd.f32 %v8408_v19, %v8407_v41  ;;  %v8297_v3 = vadd.f32 %v8296_v50, %v8295_v37  ;;  %v7780_v61 = vadd.f32 %v11097_v20, %v14808_v30  ;;  %v7779_v6 = vadd.f32 %v7720_v17, %v15908_v1  ;;  %v7730_v30 = vpop.f32.mrf.mxu0 }
 0x4b3   : > { %v15063_v33 = vadd.f32 %v8130_v56, %v7775_v25  ;;  %v8298_v63 = vsel %vm389_vm1, %v8239_v34, 0.0  ;;  %v8353_v39 = vmul.f32 %v8239_v34, %v8239_v34  ;;  %v8242_v27 = vmul.f32 %v15055_v4, %v15907_v29 }
 0x4b4   : > { %v11150_v24 = vpop.f32.mrf.mxu1  ;;  %v8299_v28 = vadd.f32 %v8298_v63, %v8297_v3  ;;  %v8411_v59 = vadd.f32 %v8410_v47, %v8409_v52  ;;  %v8300_v38 = vsel %vm389_vm1, %v8240_v14, 0.0  ;;  %v8414_v36 = vsel %vm389_vm1, %v8354_v58, 0.0  ;;  %v15910_v14 = vld [vmem:[#allocation26_spill] sm:$0xff] }
 0x4b5   : > { %v8412_v25 = vsel %vm389_vm1, %v8353_v39, 0.0  ;;  %v8241_v26 = vmul.f32 %v15063_v33, %v15909_v22  ;;  %v15075_v60 = vadd.f32 %v11150_v24, %v7778_v23  ;;  %v8356_v20 = vmul.f32 %v8242_v27, %v8242_v27  ;;  %v15911_v23 = vld [vmem:[#allocation15_spill] sm:$0xff]  ;;  %v11103_v24 = vpop.f32.mrf.mxu0 }
 0x4b6   : > { %v8140_v16 = vpop.f32.mrf.mxu1  ;;  %v8413_v53 = vadd.f32 %v8412_v25, %v8411_v59  ;;  %v8301_v7 = vadd.f32 %v8300_v38, %v8299_v28  ;;  %v7782_v34 = vadd.f32 %v11100_v55, %v14816_v10  ;;  %v8304_v52 = vsel %vm389_vm1, %v8242_v27, 0.0 }
 0x4b7   : > { %v15078_v35 = vadd.f32 %v8140_v16, %v7777_v32  ;;  %v8302_v17 = vsel %vm389_vm1, %v8241_v26, 0.0  ;;  %v8355_v46 = vmul.f32 %v8241_v26, %v8241_v26  ;;  %v8244_v37 = vmul.f32 %v15075_v60, %v15910_v14  ;;  %v15912_v32 = vld [vmem:[#allocation29_spill] sm:$0xff]  ;;  %v15914_v26 = vld [vmem:[#allocation38_spill] sm:$0xff]  ;;  %v7740_v14 = vpop.f32.mrf.mxu0 }
 0x4b8   : > { %v11153_v41 = vpop.f32.mrf.mxu1  ;;  %v8303_v19 = vadd.f32 %v8302_v17, %v8301_v7  ;;  %v8415_v13 = vadd.f32 %v8414_v36, %v8413_v53  ;;  %v7781_v56 = vadd.f32 %v7730_v30, %v15912_v32  ;;  %v8418_v1 = vsel %vm389_vm1, %v8356_v20, 0.0  ;;  %v15915_v53 = vld [vmem:[#allocation32_spill] sm:$0xff] }
 0x4b9   : > { %v8243_v50 = vmul.f32 %v15078_v35, %v15911_v23  ;;  %v15085_v18 = vadd.f32 %v11153_v41, %v7780_v61  ;;  %v8416_v58 = vsel %vm389_vm1, %v8355_v46, 0.0  ;;  %v8358_v28 = vmul.f32 %v8244_v37, %v8244_v37  ;;  %v15913_v61 = vld [vmem:[#allocation39_spill] sm:$0xff]  ;;  %v15916_v23 = vld [vmem:[#allocation16_spill] sm:$0xff] }
 0x4ba   : > { %v8150_v3 = vpop.f32.mrf.mxu1  ;;  %v8417_v47 = vadd.f32 %v8416_v58, %v8415_v13  ;;  %v8305_v63 = vadd.f32 %v8304_v52, %v8303_v19  ;;  %v7784_v16 = vadd.f32 %v11103_v24, %v15914_v26  ;;  %v8308_v36 = vsel %vm389_vm1, %v8244_v37, 0.0  ;;  %v15917_v37 = vld [vmem:[#allocation40_spill] sm:$0xff] }
 0x4bb   : > { %v8306_v39 = vsel %vm389_vm1, %v8243_v50, 0.0  ;;  %v8357_v29 = vmul.f32 %v8243_v50, %v8243_v50  ;;  %v8246_v59 = vmul.f32 %v15085_v18, %v15913_v61  ;;  %v15095_v10 = vadd.f32 %v8150_v3, %v7779_v6 }
 0x4bc   : > { %v11156_v55 = vpop.f32.mrf.mxu1  ;;  %v8307_v38 = vadd.f32 %v8306_v39, %v8305_v63  ;;  %v8419_v27 = vadd.f32 %v8418_v1, %v8417_v47  ;;  %v8422_v41 = vsel %vm389_vm1, %v8358_v28, 0.0  ;;  %v7783_v32 = vadd.f32 %v7740_v14, %v15917_v37 }
 0x4bd   : > { %v8420_v25 = vsel %vm389_vm1, %v8357_v29, 0.0  ;;  %v15098_v22 = vadd.f32 %v11156_v55, %v7782_v34  ;;  %v8245_v7 = vmul.f32 %v15095_v10, %v15915_v53  ;;  %v8360_v17 = vmul.f32 %v8246_v59, %v8246_v59  ;;  %v15920_v53 = vld [vmem:[#allocation20_spill] sm:$0xff] }
 0x4be   : > { %v8160_v30 = vpop.f32.mrf.mxu1  ;;  %v8421_v20 = vadd.f32 %v8420_v25, %v8419_v27  ;;  %v8309_v46 = vadd.f32 %v8308_v36, %v8307_v38  ;;  %v8312_v3 = vsel %vm389_vm1, %v8246_v59, 0.0  ;;  %v15919_v25 = vld [vmem:[#allocation18_spill] sm:$0xff] }
 0x4bf   : > { %v15104_v6 = vadd.f32 %v8160_v30, %v7781_v56  ;;  %v8310_v19 = vsel %vm389_vm1, %v8245_v7, 0.0  ;;  %v8359_v13 = vmul.f32 %v8245_v7, %v8245_v7  ;;  %v8248_v50 = vmul.f32 %v15098_v22, %v15916_v23  ;;  %v15918_v56 = vld [vmem:[#allocation41_spill] sm:$0xff] }
 0x4c0   : > { %v11159_v34 = vpop.f32.mrf.mxu1  ;;  %v8311_v52 = vadd.f32 %v8310_v19, %v8309_v46  ;;  %v8423_v58 = vadd.f32 %v8422_v41, %v8421_v20  ;;  %v8426_v24 = vsel %vm389_vm1, %v8360_v17, 0.0 }
 0x4c1   : > { %v8424_v47 = vsel %vm389_vm1, %v8359_v13, 0.0  ;;  %v8247_v63 = vmul.f32 %v15104_v6, %v15918_v56  ;;  %v15115_v39 = vadd.f32 %v11159_v34, %v7784_v16  ;;  %v8362_v55 = vmul.f32 %v8248_v50, %v8248_v50 }
 0x4c2   : > { %v8170_v29 = vpop.f32.mrf.mxu1  ;;  %v8425_v1 = vadd.f32 %v8424_v47, %v8423_v58  ;;  %v8313_v28 = vadd.f32 %v8312_v3, %v8311_v52  ;;  %v8316_v7 = vsel %vm389_vm1, %v8248_v50, 0.0 }
 0x4c3   : > { %v15118_v61 = vadd.f32 %v8170_v29, %v7783_v32  ;;  %v8314_v38 = vsel %vm389_vm1, %v8247_v63, 0.0  ;;  %v8361_v27 = vmul.f32 %v8247_v63, %v8247_v63  ;;  %v8250_v59 = vmul.f32 %v15115_v39, %v15919_v25 }
 0x4c4   : > { %v8315_v26 = vadd.f32 %v8314_v38, %v8313_v28  ;;  %v8427_v36 = vadd.f32 %v8426_v24, %v8425_v1  ;;  %v8430_v41 = vsel %vm389_vm1, %v8362_v55, 0.0 }
 0x4c5   : > { %v8249_v16 = vmul.f32 %v15118_v61, %v15920_v53  ;;  %v8428_v30 = vsel %vm389_vm1, %v8361_v27, 0.0  ;;  %v8364_v19 = vmul.f32 %v8250_v59, %v8250_v59  ;;  %v8320_v37 = vsel %vm389_vm1, %v8250_v59, 0.0 }
 0x4c6   : > { %v8429_v20 = vadd.f32 %v8428_v30, %v8427_v36  ;;  %v8317_v17 = vadd.f32 %v8316_v7, %v8315_v26 }
 0x4c7   : > { %v8318_v46 = vsel %vm389_vm1, %v8249_v16, 0.0  ;;  %v8363_v14 = vmul.f32 %v8249_v16, %v8249_v16  ;;  %v8434_v50 = vsel %vm389_vm1, %v8364_v19, 0.0 }
 0x4c8   : > { %v8319_v13 = vadd.f32 %v8318_v46, %v8317_v17  ;;  %v8431_v23 = vadd.f32 %v8430_v41, %v8429_v20 }
 0x4c9   : > { %v8432_v34 = vsel %vm389_vm1, %v8363_v14, 0.0 }
 0x4ca   : > { %v8321_v32 = vadd.f32 %v8320_v37, %v8319_v13  ;;  %v8433_v52 = vadd.f32 %v8432_v34, %v8431_v23  ;;  %v15922_v13 = vld [vmem:[#allocation46_spill] sm:$0xff]  ;;  %v15923_v23 = vld [vmem:[#allocation44_spill] sm:$0xff]  ;;  %v15924_v34 = vld [vmem:[#allocation43_spill] sm:$0xff] }
 0x4cb   : > { %v15925_v37 = vld [vmem:[#allocation47_spill] sm:$0xff] }
 0x4cc   : > { %v8322_v58 = vrot.slane %v8321_v32, 4  ;;  %v8435_v3 = vadd.f32 %v8434_v50, %v8433_v52 }
 0x4ce   : > { %v8323_v47 = vadd.f32 %v8322_v58, %v8321_v32  ;;  %v8436_v56 = vrot.slane %v8435_v3, 4 }
 0x4d0   : > { %v8324_v63 = vrot.slane %v8323_v47, 2  ;;  %v8437_v29 = vadd.f32 %v8436_v56, %v8435_v3 }
 0x4d2   : > { %v8325_v24 = vadd.f32 %v8324_v63, %v8323_v47  ;;  %v8438_v1 = vrot.slane %v8437_v29, 2 }
 0x4d4   : > { %v8326_v28 = vrot.slane %v8325_v24, 1  ;;  %v8439_v55 = vadd.f32 %v8438_v1, %v8437_v29 }
 0x4d6   : > { %v8327_v38 = vadd.f32 %v8326_v28, %v8325_v24  ;;  %v8440_v27 = vrot.slane %v8439_v55, 1 }
 0x4d8   : > { %v15132_v25 = vmul.f32 0.00390625, %v8327_v38  ;;  %v8441_v26 = vadd.f32 %v8440_v27, %v8439_v55 }
 0x4da   : > { %v8442_v59 = vmul.f32 0.00390625, %v8441_v26  ;;  %v8443_v36 = vmul.f32 %v15132_v25, %v15132_v25  ;;  %v8462_v7 = vsub.f32 %v14981_v5, %v15132_v25  ;;  %v8463_v30 = vsub.f32 %v14978_v11, %v15132_v25 }
 0x4db   : > { %v8464_v20 = vsub.f32 %v15004_v8, %v15132_v25  ;;  %v8465_v17 = vsub.f32 %v14990_v51, %v15132_v25  ;;  %v8466_v46 = vsub.f32 %v15016_v2, %v15132_v25  ;;  %v8467_v14 = vsub.f32 %v15007_v21, %v15132_v25 }
 0x4dc   : > { %v8444_v53 = vsub.f32 %v8442_v59, %v8443_v36  ;;  %v8468_v41 = vsub.f32 %v15033_v40, %v15132_v25  ;;  %v8469_v5 = vsub.f32 %v15030_v42, %v15132_v25  ;;  %v8470_v11 = vsub.f32 %v15052_v43, %v15132_v25 }
 0x4dd   : > { %v8471_v8 = vsub.f32 %v15040_v12, %v15132_v25  ;;  %v8472_v51 = vsub.f32 %v15063_v33, %v15132_v25  ;;  %v8473_v2 = vsub.f32 %v15055_v4, %v15132_v25  ;;  %v8474_v21 = vsub.f32 %v15078_v35, %v15132_v25 }
 0x4de   : > { %v8445_v16 = vmax.f32 %v8444_v53, 0.0  ;;  %v8475_v40 = vsub.f32 %v15075_v60, %v15132_v25  ;;  %v8476_v42 = vsub.f32 %v15095_v10, %v15132_v25  ;;  %v8477_v43 = vsub.f32 %v15085_v18, %v15132_v25  ;;  %v15921_v60 = vld [vmem:[#allocation42_spill] sm:$0xff] }
 0x4df   : > { %v8478_v12 = vsub.f32 %v15104_v6, %v15132_v25  ;;  %v8479_v33 = vsub.f32 %v15098_v22, %v15132_v25  ;;  %v8480_v4 = vsub.f32 %v15118_v61, %v15132_v25  ;;  %v8481_v35 = vsub.f32 %v15115_v39, %v15132_v25 }
 0x4e0   : > { %v8482_v19 = vadd.f32 1e-05, %v8445_v16  ;;  %v8446_v10 = vsub.f32 %v15921_v60, %v15132_v25  ;;  %v8447_v18 = vsub.f32 %v15922_v13, %v15132_v25  ;;  %v8448_v6 = vsub.f32 %v15923_v23, %v15132_v25 }
 0x4e1   : > { %v8449_v22 = vsub.f32 %v15924_v34, %v15132_v25  ;;  %v8450_v61 = vsub.f32 %v14872_v45, %v15132_v25  ;;  %v8451_v39 = vsub.f32 %v15925_v37, %v15132_v25  ;;  %v8452_v32 = vsub.f32 %v14896_v31, %v15132_v25 }
 0x4e2   : > { %11176 = vrsqrt.f32 %v8482_v19  ;;  %v8453_v52 = vsub.f32 %v14888_v54, %v15132_v25  ;;  %v8454_v50 = vsub.f32 %v14908_v48, %v15132_v25  ;;  %v8455_v58 = vsub.f32 %v14900_v15, %v15132_v25 }
 0x4e3   : > { %v8456_v3 = vsub.f32 %v14927_v57, %v15132_v25  ;;  %v8457_v45 = vsub.f32 %v14924_v62, %v15132_v25  ;;  %v8458_v56 = vsub.f32 %v14950_v9, %v15132_v25  ;;  %v8459_v31 = vsub.f32 %v14936_v49, %v15132_v25 }
 0x4e4   : > { %v8460_v54 = vsub.f32 %v14962_v0, %v15132_v25  ;;  %v8461_v48 = vsub.f32 %v14953_v44, %v15132_v25 }
 0x4ef   : > { %v11177_v47 = vpop.eup %11176 }
 0x4f0   : > { %v15208_v15 = vmul.f32 %v11177_v47, %v8446_v10  ;;  %v8485_v63 = vmul.f32 %v11177_v47, %v8447_v18  ;;  %v8486_v57 = vmul.f32 %v11177_v47, %v8448_v6  ;;  %v8487_v29 = vmul.f32 %v11177_v47, %v8449_v22 }
 0x4f1   : > { %v8488_v24 = vmul.f32 %v11177_v47, %v8450_v61  ;;  %v8489_v62 = vmul.f32 %v11177_v47, %v8451_v39  ;;  %v8490_v1 = vmul.f32 %v11177_v47, %v8452_v32  ;;  %v8491_v28 = vmul.f32 %v11177_v47, %v8453_v52 }
 0x4f2   : > { %v8492_v55 = vmul.f32 %v11177_v47, %v8454_v50  ;;  %v8493_v9 = vmul.f32 %v11177_v47, %v8455_v58  ;;  %v8494_v38 = vmul.f32 %v11177_v47, %v8456_v3  ;;  %v8495_v27 = vmul.f32 %v11177_v47, %v8457_v45 }
 0x4f3   : > { %v8496_v49 = vmul.f32 %v11177_v47, %v8458_v56  ;;  %v8497_v26 = vmul.f32 %v11177_v47, %v8459_v31  ;;  %v8498_v59 = vmul.f32 %v11177_v47, %v8460_v54  ;;  %v8499_v0 = vmul.f32 %v11177_v47, %v8461_v48 }
 0x4f4   : > { %v15210_v36 = vmul.f32 %v11177_v47, %v8462_v7  ;;  %v15212_v44 = vmul.f32 %v11177_v47, %v8463_v30  ;;  %v15214_v25 = vmul.f32 %v11177_v47, %v8464_v20  ;;  %v15216_v53 = vmul.f32 %v11177_v47, %v8465_v17 }
 0x4f5   : > { %v15218_v16 = vmul.f32 %v11177_v47, %v8466_v46  ;;  %v15220_v19 = vmul.f32 %v11177_v47, %v8467_v14  ;;  %v15222_v60 = vmul.f32 %v11177_v47, %v8468_v41  ;;  %v15224_v10 = vmul.f32 %v11177_v47, %v8469_v5 }
 0x4f6   : > { %v15226_v13 = vmul.f32 %v11177_v47, %v8470_v11  ;;  %v15228_v18 = vmul.f32 %v11177_v47, %v8471_v8  ;;  %v15230_v7 = vmul.f32 %v11177_v47, %v8472_v51  ;;  %v15232_v30 = vmul.f32 %v11177_v47, %v8473_v2 }
 0x4f7   : > { %v15234_v20 = vmul.f32 %v11177_v47, %v8474_v21  ;;  %v15236_v17 = vmul.f32 %v11177_v47, %v8475_v40  ;;  %v15238_v46 = vmul.f32 %v11177_v47, %v8476_v42  ;;  %v15240_v14 = vmul.f32 %v11177_v47, %v8477_v43 }
 0x4f8   : > { %v15242_v41 = vmul.f32 %v11177_v47, %v8478_v12  ;;  %v15244_v5 = vmul.f32 %v11177_v47, %v8479_v33  ;;  %v15246_v11 = vmul.f32 %v11177_v47, %v8480_v4  ;;  %v15248_v8 = vmul.f32 %v11177_v47, %v8481_v35 }
 0x4f9   : > { %v8556_v51 = vrot.slane %v15208_v15, 5  ;;  %v8557_v2 = vrot.slane %v8485_v63, 5  ;;  %v8559_v23 = vrot.slane %v8486_v57, 5  ;;  %v8561_v21 = vrot.slane %v8487_v29, 5 }
 0x4fa   : > { %v8563_v6 = vrot.slane %v8488_v24, 5  ;;  %v8565_v40 = vrot.slane %v8489_v62, 5  ;;  %v8567_v34 = vrot.slane %v8490_v1, 5  ;;  %v8569_v42 = vrot.slane %v8491_v28, 5 }
 0x4fb   : > { %v15254_v43 = vsel %vm2920_vm5, %v8556_v51, %v8557_v2  ;;  %v15257_v12 = vsel %vm2920_vm5, %v8557_v2, %v8559_v23  ;;  %v15260_v33 = vsel %vm2920_vm5, %v8559_v23, %v8561_v21  ;;  %v8571_v4 = vrot.slane %v8492_v55, 5 }
 0x4fc   : > { %v15263_v35 = vsel %vm2920_vm5, %v8561_v21, %v8563_v6  ;;  %v15266_v22 = vsel %vm2920_vm5, %v8563_v6, %v8565_v40  ;;  %v15269_v61 = vsel %vm2920_vm5, %v8565_v40, %v8567_v34  ;;  %v15272_v37 = vsel %vm2920_vm5, %v8567_v34, %v8569_v42 }
 0x4fd   : > { %v15275_v39 = vsel %vm2920_vm5, %v8569_v42, %v8571_v4  ;;  %v8573_v32 = vrot.slane %v8493_v9, 5  ;;  %v8575_v52 = vrot.slane %v8494_v38, 5  ;;  %v8577_v50 = vrot.slane %v8495_v27, 5 }
 0x4fe   : > { %v8579_v58 = vrot.slane %v8496_v49, 5  ;;  %v8581_v3 = vrot.slane %v8497_v26, 5  ;;  %v8583_v45 = vrot.slane %v8498_v59, 5  ;;  %v8585_v47 = vrot.slane %v8499_v0, 5 }
 0x4ff   : > { %v15278_v56 = vsel %vm2920_vm5, %v8571_v4, %v8573_v32  ;;  %v15281_v31 = vsel %vm2920_vm5, %v8573_v32, %v8575_v52  ;;  %v15284_v54 = vsel %vm2920_vm5, %v8575_v52, %v8577_v50  ;;  %v8587_v48 = vrot.slane %v15210_v36, 5  ;;  %v11213_v32 = vld [vmem:[%s11317_s28 + $0x10] sm:$0xff] }
 0x500   : > { %v15288_v63 = vsel %vm2920_vm5, %v8577_v50, %v8579_v58  ;;  %v15291_v57 = vsel %vm2920_vm5, %v8579_v58, %v8581_v3  ;;  %v15294_v29 = vsel %vm2920_vm5, %v8581_v3, %v8583_v45  ;;  %v15297_v24 = vsel %vm2920_vm5, %v8583_v45, %v8585_v47  ;;  %v11214_v50 = vld [vmem:[%s11317_s28 + $0x18] sm:$0xff]  ;;  %v11215_v3 = vld [vmem:[%s11317_s28 + $0x20] sm:$0xff] }
 0x501   : > { %v15300_v62 = vsel %vm2920_vm5, %v8585_v47, %v8587_v48  ;;  %v8589_v1 = vrot.slane %v15212_v44, 5  ;;  %v8591_v28 = vrot.slane %v15214_v25, 5  ;;  %v8593_v55 = vrot.slane %v15216_v53, 5  ;;  %v11216_v47 = vld [vmem:[%s11317_s28 + $0x28] sm:$0xff] }
 0x502   : > { %v8595_v9 = vrot.slane %v15218_v16, 5  ;;  %v8597_v38 = vrot.slane %v15220_v19, 5  ;;  %v8599_v27 = vrot.slane %v15222_v60, 5  ;;  %v8601_v49 = vrot.slane %v15224_v10, 5 }
 0x503   : > { %v15310_v26 = vsel %vm2920_vm5, %v8587_v48, %v8589_v1  ;;  %v15313_v59 = vsel %vm2920_vm5, %v8589_v1, %v8591_v28  ;;  %v15316_v0 = vsel %vm2920_vm5, %v8591_v28, %v8593_v55  ;;  %v8603_v36 = vrot.slane %v15226_v13, 5  ;;  %v11219_v1 = vld [vmem:[%s11317_s28 + $0x40] sm:$0xff] }
 0x504   : > { %v15320_v44 = vsel %vm2920_vm5, %v8593_v55, %v8595_v9  ;;  %v15323_v25 = vsel %vm2920_vm5, %v8595_v9, %v8597_v38  ;;  %v15326_v53 = vsel %vm2920_vm5, %v8597_v38, %v8599_v27  ;;  %v15329_v16 = vsel %vm2920_vm5, %v8599_v27, %v8601_v49  ;;  %v11220_v55 = vld [vmem:[%s11317_s28 + $0x48] sm:$0xff]  ;;  %v11221_v38 = vld [vmem:[%s11317_s28 + $0x50] sm:$0xff] }
 0x505   : > { %v15333_v19 = vsel %vm2920_vm5, %v8601_v49, %v8603_v36  ;;  %v8605_v60 = vrot.slane %v15228_v18, 5  ;;  %v8607_v10 = vrot.slane %v15230_v7, 5  ;;  %v8609_v13 = vrot.slane %v15232_v30, 5 }
 0x506   : > { %v8611_v2 = vrot.slane %v15234_v20, 5  ;;  %v8613_v23 = vrot.slane %v15236_v17, 5  ;;  %v8615_v21 = vrot.slane %v15238_v46, 5  ;;  %v8617_v6 = vrot.slane %v15240_v14, 5 }
 0x507   : > { %v15343_v40 = vsel %vm2920_vm5, %v8603_v36, %v8605_v60  ;;  %v15346_v34 = vsel %vm2920_vm5, %v8605_v60, %v8607_v10  ;;  %v15349_v18 = vsel %vm2920_vm5, %v8607_v10, %v8609_v13  ;;  %v8619_v7 = vrot.slane %v15242_v41, 5  ;;  %v11225_v36 = vld [vmem:[%s11317_s28 + $0x70] sm:$0xff]  ;;  %v11226_v10 = vld [vmem:[%s11317_s28 + $0x78] sm:$0xff] }
 0x508   : > { %v15353_v30 = vsel %vm2920_vm5, %v8609_v13, %v8611_v2  ;;  %v15356_v20 = vsel %vm2920_vm5, %v8611_v2, %v8613_v23  ;;  %v15359_v17 = vsel %vm2920_vm5, %v8613_v23, %v8615_v21  ;;  %v15362_v46 = vsel %vm2920_vm5, %v8615_v21, %v8617_v6  ;;  %v11227_v13 = vld [vmem:[%s11317_s28 + $0x80] sm:$0xff]  ;;  %v11228_v2 = vld [vmem:[%s11317_s28 + $0x88] sm:$0xff] }
 0x509   : > { %v15370_v14 = vsel %vm2920_vm5, %v8617_v6, %v8619_v7  ;;  %v8621_v41 = vrot.slane %v15244_v5, 5  ;;  %v8623_v42 = vrot.slane %v15246_v11, 5  ;;  %v8625_v4 = vrot.slane %v15248_v8, 5 }
 0x50a   : > { %v8664_v52 = vadd.f32 %v11213_v32, %v8556_v51  ;;  %v8665_v58 = vadd.f32 %v11214_v50, %v15254_v43  ;;  %v8666_v45 = vadd.f32 %v11215_v3, %v15257_v12  ;;  %v8667_v5 = vadd.f32 %v11216_v47, %v15260_v33  ;;  %v11217_v43 = vld [vmem:[%s11317_s28 + $0x30] sm:$0xff]  ;;  %v11218_v33 = vld [vmem:[%s11317_s28 + $0x38] sm:$0xff] }
 0x50b   : > { %v15385_v11 = vsel %vm2920_vm5, %v8619_v7, %v8621_v41  ;;  %v15388_v15 = vsel %vm2920_vm5, %v8621_v41, %v8623_v42  ;;  %v15393_v51 = vsel %vm2920_vm5, %v8623_v42, %v8625_v4  ;;  %v8668_v12 = vadd.f32 %v11217_v43, %v15263_v35  ;;  %v11222_v35 = vld [vmem:[%s11317_s28 + $0x58] sm:$0xff]  ;;  %v11233_v7 = vld [vmem:[%s11317_s28 + $0xb0] sm:$0xff] }
 0x50c   : > { %v8669_v48 = vadd.f32 %v11218_v33, %v15266_v22  ;;  %v8670_v28 = vadd.f32 %v11219_v1, %v15269_v61  ;;  %v8671_v9 = vadd.f32 %v11220_v55, %v15272_v37  ;;  %v8672_v27 = vadd.f32 %v11221_v38, %v15275_v39  ;;  %8702 = vst.msk [vmem:[%s15367_s13 - $0x3] sm:$0xf8] %vm8701_vm9, %v8664_v52  ;;  %v11223_v61 = vld [vmem:[%s11317_s28 + $0x60] sm:$0xff]  ;;  %v11224_v39 = vld [vmem:[%s11317_s28 + $0x68] sm:$0xff]  ;;  %v11237_v52 = vld [vmem:[%s11317_s28 + $0xd0] sm:$0xff] }
 0x50d   : > { %8703 = vst.msk [vmem:[%s15367_s13 + $0x5] sm:$0xff] %vm389_vm1, %v8665_v58  ;;  %8704 = vst.msk [vmem:[%s15367_s13 + $0xd] sm:$0xff] %vm389_vm1, %v8666_v45  ;;  %v8673_v22 = vadd.f32 %v11222_v35, %v15278_v56  ;;  %v8674_v37 = vadd.f32 %v11223_v61, %v15281_v31  ;;  %v8675_v49 = vadd.f32 %v11224_v39, %v15284_v54  ;;  %v11229_v54 = vld [vmem:[%s11317_s28 + $0x90] sm:$0xff] }
 0x50e   : > { %8705 = vst.msk [vmem:[%s15367_s13 + $0x15] sm:$0xff] %vm389_vm1, %v8667_v5  ;;  %v8676_v60 = vadd.f32 %v11225_v36, %v15288_v63  ;;  %8706 = vst.msk [vmem:[%s15367_s13 + $0x1d] sm:$0xff] %vm389_vm1, %v8668_v12  ;;  %v8677_v56 = vadd.f32 %v11226_v10, %v15291_v57  ;;  %v8678_v31 = vadd.f32 %v11227_v13, %v15294_v29  ;;  %v11230_v57 = vld [vmem:[%s11317_s28 + $0x98] sm:$0xff]  ;;  %v11241_v45 = vld [vmem:[%s11317_s28 + $0xf0] sm:$0xff] }
 0x50f   : > { %v8679_v23 = vadd.f32 %v11228_v2, %v15297_v24  ;;  %v8680_v63 = vadd.f32 %v11229_v54, %v15300_v62  ;;  %8707 = vst.msk [vmem:[%s15367_s13 + $0x25] sm:$0xff] %vm389_vm1, %v8669_v48  ;;  %8708 = vst.msk [vmem:[%s15367_s13 + $0x2d] sm:$0xff] %vm389_vm1, %v8670_v28  ;;  %v8681_v29 = vadd.f32 %v11230_v57, %v15310_v26  ;;  %v11231_v24 = vld [vmem:[%s11317_s28 + $0xa0] sm:$0xff]  ;;  %v11232_v62 = vld [vmem:[%s11317_s28 + $0xa8] sm:$0xff] }
 0x510   : > { %8709 = vst.msk [vmem:[%s15367_s13 + $0x35] sm:$0xff] %vm389_vm1, %v8671_v9  ;;  %8710 = vst.msk [vmem:[%s15367_s13 + $0x3d] sm:$0xff] %vm389_vm1, %v8672_v27  ;;  %v8682_v21 = vadd.f32 %v11231_v24, %v15313_v59  ;;  %v8683_v6 = vadd.f32 %v11232_v62, %v15316_v0  ;;  %v8684_v41 = vadd.f32 %v11233_v7, %v15320_v44  ;;  %v11234_v26 = vld [vmem:[%s11317_s28 + $0xb8] sm:$0xff]  ;;  %v11235_v0 = vld [vmem:[%s11317_s28 + $0xc0] sm:$0xff] }
 0x511   : > { %8711 = vst.msk [vmem:[%s15367_s13 + $0x45] sm:$0xff] %vm389_vm1, %v8673_v22  ;;  %8712 = vst.msk [vmem:[%s15367_s13 + $0x4d] sm:$0xff] %vm389_vm1, %v8674_v37  ;;  %v8685_v59 = vadd.f32 %v11234_v26, %v15323_v25  ;;  %v8686_v42 = vadd.f32 %v11235_v0, %v15326_v53  ;;  %v11236_v44 = vld [vmem:[%s11317_s28 + $0xc8] sm:$0xff]  ;;  %v8688_v50 = vadd.f32 %v11237_v52, %v15333_v19  ;;  %v11238_v25 = vld [vmem:[%s11317_s28 + $0xd8] sm:$0xff] }
 0x512   : > { %8713 = vst.msk [vmem:[%s15367_s13 + $0x55] sm:$0xff] %vm389_vm1, %v8675_v49  ;;  %8714 = vst.msk [vmem:[%s15367_s13 + $0x5d] sm:$0xff] %vm389_vm1, %v8676_v60  ;;  %v8687_v32 = vadd.f32 %v11236_v44, %v15329_v16  ;;  %v8689_v53 = vadd.f32 %v11238_v25, %v15343_v40  ;;  %v11239_v16 = vld [vmem:[%s11317_s28 + $0xe0] sm:$0xff]  ;;  %v11240_v19 = vld [vmem:[%s11317_s28 + $0xe8] sm:$0xff]  ;;  %v8692_v47 = vadd.f32 %v11241_v45, %v15353_v30 }
 0x513   : > { %8715 = vst.msk [vmem:[%s15367_s13 + $0x65] sm:$0xff] %vm389_vm1, %v8677_v56  ;;  %8716 = vst.msk [vmem:[%s15367_s13 + $0x6d] sm:$0xff] %vm389_vm1, %v8678_v31  ;;  %v8690_v58 = vadd.f32 %v11239_v16, %v15346_v34  ;;  %v8691_v3 = vadd.f32 %v11240_v19, %v15349_v18  ;;  %v11242_v40 = vld [vmem:[%s11317_s28 + $0xf8] sm:$0xff]  ;;  %v11243_v18 = vld [vmem:[%s11317_s28 + $0x100] sm:$0xff] }
 0x514   : > { %8717 = vst.msk [vmem:[%s15367_s13 + $0x75] sm:$0xff] %vm389_vm1, %v8679_v23  ;;  %8718 = vst.msk [vmem:[%s15367_s13 + $0x7d] sm:$0xff] %vm389_vm1, %v8680_v63  ;;  %v8693_v34 = vadd.f32 %v11242_v40, %v15356_v20  ;;  %v8694_v5 = vadd.f32 %v11243_v18, %v15359_v17  ;;  %v11244_v30 = vld [vmem:[%s11317_s28 + $0x108] sm:$0xff]  ;;  %v11245_v12 = vld [vmem:[%s11317_s28 + $0x110] sm:$0xff] }
 0x515   : > { %8719 = vst.msk [vmem:[%s15367_s13 + $0x85] sm:$0xff] %vm389_vm1, %v8681_v29  ;;  %8720 = vst.msk [vmem:[%s15367_s13 + $0x8d] sm:$0xff] %vm389_vm1, %v8682_v21  ;;  %v8695_v43 = vadd.f32 %v11244_v30, %v15362_v46  ;;  %v8696_v33 = vadd.f32 %v11245_v12, %v15370_v14  ;;  %v11246_v20 = vld [vmem:[%s11317_s28 + $0x118] sm:$0xff]  ;;  %v11247_v46 = vld [vmem:[%s11317_s28 + $0x120] sm:$0xff] }
 0x516   : > { %8721 = vst.msk [vmem:[%s15367_s13 + $0x95] sm:$0xff] %vm389_vm1, %v8683_v6  ;;  %8722 = vst.msk [vmem:[%s15367_s13 + $0x9d] sm:$0xff] %vm389_vm1, %v8684_v41  ;;  %v8697_v17 = vadd.f32 %v11246_v20, %v15385_v11  ;;  %v8698_v14 = vadd.f32 %v11247_v46, %v15388_v15  ;;  %v11248_v48 = vld [vmem:[%s11317_s28 + $0x128] sm:$0xff]  ;;  %v11249_v28 = vld [vmem:[%s11317_s28 + $0x130] sm:$0xff] }
 0x517   : > { %8723 = vst.msk [vmem:[%s15367_s13 + $0xa5] sm:$0xff] %vm389_vm1, %v8685_v59  ;;  %8724 = vst.msk [vmem:[%s15367_s13 + $0xad] sm:$0xff] %vm389_vm1, %v8686_v42  ;;  %v8699_v1 = vadd.f32 %v11248_v48, %v15393_v51  ;;  %v8700_v55 = vadd.f32 %v11249_v28, %v8625_v4 }
 0x518   : > { %8725 = vst.msk [vmem:[%s15367_s13 + $0xb5] sm:$0xff] %vm389_vm1, %v8687_v32  ;;  %8726 = vst.msk [vmem:[%s15367_s13 + $0xbd] sm:$0xff] %vm389_vm1, %v8688_v50 }
 0x519   : > { %8727 = vst.msk [vmem:[%s15367_s13 + $0xc5] sm:$0xff] %vm389_vm1, %v8689_v53  ;;  %8728 = vst.msk [vmem:[%s15367_s13 + $0xcd] sm:$0xff] %vm389_vm1, %v8690_v58 }
 0x51a   : > { %8729 = vst.msk [vmem:[%s15367_s13 + $0xd5] sm:$0xff] %vm389_vm1, %v8691_v3  ;;  %8730 = vst.msk [vmem:[%s15367_s13 + $0xdd] sm:$0xff] %vm389_vm1, %v8692_v47 }
 0x51b   : > { %8731 = vst.msk [vmem:[%s15367_s13 + $0xe5] sm:$0xff] %vm389_vm1, %v8693_v34  ;;  %8732 = vst.msk [vmem:[%s15367_s13 + $0xed] sm:$0xff] %vm389_vm1, %v8694_v5 }
 0x51c   : > { %8733 = vst.msk [vmem:[%s15367_s13 + $0xf5] sm:$0xff] %vm389_vm1, %v8695_v43  ;;  %8734 = vst.msk [vmem:[%s15367_s13 + $0xfd] sm:$0xff] %vm389_vm1, %v8696_v33 }
 0x51d   : > { %8735 = vst.msk [vmem:[%s15367_s13 + $0x105] sm:$0xff] %vm389_vm1, %v8697_v17  ;;  %8736 = vst.msk [vmem:[%s15367_s13 + $0x10d] sm:$0xff] %vm389_vm1, %v8698_v14 }
 0x51e   : > { %8737 = vst.msk [vmem:[%s15367_s13 + $0x115] sm:$0xff] %vm389_vm1, %v8699_v1 }
 0x51f   : > { %8739 = vst.msk [vmem:[%s15367_s13 + $0x11d] sm:$0x7] %vm8738_vm10, %v8700_v55 }
 0x520 PF: > { %s14_s15 = sadd.s32 1, %s11256_s15  }
 0x521   : > { %p11_p4 = scmp.ge.s32.totalorder %s14_s15, 4  }
 0x523   :  { %13 = sbr.rel (!%p11_p4) target bundleno = 1 (0x1), region = 82 }

</bundles_post_ra>
